<compile_context>
chip_gen: v7x
topology: tpu7x:2x2x1
jax: 0.10.0
libtpu: 0.0.40
codegen_flags: <defaults>
</compile_context>

<pallas_src>
import random as pyrandom
from functools import partial

import jax
import jax.numpy as jnp
from jax.experimental import pallas as pl
from jax.experimental.pallas import tpu as pltpu

HIDDEN = 512   # hidden_size fixed by Seq2Seq.__init__
EMB = 256      # emb_hidden fixed by Seq2Seq.__init__


def _round_up(n, m):
    return ((n + m - 1) // m) * m


# ---------------------------------------------------------------------------
# Encoder kernel: hoisted input projection + full GRU recurrence, one call.
# ---------------------------------------------------------------------------
def _enc_kernel(x_ref, wih_ref, gib_ref, whh_ref, bhn_ref, h_ref, gi_scr):
    """x_ref: (S*Bp, EMB) bf16;  h_ref: (Bp, H) f32 final hidden."""
    H = whh_ref.shape[0]
    Bp = h_ref.shape[0]
    S = x_ref.shape[0] // Bp

    # Hoisted projection for ALL timesteps in one MXU op; b_ih (+ b_hh r,z) folded.
    gi_scr[...] = (
        jnp.dot(x_ref[...], wih_ref[...], preferred_element_type=jnp.float32)
        + gib_ref[...]
    )

    bhn = bhn_ref[...]                                   # (1, H) b_hh n-gate slice

    def step(t, h):
        off = pl.multiple_of(t * Bp, Bp)                 # sublane-aligned slice
        gi = gi_scr[pl.ds(off, Bp), :]                   # (Bp, 3H)
        gh = jnp.dot(h.astype(jnp.bfloat16), whh_ref[...],
                     preferred_element_type=jnp.float32)  # (Bp, 3H)
        rz = jax.nn.sigmoid(gi[:, :2 * H] + gh[:, :2 * H])
        r = rz[:, :H]
        z = rz[:, H:]
        n = jnp.tanh(gi[:, 2 * H:] + r * (gh[:, 2 * H:] + bhn))
        return (1.0 - z) * n + z * h

    # PyTorch GRU default h0 = 0.
    h_ref[...] = jax.lax.fori_loop(0, S, step, jnp.zeros((Bp, H), jnp.float32))


# ---------------------------------------------------------------------------
# Decoder kernel: whole autoregressive loop fused; token ids / flags in SMEM.
# ---------------------------------------------------------------------------
def _dec_kernel(flags_ref, ids_ref, h0_ref, wemb_ref, whf_ref,
                brz_ref, bin_ref, bhn_ref, aw1_ref, ab_ref,
                out_ref, *, v_real):
    """
    flags_ref : SMEM (T,)     teacher-forcing flags (flag[j] used at step j)
    ids_ref   : SMEM (T-1,Bp) teacher token ids (target[:, j])
    h0_ref    : (Bp, H)       encoder final hidden
    wemb_ref  : (Vp, 3H)      dec_emb @ W_ih[:EMB]  (embedding folded into W_ih)
    whf_ref   : (H, 6H+Vp)    [W_ih[EMB:] | W_hh | aff_W(h_old half)] fused
    aw1_ref   : (H, Vp)       aff_W (h_new half)
    out_ref   : (T, Bp, Vp)   logits; row 0 stays zero (matches `outputs[:,0,:]`)
    """
    H = whf_ref.shape[0]
    Tm1, Bp = ids_ref.shape
    Vp = out_ref.shape[2]

    out_ref[0] = jnp.zeros((Bp, Vp), jnp.float32)

    brz = brz_ref[...]
    b_in = bin_ref[...]
    bhn = bhn_ref[...]
    ab = ab_ref[...]
    lane = jax.lax.broadcasted_iota(jnp.int32, (Bp, Vp), 1)     # hoisted iotas
    row_col = jax.lax.broadcasted_iota(jnp.int32, (Bp, 1), 0)

    def step(j, carry):
        h, prev_tok = carry                         # (Bp,H) f32, (Bp,1) int32
        # Input token: teacher-forced target id vs previous greedy argmax.
        tgt_tok = jnp.zeros((Bp, 1), jnp.int32)
        for b in range(Bp):                          # Bp is tiny & static
            tgt_tok = jnp.where(row_col == b, ids_ref[j, b], tgt_tok)
        use_tf = jnp.logical_or(j == 0, flags_ref[j] > 0)
        tok = jnp.where(use_tf, tgt_tok, prev_tok)   # (Bp, 1)
        x_oh = (lane == tok).astype(jnp.bfloat16)    # (Bp, Vp) one-hot

        # Three MXU dots per step (embedding folded, hb-weights fused).
        gi_x = jnp.dot(x_oh, wemb_ref[...], preferred_element_type=jnp.float32)
        hb = h.astype(jnp.bfloat16)
        fused = jnp.dot(hb, whf_ref[...], preferred_element_type=jnp.float32)
        gi = gi_x + fused[:, :3 * H]
        gh = fused[:, 3 * H:6 * H]
        rz = jax.nn.sigmoid(gi[:, :2 * H] + gh[:, :2 * H] + brz)
        r = rz[:, :H]
        z = rz[:, H:]
        n = jnp.tanh(gi[:, 2 * H:] + b_in + r * (gh[:, 2 * H:] + bhn))
        h_new = (1.0 - z) * n + z * h
        logits = (jnp.dot(h_new.astype(jnp.bfloat16), aw1_ref[...],
                          preferred_element_type=jnp.float32)
                  + fused[:, 6 * H:] + ab)
        out_ref[j + 1] = logits

        # Greedy argmax in f32 (first maximal index wins, pad lanes masked).
        masked = jnp.where(lane < v_real, logits, -1e30)
        mx = jnp.max(masked, axis=1, keepdims=True)
        idx = jnp.min(jnp.where(masked >= mx, lane, Vp), axis=1, keepdims=True)
        return h_new, idx

    jax.lax.fori_loop(0, Tm1, step,
                      (h0_ref[...], jnp.zeros((Bp, 1), jnp.int32)))


# ---------------------------------------------------------------------------
# pallas_call wrappers
# ---------------------------------------------------------------------------
_VMEM = pl.BlockSpec(memory_space=pltpu.MemorySpace.VMEM)
_SMEM = pl.BlockSpec(memory_space=pltpu.MemorySpace.SMEM)


def encoder_forward(x, p, S, Bp):
    H = HIDDEN
    G = 3 * H
    flops = 2 * S * Bp * EMB * G + S * 2 * Bp * H * G
    bytes_acc = (x.size * 2 + p["enc_wih"].size * 2 + p["enc_whh"].size * 2
                 + p["enc_gi_bias"].size * 4 + p["enc_bhn"].size * 4 + Bp * H * 4)
    return pl.pallas_call(
        _enc_kernel,
        out_shape=jax.ShapeDtypeStruct((Bp, H), jnp.float32),
        in_specs=[_VMEM] * 5,
        out_specs=_VMEM,
        scratch_shapes=[pltpu.VMEM((S * Bp, G), jnp.float32)],
        cost_estimate=pl.CostEstimate(flops=flops, transcendentals=S * Bp * G,
                                      bytes_accessed=bytes_acc),
    )(x, p["enc_wih"], p["enc_gi_bias"], p["enc_whh"], p["enc_bhn"])


def decoder_forward(tf_flags, tgt_ids, h0, p, dest_voc, T):
    Tm1, Bp = tgt_ids.shape
    H = HIDDEN
    Vp = p["aff_b"].shape[1]
    flops = Tm1 * (2 * Bp * Vp * 3 * H + 2 * Bp * H * (6 * H + Vp) + 2 * Bp * H * Vp)
    bytes_acc = (p["dec_wemb"].size * 2 + p["dec_whf"].size * 2
                 + p["aff_w1"].size * 2 + T * Bp * Vp * 4 + Bp * H * 4)
    return pl.pallas_call(
        partial(_dec_kernel, v_real=dest_voc),
        out_shape=jax.ShapeDtypeStruct((T, Bp, Vp), jnp.float32),
        in_specs=[_SMEM, _SMEM] + [_VMEM] * 8,
        out_specs=_VMEM,
        cost_estimate=pl.CostEstimate(flops=flops,
                                      transcendentals=Tm1 * Bp * 3 * H,
                                      bytes_accessed=bytes_acc),
    )(tf_flags, tgt_ids, h0,
      p["dec_wemb"], p["dec_whf"],
      p["dec_brz"], p["dec_bin"], p["dec_bhn"],
      p["aff_w1"], p["aff_b"])


# ---------------------------------------------------------------------------
# Parameters (deterministic synthetic init — shapes from the module __init__)
# ---------------------------------------------------------------------------
def init_params(key, src_voc, dest_voc):
    ks = jax.random.split(key, 12)
    s = 0.05

    def rnd(k, shape):
        return jax.random.normal(k, shape, jnp.float32) * s

    p = {}
    # Encoder: Embedding(src_voc, 256), GRU(256 -> 512)
    p["enc_emb"] = rnd(ks[0], (src_voc, EMB))
    p["enc_wih"] = rnd(ks[1], (EMB, 3 * HIDDEN))
    p["enc_whh"] = rnd(ks[2], (HIDDEN, 3 * HIDDEN))
    p["enc_bih"] = rnd(ks[3], (1, 3 * HIDDEN))
    p["enc_bhh"] = rnd(ks[4], (1, 3 * HIDDEN))
    # Decoder: Embedding(dest_voc, 256), GRU(256+512 -> 512), Linear(1024 -> dest_voc)
    p["dec_emb"] = rnd(ks[5], (dest_voc, EMB))
    p["dec_wih"] = rnd(ks[6], (EMB + HIDDEN, 3 * HIDDEN))
    p["dec_whh"] = rnd(ks[7], (HIDDEN, 3 * HIDDEN))
    p["dec_bih"] = rnd(ks[8], (1, 3 * HIDDEN))
    p["dec_bhh"] = rnd(ks[9], (1, 3 * HIDDEN))
    p["aff_w"] = rnd(ks[10], (2 * HIDDEN, dest_voc))
    p["aff_b"] = rnd(ks[11], (1, dest_voc))
    return p


def prepare_params(p, dest_voc):
    """Fold biases & embedding, fuse hb-weights, pad vocab to 128 lanes, bf16-cast."""
    H = HIDDEN
    Vp = _round_up(dest_voc, 128)
    q = {}
    # Encoder
    q["enc_emb"] = p["enc_emb"]                                          # f32 gather
    q["enc_wih"] = p["enc_wih"].astype(jnp.bfloat16)
    q["enc_gi_bias"] = p["enc_bih"].at[:, :2 * H].add(p["enc_bhh"][:, :2 * H])
    q["enc_whh"] = p["enc_whh"].astype(jnp.bfloat16)
    q["enc_bhn"] = p["enc_bhh"][:, 2 * H:]
    # Decoder: embedding folded into W_ih (one dot instead of two per step)
    emb_pad = jnp.zeros((Vp, EMB), jnp.float32).at[:dest_voc].set(p["dec_emb"])
    q["dec_wemb"] = jnp.dot(emb_pad, p["dec_wih"][:EMB]).astype(jnp.bfloat16)
    # All matrices that multiply the OLD hidden, fused into one (H, 6H+Vp) matrix.
    aff_w = jnp.zeros((2 * H, Vp), jnp.float32).at[:, :dest_voc].set(p["aff_w"])
    q["dec_whf"] = jnp.concatenate(
        [p["dec_wih"][EMB:], p["dec_whh"], aff_w[H:]], axis=1).astype(jnp.bfloat16)
    q["aff_w1"] = aff_w[:H].astype(jnp.bfloat16)                          # h_new half
    q["aff_b"] = jnp.zeros((1, Vp), jnp.float32).at[:, :dest_voc].set(p["aff_b"])
    q["dec_brz"] = (p["dec_bih"] + p["dec_bhh"])[:, :2 * H]
    q["dec_bin"] = p["dec_bih"][:, 2 * H:]
    q["dec_bhn"] = p["dec_bhh"][:, 2 * H:]
    return q


# ---------------------------------------------------------------------------
# Model forward (jitted; all per-token work lives inside two fused kernels)
# ---------------------------------------------------------------------------
@partial(jax.jit, static_argnames=("dest_voc",))
def seq2seq_forward(params, source, target, tf_flags, *, dest_voc):
    B, S = source.shape
    T = target.shape[1]
    Bp = _round_up(max(B, 8), 8)

    # ---- encoder ----------------------------------------------------------
    emb = jnp.take(params["enc_emb"], source, axis=0)                    # (B,S,EMB)
    emb = jnp.pad(emb, ((0, Bp - B), (0, 0), (0, 0)))
    x = jnp.transpose(emb, (1, 0, 2)).reshape(S * Bp, EMB).astype(jnp.bfloat16)
    h = encoder_forward(x, params, S, Bp)                                # (Bp, H)

    # ---- decoder ----------------------------------------------------------
    tgt_ids = jnp.pad(target[:, :T - 1].astype(jnp.int32), ((0, Bp - B), (0, 0)))
    tgt_ids = jnp.transpose(tgt_ids, (1, 0))                             # (T-1, Bp)
    dec_out = decoder_forward(tf_flags.astype(jnp.int32), tgt_ids, h,
                              params, dest_voc, T)                       # (T, Bp, Vp)
    return jnp.transpose(dec_out[:, :B, :dest_voc], (1, 0, 2))           # (B, T, V)


# ---------------------------------------------------------------------------
if __name__ == "__main__":
    src_voc_size, dest_voc_size = 48, 40
    B, S_src, T_tgt = 2, 8, 6
    teacher_forcing_ratio, seed = 0.5, 0

    key = jax.random.PRNGKey(0)
    kp, ksrc, ktgt = jax.random.split(key, 3)

    raw_params = init_params(kp, src_voc_size, dest_voc_size)
    params = prepare_params(raw_params, dest_voc_size)
    source = jax.random.randint(ksrc, (B, S_src), 0, src_voc_size, dtype=jnp.int32)
    target = jax.random.randint(ktgt, (B, T_tgt), 0, dest_voc_size, dtype=jnp.int32)

    # Teacher-forcing coin flips drawn host-side (same draw order as the PyTorch
    # loop: the coin flipped at iteration i selects iteration i+1's input), passed
    # as an SMEM array so per-call randomness is preserved under jit.
    rng = pyrandom.Random(seed)
    flags = [1] + [int(rng.random() < teacher_forcing_ratio) for _ in range(1, T_tgt)]
    tf_flags = jnp.asarray(flags, dtype=jnp.int32)                       # (T,)

    out = seq2seq_forward(params, source, target, tf_flags, dest_voc=dest_voc_size)
    out = jax.block_until_ready(out)
    assert out.shape == (B, T_tgt, dest_voc_size)
    assert out.dtype == jnp.float32
    assert bool(jnp.all(jnp.isfinite(out)))
    print("KERNEL_OK")
</pallas_src>

<mosaic_0001>
module attributes {stable_mosaic.version = 11 : i64} {
  func.func @_enc_kernel(%arg0: memref<64x256xbf16, #tpu.memory_space<vmem>>, %arg1: memref<256x1536xbf16, #tpu.memory_space<vmem>>, %arg2: memref<1x1536xf32, #tpu.memory_space<vmem>>, %arg3: memref<512x1536xbf16, #tpu.memory_space<vmem>>, %arg4: memref<1x512xf32, #tpu.memory_space<vmem>>, %arg5: memref<8x512xf32, #tpu.memory_space<vmem>>, %arg6: memref<64x1536xf32, #tpu.memory_space<vmem>>) attributes {dimension_semantics = [], scalar_prefetch = 0 : i64, scratch_operands = 1 : i64, tpu.core_type = #tpu.core_type<tc>} {
    %c0 = arith.constant 0 : index
    %c0_0 = arith.constant 0 : index
    %0 = vector.load %arg0[%c0, %c0_0] : memref<64x256xbf16, #tpu.memory_space<vmem>>, vector<64x256xbf16>
    %c0_1 = arith.constant 0 : index
    %c0_2 = arith.constant 0 : index
    %1 = vector.load %arg1[%c0_1, %c0_2] : memref<256x1536xbf16, #tpu.memory_space<vmem>>, vector<256x1536xbf16>
    %cst = arith.constant dense<0.000000e+00> : vector<64x1536xf32>
    %2 = tpu.matmul %0, %1, %cst {dimension_numbers = #tpu.dot_dimension_numbers<[1], [0], [0], [1], [0, 0, 1, 1], [], []>} : vector<64x256xbf16>, vector<256x1536xbf16>, vector<64x1536xf32> -> vector<64x1536xf32>
    %c0_3 = arith.constant 0 : index
    %c0_4 = arith.constant 0 : index
    %3 = vector.load %arg2[%c0_3, %c0_4] : memref<1x1536xf32, #tpu.memory_space<vmem>>, vector<1x1536xf32>
    %4 = vector.broadcast %3 : vector<1x1536xf32> to vector<64x1536xf32>
    %5 = arith.addf %2, %4 : vector<64x1536xf32>
    %c0_5 = arith.constant 0 : index
    %c0_6 = arith.constant 0 : index
    %6 = vector.load %arg6[%c0_5, %c0_6] : memref<64x1536xf32, #tpu.memory_space<vmem>>, vector<64x1536xf32>
    tpu.vector_store %arg6[%c0_5, %c0_6], %5 {strides = array<i32>} : memref<64x1536xf32, #tpu.memory_space<vmem>>, vector<64x1536xf32>,
    %c0_7 = arith.constant 0 : index
    %c0_8 = arith.constant 0 : index
    %7 = vector.load %arg4[%c0_7, %c0_8] : memref<1x512xf32, #tpu.memory_space<vmem>>, vector<1x512xf32>
    %cst_9 = arith.constant 0.000000e+00 : f32
    %8 = vector.broadcast %cst_9 : f32 to vector<8x512xf32>
    %c0_i32 = arith.constant 0 : i32
    %c8_i32 = arith.constant 8 : i32
    %9 = arith.addi %c0_i32, %c8_i32 : i32
    %c1_i32 = arith.constant 1 : i32
    %10 = scf.for %arg7 = %c0_i32 to %9 step %c1_i32 iter_args(%arg8 = %8) -> (vector<8x512xf32>)  : i32 {
      %c8_i32_13 = arith.constant 8 : i32
      %12 = arith.muli %arg7, %c8_i32_13 : i32
      %13 = tpu.assume_multiple %12, 8 : i32
      %14 = arith.index_cast %13 : i32 to index
      %c0_14 = arith.constant 0 : index
      %15 = vector.load %arg6[%14, %c0_14] : memref<64x1536xf32, #tpu.memory_space<vmem>>, vector<8x1536xf32>
      %16 = arith.truncf %arg8 : vector<8x512xf32> to vector<8x512xbf16>
      %c0_15 = arith.constant 0 : index
      %c0_16 = arith.constant 0 : index
      %17 = vector.load %arg3[%c0_15, %c0_16] : memref<512x1536xbf16, #tpu.memory_space<vmem>>, vector<512x1536xbf16>
      %cst_17 = arith.constant dense<0.000000e+00> : vector<8x1536xf32>
      %18 = tpu.matmul %16, %17, %cst_17 {dimension_numbers = #tpu.dot_dimension_numbers<[1], [0], [0], [1], [0, 0, 1, 1], [], []>} : vector<8x512xbf16>, vector<512x1536xbf16>, vector<8x1536xf32> -> vector<8x1536xf32>
      %19 = vector.extract_strided_slice %15 {offsets = [0, 0], sizes = [8, 1024], strides = [1, 1]} : vector<8x1536xf32> to vector<8x1024xf32>
      %20 = vector.extract_strided_slice %18 {offsets = [0, 0], sizes = [8, 1024], strides = [1, 1]} : vector<8x1536xf32> to vector<8x1024xf32>
      %21 = arith.addf %19, %20 : vector<8x1024xf32>
      %22 = arith.negf %21 : vector<8x1024xf32>
      %23 = math.exp %22 : vector<8x1024xf32>
      %cst_18 = arith.constant 1.000000e+00 : f32
      %24 = vector.broadcast %cst_18 : f32 to vector<8x1024xf32>
      %25 = arith.addf %24, %23 : vector<8x1024xf32>
      %26 = arith.divf %24, %25 : vector<8x1024xf32>
      %27 = vector.extract_strided_slice %26 {offsets = [0, 0], sizes = [8, 512], strides = [1, 1]} : vector<8x1024xf32> to vector<8x512xf32>
      %28 = vector.extract_strided_slice %26 {offsets = [0, 512], sizes = [8, 512], strides = [1, 1]} : vector<8x1024xf32> to vector<8x512xf32>
      %29 = vector.extract_strided_slice %15 {offsets = [0, 1024], sizes = [8, 512], strides = [1, 1]} : vector<8x1536xf32> to vector<8x512xf32>
      %30 = vector.extract_strided_slice %18 {offsets = [0, 1024], sizes = [8, 512], strides = [1, 1]} : vector<8x1536xf32> to vector<8x512xf32>
      %31 = vector.broadcast %7 : vector<1x512xf32> to vector<8x512xf32>
      %32 = arith.addf %30, %31 : vector<8x512xf32>
      %33 = arith.mulf %27, %32 : vector<8x512xf32>
      %34 = arith.addf %29, %33 : vector<8x512xf32>
      %35 = math.tanh %34 : vector<8x512xf32>
      %cst_19 = arith.constant 1.000000e+00 : f32
      %36 = vector.broadcast %cst_19 : f32 to vector<8x512xf32>
      %37 = arith.subf %36, %28 : vector<8x512xf32>
      %38 = arith.mulf %37, %35 : vector<8x512xf32>
      %39 = arith.mulf %28, %arg8 : vector<8x512xf32>
      %40 = arith.addf %38, %39 : vector<8x512xf32>
      scf.yield %40 : vector<8x512xf32>
    }
    %c8_i32_10 = arith.constant 8 : i32
    %c0_11 = arith.constant 0 : index
    %c0_12 = arith.constant 0 : index
    %11 = vector.load %arg5[%c0_11, %c0_12] : memref<8x512xf32, #tpu.memory_space<vmem>>, vector<8x512xf32>
    tpu.vector_store %arg5[%c0_11, %c0_12], %10 {strides = array<i32>} : memref<8x512xf32, #tpu.memory_space<vmem>>, vector<8x512xf32>,
    return
  }
}

module attributes {stable_mosaic.version = 11 : i64} {
  func.func @_dec_kernel(%arg0: memref<6xi32, #tpu.memory_space<smem>>, %arg1: memref<5x8xi32, #tpu.memory_space<smem>>, %arg2: memref<8x512xf32, #tpu.memory_space<vmem>>, %arg3: memref<128x1536xbf16, #tpu.memory_space<vmem>>, %arg4: memref<512x3200xbf16, #tpu.memory_space<vmem>>, %arg5: memref<1x1024xf32, #tpu.memory_space<vmem>>, %arg6: memref<1x512xf32, #tpu.memory_space<vmem>>, %arg7: memref<1x512xf32, #tpu.memory_space<vmem>>, %arg8: memref<512x128xbf16, #tpu.memory_space<vmem>>, %arg9: memref<1x128xf32, #tpu.memory_space<vmem>>, %arg10: memref<6x8x128xf32, #tpu.memory_space<vmem>>) attributes {dimension_semantics = [], scalar_prefetch = 0 : i64, scratch_operands = 0 : i64, tpu.core_type = #tpu.core_type<tc>} {
    %cst = arith.constant 0.000000e+00 : f32
    %0 = vector.broadcast %cst : f32 to vector<8x128xf32>
    %c0 = arith.constant 0 : index
    %c0_0 = arith.constant 0 : index
    %c0_1 = arith.constant 0 : index
    %1 = vector.load %arg10[%c0, %c0_0, %c0_1] : memref<6x8x128xf32, #tpu.memory_space<vmem>>, vector<1x8x128xf32>
    %2 = vector.shape_cast %1 : vector<1x8x128xf32> to vector<8x128xf32>
    %3 = vector.shape_cast %0 : vector<8x128xf32> to vector<1x8x128xf32>
    tpu.vector_store %arg10[%c0, %c0_0, %c0_1], %3 {strides = array<i32>} : memref<6x8x128xf32, #tpu.memory_space<vmem>>, vector<1x8x128xf32>,
    %c0_2 = arith.constant 0 : index
    %c0_3 = arith.constant 0 : index
    %4 = vector.load %arg5[%c0_2, %c0_3] : memref<1x1024xf32, #tpu.memory_space<vmem>>, vector<1x1024xf32>
    %c0_4 = arith.constant 0 : index
    %c0_5 = arith.constant 0 : index
    %5 = vector.load %arg6[%c0_4, %c0_5] : memref<1x512xf32, #tpu.memory_space<vmem>>, vector<1x512xf32>
    %c0_6 = arith.constant 0 : index
    %c0_7 = arith.constant 0 : index
    %6 = vector.load %arg7[%c0_6, %c0_7] : memref<1x512xf32, #tpu.memory_space<vmem>>, vector<1x512xf32>
    %c0_8 = arith.constant 0 : index
    %c0_9 = arith.constant 0 : index
    %7 = vector.load %arg9[%c0_8, %c0_9] : memref<1x128xf32, #tpu.memory_space<vmem>>, vector<1x128xf32>
    %8 = tpu.iota {dimensions = array<i32: 1>} : vector<8x128xi32>
    %9 = tpu.iota {dimensions = array<i32: 0>} : vector<8x1xi32>
    %c0_10 = arith.constant 0 : index
    %c0_11 = arith.constant 0 : index
    %10 = vector.load %arg2[%c0_10, %c0_11] : memref<8x512xf32, #tpu.memory_space<vmem>>, vector<8x512xf32>
    %c0_i32 = arith.constant 0 : i32
    %11 = vector.broadcast %c0_i32 : i32 to vector<8x1xi32>
    %c0_i32_12 = arith.constant 0 : i32
    %c5_i32 = arith.constant 5 : i32
    %12 = arith.addi %c0_i32_12, %c5_i32 : i32
    %c1_i32 = arith.constant 1 : i32
    %13:2 = scf.for %arg11 = %c0_i32_12 to %12 step %c1_i32 iter_args(%arg12 = %10, %arg13 = %11) -> (vector<8x512xf32>, vector<8x1xi32>)  : i32 {
      %c0_i32_14 = arith.constant 0 : i32
      %14 = vector.broadcast %c0_i32_14 : i32 to vector<8x1xi32>
      %c0_i32_15 = arith.constant 0 : i32
      %15 = vector.broadcast %c0_i32_15 : i32 to vector<8x1xi32>
      %16 = arith.cmpi eq, %9, %15 : vector<8x1xi32>
      %17 = arith.index_cast %arg11 : i32 to index
      %c0_16 = arith.constant 0 : index
      %18 = memref.load %arg1[%17, %c0_16] : memref<5x8xi32, #tpu.memory_space<smem>>
      %19 = vector.broadcast %18 : i32 to vector<8x1xi32>
      %20 = arith.select %16, %19, %14 : vector<8x1xi1>, vector<8x1xi32>
      %c1_i32_17 = arith.constant 1 : i32
      %21 = vector.broadcast %c1_i32_17 : i32 to vector<8x1xi32>
      %22 = arith.cmpi eq, %9, %21 : vector<8x1xi32>
      %23 = arith.index_cast %arg11 : i32 to index
      %c1 = arith.constant 1 : index
      %24 = memref.load %arg1[%23, %c1] : memref<5x8xi32, #tpu.memory_space<smem>>
      %25 = vector.broadcast %24 : i32 to vector<8x1xi32>
      %26 = arith.select %22, %25, %20 : vector<8x1xi1>, vector<8x1xi32>
      %c2_i32 = arith.constant 2 : i32
      %27 = vector.broadcast %c2_i32 : i32 to vector<8x1xi32>
      %28 = arith.cmpi eq, %9, %27 : vector<8x1xi32>
      %29 = arith.index_cast %arg11 : i32 to index
      %c2 = arith.constant 2 : index
      %30 = memref.load %arg1[%29, %c2] : memref<5x8xi32, #tpu.memory_space<smem>>
      %31 = vector.broadcast %30 : i32 to vector<8x1xi32>
      %32 = arith.select %28, %31, %26 : vector<8x1xi1>, vector<8x1xi32>
      %c3_i32 = arith.constant 3 : i32
      %33 = vector.broadcast %c3_i32 : i32 to vector<8x1xi32>
      %34 = arith.cmpi eq, %9, %33 : vector<8x1xi32>
      %35 = arith.index_cast %arg11 : i32 to index
      %c3 = arith.constant 3 : index
      %36 = memref.load %arg1[%35, %c3] : memref<5x8xi32, #tpu.memory_space<smem>>
      %37 = vector.broadcast %36 : i32 to vector<8x1xi32>
      %38 = arith.select %34, %37, %32 : vector<8x1xi1>, vector<8x1xi32>
      %c4_i32 = arith.constant 4 : i32
      %39 = vector.broadcast %c4_i32 : i32 to vector<8x1xi32>
      %40 = arith.cmpi eq, %9, %39 : vector<8x1xi32>
      %41 = arith.index_cast %arg11 : i32 to index
      %c4 = arith.constant 4 : index
      %42 = memref.load %arg1[%41, %c4] : memref<5x8xi32, #tpu.memory_space<smem>>
      %43 = vector.broadcast %42 : i32 to vector<8x1xi32>
      %44 = arith.select %40, %43, %38 : vector<8x1xi1>, vector<8x1xi32>
      %c5_i32_18 = arith.constant 5 : i32
      %45 = vector.broadcast %c5_i32_18 : i32 to vector<8x1xi32>
      %46 = arith.cmpi eq, %9, %45 : vector<8x1xi32>
      %47 = arith.index_cast %arg11 : i32 to index
      %c5 = arith.constant 5 : index
      %48 = memref.load %arg1[%47, %c5] : memref<5x8xi32, #tpu.memory_space<smem>>
      %49 = vector.broadcast %48 : i32 to vector<8x1xi32>
      %50 = arith.select %46, %49, %44 : vector<8x1xi1>, vector<8x1xi32>
      %c6_i32 = arith.constant 6 : i32
      %51 = vector.broadcast %c6_i32 : i32 to vector<8x1xi32>
      %52 = arith.cmpi eq, %9, %51 : vector<8x1xi32>
      %53 = arith.index_cast %arg11 : i32 to index
      %c6 = arith.constant 6 : index
      %54 = memref.load %arg1[%53, %c6] : memref<5x8xi32, #tpu.memory_space<smem>>
      %55 = vector.broadcast %54 : i32 to vector<8x1xi32>
      %56 = arith.select %52, %55, %50 : vector<8x1xi1>, vector<8x1xi32>
      %c7_i32 = arith.constant 7 : i32
      %57 = vector.broadcast %c7_i32 : i32 to vector<8x1xi32>
      %58 = arith.cmpi eq, %9, %57 : vector<8x1xi32>
      %59 = arith.index_cast %arg11 : i32 to index
      %c7 = arith.constant 7 : index
      %60 = memref.load %arg1[%59, %c7] : memref<5x8xi32, #tpu.memory_space<smem>>
      %61 = vector.broadcast %60 : i32 to vector<8x1xi32>
      %62 = arith.select %58, %61, %56 : vector<8x1xi1>, vector<8x1xi32>
      %c0_i32_19 = arith.constant 0 : i32
      %63 = arith.cmpi eq, %arg11, %c0_i32_19 : i32
      %64 = arith.index_cast %arg11 : i32 to index
      %65 = memref.load %arg0[%64] : memref<6xi32, #tpu.memory_space<smem>>
      %c0_i32_20 = arith.constant 0 : i32
      %66 = arith.cmpi sgt, %65, %c0_i32_20 : i32
      %67 = arith.ori %63, %66 : i1
      %68 = arith.select %67, %62, %arg13 : vector<8x1xi32>
      %69 = vector.broadcast %68 : vector<8x1xi32> to vector<8x128xi32>
      %70 = arith.cmpi eq, %8, %69 : vector<8x128xi32>
      %71 = arith.extui %70 : vector<8x128xi1> to vector<8x128xi32>
      %72 = arith.sitofp %71 : vector<8x128xi32> to vector<8x128xf32>
      %73 = arith.truncf %72 : vector<8x128xf32> to vector<8x128xbf16>
      %c0_21 = arith.constant 0 : index
      %c0_22 = arith.constant 0 : index
      %74 = vector.load %arg3[%c0_21, %c0_22] : memref<128x1536xbf16, #tpu.memory_space<vmem>>, vector<128x1536xbf16>
      %cst_23 = arith.constant dense<0.000000e+00> : vector<8x1536xf32>
      %75 = tpu.matmul %73, %74, %cst_23 {dimension_numbers = #tpu.dot_dimension_numbers<[1], [0], [0], [1], [0, 0, 1, 1], [], []>} : vector<8x128xbf16>, vector<128x1536xbf16>, vector<8x1536xf32> -> vector<8x1536xf32>
      %76 = arith.truncf %arg12 : vector<8x512xf32> to vector<8x512xbf16>
      %c0_24 = arith.constant 0 : index
      %c0_25 = arith.constant 0 : index
      %77 = vector.load %arg4[%c0_24, %c0_25] : memref<512x3200xbf16, #tpu.memory_space<vmem>>, vector<512x3200xbf16>
      %cst_26 = arith.constant dense<0.000000e+00> : vector<8x3200xf32>
      %78 = tpu.matmul %76, %77, %cst_26 {dimension_numbers = #tpu.dot_dimension_numbers<[1], [0], [0], [1], [0, 0, 1, 1], [], []>} : vector<8x512xbf16>, vector<512x3200xbf16>, vector<8x3200xf32> -> vector<8x3200xf32>
      %79 = vector.extract_strided_slice %78 {offsets = [0, 0], sizes = [8, 1536], strides = [1, 1]} : vector<8x3200xf32> to vector<8x1536xf32>
      %80 = arith.addf %75, %79 : vector<8x1536xf32>
      %81 = vector.extract_strided_slice %78 {offsets = [0, 1536], sizes = [8, 1536], strides = [1, 1]} : vector<8x3200xf32> to vector<8x1536xf32>
      %82 = vector.extract_strided_slice %80 {offsets = [0, 0], sizes = [8, 1024], strides = [1, 1]} : vector<8x1536xf32> to vector<8x1024xf32>
      %83 = vector.extract_strided_slice %81 {offsets = [0, 0], sizes = [8, 1024], strides = [1, 1]} : vector<8x1536xf32> to vector<8x1024xf32>
      %84 = arith.addf %82, %83 : vector<8x1024xf32>
      %85 = vector.broadcast %4 : vector<1x1024xf32> to vector<8x1024xf32>
      %86 = arith.addf %84, %85 : vector<8x1024xf32>
      %87 = arith.negf %86 : vector<8x1024xf32>
      %88 = math.exp %87 : vector<8x1024xf32>
      %cst_27 = arith.constant 1.000000e+00 : f32
      %89 = vector.broadcast %cst_27 : f32 to vector<8x1024xf32>
      %90 = arith.addf %89, %88 : vector<8x1024xf32>
      %91 = arith.divf %89, %90 : vector<8x1024xf32>
      %92 = vector.extract_strided_slice %91 {offsets = [0, 0], sizes = [8, 512], strides = [1, 1]} : vector<8x1024xf32> to vector<8x512xf32>
      %93 = vector.extract_strided_slice %91 {offsets = [0, 512], sizes = [8, 512], strides = [1, 1]} : vector<8x1024xf32> to vector<8x512xf32>
      %94 = vector.extract_strided_slice %80 {offsets = [0, 1024], sizes = [8, 512], strides = [1, 1]} : vector<8x1536xf32> to vector<8x512xf32>
      %95 = vector.broadcast %5 : vector<1x512xf32> to vector<8x512xf32>
      %96 = arith.addf %94, %95 : vector<8x512xf32>
      %97 = vector.extract_strided_slice %81 {offsets = [0, 1024], sizes = [8, 512], strides = [1, 1]} : vector<8x1536xf32> to vector<8x512xf32>
      %98 = vector.broadcast %6 : vector<1x512xf32> to vector<8x512xf32>
      %99 = arith.addf %97, %98 : vector<8x512xf32>
      %100 = arith.mulf %92, %99 : vector<8x512xf32>
      %101 = arith.addf %96, %100 : vector<8x512xf32>
      %102 = math.tanh %101 : vector<8x512xf32>
      %cst_28 = arith.constant 1.000000e+00 : f32
      %103 = vector.broadcast %cst_28 : f32 to vector<8x512xf32>
      %104 = arith.subf %103, %93 : vector<8x512xf32>
      %105 = arith.mulf %104, %102 : vector<8x512xf32>
      %106 = arith.mulf %93, %arg12 : vector<8x512xf32>
      %107 = arith.addf %105, %106 : vector<8x512xf32>
      %108 = arith.truncf %107 : vector<8x512xf32> to vector<8x512xbf16>
      %c0_29 = arith.constant 0 : index
      %c0_30 = arith.constant 0 : index
      %109 = vector.load %arg8[%c0_29, %c0_30] : memref<512x128xbf16, #tpu.memory_space<vmem>>, vector<512x128xbf16>
      %cst_31 = arith.constant dense<0.000000e+00> : vector<8x128xf32>
      %110 = tpu.matmul %108, %109, %cst_31 {dimension_numbers = #tpu.dot_dimension_numbers<[1], [0], [0], [1], [0, 0, 1, 1], [], []>} : vector<8x512xbf16>, vector<512x128xbf16>, vector<8x128xf32> -> vector<8x128xf32>
      %111 = vector.extract_strided_slice %78 {offsets = [0, 3072], sizes = [8, 128], strides = [1, 1]} : vector<8x3200xf32> to vector<8x128xf32>
      %112 = arith.addf %110, %111 : vector<8x128xf32>
      %113 = vector.broadcast %7 : vector<1x128xf32> to vector<8x128xf32>
      %114 = arith.addf %112, %113 : vector<8x128xf32>
      %c1_i32_32 = arith.constant 1 : i32
      %115 = arith.addi %arg11, %c1_i32_32 : i32
      %116 = arith.index_cast %115 : i32 to index
      %c0_33 = arith.constant 0 : index
      %c0_34 = arith.constant 0 : index
      %117 = vector.load %arg10[%116, %c0_33, %c0_34] : memref<6x8x128xf32, #tpu.memory_space<vmem>>, vector<1x8x128xf32>
      %118 = vector.shape_cast %117 : vector<1x8x128xf32> to vector<8x128xf32>
      %119 = vector.shape_cast %114 : vector<8x128xf32> to vector<1x8x128xf32>
      tpu.vector_store %arg10[%116, %c0_33, %c0_34], %119 {strides = array<i32>} : memref<6x8x128xf32, #tpu.memory_space<vmem>>, vector<1x8x128xf32>,
      %c40_i32 = arith.constant 40 : i32
      %120 = vector.broadcast %c40_i32 : i32 to vector<8x128xi32>
      %121 = arith.cmpi slt, %8, %120 : vector<8x128xi32>
      %cst_35 = arith.constant -1.000000e+30 : f32
      %122 = vector.broadcast %cst_35 : f32 to vector<8x128xf32>
      %123 = arith.select %121, %114, %122 : vector<8x128xi1>, vector<8x128xf32>
      %cst_36 = arith.constant dense<0xFF800000> : vector<8xf32>
      %124 = vector.multi_reduction <maximumf>, %123, %cst_36 [1] : vector<8x128xf32> to vector<8xf32>
      %125 = vector.shape_cast %124 : vector<8xf32> to vector<8x1xf32>
      %126 = vector.broadcast %125 : vector<8x1xf32> to vector<8x128xf32>
      %127 = arith.cmpf oge, %123, %126 : vector<8x128xf32>
      %c128_i32 = arith.constant 128 : i32
      %128 = vector.broadcast %c128_i32 : i32 to vector<8x128xi32>
      %129 = arith.select %127, %8, %128 : vector<8x128xi1>, vector<8x128xi32>
      %cst_37 = arith.constant dense<2147483647> : vector<8xi32>
      %130 = vector.multi_reduction <minsi>, %129, %cst_37 [1] : vector<8x128xi32> to vector<8xi32>
      %131 = vector.shape_cast %130 : vector<8xi32> to vector<8x1xi32>
      scf.yield %107, %131 : vector<8x512xf32>, vector<8x1xi32>
    }
    %c5_i32_13 = arith.constant 5 : i32
    return
  }
}

</mosaic_0001>

<bundles_post_ra>
// kernel: seq2seq_forward.2
= control target key start
LH: loop header
LB: loop body
LE: loop exit
PB: predicated region body
PF: predicated region fallthrough
CT: control target
= control target key end

     0   :  { %10 = vsyncpa [#allocation4], 0  ;;  %s7006_s0 = inlined_call_operand.vmem [shape: bf16[64,256], index: 0, kind: input, shape index: {}]   ;;  %s7007_s1 = inlined_call_operand.hbm [shape: bf16[256,1536], index: 1, kind: input, shape index: {}]   ;;  %s7008_s2 = inlined_call_operand.hbm [shape: f32[1,1536], index: 2, kind: input, shape index: {}]   ;;  %s7009_s3 = inlined_call_operand.hbm [shape: bf16[512,1536], index: 3, kind: input, shape index: {}]   ;;  %s7010_s4 = inlined_call_operand.hbm [shape: f32[1,512], index: 4, kind: input, shape index: {}]   ;;  %s7011_s5 = inlined_call_operand.vmem [shape: f32[8,512], index: 5, kind: output, shape index: {}]  }
   0x1   :  { %11 = vsyncpa [#allocation6], 0 }
   0x2   :  { %12 = vsyncpa [#allocation9], 0  ;;  %s6528_s18 = smov [#allocation5]   ;;  %s6529_s20 = smov [#allocation3]  }
   0x3   :  { %s33_s19 = sshll.u32 %s6528_s18, 4  ;;  %s20_s21 = sshll.u32 %s6529_s20, 4  ;;  %s34_s19 = int_to_ptr.vmem [resolvable:$true] %s33_s19  ;;  %s6564_s21 = int_to_ptr.vmem [resolvable:$true] %s20_s21 }
   0x4   :  { %s6394_s24 = scalar_lea.hbm %s7008_s2, 192 }
   0x5   :  { %p6395_p0 = scmp.ne.s32.totalorder %s7008_s2, %s6394_s24  ;;  %p6398_p1 = scmp.lt.u32.totalorder %s6394_s24, %s7008_s2 }
   0x7   :  { %p6400_p2 = pnand %p6398_p1, %p6395_p0 }
   0x9   :  { %6403 = shalt.err (!%p6400_p2)
}
   0xa   :  { %s6404_s29 = scalar_lea.vmem %s34_s19, 192  ;;  %p6409_p4 = scmp.lt.s32.totalorder %s34_s19, %s34_s19 }
   0xb   :  { %p6405_p3 = scmp.ne.s32.totalorder %s34_s19, %s6404_s29  ;;  %p6410_p5 = scmp.lt.s32.totalorder %s6404_s29, %s6404_s29 }
   0xd   :  { %p6411_p6 = por %p6410_p5, %p6409_p4 }
   0xf   :  { %p6412_p7 = pnand %p6411_p6, %p6405_p3 }
  0x11   :  { %6415 = shalt.err (!%p6412_p7)
}
  0x12   :  { %36 = dma.hbm_to_vmem [thread:$0]  %s7008_s2, 192, %s34_s19, [#allocation6]  }
  0x13   :  { %s6416_s9 = scalar_lea.hbm %s7007_s1, 24576 }
  0x14   :  { %p6417_p8 = scmp.ne.s32.totalorder %s7007_s1, %s6416_s9  ;;  %p6420_p9 = scmp.lt.u32.totalorder %s6416_s9, %s7007_s1 }
  0x16   :  { %p6422_p10 = pnand %p6420_p9, %p6417_p8 }
  0x18   :  { %6425 = shalt.err (!%p6422_p10)
}
  0x19   :  { %s6426_s14 = scalar_lea.vmem %s6564_s21, 24576  ;;  %p6431_p12 = scmp.lt.s32.totalorder %s6564_s21, %s6564_s21 }
  0x1a   :  { %p6427_p11 = scmp.ne.s32.totalorder %s6564_s21, %s6426_s14  ;;  %p6432_p13 = scmp.lt.s32.totalorder %s6426_s14, %s6426_s14 }
  0x1c   :  { %p6433_p0 = por %p6432_p13, %p6431_p12 }
  0x1e   :  { %p6434_p1 = pnand %p6433_p0, %p6427_p11 }
  0x20   :  { %6437 = shalt.err (!%p6434_p1)
}
  0x21   :  { %s6530_s2 = smov 768   ;;  %s6531_s15 = smov 48  }
  0x22   :  { %26 = dma.hbm_to_vmem [thread:$0]  %s7007_s1, 24576, %s6564_s21, [#allocation4], %s6530_s2, %s6530_s2, %s6531_s15  }
  0x23   :  { %s6532_s18 = smov [#allocation7]   ;;  %s6533_s20 = smov [#allocation8]  }
  0x24   :  { %s42_s19 = sshll.u32 %s6532_s18, 4  ;;  %s55_s22 = sshll.u32 %s6533_s20, 4  ;;  %s43_s19 = int_to_ptr.vmem [resolvable:$true] %s42_s19  ;;  %s56_s22 = int_to_ptr.vmem [resolvable:$true] %s55_s22 }
  0x25   :  { %s6438_s25 = scalar_lea.hbm %s7009_s3, 49152 }
  0x26   :  { %p6439_p2 = scmp.ne.s32.totalorder %s7009_s3, %s6438_s25  ;;  %p6442_p3 = scmp.lt.u32.totalorder %s6438_s25, %s7009_s3 }
  0x28   :  { %p6444_p4 = pnand %p6442_p3, %p6439_p2 }
  0x2a   :  { %6447 = shalt.err (!%p6444_p4)
}
  0x2b   :  { %s6448_s1 = scalar_lea.vmem %s43_s19, 49152  ;;  %p6453_p6 = scmp.lt.s32.totalorder %s43_s19, %s43_s19 }
  0x2c   :  { %p6449_p5 = scmp.ne.s32.totalorder %s43_s19, %s6448_s1  ;;  %p6454_p7 = scmp.lt.s32.totalorder %s6448_s1, %s6448_s1 }
  0x2e   :  { %p6455_p8 = por %p6454_p7, %p6453_p6 }
  0x30   :  { %p6456_p9 = pnand %p6455_p8, %p6449_p5 }
  0x32   :  { %6459 = shalt.err (!%p6456_p9)
}
  0x33   :  { %48 = dma.hbm_to_vmem [thread:$0]  %s7009_s3, 49152, %s43_s19, [#allocation6], %s6530_s2, %s6530_s2, %s6531_s15  }
  0x34   :  { %s6460_s8 = scalar_lea.hbm %s7010_s4, 64 }
  0x35   :  { %p6461_p10 = scmp.ne.s32.totalorder %s7010_s4, %s6460_s8  ;;  %p6464_p11 = scmp.lt.u32.totalorder %s6460_s8, %s7010_s4 }
  0x37   :  { %p6466_p12 = pnand %p6464_p11, %p6461_p10 }
  0x39   :  { %6469 = shalt.err (!%p6466_p12)
}
  0x3a   :  { %s6470_s13 = scalar_lea.vmem %s56_s22, 64  ;;  %p6475_p0 = scmp.lt.s32.totalorder %s56_s22, %s56_s22 }
  0x3b   :  { %p6471_p13 = scmp.ne.s32.totalorder %s56_s22, %s6470_s13  ;;  %p6476_p1 = scmp.lt.s32.totalorder %s6470_s13, %s6470_s13 }
  0x3d   :  { %p6477_p2 = por %p6476_p1, %p6475_p0 }
  0x3f   :  { %p6478_p3 = pnand %p6477_p2, %p6471_p13 }
  0x41   :  { %6481 = shalt.err (!%p6478_p3)
}
  0x42   :  { %58 = dma.hbm_to_vmem [thread:$0]  %s7010_s4, 64, %s56_s22, [#allocation9]  }
  0x43   :  { %6502 = dma.done.wait [#allocation4], 24576  }
  0x44   :  { %6503 = vsyncadd [#allocation4], 4294942720 }
  0x45   :  { %6504 = dma.done.wait [#allocation6], 49344  }
  0x46   :  { %6505 = vsyncadd [#allocation6], 4294917952 }
  0x47   :  { %6506 = dma.done.wait [#allocation9], 64  }
  0x48   :  { %6507 = vsyncadd [#allocation9], 4294967232  ;;  %v6619_v0 = vld [vmem:[#allocation8] sm:$0xf]  ;;  %v5478_v1 = vld [vmem:[#allocation3 + $0x4] ss:$48 sps:$4 sm:$0xff]  }
  0x49   :  { %v5480_v2 = vld [vmem:[#allocation3 + $0xc] ss:$48 sps:$4 sm:$0xff]   ;;  %v5482_v3 = vld [vmem:[#allocation3] ss:$48 sps:$4 sm:$0xff]   ;;  %v5483_v4 = vld [vmem:[#allocation3 + $0x8] ss:$48 sps:$4 sm:$0xff]   ;;  %1335 = vmatprep.subr.bf16.mxu0 %v5478_v1 }
  0x4a   :  { %v5484_v5 = vld [vmem:[#allocation3 + $0x64] ss:$48 sps:$4 sm:$0xff]   ;;  %1408 = vmatprep.subr.bf16.mxu1 %v5480_v2  ;;  %1336 = vmatpush1.bf16.msra.mxu0 %v5482_v3  ;;  %v5486_v6 = vld [vmem:[#allocation3 + $0x6c] ss:$48 sps:$4 sm:$0xff]   ;;  %v5488_v7 = vld [vmem:[#allocation3 + $0x60] ss:$48 sps:$4 sm:$0xff]  }
  0x4b   :  { %1409 = vmatpush1.bf16.msra.mxu1 %v5483_v4  ;;  %1337 = vmatprep.subr.bf16.mxu0 %v5484_v5  ;;  %v5489_v8 = vld [vmem:[#allocation3 + $0x68] ss:$48 sps:$4 sm:$0xff]   ;;  %v5490_v9 = vld [vmem:[#allocation3 + $0xc4] ss:$48 sps:$4 sm:$0xff]   ;;  %v5492_v10 = vld [vmem:[#allocation3 + $0xcc] ss:$48 sps:$4 sm:$0xff]  }
  0x4c   :  { %1410 = vmatprep.subr.bf16.mxu1 %v5486_v6  ;;  %v5494_v11 = vld [vmem:[#allocation3 + $0xc0] ss:$48 sps:$4 sm:$0xff]   ;;  %v5495_v12 = vld [vmem:[#allocation3 + $0xc8] ss:$48 sps:$4 sm:$0xff]   ;;  %v5496_v13 = vld [vmem:[#allocation3 + $0x124] ss:$48 sps:$4 sm:$0xff]  }
  0x4d   :  { %v5498_v14 = vld [vmem:[#allocation3 + $0x12c] ss:$48 sps:$4 sm:$0xff]   ;;  %v5500_v15 = vld [vmem:[#allocation3 + $0x120] ss:$48 sps:$4 sm:$0xff]   ;;  %v5501_v16 = vld [vmem:[#allocation3 + $0x128] ss:$48 sps:$4 sm:$0xff]  }
  0x4e   :  { %1338 = vmatpush1.bf16.msra.mxu0 %v5488_v7  ;;  %v5502_v17 = vld [vmem:[#allocation3 + $0x184] ss:$48 sps:$4 sm:$0xff]   ;;  %v5504_v18 = vld [vmem:[#allocation3 + $0x18c] ss:$48 sps:$4 sm:$0xff]   ;;  %v5506_v19 = vld [vmem:[#allocation3 + $0x180] ss:$48 sps:$4 sm:$0xff]  }
  0x4f   :  { %1411 = vmatpush1.bf16.msra.mxu1 %v5489_v8  ;;  %1339 = vmatprep.subr.bf16.mxu0 %v5490_v9  ;;  %v5507_v20 = vld [vmem:[#allocation3 + $0x188] ss:$48 sps:$4 sm:$0xff]   ;;  %v5508_v21 = vld [vmem:[#allocation3 + $0x1e4] ss:$48 sps:$4 sm:$0xff]   ;;  %v5510_v22 = vld [vmem:[#allocation3 + $0x1ec] ss:$48 sps:$4 sm:$0xff]  }
  0x50   :  { %1412 = vmatprep.subr.bf16.mxu1 %v5492_v10  ;;  %v5512_v23 = vld [vmem:[#allocation3 + $0x1e0] ss:$48 sps:$4 sm:$0xff]   ;;  %v5513_v24 = vld [vmem:[#allocation3 + $0x1e8] ss:$48 sps:$4 sm:$0xff]   ;;  %v5514_v25 = vld [vmem:[#allocation3 + $0x244] ss:$48 sps:$4 sm:$0xff]  }
  0x51   :  { %v5516_v26 = vld [vmem:[#allocation3 + $0x24c] ss:$48 sps:$4 sm:$0xff]   ;;  %v5518_v27 = vld [vmem:[#allocation3 + $0x240] ss:$48 sps:$4 sm:$0xff]   ;;  %v5519_v28 = vld [vmem:[#allocation3 + $0x248] ss:$48 sps:$4 sm:$0xff]  }
  0x52   :  { %1340 = vmatpush1.bf16.msra.mxu0 %v5494_v11  ;;  %v5520_v29 = vld [vmem:[#allocation3 + $0x2a4] ss:$48 sps:$4 sm:$0xff]   ;;  %v5522_v30 = vld [vmem:[#allocation3 + $0x2ac] ss:$48 sps:$4 sm:$0xff]   ;;  %v5524_v31 = vld [vmem:[#allocation3 + $0x2a0] ss:$48 sps:$4 sm:$0xff]  }
  0x53   :  { %1413 = vmatpush1.bf16.msra.mxu1 %v5495_v12  ;;  %1341 = vmatprep.subr.bf16.mxu0 %v5496_v13  ;;  %v5525_v32 = vld [vmem:[#allocation3 + $0x2a8] ss:$48 sps:$4 sm:$0xff]   ;;  %v5526_v33 = vld [vmem:[#allocation3 + $0x304] ss:$48 sps:$4 sm:$0xff]   ;;  %v5528_v34 = vld [vmem:[#allocation3 + $0x30c] ss:$48 sps:$4 sm:$0xff]  }
  0x54   :  { %1414 = vmatprep.subr.bf16.mxu1 %v5498_v14  ;;  %v5530_v35 = vld [vmem:[#allocation3 + $0x300] ss:$48 sps:$4 sm:$0xff]   ;;  %v5531_v36 = vld [vmem:[#allocation3 + $0x308] ss:$48 sps:$4 sm:$0xff]   ;;  %v5532_v37 = vld [vmem:[#allocation3 + $0x364] ss:$48 sps:$4 sm:$0xff]  }
  0x55   :  { %v5534_v38 = vld [vmem:[#allocation3 + $0x36c] ss:$48 sps:$4 sm:$0xff]   ;;  %v5536_v39 = vld [vmem:[#allocation3 + $0x360] ss:$48 sps:$4 sm:$0xff]   ;;  %v5537_v40 = vld [vmem:[#allocation3 + $0x368] ss:$48 sps:$4 sm:$0xff]  }
  0x56   :  { %1342 = vmatpush1.bf16.msra.mxu0 %v5500_v15  ;;  %v5538_v41 = vld [vmem:[#allocation3 + $0x3c4] ss:$48 sps:$4 sm:$0xff]   ;;  %v5540_v42 = vld [vmem:[#allocation3 + $0x3cc] ss:$48 sps:$4 sm:$0xff]   ;;  %v5542_v43 = vld [vmem:[#allocation3 + $0x3c0] ss:$48 sps:$4 sm:$0xff]  }
  0x57   :  { %1415 = vmatpush1.bf16.msra.mxu1 %v5501_v16  ;;  %1343 = vmatprep.subr.bf16.mxu0 %v5502_v17  ;;  %v5543_v44 = vld [vmem:[#allocation3 + $0x3c8] ss:$48 sps:$4 sm:$0xff]   ;;  %v5544_v45 = vld [vmem:[#allocation3 + $0x424] ss:$48 sps:$4 sm:$0xff]   ;;  %v5546_v46 = vld [vmem:[#allocation3 + $0x42c] ss:$48 sps:$4 sm:$0xff]  }
  0x58   :  { %1416 = vmatprep.subr.bf16.mxu1 %v5504_v18  ;;  %v6624_v47 = vld [vmem:[%s7006_s0 + $0x4] ss:$8 sps:$4 sm:$0xff]   ;;  %v5548_v48 = vld [vmem:[#allocation3 + $0x420] ss:$48 sps:$4 sm:$0xff]   ;;  %v5549_v49 = vld [vmem:[#allocation3 + $0x428] ss:$48 sps:$4 sm:$0xff]  }
  0x59   :  { %v5550_v50 = vld [vmem:[#allocation3 + $0x484] ss:$48 sps:$4 sm:$0xff]   ;;  %v5552_v51 = vld [vmem:[#allocation3 + $0x48c] ss:$48 sps:$4 sm:$0xff]   ;;  %1367 = vmatprep.mubr.bf16.mxu0 %v6624_v47  ;;  %1440 = vmatprep.mubr.bf16.mxu1 %v6624_v47  ;;  %v5554_v52 = vld [vmem:[#allocation3 + $0x480] ss:$48 sps:$4 sm:$0xff]  }
  0x5a   :  { %1344 = vmatpush1.bf16.msra.mxu0 %v5506_v19  ;;  %v5555_v53 = vld [vmem:[#allocation3 + $0x488] ss:$48 sps:$4 sm:$0xff]   ;;  %v5556_v54 = vld [vmem:[#allocation3 + $0x4e4] ss:$48 sps:$4 sm:$0xff]   ;;  %v5558_v55 = vld [vmem:[#allocation3 + $0x4ec] ss:$48 sps:$4 sm:$0xff]  }
  0x5b   :  { %1417 = vmatpush1.bf16.msra.mxu1 %v5507_v20  ;;  %1345 = vmatprep.subr.bf16.mxu0 %v5508_v21  ;;  %v5560_v56 = vld [vmem:[#allocation3 + $0x4e0] ss:$48 sps:$4 sm:$0xff]   ;;  %v5561_v57 = vld [vmem:[#allocation3 + $0x4e8] ss:$48 sps:$4 sm:$0xff]   ;;  %v5562_v58 = vld [vmem:[#allocation3 + $0x544] ss:$48 sps:$4 sm:$0xff]  }
  0x5c   :  { %1418 = vmatprep.subr.bf16.mxu1 %v5510_v22  ;;  %v5564_v59 = vld [vmem:[#allocation3 + $0x54c] ss:$48 sps:$4 sm:$0xff]   ;;  %v5566_v60 = vld [vmem:[#allocation3 + $0x540] ss:$48 sps:$4 sm:$0xff]   ;;  %v5567_v61 = vld [vmem:[#allocation3 + $0x548] ss:$48 sps:$4 sm:$0xff]  }
  0x5d   :  { %v5568_v62 = vld [vmem:[#allocation3 + $0x5a4] ss:$48 sps:$4 sm:$0xff]   ;;  %v5570_v63 = vld [vmem:[#allocation3 + $0x5ac] ss:$48 sps:$4 sm:$0xff]   ;;  %v5572_v1 = vld [vmem:[#allocation3 + $0x5a0] ss:$48 sps:$4 sm:$0xff]  }
  0x5e   :  { %1346 = vmatpush1.bf16.msra.mxu0 %v5512_v23  ;;  %v5573_v2 = vld [vmem:[#allocation3 + $0x5a8] ss:$48 sps:$4 sm:$0xff]   ;;  %v5579_v3 = vld [vmem:[#allocation3 + $0x14] ss:$48 sps:$4 sm:$0xff]   ;;  %v5582_v4 = vld [vmem:[#allocation3 + $0x1c] ss:$48 sps:$4 sm:$0xff]  }
  0x5f   :  { %1419 = vmatpush1.bf16.msra.mxu1 %v5513_v24  ;;  %1347 = vmatprep.subr.bf16.mxu0 %v5514_v25  ;;  %v6631_v5 = vld [vmem:[%s7006_s0] ss:$8 sps:$4 sm:$0xff]   ;;  %v5585_v8 = vld [vmem:[#allocation3 + $0x74] ss:$48 sps:$4 sm:$0xff]   ;;  %v5588_v9 = vld [vmem:[#allocation3 + $0x7c] ss:$48 sps:$4 sm:$0xff]  }
  0x60   :  { %1420 = vmatprep.subr.bf16.mxu1 %v5516_v26  ;;  %v5577_v6 = vld [vmem:[#allocation3 + $0x10] ss:$48 sps:$4 sm:$0xff]   ;;  %v5580_v7 = vld [vmem:[#allocation3 + $0x18] ss:$48 sps:$4 sm:$0xff]   ;;  %v5591_v12 = vld [vmem:[#allocation3 + $0xd4] ss:$48 sps:$4 sm:$0xff]  }
  0x61   :  { %v5583_v10 = vld [vmem:[#allocation3 + $0x70] ss:$48 sps:$4 sm:$0xff]   ;;  %v5586_v11 = vld [vmem:[#allocation3 + $0x78] ss:$48 sps:$4 sm:$0xff]   ;;  %v5594_v14 = vld [vmem:[#allocation3 + $0xdc] ss:$48 sps:$4 sm:$0xff]  }
  0x62   :  { %1348 = vmatpush1.bf16.msra.mxu0 %v5518_v27  ;;  %v5589_v13 = vld [vmem:[#allocation3 + $0xd0] ss:$48 sps:$4 sm:$0xff]   ;;  %v6638_v15 = vld [vmem:[%s7006_s0 + $0x14] ss:$8 sps:$4 sm:$0xff]   ;;  %v5592_v17 = vld [vmem:[#allocation3 + $0xd8] ss:$48 sps:$4 sm:$0xff]  }
  0x63   :  { %1421 = vmatpush1.bf16.msra.mxu1 %v5519_v28  ;;  %1349 = vmatprep.subr.bf16.mxu0 %v5520_v29  ;;  %v6643_v16 = vld [vmem:[%s7006_s0 + $0x10] ss:$8 sps:$4 sm:$0xff]   ;;  %v5597_v18 = vld [vmem:[#allocation3 + $0x134] ss:$48 sps:$4 sm:$0xff]   ;;  %v5600_v19 = vld [vmem:[#allocation3 + $0x13c] ss:$48 sps:$4 sm:$0xff]  }
  0x64   :  { %1422 = vmatprep.subr.bf16.mxu1 %v5522_v30  ;;  %v5595_v20 = vld [vmem:[#allocation3 + $0x130] ss:$48 sps:$4 sm:$0xff]   ;;  %v5598_v21 = vld [vmem:[#allocation3 + $0x138] ss:$48 sps:$4 sm:$0xff]   ;;  %v5603_v22 = vld [vmem:[#allocation3 + $0x194] ss:$48 sps:$4 sm:$0xff]  }
  0x65   :  { %v5606_v23 = vld [vmem:[#allocation3 + $0x19c] ss:$48 sps:$4 sm:$0xff]   ;;  %v6657_v25 = vld [vmem:[%s7006_s0 + $0x20] ss:$8 sps:$4 sm:$0xff]   ;;  %v5609_v28 = vld [vmem:[#allocation3 + $0x1f4] ss:$48 sps:$4 sm:$0xff]  }
  0x66   :  { %1350 = vmatpush1.bf16.msra.mxu0 %v5524_v31  ;;  %v6652_v24 = vld [vmem:[%s7006_s0 + $0x24] ss:$8 sps:$4 sm:$0xff]   ;;  %v5601_v26 = vld [vmem:[#allocation3 + $0x190] ss:$48 sps:$4 sm:$0xff]   ;;  %v5604_v27 = vld [vmem:[#allocation3 + $0x198] ss:$48 sps:$4 sm:$0xff]  }
  0x67   :  { %1423 = vmatpush1.bf16.msra.mxu1 %v5525_v32  ;;  %1351 = vmatprep.subr.bf16.mxu0 %v5526_v33  ;;  %v5612_v29 = vld [vmem:[#allocation3 + $0x1fc] ss:$48 sps:$4 sm:$0xff]   ;;  %v5607_v30 = vld [vmem:[#allocation3 + $0x1f0] ss:$48 sps:$4 sm:$0xff]   ;;  %v5610_v31 = vld [vmem:[#allocation3 + $0x1f8] ss:$48 sps:$4 sm:$0xff]  }
  0x68   :  { %1424 = vmatprep.subr.bf16.mxu1 %v5528_v34  ;;  %v5615_v32 = vld [vmem:[#allocation3 + $0x254] ss:$48 sps:$4 sm:$0xff]   ;;  %v5618_v34 = vld [vmem:[#allocation3 + $0x25c] ss:$48 sps:$4 sm:$0xff]  }
  0x69   :  { %v6666_v33 = vld [vmem:[%s7006_s0 + $0x34] ss:$8 sps:$4 sm:$0xff]  }
  0x6a   :  { %1352 = vmatpush1.bf16.msra.mxu0 %v5530_v35  ;;  %v6673_v35 = vld [vmem:[%s7006_s0 + $0x30] ss:$8 sps:$4 sm:$0xff]   ;;  %s6873_s0 = smov 0  }
  0x6b   :  { %1425 = vmatpush1.bf16.msra.mxu1 %v5531_v36  ;;  %1353 = vmatprep.subr.bf16.mxu0 %v5532_v37  ;;  %v5613_v36 = vld [vmem:[#allocation3 + $0x250] ss:$48 sps:$4 sm:$0xff]   ;;  %v5616_v37 = vld [vmem:[#allocation3 + $0x258] ss:$48 sps:$4 sm:$0xff]  }
  0x6c   :  { %1426 = vmatprep.subr.bf16.mxu1 %v5534_v38  ;;  %v5621_v38 = vld [vmem:[#allocation3 + $0x2b4] ss:$48 sps:$4 sm:$0xff]  }
  0x6e   :  { %1354 = vmatpush1.bf16.msra.mxu0 %v5536_v39  ;;  %v5624_v39 = vld [vmem:[#allocation3 + $0x2bc] ss:$48 sps:$4 sm:$0xff]  }
  0x6f   :  { %1427 = vmatpush1.bf16.msra.mxu1 %v5537_v40  ;;  %1355 = vmatprep.subr.bf16.mxu0 %v5538_v41  ;;  %v5619_v40 = vld [vmem:[#allocation3 + $0x2b0] ss:$48 sps:$4 sm:$0xff]   ;;  %v5622_v41 = vld [vmem:[#allocation3 + $0x2b8] ss:$48 sps:$4 sm:$0xff]  }
  0x70   :  { %1428 = vmatprep.subr.bf16.mxu1 %v5540_v42  ;;  %v5627_v42 = vld [vmem:[#allocation3 + $0x314] ss:$48 sps:$4 sm:$0xff]  }
  0x72   :  { %1356 = vmatpush1.bf16.msra.mxu0 %v5542_v43  ;;  %v5630_v43 = vld [vmem:[#allocation3 + $0x31c] ss:$48 sps:$4 sm:$0xff]  }
  0x73   :  { %1429 = vmatpush1.bf16.msra.mxu1 %v5543_v44  ;;  %1357 = vmatprep.subr.bf16.mxu0 %v5544_v45  ;;  %v5625_v44 = vld [vmem:[#allocation3 + $0x310] ss:$48 sps:$4 sm:$0xff]   ;;  %v5628_v45 = vld [vmem:[#allocation3 + $0x318] ss:$48 sps:$4 sm:$0xff]  }
  0x74   :  { %1430 = vmatprep.subr.bf16.mxu1 %v5546_v46  ;;  %v5633_v46 = vld [vmem:[#allocation3 + $0x374] ss:$48 sps:$4 sm:$0xff]  }
  0x76   :  { %1358 = vmatpush1.bf16.msra.mxu0 %v5548_v48  ;;  %v5636_v48 = vld [vmem:[#allocation3 + $0x37c] ss:$48 sps:$4 sm:$0xff]  }
  0x77   :  { %1431 = vmatpush1.bf16.msra.mxu1 %v5549_v49  ;;  %1359 = vmatprep.subr.bf16.mxu0 %v5550_v50  ;;  %v5631_v49 = vld [vmem:[#allocation3 + $0x370] ss:$48 sps:$4 sm:$0xff]   ;;  %v5634_v50 = vld [vmem:[#allocation3 + $0x378] ss:$48 sps:$4 sm:$0xff]  }
  0x78   :  { %1432 = vmatprep.subr.bf16.mxu1 %v5552_v51  ;;  %v5642_v51 = vld [vmem:[#allocation3 + $0x3d4] ss:$48 sps:$4 sm:$0xff]  }
  0x7a   :  { %1360 = vmatpush1.bf16.msra.mxu0 %v5554_v52  ;;  %v5645_v52 = vld [vmem:[#allocation3 + $0x3dc] ss:$48 sps:$4 sm:$0xff]  }
  0x7b   :  { %1433 = vmatpush1.bf16.msra.mxu1 %v5555_v53  ;;  %1361 = vmatprep.subr.bf16.mxu0 %v5556_v54  ;;  %v5640_v53 = vld [vmem:[#allocation3 + $0x3d0] ss:$48 sps:$4 sm:$0xff]   ;;  %v5643_v54 = vld [vmem:[#allocation3 + $0x3d8] ss:$48 sps:$4 sm:$0xff]  }
  0x7c   :  { %1434 = vmatprep.subr.bf16.mxu1 %v5558_v55  ;;  %v5648_v55 = vld [vmem:[#allocation3 + $0x434] ss:$48 sps:$4 sm:$0xff]  }
  0x7e   :  { %1362 = vmatpush1.bf16.msra.mxu0 %v5560_v56  ;;  %v5651_v56 = vld [vmem:[#allocation3 + $0x43c] ss:$48 sps:$4 sm:$0xff]  }
  0x7f   :  { %1435 = vmatpush1.bf16.msra.mxu1 %v5561_v57  ;;  %1363 = vmatprep.subr.bf16.mxu0 %v5562_v58  ;;  %v5646_v57 = vld [vmem:[#allocation3 + $0x430] ss:$48 sps:$4 sm:$0xff]   ;;  %v5649_v58 = vld [vmem:[#allocation3 + $0x438] ss:$48 sps:$4 sm:$0xff]  }
  0x80   :  { %1436 = vmatprep.subr.bf16.mxu1 %v5564_v59  ;;  %v5657_v59 = vld [vmem:[#allocation3 + $0x494] ss:$48 sps:$4 sm:$0xff]  }
  0x82   :  { %1364 = vmatpush1.bf16.msra.mxu0 %v5566_v60  ;;  %v5660_v60 = vld [vmem:[#allocation3 + $0x49c] ss:$48 sps:$4 sm:$0xff]  }
  0x83   :  { %1437 = vmatpush1.bf16.msra.mxu1 %v5567_v61  ;;  %1365 = vmatprep.subr.bf16.mxu0 %v5568_v62  ;;  %v5655_v61 = vld [vmem:[#allocation3 + $0x490] ss:$48 sps:$4 sm:$0xff]   ;;  %v5658_v62 = vld [vmem:[#allocation3 + $0x498] ss:$48 sps:$4 sm:$0xff]  }
  0x84   :  { %1438 = vmatprep.subr.bf16.mxu1 %v5570_v63  ;;  %v5663_v63 = vld [vmem:[#allocation3 + $0x4f4] ss:$48 sps:$4 sm:$0xff]  }
  0x86   :  { %1366 = vmatpush1.bf16.msra.mxu0 %v5572_v1  ;;  %v5666_v1 = vld [vmem:[#allocation3 + $0x4fc] ss:$48 sps:$4 sm:$0xff]  }
  0x87   :  { %1439 = vmatpush1.bf16.msra.mxu1 %v5573_v2  ;;  %1481 = vmatprep.subr.bf16.mxu0 %v5579_v3  ;;  %v5661_v2 = vld [vmem:[#allocation3 + $0x4f0] ss:$48 sps:$4 sm:$0xff]   ;;  %v5664_v3 = vld [vmem:[#allocation3 + $0x4f8] ss:$48 sps:$4 sm:$0xff]  }
  0x88   :  { %1554 = vmatprep.subr.bf16.mxu1 %v5582_v4  ;;  %v5672_v4 = vld [vmem:[#allocation3 + $0x554] ss:$48 sps:$4 sm:$0xff]  }
  0x89   :  { %1368 = vmatmul.mubr.bf16.vlgmr.msra.gmra.mrb[0].mxu0 %v6631_v5 }
  0x8a   :  { %1441 = vmatmul.mubr.bf16.vlgmr.msra.gmra.mrb[0].mxu1 %v6631_v5  ;;  %1482 = vmatpush1.bf16.msra.mxu0 %v5577_v6  ;;  %v5675_v6 = vld [vmem:[#allocation3 + $0x55c] ss:$48 sps:$4 sm:$0xff]  }
  0x8b   :  { %1555 = vmatpush1.bf16.msra.mxu1 %v5580_v7  ;;  %1483 = vmatprep.subr.bf16.mxu0 %v5585_v8  ;;  %v5670_v7 = vld [vmem:[#allocation3 + $0x550] ss:$48 sps:$4 sm:$0xff]   ;;  %v5673_v8 = vld [vmem:[#allocation3 + $0x558] ss:$48 sps:$4 sm:$0xff]  }
  0x8c   :  { %1556 = vmatprep.subr.bf16.mxu1 %v5588_v9  ;;  %1377 = vmatprep.mubr.bf16.mxu0 %v6638_v15  ;;  %v5678_v9 = vld [vmem:[#allocation3 + $0x5b4] ss:$48 sps:$4 sm:$0xff]  }
  0x8d   :  { %1450 = vmatprep.mubr.bf16.mxu1 %v6638_v15 }
  0x8e   :  { %1484 = vmatpush1.bf16.msra.mxu0 %v5583_v10  ;;  %v5681_v10 = vld [vmem:[#allocation3 + $0x5bc] ss:$48 sps:$4 sm:$0xff]  }
  0x8f   :  { %1557 = vmatpush1.bf16.msra.mxu1 %v5586_v11  ;;  %1485 = vmatprep.subr.bf16.mxu0 %v5591_v12  ;;  %v5676_v11 = vld [vmem:[#allocation3 + $0x5b0] ss:$48 sps:$4 sm:$0xff]   ;;  %v5679_v12 = vld [vmem:[#allocation3 + $0x5b8] ss:$48 sps:$4 sm:$0xff]  }
  0x90   :  { %1558 = vmatprep.subr.bf16.mxu1 %v5594_v14  ;;  %v5687_v14 = vld [vmem:[#allocation3 + $0x2c] ss:$48 sps:$4 sm:$0xff]  }
  0x91   :  { %1378 = vmatmul.mubr.bf16.gmra.mrb[4].mxu0 %v6643_v16 }
  0x92   :  { %1486 = vmatpush1.bf16.msra.mxu0 %v5589_v13  ;;  %1451 = vmatmul.mubr.bf16.gmra.mrb[4].mxu1 %v6643_v16  ;;  %v5684_v13 = vld [vmem:[#allocation3 + $0x24] ss:$48 sps:$4 sm:$0xff]  }
  0x93   :  { %1559 = vmatpush1.bf16.msra.mxu1 %v5592_v17  ;;  %1487 = vmatprep.subr.bf16.mxu0 %v5597_v18  ;;  %v5682_v17 = vld [vmem:[#allocation3 + $0x20] ss:$48 sps:$4 sm:$0xff]   ;;  %v5685_v18 = vld [vmem:[#allocation3 + $0x28] ss:$48 sps:$4 sm:$0xff]  }
  0x94   :  { %1560 = vmatprep.subr.bf16.mxu1 %v5600_v19  ;;  %1387 = vmatprep.mubr.bf16.mxu0 %v6652_v24  ;;  %v5690_v19 = vld [vmem:[#allocation3 + $0x84] ss:$48 sps:$4 sm:$0xff]  }
  0x95   :  { %1460 = vmatprep.mubr.bf16.mxu1 %v6652_v24 }
  0x96   :  { %1488 = vmatpush1.bf16.msra.mxu0 %v5595_v20  ;;  %v5693_v20 = vld [vmem:[#allocation3 + $0x8c] ss:$48 sps:$4 sm:$0xff]  }
  0x97   :  { %1561 = vmatpush1.bf16.msra.mxu1 %v5598_v21  ;;  %1489 = vmatprep.subr.bf16.mxu0 %v5603_v22  ;;  %v5688_v21 = vld [vmem:[#allocation3 + $0x80] ss:$48 sps:$4 sm:$0xff]   ;;  %v5691_v22 = vld [vmem:[#allocation3 + $0x88] ss:$48 sps:$4 sm:$0xff]  }
  0x98   :  { %1562 = vmatprep.subr.bf16.mxu1 %v5606_v23  ;;  %v5696_v23 = vld [vmem:[#allocation3 + $0xe4] ss:$48 sps:$4 sm:$0xff]  }
  0x99   :  { %1388 = vmatmul.mubr.bf16.gmra.mrb[8].mxu0 %v6657_v25 }
  0x9a   :  { %1490 = vmatpush1.bf16.msra.mxu0 %v5601_v26  ;;  %1461 = vmatmul.mubr.bf16.gmra.mrb[8].mxu1 %v6657_v25  ;;  %v5699_v26 = vld [vmem:[#allocation3 + $0xec] ss:$48 sps:$4 sm:$0xff]  }
  0x9b   :  { %1563 = vmatpush1.bf16.msra.mxu1 %v5604_v27  ;;  %1491 = vmatprep.subr.bf16.mxu0 %v5609_v28  ;;  %v5694_v27 = vld [vmem:[#allocation3 + $0xe0] ss:$48 sps:$4 sm:$0xff]   ;;  %v5697_v28 = vld [vmem:[#allocation3 + $0xe8] ss:$48 sps:$4 sm:$0xff]  }
  0x9c   :  { %1564 = vmatprep.subr.bf16.mxu1 %v5612_v29  ;;  %1397 = vmatprep.mubr.bf16.mxu0 %v6666_v33  ;;  %v5702_v29 = vld [vmem:[#allocation3 + $0x144] ss:$48 sps:$4 sm:$0xff]  }
  0x9d   :  { %1470 = vmatprep.mubr.bf16.mxu1 %v6666_v33 }
  0x9e   :  { %1492 = vmatpush1.bf16.msra.mxu0 %v5607_v30  ;;  %v5705_v30 = vld [vmem:[#allocation3 + $0x14c] ss:$48 sps:$4 sm:$0xff]  }
  0x9f   :  { %1565 = vmatpush1.bf16.msra.mxu1 %v5610_v31  ;;  %1493 = vmatprep.subr.bf16.mxu0 %v5615_v32  ;;  %v5700_v31 = vld [vmem:[#allocation3 + $0x140] ss:$48 sps:$4 sm:$0xff]   ;;  %v5703_v32 = vld [vmem:[#allocation3 + $0x148] ss:$48 sps:$4 sm:$0xff]  }
  0xa0   :  { %1566 = vmatprep.subr.bf16.mxu1 %v5618_v34  ;;  %v5708_v34 = vld [vmem:[#allocation3 + $0x1a4] ss:$48 sps:$4 sm:$0xff]  }
  0xa1   :  { %1398 = vmatmul.mubr.bf16.gmra.mrb[12].mxu0 %v6673_v35 }
  0xa2   :  { %1494 = vmatpush1.bf16.msra.mxu0 %v5613_v36  ;;  %1471 = vmatmul.mubr.bf16.gmra.mrb[12].mxu1 %v6673_v35  ;;  %v5711_v36 = vld [vmem:[#allocation3 + $0x1ac] ss:$48 sps:$4 sm:$0xff]  }
  0xa3   :  { %1567 = vmatpush1.bf16.msra.mxu1 %v5616_v37  ;;  %1495 = vmatprep.subr.bf16.mxu0 %v5621_v38  ;;  %v5706_v37 = vld [vmem:[#allocation3 + $0x1a0] ss:$48 sps:$4 sm:$0xff]   ;;  %v5709_v38 = vld [vmem:[#allocation3 + $0x1a8] ss:$48 sps:$4 sm:$0xff]  }
  0xa4   :  { %1568 = vmatprep.subr.bf16.mxu1 %v5624_v39  ;;  %1513 = vmatprep.mubr.bf16.mxu0 %v6624_v47  ;;  %v5714_v39 = vld [vmem:[#allocation3 + $0x204] ss:$48 sps:$4 sm:$0xff]  }
  0xa5   :  { %1586 = vmatprep.mubr.bf16.mxu1 %v6624_v47 }
  0xa6   :  { %1496 = vmatpush1.bf16.msra.mxu0 %v5619_v40  ;;  %v5717_v40 = vld [vmem:[#allocation3 + $0x20c] ss:$48 sps:$4 sm:$0xff]  }
  0xa7   :  { %1569 = vmatpush1.bf16.msra.mxu1 %v5622_v41  ;;  %1497 = vmatprep.subr.bf16.mxu0 %v5627_v42  ;;  %v5712_v41 = vld [vmem:[#allocation3 + $0x200] ss:$48 sps:$4 sm:$0xff]   ;;  %v5715_v42 = vld [vmem:[#allocation3 + $0x208] ss:$48 sps:$4 sm:$0xff]  }
  0xa8   :  { %1570 = vmatprep.subr.bf16.mxu1 %v5630_v43  ;;  %v5720_v43 = vld [vmem:[#allocation3 + $0x264] ss:$48 sps:$4 sm:$0xff]  }
  0xaa   :  { %1498 = vmatpush1.bf16.msra.mxu0 %v5625_v44  ;;  %v5723_v44 = vld [vmem:[#allocation3 + $0x26c] ss:$48 sps:$4 sm:$0xff]  }
  0xab   :  { %1571 = vmatpush1.bf16.msra.mxu1 %v5628_v45  ;;  %1499 = vmatprep.subr.bf16.mxu0 %v5633_v46  ;;  %v5718_v45 = vld [vmem:[#allocation3 + $0x260] ss:$48 sps:$4 sm:$0xff]   ;;  %v5721_v46 = vld [vmem:[#allocation3 + $0x268] ss:$48 sps:$4 sm:$0xff]  }
  0xac   :  { %1572 = vmatprep.subr.bf16.mxu1 %v5636_v48  ;;  %v5726_v48 = vld [vmem:[#allocation3 + $0x2c4] ss:$48 sps:$4 sm:$0xff]  }
  0xae   :  { %1500 = vmatpush1.bf16.msra.mxu0 %v5631_v49  ;;  %v5729_v49 = vld [vmem:[#allocation3 + $0x2cc] ss:$48 sps:$4 sm:$0xff]  }
  0xaf   :  { %1573 = vmatpush1.bf16.msra.mxu1 %v5634_v50  ;;  %1501 = vmatprep.subr.bf16.mxu0 %v5642_v51  ;;  %v5724_v50 = vld [vmem:[#allocation3 + $0x2c0] ss:$48 sps:$4 sm:$0xff]   ;;  %v5727_v51 = vld [vmem:[#allocation3 + $0x2c8] ss:$48 sps:$4 sm:$0xff]  }
  0xb0   :  { %1574 = vmatprep.subr.bf16.mxu1 %v5645_v52  ;;  %v5732_v52 = vld [vmem:[#allocation3 + $0x324] ss:$48 sps:$4 sm:$0xff]  }
  0xb2   :  { %1502 = vmatpush1.bf16.msra.mxu0 %v5640_v53  ;;  %v5735_v53 = vld [vmem:[#allocation3 + $0x32c] ss:$48 sps:$4 sm:$0xff]  }
  0xb3   :  { %1575 = vmatpush1.bf16.msra.mxu1 %v5643_v54  ;;  %1503 = vmatprep.subr.bf16.mxu0 %v5648_v55  ;;  %v5730_v54 = vld [vmem:[#allocation3 + $0x320] ss:$48 sps:$4 sm:$0xff]   ;;  %v5733_v55 = vld [vmem:[#allocation3 + $0x328] ss:$48 sps:$4 sm:$0xff]  }
  0xb4   :  { %1576 = vmatprep.subr.bf16.mxu1 %v5651_v56  ;;  %v5738_v56 = vld [vmem:[#allocation3 + $0x384] ss:$48 sps:$4 sm:$0xff]  }
  0xb6   :  { %1504 = vmatpush1.bf16.msra.mxu0 %v5646_v57  ;;  %v5741_v57 = vld [vmem:[#allocation3 + $0x38c] ss:$48 sps:$4 sm:$0xff]  }
  0xb7   :  { %1577 = vmatpush1.bf16.msra.mxu1 %v5649_v58  ;;  %1505 = vmatprep.subr.bf16.mxu0 %v5657_v59  ;;  %v5736_v58 = vld [vmem:[#allocation3 + $0x380] ss:$48 sps:$4 sm:$0xff]   ;;  %v5739_v59 = vld [vmem:[#allocation3 + $0x388] ss:$48 sps:$4 sm:$0xff]  }
  0xb8   :  { %1578 = vmatprep.subr.bf16.mxu1 %v5660_v60  ;;  %v5744_v60 = vld [vmem:[#allocation3 + $0x3e4] ss:$48 sps:$4 sm:$0xff]  }
  0xba   :  { %1506 = vmatpush1.bf16.msra.mxu0 %v5655_v61  ;;  %v5747_v61 = vld [vmem:[#allocation3 + $0x3ec] ss:$48 sps:$4 sm:$0xff]  }
  0xbb   :  { %1579 = vmatpush1.bf16.msra.mxu1 %v5658_v62  ;;  %1507 = vmatprep.subr.bf16.mxu0 %v5663_v63  ;;  %v5742_v62 = vld [vmem:[#allocation3 + $0x3e0] ss:$48 sps:$4 sm:$0xff]   ;;  %v5750_v63 = vld [vmem:[#allocation3 + $0x444] ss:$48 sps:$4 sm:$0xff]  }
  0xbc   :  { %1580 = vmatprep.subr.bf16.mxu1 %v5666_v1  ;;  %v5753_v1 = vld [vmem:[#allocation3 + $0x44c] ss:$48 sps:$4 sm:$0xff]  }
  0xbe   :  { %1508 = vmatpush1.bf16.msra.mxu0 %v5661_v2  ;;  %v5748_v2 = vld [vmem:[#allocation3 + $0x440] ss:$48 sps:$4 sm:$0xff]  }
  0xbf   :  { %1581 = vmatpush1.bf16.msra.mxu1 %v5664_v3  ;;  %1509 = vmatprep.subr.bf16.mxu0 %v5672_v4  ;;  %v5751_v3 = vld [vmem:[#allocation3 + $0x448] ss:$48 sps:$4 sm:$0xff]   ;;  %v5756_v4 = vld [vmem:[#allocation3 + $0x4a4] ss:$48 sps:$4 sm:$0xff]  }
  0xc0   :  { %1582 = vmatprep.subr.bf16.mxu1 %v5675_v6  ;;  %v5759_v6 = vld [vmem:[#allocation3 + $0x4ac] ss:$48 sps:$4 sm:$0xff]  }
  0xc2   :  { %1510 = vmatpush1.bf16.msra.mxu0 %v5670_v7  ;;  %v5754_v7 = vld [vmem:[#allocation3 + $0x4a0] ss:$48 sps:$4 sm:$0xff]  }
  0xc3   :  { %1583 = vmatpush1.bf16.msra.mxu1 %v5673_v8  ;;  %1511 = vmatprep.subr.bf16.mxu0 %v5678_v9  ;;  %v5757_v8 = vld [vmem:[#allocation3 + $0x4a8] ss:$48 sps:$4 sm:$0xff]   ;;  %v5762_v9 = vld [vmem:[#allocation3 + $0x504] ss:$48 sps:$4 sm:$0xff]  }
  0xc4   :  { %1584 = vmatprep.subr.bf16.mxu1 %v5681_v10  ;;  %v5765_v10 = vld [vmem:[#allocation3 + $0x50c] ss:$48 sps:$4 sm:$0xff]  }
  0xc6   :  { %1512 = vmatpush1.bf16.msra.mxu0 %v5676_v11  ;;  %v5760_v11 = vld [vmem:[#allocation3 + $0x500] ss:$48 sps:$4 sm:$0xff]  }
  0xc7   :  { %1585 = vmatpush1.bf16.msra.mxu1 %v5679_v12  ;;  %1627 = vmatprep.subr.bf16.mxu0 %v5684_v13  ;;  %v5763_v12 = vld [vmem:[#allocation3 + $0x508] ss:$48 sps:$4 sm:$0xff]   ;;  %v5768_v13 = vld [vmem:[#allocation3 + $0x564] ss:$48 sps:$4 sm:$0xff]  }
  0xc8   :  { %1700 = vmatprep.subr.bf16.mxu1 %v5687_v14  ;;  %v5771_v14 = vld [vmem:[#allocation3 + $0x56c] ss:$48 sps:$4 sm:$0xff]  }
  0xc9   :  { %1514 = vmatmul.mubr.bf16.vlgmr.msra.gmra.mrb[16].mxu0 %v6631_v5 }
  0xca   :  { %1587 = vmatmul.mubr.bf16.vlgmr.msra.gmra.mrb[16].mxu1 %v6631_v5  ;;  %1628 = vmatpush1.bf16.msra.mxu0 %v5682_v17  ;;  %v5766_v17 = vld [vmem:[#allocation3 + $0x560] ss:$48 sps:$4 sm:$0xff]  }
  0xcb   :  { %1701 = vmatpush1.bf16.msra.mxu1 %v5685_v18  ;;  %1629 = vmatprep.subr.bf16.mxu0 %v5690_v19  ;;  %v5769_v18 = vld [vmem:[#allocation3 + $0x568] ss:$48 sps:$4 sm:$0xff]   ;;  %v5774_v19 = vld [vmem:[#allocation3 + $0x5c4] ss:$48 sps:$4 sm:$0xff]  }
  0xcc   :  { %1702 = vmatprep.subr.bf16.mxu1 %v5693_v20  ;;  %1523 = vmatprep.mubr.bf16.mxu0 %v6638_v15  ;;  %v5777_v20 = vld [vmem:[#allocation3 + $0x5cc] ss:$48 sps:$4 sm:$0xff]  }
  0xcd   :  { %1596 = vmatprep.mubr.bf16.mxu1 %v6638_v15 }
  0xce   :  { %1630 = vmatpush1.bf16.msra.mxu0 %v5688_v21  ;;  %v5772_v21 = vld [vmem:[#allocation3 + $0x5c0] ss:$48 sps:$4 sm:$0xff]  }
  0xcf   :  { %1703 = vmatpush1.bf16.msra.mxu1 %v5691_v22  ;;  %1631 = vmatprep.subr.bf16.mxu0 %v5696_v23  ;;  %v5775_v22 = vld [vmem:[#allocation3 + $0x5c8] ss:$48 sps:$4 sm:$0xff]   ;;  %v6714_v23 = vld [vmem:[#allocation5] sm:$0xff] }
  0xd0   :  { %1704 = vmatprep.subr.bf16.mxu1 %v5699_v26 }
  0xd1   :  { %1524 = vmatmul.mubr.bf16.gmra.mrb[20].mxu0 %v6643_v16 }
  0xd2   :  { %1632 = vmatpush1.bf16.msra.mxu0 %v5694_v27  ;;  %1597 = vmatmul.mubr.bf16.gmra.mrb[20].mxu1 %v6643_v16 }
  0xd3   :  { %1705 = vmatpush1.bf16.msra.mxu1 %v5697_v28  ;;  %1633 = vmatprep.subr.bf16.mxu0 %v5702_v29 }
  0xd4   :  { %1706 = vmatprep.subr.bf16.mxu1 %v5705_v30  ;;  %1533 = vmatprep.mubr.bf16.mxu0 %v6652_v24 }
  0xd5   :  { %1606 = vmatprep.mubr.bf16.mxu1 %v6652_v24 }
  0xd6   :  { %1634 = vmatpush1.bf16.msra.mxu0 %v5700_v31 }
  0xd7   :  { %1707 = vmatpush1.bf16.msra.mxu1 %v5703_v32  ;;  %1635 = vmatprep.subr.bf16.mxu0 %v5708_v34 }
  0xd8   :  { %1708 = vmatprep.subr.bf16.mxu1 %v5711_v36 }
  0xd9   :  { %1534 = vmatmul.mubr.bf16.gmra.mrb[24].mxu0 %v6657_v25 }
  0xda   :  { %1636 = vmatpush1.bf16.msra.mxu0 %v5706_v37  ;;  %1607 = vmatmul.mubr.bf16.gmra.mrb[24].mxu1 %v6657_v25 }
  0xdb   :  { %1709 = vmatpush1.bf16.msra.mxu1 %v5709_v38  ;;  %1637 = vmatprep.subr.bf16.mxu0 %v5714_v39 }
  0xdc   :  { %1710 = vmatprep.subr.bf16.mxu1 %v5717_v40  ;;  %1543 = vmatprep.mubr.bf16.mxu0 %v6666_v33 }
  0xdd   :  { %1616 = vmatprep.mubr.bf16.mxu1 %v6666_v33 }
  0xde   :  { %1638 = vmatpush1.bf16.msra.mxu0 %v5712_v41 }
  0xdf   :  { %1711 = vmatpush1.bf16.msra.mxu1 %v5715_v42  ;;  %1639 = vmatprep.subr.bf16.mxu0 %v5720_v43 }
  0xe0   :  { %1712 = vmatprep.subr.bf16.mxu1 %v5723_v44 }
  0xe1   :  { %1544 = vmatmul.mubr.bf16.gmra.mrb[28].mxu0 %v6673_v35 }
  0xe2   :  { %1640 = vmatpush1.bf16.msra.mxu0 %v5718_v45  ;;  %1617 = vmatmul.mubr.bf16.gmra.mrb[28].mxu1 %v6673_v35 }
  0xe3   :  { %1713 = vmatpush1.bf16.msra.mxu1 %v5721_v46  ;;  %1641 = vmatprep.subr.bf16.mxu0 %v5726_v48 }
  0xe4   :  { %1714 = vmatprep.subr.bf16.mxu1 %v5729_v49  ;;  %1659 = vmatprep.mubr.bf16.mxu0 %v6624_v47 }
  0xe5   :  { %1732 = vmatprep.mubr.bf16.mxu1 %v6624_v47  ;;  %v5745_v47 = vld [vmem:[#allocation3 + $0x3e8] ss:$48 sps:$4 sm:$0xff]  }
  0xe6   :  { %1642 = vmatpush1.bf16.msra.mxu0 %v5724_v50 }
  0xe7   :  { %1715 = vmatpush1.bf16.msra.mxu1 %v5727_v51  ;;  %1643 = vmatprep.subr.bf16.mxu0 %v5732_v52 }
  0xe8   :  { %1716 = vmatprep.subr.bf16.mxu1 %v5735_v53 }
  0xea   :  { %1644 = vmatpush1.bf16.msra.mxu0 %v5730_v54 }
  0xeb   :  { %1717 = vmatpush1.bf16.msra.mxu1 %v5733_v55  ;;  %1645 = vmatprep.subr.bf16.mxu0 %v5738_v56 }
  0xec   :  { %1718 = vmatprep.subr.bf16.mxu1 %v5741_v57 }
  0xee   :  { %1646 = vmatpush1.bf16.msra.mxu0 %v5736_v58 }
  0xef   :  { %1719 = vmatpush1.bf16.msra.mxu1 %v5739_v59  ;;  %1647 = vmatprep.subr.bf16.mxu0 %v5744_v60 }
  0xf0   :  { %1720 = vmatprep.subr.bf16.mxu1 %v5747_v61 }
  0xf2   :  { %1648 = vmatpush1.bf16.msra.mxu0 %v5742_v62 }
  0xf3   :  { %1721 = vmatpush1.bf16.msra.mxu1 %v5745_v47  ;;  %1649 = vmatprep.subr.bf16.mxu0 %v5750_v63 }
  0xf4   :  { %1722 = vmatprep.subr.bf16.mxu1 %v5753_v1 }
  0xf6   :  { %1650 = vmatpush1.bf16.msra.mxu0 %v5748_v2 }
  0xf7   :  { %1723 = vmatpush1.bf16.msra.mxu1 %v5751_v3  ;;  %1651 = vmatprep.subr.bf16.mxu0 %v5756_v4 }
  0xf8   :  { %1724 = vmatprep.subr.bf16.mxu1 %v5759_v6 }
  0xfa   :  { %1652 = vmatpush1.bf16.msra.mxu0 %v5754_v7 }
  0xfb   :  { %1725 = vmatpush1.bf16.msra.mxu1 %v5757_v8  ;;  %1653 = vmatprep.subr.bf16.mxu0 %v5762_v9 }
  0xfc   :  { %1726 = vmatprep.subr.bf16.mxu1 %v5765_v10 }
  0xfe   :  { %1654 = vmatpush1.bf16.msra.mxu0 %v5760_v11 }
  0xff   :  { %1727 = vmatpush1.bf16.msra.mxu1 %v5763_v12  ;;  %1655 = vmatprep.subr.bf16.mxu0 %v5768_v13 }
 0x100   :  { %1728 = vmatprep.subr.bf16.mxu1 %v5771_v14 }
 0x102   :  { %1656 = vmatpush1.bf16.msra.mxu0 %v5766_v17 }
 0x103   :  { %1729 = vmatpush1.bf16.msra.mxu1 %v5769_v18  ;;  %1657 = vmatprep.subr.bf16.mxu0 %v5774_v19 }
 0x104   :  { %1730 = vmatprep.subr.bf16.mxu1 %v5777_v20 }
 0x106   :  { %1658 = vmatpush1.bf16.msra.mxu0 %v5772_v21 }
 0x107   :  { %1731 = vmatpush1.bf16.msra.mxu1 %v5775_v22 }
 0x109   :  { %1660 = vmatmul.mubr.bf16.vlgmr.msra.gmra.mrb[32].mxu0 %v6631_v5 }
 0x10a   :  { %1733 = vmatmul.mubr.bf16.vlgmr.msra.gmra.mrb[32].mxu1 %v6631_v5  ;;  %1669 = vmatprep.mubr.bf16.mxu0 %v6638_v15  ;;  %v275_v5 = vlaneseq }
 0x10b   :  { %1742 = vmatprep.mubr.bf16.mxu1 %v6638_v15 }
 0x10c   :  { %v6709_v15 = vshrl.u32 %v275_v5, 7 }
 0x111   :  { %1670 = vmatmul.mubr.bf16.gmra.mrb[36].mxu0 %v6643_v16 }
 0x112   :  { %1743 = vmatmul.mubr.bf16.gmra.mrb[36].mxu1 %v6643_v16  ;;  %1679 = vmatprep.mubr.bf16.mxu0 %v6652_v24  ;;  %v6712_v16 = vsub.s32 0, %v6709_v15 }
 0x113   :  { %1752 = vmatprep.mubr.bf16.mxu1 %v6652_v24  ;;  %v6717_v24 = vsub.s32 2, %v6709_v15 }
 0x115   :  { %v6731_v26 = vrot.slane %v6714_v23, %v6717_v24 }
 0x119   :  { %1680 = vmatmul.mubr.bf16.gmra.mrb[40].mxu0 %v6657_v25 }
 0x11a   :  { %1753 = vmatmul.mubr.bf16.gmra.mrb[40].mxu1 %v6657_v25  ;;  %1689 = vmatprep.mubr.bf16.mxu0 %v6666_v33  ;;  %v6720_v25 = vsub.s32 1, %v6709_v15 }
 0x11b   :  { %1762 = vmatprep.mubr.bf16.mxu1 %v6666_v33  ;;  %v6723_v33 = vsub.s32 3, %v6709_v15 }
 0x11c   :  { %v6735_v27 = vrot.slane %v6714_v23, %v6720_v25 }
 0x11d   :  { %v6739_v28 = vrot.slane %v6714_v23, %v6723_v33 }
 0x121   :  { %1690 = vmatmul.mubr.bf16.gmra.mrb[44].mxu0 %v6673_v35 }
 0x122   :  { %1763 = vmatmul.mubr.bf16.gmra.mrb[44].mxu1 %v6673_v35  ;;  %v6727_v35 = vrot.slane %v6714_v23, %v6712_v16 }
 0x15c   :  { %v1369_v29 = vpop.f32.mrb[0].mxu0 }
 0x15d   :  { %v1370_v30 = vadd.f32 %v1369_v29, %v6727_v35  ;;  %v1442_v31 = vpop.f32.mrb[0].mxu1  ;;  %v1371_v32 = vpop.f32.mrb[1].mxu0 }
 0x15e   :  { %v1443_v34 = vadd.f32 %v1442_v31, %v6731_v26  ;;  %v1372_v36 = vadd.f32 %v1371_v32, %v6735_v27  ;;  %v1444_v37 = vpop.f32.mrb[1].mxu1  ;;  %v1373_v38 = vpop.f32.mrb[2].mxu0 }
 0x15f   :  { %1773 = vst [vmem:[#allocation2] sm:$0xff] %v1370_v30  ;;  %v1445_v39 = vadd.f32 %v1444_v37, %v6739_v28  ;;  %v1374_v40 = vadd.f32 %v1373_v38, %v6727_v35  ;;  %v1446_v41 = vpop.f32.mrb[2].mxu1  ;;  %v1375_v42 = vpop.f32.mrb[3].mxu0 }
 0x160   :  { %1775 = vst [vmem:[#allocation2 + $0x10] sm:$0xff] %v1443_v34  ;;  %1774 = vst [vmem:[#allocation2 + $0x8] sm:$0xff] %v1372_v36  ;;  %v1447_v43 = vadd.f32 %v1446_v41, %v6731_v26  ;;  %v1376_v44 = vadd.f32 %v1375_v42, %v6735_v27  ;;  %v1448_v45 = vpop.f32.mrb[3].mxu1  ;;  %v293_v42 = vsub.s32 4, %v6709_v15 }
 0x161   :  { %1776 = vst [vmem:[#allocation2 + $0x18] sm:$0xff] %v1445_v39  ;;  %1785 = vst [vmem:[#allocation2 + $0x60] sm:$0xff] %v1374_v40  ;;  %v1449_v46 = vadd.f32 %v1448_v45, %v6739_v28 }
 0x162   :  { %1787 = vst [vmem:[#allocation2 + $0x70] sm:$0xff] %v1447_v43  ;;  %1786 = vst [vmem:[#allocation2 + $0x68] sm:$0xff] %v1376_v44  ;;  %v297_v43 = vsub.s32 5, %v6709_v15  ;;  %v305_v44 = vsub.s32 7, %v6709_v15 }
 0x163   :  { %1788 = vst [vmem:[#allocation2 + $0x78] sm:$0xff] %v1449_v46 }
 0x164   :  { %v1379_v48 = vpop.f32.mrb[4].mxu0  ;;  %v6784_v45 = vrot.slane %v6714_v23, %v297_v43 }
 0x165   :  { %v1380_v49 = vadd.f32 %v1379_v48, %v6727_v35  ;;  %v1452_v50 = vpop.f32.mrb[4].mxu1  ;;  %v1381_v51 = vpop.f32.mrb[5].mxu0 }
 0x166   :  { %v1453_v52 = vadd.f32 %v1452_v50, %v6731_v26  ;;  %v1382_v53 = vadd.f32 %v1381_v51, %v6735_v27  ;;  %v1454_v54 = vpop.f32.mrb[5].mxu1  ;;  %v1383_v55 = vpop.f32.mrb[6].mxu0 }
 0x167   :  { %1797 = vst [vmem:[#allocation2 + $0xc0] sm:$0xff] %v1380_v49  ;;  %v1455_v56 = vadd.f32 %v1454_v54, %v6739_v28  ;;  %v1384_v57 = vadd.f32 %v1383_v55, %v6727_v35  ;;  %v1456_v58 = vpop.f32.mrb[6].mxu1  ;;  %v1385_v59 = vpop.f32.mrb[7].mxu0 }
 0x168   :  { %1799 = vst [vmem:[#allocation2 + $0xd0] sm:$0xff] %v1453_v52  ;;  %1798 = vst [vmem:[#allocation2 + $0xc8] sm:$0xff] %v1382_v53  ;;  %v1457_v60 = vadd.f32 %v1456_v58, %v6731_v26  ;;  %v1386_v61 = vadd.f32 %v1385_v59, %v6735_v27  ;;  %v1458_v62 = vpop.f32.mrb[7].mxu1 }
 0x169   :  { %1800 = vst [vmem:[#allocation2 + $0xd8] sm:$0xff] %v1455_v56  ;;  %1809 = vst [vmem:[#allocation2 + $0x120] sm:$0xff] %v1384_v57  ;;  %v1459_v47 = vadd.f32 %v1458_v62, %v6739_v28 }
 0x16a   :  { %1811 = vst [vmem:[#allocation2 + $0x130] sm:$0xff] %v1457_v60  ;;  %1810 = vst [vmem:[#allocation2 + $0x128] sm:$0xff] %v1386_v61 }
 0x16b   :  { %1812 = vst [vmem:[#allocation2 + $0x138] sm:$0xff] %v1459_v47 }
 0x16c   :  { %v1389_v63 = vpop.f32.mrb[8].mxu0 }
 0x16d   :  { %v1390_v1 = vadd.f32 %v1389_v63, %v6727_v35  ;;  %v1462_v2 = vpop.f32.mrb[8].mxu1  ;;  %v1391_v3 = vpop.f32.mrb[9].mxu0 }
 0x16e   :  { %v1463_v4 = vadd.f32 %v1462_v2, %v6731_v26  ;;  %v1392_v6 = vadd.f32 %v1391_v3, %v6735_v27  ;;  %v1464_v7 = vpop.f32.mrb[9].mxu1  ;;  %v1393_v8 = vpop.f32.mrb[10].mxu0 }
 0x16f   :  { %1821 = vst [vmem:[#allocation2 + $0x180] sm:$0xff] %v1390_v1  ;;  %v1465_v9 = vadd.f32 %v1464_v7, %v6739_v28  ;;  %v1394_v10 = vadd.f32 %v1393_v8, %v6727_v35  ;;  %v1466_v11 = vpop.f32.mrb[10].mxu1  ;;  %v1395_v12 = vpop.f32.mrb[11].mxu0 }
 0x170   :  { %1823 = vst [vmem:[#allocation2 + $0x190] sm:$0xff] %v1463_v4  ;;  %1822 = vst [vmem:[#allocation2 + $0x188] sm:$0xff] %v1392_v6  ;;  %v1467_v13 = vadd.f32 %v1466_v11, %v6731_v26  ;;  %v1396_v14 = vadd.f32 %v1395_v12, %v6735_v27  ;;  %v1468_v17 = vpop.f32.mrb[11].mxu1 }
 0x171   :  { %1824 = vst [vmem:[#allocation2 + $0x198] sm:$0xff] %v1465_v9  ;;  %1833 = vst [vmem:[#allocation2 + $0x1e0] sm:$0xff] %v1394_v10  ;;  %v1469_v18 = vadd.f32 %v1468_v17, %v6739_v28 }
 0x172   :  { %1835 = vst [vmem:[#allocation2 + $0x1f0] sm:$0xff] %v1467_v13  ;;  %1834 = vst [vmem:[#allocation2 + $0x1e8] sm:$0xff] %v1396_v14 }
 0x173   :  { %1836 = vst [vmem:[#allocation2 + $0x1f8] sm:$0xff] %v1469_v18 }
 0x174   :  { %v1399_v19 = vpop.f32.mrb[12].mxu0 }
 0x175   :  { %v1400_v20 = vadd.f32 %v1399_v19, %v6727_v35  ;;  %v1472_v21 = vpop.f32.mrb[12].mxu1  ;;  %v1401_v22 = vpop.f32.mrb[13].mxu0 }
 0x176   :  { %v1473_v5 = vadd.f32 %v1472_v21, %v6731_v26  ;;  %v1402_v29 = vadd.f32 %v1401_v22, %v6735_v27  ;;  %v1474_v30 = vpop.f32.mrb[13].mxu1  ;;  %v1403_v31 = vpop.f32.mrb[14].mxu0 }
 0x177   :  { %1845 = vst [vmem:[#allocation2 + $0x240] sm:$0xff] %v1400_v20  ;;  %v1475_v32 = vadd.f32 %v1474_v30, %v6739_v28  ;;  %v1404_v34 = vadd.f32 %v1403_v31, %v6727_v35  ;;  %v1476_v36 = vpop.f32.mrb[14].mxu1  ;;  %v1405_v37 = vpop.f32.mrb[15].mxu0  ;;  %v301_v35 = vsub.s32 6, %v6709_v15 }
 0x178   :  { %1847 = vst [vmem:[#allocation2 + $0x250] sm:$0xff] %v1473_v5  ;;  %1846 = vst [vmem:[#allocation2 + $0x248] sm:$0xff] %v1402_v29  ;;  %v1477_v38 = vadd.f32 %v1476_v36, %v6731_v26  ;;  %v1406_v39 = vadd.f32 %v1405_v37, %v6735_v27  ;;  %v1478_v40 = vpop.f32.mrb[15].mxu1  ;;  %v6778_v26 = vrot.slane %v6714_v23, %v293_v42 }
 0x179   :  { %1848 = vst [vmem:[#allocation2 + $0x258] sm:$0xff] %v1475_v32  ;;  %1857 = vst [vmem:[#allocation2 + $0x2a0] sm:$0xff] %v1404_v34  ;;  %v1479_v41 = vadd.f32 %v1478_v40, %v6739_v28  ;;  %v6781_v27 = vrot.slane %v6714_v23, %v301_v35  ;;  %v6787_v28 = vrot.slane %v6714_v23, %v305_v44 }
 0x17a   :  { %1859 = vst [vmem:[#allocation2 + $0x2b0] sm:$0xff] %v1477_v38  ;;  %1858 = vst [vmem:[#allocation2 + $0x2a8] sm:$0xff] %v1406_v39 }
 0x17b   :  { %1860 = vst [vmem:[#allocation2 + $0x2b8] sm:$0xff] %v1479_v41 }
 0x19c   :  { %v1515_v46 = vpop.f32.mrb[16].mxu0 }
 0x19d   :  { %v1516_v48 = vadd.f32 %v1515_v46, %v6778_v26  ;;  %v1588_v49 = vpop.f32.mrb[16].mxu1  ;;  %v1517_v50 = vpop.f32.mrb[17].mxu0 }
 0x19e   :  { %v1589_v51 = vadd.f32 %v1588_v49, %v6781_v27  ;;  %v1518_v15 = vadd.f32 %v1517_v50, %v6784_v45  ;;  %v1590_v52 = vpop.f32.mrb[17].mxu1  ;;  %v1519_v53 = vpop.f32.mrb[18].mxu0 }
 0x19f   :  { %1777 = vst [vmem:[#allocation2 + $0x20] sm:$0xff] %v1516_v48  ;;  %v1591_v54 = vadd.f32 %v1590_v52, %v6787_v28  ;;  %v1520_v55 = vadd.f32 %v1519_v53, %v6778_v26  ;;  %v1592_v56 = vpop.f32.mrb[18].mxu1  ;;  %v1521_v57 = vpop.f32.mrb[19].mxu0 }
 0x1a0   :  { %1779 = vst [vmem:[#allocation2 + $0x30] sm:$0xff] %v1589_v51  ;;  %1778 = vst [vmem:[#allocation2 + $0x28] sm:$0xff] %v1518_v15  ;;  %v1593_v23 = vadd.f32 %v1592_v56, %v6781_v27  ;;  %v1522_v58 = vadd.f32 %v1521_v57, %v6784_v45  ;;  %v1594_v59 = vpop.f32.mrb[19].mxu1 }
 0x1a1   :  { %1780 = vst [vmem:[#allocation2 + $0x38] sm:$0xff] %v1591_v54  ;;  %1789 = vst [vmem:[#allocation2 + $0x80] sm:$0xff] %v1520_v55  ;;  %v1595_v60 = vadd.f32 %v1594_v59, %v6787_v28  ;;  %v272_v55 = vld [vmem:[#allocation5 + $0x8] sm:$0xf] }
 0x1a2   :  { %1791 = vst [vmem:[#allocation2 + $0x90] sm:$0xff] %v1593_v23  ;;  %1790 = vst [vmem:[#allocation2 + $0x88] sm:$0xff] %v1522_v58  ;;  %v6822_v56 = vrot.slane %v272_v55, %v6712_v16  ;;  %v6828_v57 = vrot.slane %v272_v55, %v6720_v25 }
 0x1a3   :  { %1792 = vst [vmem:[#allocation2 + $0x98] sm:$0xff] %v1595_v60 }
 0x1a4   :  { %v1525_v61 = vpop.f32.mrb[20].mxu0 }
 0x1a5   :  { %v1526_v62 = vadd.f32 %v1525_v61, %v6778_v26  ;;  %v1598_v47 = vpop.f32.mrb[20].mxu1  ;;  %v1527_v63 = vpop.f32.mrb[21].mxu0 }
 0x1a6   :  { %v1599_v1 = vadd.f32 %v1598_v47, %v6781_v27  ;;  %v1528_v2 = vadd.f32 %v1527_v63, %v6784_v45  ;;  %v1600_v3 = vpop.f32.mrb[21].mxu1  ;;  %v1529_v4 = vpop.f32.mrb[22].mxu0 }
 0x1a7   :  { %1801 = vst [vmem:[#allocation2 + $0xe0] sm:$0xff] %v1526_v62  ;;  %v1601_v6 = vadd.f32 %v1600_v3, %v6787_v28  ;;  %v1530_v7 = vadd.f32 %v1529_v4, %v6778_v26  ;;  %v1602_v8 = vpop.f32.mrb[22].mxu1  ;;  %v1531_v9 = vpop.f32.mrb[23].mxu0 }
 0x1a8   :  { %1803 = vst [vmem:[#allocation2 + $0xf0] sm:$0xff] %v1599_v1  ;;  %1802 = vst [vmem:[#allocation2 + $0xe8] sm:$0xff] %v1528_v2  ;;  %v1603_v10 = vadd.f32 %v1602_v8, %v6781_v27  ;;  %v1532_v11 = vadd.f32 %v1531_v9, %v6784_v45  ;;  %v1604_v12 = vpop.f32.mrb[23].mxu1 }
 0x1a9   :  { %1804 = vst [vmem:[#allocation2 + $0xf8] sm:$0xff] %v1601_v6  ;;  %1813 = vst [vmem:[#allocation2 + $0x140] sm:$0xff] %v1530_v7  ;;  %v1605_v13 = vadd.f32 %v1604_v12, %v6787_v28 }
 0x1aa   :  { %1815 = vst [vmem:[#allocation2 + $0x150] sm:$0xff] %v1603_v10  ;;  %1814 = vst [vmem:[#allocation2 + $0x148] sm:$0xff] %v1532_v11 }
 0x1ab   :  { %1816 = vst [vmem:[#allocation2 + $0x158] sm:$0xff] %v1605_v13 }
 0x1ac   :  { %v1535_v14 = vpop.f32.mrb[24].mxu0 }
 0x1ad   :  { %v1536_v17 = vadd.f32 %v1535_v14, %v6778_v26  ;;  %v1608_v18 = vpop.f32.mrb[24].mxu1  ;;  %v1537_v19 = vpop.f32.mrb[25].mxu0 }
 0x1ae   :  { %v1609_v20 = vadd.f32 %v1608_v18, %v6781_v27  ;;  %v1538_v21 = vadd.f32 %v1537_v19, %v6784_v45  ;;  %v1610_v22 = vpop.f32.mrb[25].mxu1  ;;  %v1539_v5 = vpop.f32.mrb[26].mxu0 }
 0x1af   :  { %1825 = vst [vmem:[#allocation2 + $0x1a0] sm:$0xff] %v1536_v17  ;;  %v1611_v29 = vadd.f32 %v1610_v22, %v6787_v28  ;;  %v1540_v30 = vadd.f32 %v1539_v5, %v6778_v26  ;;  %v1612_v31 = vpop.f32.mrb[26].mxu1  ;;  %v1541_v32 = vpop.f32.mrb[27].mxu0 }
 0x1b0   :  { %1827 = vst [vmem:[#allocation2 + $0x1b0] sm:$0xff] %v1609_v20  ;;  %1826 = vst [vmem:[#allocation2 + $0x1a8] sm:$0xff] %v1538_v21  ;;  %v1613_v34 = vadd.f32 %v1612_v31, %v6781_v27  ;;  %v1542_v36 = vadd.f32 %v1541_v32, %v6784_v45  ;;  %v1614_v37 = vpop.f32.mrb[27].mxu1 }
 0x1b1   :  { %1828 = vst [vmem:[#allocation2 + $0x1b8] sm:$0xff] %v1611_v29  ;;  %1837 = vst [vmem:[#allocation2 + $0x200] sm:$0xff] %v1540_v30  ;;  %v1615_v38 = vadd.f32 %v1614_v37, %v6787_v28 }
 0x1b2   :  { %1839 = vst [vmem:[#allocation2 + $0x210] sm:$0xff] %v1613_v34  ;;  %1838 = vst [vmem:[#allocation2 + $0x208] sm:$0xff] %v1542_v36 }
 0x1b3   :  { %1840 = vst [vmem:[#allocation2 + $0x218] sm:$0xff] %v1615_v38 }
 0x1b4   :  { %v1545_v39 = vpop.f32.mrb[28].mxu0 }
 0x1b5   :  { %v1546_v40 = vadd.f32 %v1545_v39, %v6778_v26  ;;  %v1618_v41 = vpop.f32.mrb[28].mxu1  ;;  %v1547_v42 = vpop.f32.mrb[29].mxu0 }
 0x1b6   :  { %v1619_v35 = vadd.f32 %v1618_v41, %v6781_v27  ;;  %v1548_v43 = vadd.f32 %v1547_v42, %v6784_v45  ;;  %v1620_v44 = vpop.f32.mrb[29].mxu1  ;;  %v1549_v46 = vpop.f32.mrb[30].mxu0 }
 0x1b7   :  { %1849 = vst [vmem:[#allocation2 + $0x260] sm:$0xff] %v1546_v40  ;;  %v1621_v48 = vadd.f32 %v1620_v44, %v6787_v28  ;;  %v1550_v49 = vadd.f32 %v1549_v46, %v6778_v26  ;;  %v1622_v50 = vpop.f32.mrb[30].mxu1  ;;  %v1551_v51 = vpop.f32.mrb[31].mxu0  ;;  %v6825_v26 = vrot.slane %v272_v55, %v6717_v24 }
 0x1b8   :  { %1851 = vst [vmem:[#allocation2 + $0x270] sm:$0xff] %v1619_v35  ;;  %1850 = vst [vmem:[#allocation2 + $0x268] sm:$0xff] %v1548_v43  ;;  %v1623_v15 = vadd.f32 %v1622_v50, %v6781_v27  ;;  %v1552_v52 = vadd.f32 %v1551_v51, %v6784_v45  ;;  %v1624_v53 = vpop.f32.mrb[31].mxu1  ;;  %v6831_v27 = vrot.slane %v272_v55, %v6723_v33 }
 0x1b9   :  { %1852 = vst [vmem:[#allocation2 + $0x278] sm:$0xff] %v1621_v48  ;;  %1861 = vst [vmem:[#allocation2 + $0x2c0] sm:$0xff] %v1550_v49  ;;  %v1625_v54 = vadd.f32 %v1624_v53, %v6787_v28 }
 0x1ba   :  { %1863 = vst [vmem:[#allocation2 + $0x2d0] sm:$0xff] %v1623_v15  ;;  %1862 = vst [vmem:[#allocation2 + $0x2c8] sm:$0xff] %v1552_v52 }
 0x1bb   :  { %1864 = vst [vmem:[#allocation2 + $0x2d8] sm:$0xff] %v1625_v54 }
 0x1dc   :  { %v1661_v45 = vpop.f32.mrb[32].mxu0 }
 0x1dd   :  { %v1662_v23 = vadd.f32 %v1661_v45, %v6822_v56  ;;  %v1734_v28 = vpop.f32.mrb[32].mxu1  ;;  %v1663_v58 = vpop.f32.mrb[33].mxu0 }
 0x1de   :  { %v1735_v59 = vadd.f32 %v1734_v28, %v6825_v26  ;;  %v1664_v60 = vadd.f32 %v1663_v58, %v6828_v57  ;;  %v1736_v61 = vpop.f32.mrb[33].mxu1  ;;  %v1665_v62 = vpop.f32.mrb[34].mxu0 }
 0x1df   :  { %1781 = vst [vmem:[#allocation2 + $0x40] sm:$0xff] %v1662_v23  ;;  %v1737_v47 = vadd.f32 %v1736_v61, %v6831_v27  ;;  %v1666_v63 = vadd.f32 %v1665_v62, %v6822_v56  ;;  %v1738_v1 = vpop.f32.mrb[34].mxu1  ;;  %v1667_v2 = vpop.f32.mrb[35].mxu0 }
 0x1e0   :  { %1783 = vst [vmem:[#allocation2 + $0x50] sm:$0xff] %v1735_v59  ;;  %1782 = vst [vmem:[#allocation2 + $0x48] sm:$0xff] %v1664_v60  ;;  %v1739_v3 = vadd.f32 %v1738_v1, %v6825_v26  ;;  %v1668_v4 = vadd.f32 %v1667_v2, %v6828_v57  ;;  %v1740_v6 = vpop.f32.mrb[35].mxu1  ;;  %v6867_v1 = vmov 0.0   ;;  %v6871_v2 = vmov 0.0  }
 0x1e1   :  { %1784 = vst [vmem:[#allocation2 + $0x58] sm:$0xff] %v1737_v47  ;;  %1793 = vst [vmem:[#allocation2 + $0xa0] sm:$0xff] %v1666_v63  ;;  %v1741_v7 = vadd.f32 %v1740_v6, %v6831_v27  ;;  %v6865_v63 = vmov 0.0  }
 0x1e2   :  { %1795 = vst [vmem:[#allocation2 + $0xb0] sm:$0xff] %v1739_v3  ;;  %1794 = vst [vmem:[#allocation2 + $0xa8] sm:$0xff] %v1668_v4 }
 0x1e3   :  { %1796 = vst [vmem:[#allocation2 + $0xb8] sm:$0xff] %v1741_v7 }
 0x1e4   :  { %v1671_v8 = vpop.f32.mrb[36].mxu0 }
 0x1e5   :  { %v1672_v9 = vadd.f32 %v1671_v8, %v6822_v56  ;;  %v1744_v10 = vpop.f32.mrb[36].mxu1  ;;  %v1673_v11 = vpop.f32.mrb[37].mxu0 }
 0x1e6   :  { %v1745_v12 = vadd.f32 %v1744_v10, %v6825_v26  ;;  %v1674_v13 = vadd.f32 %v1673_v11, %v6828_v57  ;;  %v1746_v14 = vpop.f32.mrb[37].mxu1  ;;  %v1675_v17 = vpop.f32.mrb[38].mxu0 }
 0x1e7   :  { %1805 = vst [vmem:[#allocation2 + $0x100] sm:$0xff] %v1672_v9  ;;  %v1747_v18 = vadd.f32 %v1746_v14, %v6831_v27  ;;  %v1676_v19 = vadd.f32 %v1675_v17, %v6822_v56  ;;  %v1748_v20 = vpop.f32.mrb[38].mxu1  ;;  %v1677_v21 = vpop.f32.mrb[39].mxu0 }
 0x1e8   :  { %1807 = vst [vmem:[#allocation2 + $0x110] sm:$0xff] %v1745_v12  ;;  %1806 = vst [vmem:[#allocation2 + $0x108] sm:$0xff] %v1674_v13  ;;  %v1749_v22 = vadd.f32 %v1748_v20, %v6825_v26  ;;  %v1678_v5 = vadd.f32 %v1677_v21, %v6828_v57  ;;  %v1750_v29 = vpop.f32.mrb[39].mxu1 }
 0x1e9   :  { %1808 = vst [vmem:[#allocation2 + $0x118] sm:$0xff] %v1747_v18  ;;  %1817 = vst [vmem:[#allocation2 + $0x160] sm:$0xff] %v1676_v19  ;;  %v1751_v30 = vadd.f32 %v1750_v29, %v6831_v27 }
 0x1ea   :  { %1819 = vst [vmem:[#allocation2 + $0x170] sm:$0xff] %v1749_v22  ;;  %1818 = vst [vmem:[#allocation2 + $0x168] sm:$0xff] %v1678_v5 }
 0x1eb   :  { %1820 = vst [vmem:[#allocation2 + $0x178] sm:$0xff] %v1751_v30 }
 0x1ec   :  { %v1681_v31 = vpop.f32.mrb[40].mxu0 }
 0x1ed   :  { %v1682_v32 = vadd.f32 %v1681_v31, %v6822_v56  ;;  %v1754_v34 = vpop.f32.mrb[40].mxu1  ;;  %v1683_v36 = vpop.f32.mrb[41].mxu0 }
 0x1ee   :  { %v1755_v37 = vadd.f32 %v1754_v34, %v6825_v26  ;;  %v1684_v38 = vadd.f32 %v1683_v36, %v6828_v57  ;;  %v1756_v39 = vpop.f32.mrb[41].mxu1  ;;  %v1685_v40 = vpop.f32.mrb[42].mxu0 }
 0x1ef   :  { %1829 = vst [vmem:[#allocation2 + $0x1c0] sm:$0xff] %v1682_v32  ;;  %v1757_v41 = vadd.f32 %v1756_v39, %v6831_v27  ;;  %v1686_v42 = vadd.f32 %v1685_v40, %v6822_v56  ;;  %v1758_v35 = vpop.f32.mrb[42].mxu1  ;;  %v1687_v43 = vpop.f32.mrb[43].mxu0 }
 0x1f0   :  { %1831 = vst [vmem:[#allocation2 + $0x1d0] sm:$0xff] %v1755_v37  ;;  %1830 = vst [vmem:[#allocation2 + $0x1c8] sm:$0xff] %v1684_v38  ;;  %v1759_v44 = vadd.f32 %v1758_v35, %v6825_v26  ;;  %v1688_v46 = vadd.f32 %v1687_v43, %v6828_v57  ;;  %v1760_v48 = vpop.f32.mrb[43].mxu1 }
 0x1f1   :  { %1832 = vst [vmem:[#allocation2 + $0x1d8] sm:$0xff] %v1757_v41  ;;  %1841 = vst [vmem:[#allocation2 + $0x220] sm:$0xff] %v1686_v42  ;;  %v1761_v49 = vadd.f32 %v1760_v48, %v6831_v27 }
 0x1f2   :  { %1843 = vst [vmem:[#allocation2 + $0x230] sm:$0xff] %v1759_v44  ;;  %1842 = vst [vmem:[#allocation2 + $0x228] sm:$0xff] %v1688_v46 }
 0x1f3   :  { %1844 = vst [vmem:[#allocation2 + $0x238] sm:$0xff] %v1761_v49 }
 0x1f4   :  { %v1691_v50 = vpop.f32.mrb[44].mxu0 }
 0x1f5   :  { %v1692_v51 = vadd.f32 %v1691_v50, %v6822_v56  ;;  %v1764_v15 = vpop.f32.mrb[44].mxu1  ;;  %v1693_v52 = vpop.f32.mrb[45].mxu0 }
 0x1f6   :  { %v1765_v53 = vadd.f32 %v1764_v15, %v6825_v26  ;;  %v1694_v54 = vadd.f32 %v1693_v52, %v6828_v57  ;;  %v1766_v55 = vpop.f32.mrb[45].mxu1  ;;  %v1695_v45 = vpop.f32.mrb[46].mxu0 }
 0x1f7   :  { %1853 = vst [vmem:[#allocation2 + $0x280] sm:$0xff] %v1692_v51  ;;  %v1767_v23 = vadd.f32 %v1766_v55, %v6831_v27  ;;  %v1696_v28 = vadd.f32 %v1695_v45, %v6822_v56  ;;  %v1768_v58 = vpop.f32.mrb[46].mxu1  ;;  %v1697_v59 = vpop.f32.mrb[47].mxu0  ;;  %v6869_v56 = vmov 0.0  }
 0x1f8   :  { %1855 = vst [vmem:[#allocation2 + $0x290] sm:$0xff] %v1765_v53  ;;  %1854 = vst [vmem:[#allocation2 + $0x288] sm:$0xff] %v1694_v54  ;;  %v1769_v60 = vadd.f32 %v1768_v58, %v6825_v26  ;;  %v1698_v61 = vadd.f32 %v1697_v59, %v6828_v57  ;;  %v1770_v62 = vpop.f32.mrb[47].mxu1 }
 0x1f9   :  { %1856 = vst [vmem:[#allocation2 + $0x298] sm:$0xff] %v1767_v23  ;;  %1865 = vst [vmem:[#allocation2 + $0x2e0] sm:$0xff] %v1696_v28  ;;  %v1771_v47 = vadd.f32 %v1770_v62, %v6831_v27 }
 0x1fa   :  { %1867 = vst [vmem:[#allocation2 + $0x2f0] sm:$0xff] %v1769_v60  ;;  %1866 = vst [vmem:[#allocation2 + $0x2e8] sm:$0xff] %v1698_v61 }
 0x1fb   :  { %1868 = vst [vmem:[#allocation2 + $0x2f8] sm:$0xff] %v1771_v47 }
 0x1fc LB: > { %v5778_v26 = vld [vmem:[#allocation7 + $0x4] ss:$48 sps:$4 sm:$0xff]   ;;  %v5782_v27 = vld [vmem:[#allocation7] ss:$48 sps:$4 sm:$0xff]   ;;  %v6892_v4 = vpack.c.bf16 %v6518_v56, %v6518_v56  ;;  %v6896_v6 = vpack.c.bf16 %v6510_v63, %v6510_v63  ;;  %s5037_s1 = sshll.u32 %s6526_s0, 3  ;;  %s1875_s0 = sadd.s32 1, %s6526_s0   ;;  %s6526_s0 = sphi %s6873_s0, %s1875_s0   ;;  %v6522_v2 = vphi %v6871_v2, %v7017_v2   ;;  %v6518_v56 = vphi %v6869_v56, %v7016_v56   ;;  %v6514_v1 = vphi %v6867_v1, %v7015_v1   ;;  %v6510_v63 = vphi %v6865_v63, %v7014_v63  }
 0x1fd   : > { %v5780_v57 = vld [vmem:[#allocation7 + $0x604] ss:$48 sps:$4 sm:$0xff]   ;;  %4206 = vmatprep.subr.bf16.mxu0 %v5778_v26  ;;  %v5783_v3 = vld [vmem:[#allocation7 + $0x600] ss:$48 sps:$4 sm:$0xff]   ;;  %s1881_s21 = sshra.s32 %s5037_s1, 3  ;;  %p1872_p4 = scmp.ge.s32.totalorder %s1875_s0, 8  }
 0x1fe   : > { %4247 = vmatprep.subr.bf16.mxu1 %v5780_v57  ;;  %v5784_v7 = vld [vmem:[#allocation7 + $0x64] ss:$48 sps:$4 sm:$0xff]   ;;  %4207 = vmatpush1.bf16.msra.mxu0 %v5782_v27  ;;  %v5788_v9 = vld [vmem:[#allocation7 + $0x60] ss:$48 sps:$4 sm:$0xff]   ;;  %s5431_s30 = smul.u32 96, %s1881_s21 }
 0x1ff   : > { %4248 = vmatpush1.bf16.msra.mxu1 %v5783_v3  ;;  %v5786_v8 = vld [vmem:[#allocation7 + $0x664] ss:$48 sps:$4 sm:$0xff]   ;;  %4208 = vmatprep.subr.bf16.mxu0 %v5784_v7  ;;  %v5789_v10 = vld [vmem:[#allocation7 + $0x660] ss:$48 sps:$4 sm:$0xff]  }
 0x200   : > { %4238 = vmatprep.mubr.bf16.mxu0 %v6892_v4  ;;  %4249 = vmatprep.subr.bf16.mxu1 %v5786_v8  ;;  %v5790_v11 = vld [vmem:[#allocation7 + $0xc4] ss:$48 sps:$4 sm:$0xff]   ;;  %v5794_v13 = vld [vmem:[#allocation7 + $0xc0] ss:$48 sps:$4 sm:$0xff]   ;;  %s6943_s6 = scalar_lea.vmem [#allocation2], %s5431_s30 }
 0x201   : > { %4279 = vmatprep.mubr.bf16.mxu1 %v6896_v6  ;;  %v5792_v12 = vld [vmem:[#allocation7 + $0x6c4] ss:$48 sps:$4 sm:$0xff]   ;;  %v5795_v14 = vld [vmem:[#allocation7 + $0x6c0] ss:$48 sps:$4 sm:$0xff]  }
 0x202   : > { %4209 = vmatpush1.bf16.msra.mxu0 %v5788_v9  ;;  %v5796_v17 = vld [vmem:[#allocation7 + $0x124] ss:$48 sps:$4 sm:$0xff]   ;;  %v5800_v19 = vld [vmem:[#allocation7 + $0x120] ss:$48 sps:$4 sm:$0xff]  }
 0x203   : > { %4250 = vmatpush1.bf16.msra.mxu1 %v5789_v10  ;;  %4210 = vmatprep.subr.bf16.mxu0 %v5790_v11  ;;  %v5798_v18 = vld [vmem:[#allocation7 + $0x724] ss:$48 sps:$4 sm:$0xff]   ;;  %v5801_v20 = vld [vmem:[#allocation7 + $0x720] ss:$48 sps:$4 sm:$0xff]  }
 0x204   : > { %4251 = vmatprep.subr.bf16.mxu1 %v5792_v12  ;;  %v5802_v21 = vld [vmem:[#allocation7 + $0x184] ss:$48 sps:$4 sm:$0xff]   ;;  %v5806_v5 = vld [vmem:[#allocation7 + $0x180] ss:$48 sps:$4 sm:$0xff]  }
 0x205   : > { %v5804_v22 = vld [vmem:[#allocation7 + $0x784] ss:$48 sps:$4 sm:$0xff]   ;;  %v5807_v29 = vld [vmem:[#allocation7 + $0x780] ss:$48 sps:$4 sm:$0xff]  }
 0x206   : > { %4211 = vmatpush1.bf16.msra.mxu0 %v5794_v13  ;;  %v5808_v30 = vld [vmem:[#allocation7 + $0x1e4] ss:$48 sps:$4 sm:$0xff]   ;;  %v5812_v32 = vld [vmem:[#allocation7 + $0x1e0] ss:$48 sps:$4 sm:$0xff]  }
 0x207   : > { %4252 = vmatpush1.bf16.msra.mxu1 %v5795_v14  ;;  %4212 = vmatprep.subr.bf16.mxu0 %v5796_v17  ;;  %v5810_v31 = vld [vmem:[#allocation7 + $0x7e4] ss:$48 sps:$4 sm:$0xff]   ;;  %v5813_v34 = vld [vmem:[#allocation7 + $0x7e0] ss:$48 sps:$4 sm:$0xff]   ;;  %v5876_v14 = vld [vmem:[#allocation7 + $0xc] ss:$48 sps:$4 sm:$0xff]  }
 0x208   : > { %4253 = vmatprep.subr.bf16.mxu1 %v5798_v18  ;;  %v5814_v36 = vld [vmem:[#allocation7 + $0x244] ss:$48 sps:$4 sm:$0xff]   ;;  %v5818_v38 = vld [vmem:[#allocation7 + $0x240] ss:$48 sps:$4 sm:$0xff]   ;;  %v5879_v17 = vld [vmem:[#allocation7 + $0x60c] ss:$48 sps:$4 sm:$0xff]   ;;  %v6902_v18 = vpack.c.bf16 %v6522_v2, %v6522_v2 }
 0x209   : > { %v5816_v37 = vld [vmem:[#allocation7 + $0x844] ss:$48 sps:$4 sm:$0xff]   ;;  %v5819_v39 = vld [vmem:[#allocation7 + $0x840] ss:$48 sps:$4 sm:$0xff]  }
 0x20a   : > { %4213 = vmatpush1.bf16.msra.mxu0 %v5800_v19  ;;  %v5820_v40 = vld [vmem:[#allocation7 + $0x2a4] ss:$48 sps:$4 sm:$0xff]   ;;  %v5824_v42 = vld [vmem:[#allocation7 + $0x2a0] ss:$48 sps:$4 sm:$0xff]   ;;  %v6906_v19 = vpack.c.bf16 %v6514_v1, %v6514_v1 }
 0x20b   : > { %4254 = vmatpush1.bf16.msra.mxu1 %v5801_v20  ;;  %4214 = vmatprep.subr.bf16.mxu0 %v5802_v21  ;;  %v5822_v41 = vld [vmem:[#allocation7 + $0x8a4] ss:$48 sps:$4 sm:$0xff]   ;;  %v5825_v35 = vld [vmem:[#allocation7 + $0x8a0] ss:$48 sps:$4 sm:$0xff]   ;;  %v5874_v20 = vld [vmem:[#allocation7 + $0x8] ss:$48 sps:$4 sm:$0xff]  }
 0x20c   : > { %4255 = vmatprep.subr.bf16.mxu1 %v5804_v22  ;;  %v5826_v43 = vld [vmem:[#allocation7 + $0x304] ss:$48 sps:$4 sm:$0xff]   ;;  %v5830_v46 = vld [vmem:[#allocation7 + $0x300] ss:$48 sps:$4 sm:$0xff]   ;;  %v5877_v21 = vld [vmem:[#allocation7 + $0x608] ss:$48 sps:$4 sm:$0xff]  }
 0x20d   : > { %v5828_v44 = vld [vmem:[#allocation7 + $0x904] ss:$48 sps:$4 sm:$0xff]   ;;  %v5831_v48 = vld [vmem:[#allocation7 + $0x900] ss:$48 sps:$4 sm:$0xff]   ;;  %v5882_v22 = vld [vmem:[#allocation7 + $0x6c] ss:$48 sps:$4 sm:$0xff]  }
 0x20e   : > { %4215 = vmatpush1.bf16.msra.mxu0 %v5806_v5  ;;  %v5832_v49 = vld [vmem:[#allocation7 + $0x364] ss:$48 sps:$4 sm:$0xff]   ;;  %v5836_v51 = vld [vmem:[#allocation7 + $0x360] ss:$48 sps:$4 sm:$0xff]   ;;  %v5885_v5 = vld [vmem:[#allocation7 + $0x66c] ss:$48 sps:$4 sm:$0xff]  }
 0x20f   : > { %4256 = vmatpush1.bf16.msra.mxu1 %v5807_v29  ;;  %4216 = vmatprep.subr.bf16.mxu0 %v5808_v30  ;;  %v5834_v50 = vld [vmem:[#allocation7 + $0x964] ss:$48 sps:$4 sm:$0xff]   ;;  %v5837_v15 = vld [vmem:[#allocation7 + $0x960] ss:$48 sps:$4 sm:$0xff]   ;;  %v5880_v29 = vld [vmem:[#allocation7 + $0x68] ss:$48 sps:$4 sm:$0xff]  }
 0x210   : > { %4257 = vmatprep.subr.bf16.mxu1 %v5810_v31  ;;  %v5838_v52 = vld [vmem:[#allocation7 + $0x3c4] ss:$48 sps:$4 sm:$0xff]   ;;  %v5842_v54 = vld [vmem:[#allocation7 + $0x3c0] ss:$48 sps:$4 sm:$0xff]   ;;  %v5883_v30 = vld [vmem:[#allocation7 + $0x668] ss:$48 sps:$4 sm:$0xff]  }
 0x211   : > { %v5840_v53 = vld [vmem:[#allocation7 + $0x9c4] ss:$48 sps:$4 sm:$0xff]   ;;  %v5843_v55 = vld [vmem:[#allocation7 + $0x9c0] ss:$48 sps:$4 sm:$0xff]   ;;  %v5888_v31 = vld [vmem:[#allocation7 + $0xcc] ss:$48 sps:$4 sm:$0xff]  }
 0x212   : > { %4217 = vmatpush1.bf16.msra.mxu0 %v5812_v32  ;;  %v5844_v45 = vld [vmem:[#allocation7 + $0x424] ss:$48 sps:$4 sm:$0xff]   ;;  %v5848_v28 = vld [vmem:[#allocation7 + $0x420] ss:$48 sps:$4 sm:$0xff]   ;;  %v5891_v32 = vld [vmem:[#allocation7 + $0x6cc] ss:$48 sps:$4 sm:$0xff]  }
 0x213   : > { %4258 = vmatpush1.bf16.msra.mxu1 %v5813_v34  ;;  %4218 = vmatprep.subr.bf16.mxu0 %v5814_v36  ;;  %v5846_v23 = vld [vmem:[#allocation7 + $0xa24] ss:$48 sps:$4 sm:$0xff]   ;;  %v5849_v58 = vld [vmem:[#allocation7 + $0xa20] ss:$48 sps:$4 sm:$0xff]   ;;  %v5886_v34 = vld [vmem:[#allocation7 + $0xc8] ss:$48 sps:$4 sm:$0xff]  }
 0x214   : > { %4259 = vmatprep.subr.bf16.mxu1 %v5816_v37  ;;  %v5850_v59 = vld [vmem:[#allocation7 + $0x484] ss:$48 sps:$4 sm:$0xff]   ;;  %v5854_v61 = vld [vmem:[#allocation7 + $0x480] ss:$48 sps:$4 sm:$0xff]   ;;  %v5889_v36 = vld [vmem:[#allocation7 + $0x6c8] ss:$48 sps:$4 sm:$0xff]  }
 0x215   : > { %v5852_v60 = vld [vmem:[#allocation7 + $0xa84] ss:$48 sps:$4 sm:$0xff]   ;;  %v5855_v62 = vld [vmem:[#allocation7 + $0xa80] ss:$48 sps:$4 sm:$0xff]   ;;  %v5894_v37 = vld [vmem:[#allocation7 + $0x12c] ss:$48 sps:$4 sm:$0xff]  }
 0x216   : > { %4219 = vmatpush1.bf16.msra.mxu0 %v5818_v38  ;;  %v5856_v47 = vld [vmem:[#allocation7 + $0x4e4] ss:$48 sps:$4 sm:$0xff]   ;;  %v5860_v57 = vld [vmem:[#allocation7 + $0x4e0] ss:$48 sps:$4 sm:$0xff]   ;;  %v5897_v38 = vld [vmem:[#allocation7 + $0x72c] ss:$48 sps:$4 sm:$0xff]  }
 0x217   : > { %4260 = vmatpush1.bf16.msra.mxu1 %v5819_v39  ;;  %4220 = vmatprep.subr.bf16.mxu0 %v5820_v40  ;;  %v5858_v26 = vld [vmem:[#allocation7 + $0xae4] ss:$48 sps:$4 sm:$0xff]   ;;  %v5861_v27 = vld [vmem:[#allocation7 + $0xae0] ss:$48 sps:$4 sm:$0xff]   ;;  %v5892_v39 = vld [vmem:[#allocation7 + $0x128] ss:$48 sps:$4 sm:$0xff]  }
 0x218   : > { %4261 = vmatprep.subr.bf16.mxu1 %v5822_v41  ;;  %v5862_v3 = vld [vmem:[#allocation7 + $0x544] ss:$48 sps:$4 sm:$0xff]   ;;  %v5866_v8 = vld [vmem:[#allocation7 + $0x540] ss:$48 sps:$4 sm:$0xff]   ;;  %v5895_v40 = vld [vmem:[#allocation7 + $0x728] ss:$48 sps:$4 sm:$0xff]  }
 0x219   : > { %v5864_v7 = vld [vmem:[#allocation7 + $0xb44] ss:$48 sps:$4 sm:$0xff]   ;;  %v5867_v9 = vld [vmem:[#allocation7 + $0xb40] ss:$48 sps:$4 sm:$0xff]   ;;  %v5900_v41 = vld [vmem:[#allocation7 + $0x18c] ss:$48 sps:$4 sm:$0xff]  }
 0x21a   : > { %4221 = vmatpush1.bf16.msra.mxu0 %v5824_v42  ;;  %v5868_v10 = vld [vmem:[#allocation7 + $0x5a4] ss:$48 sps:$4 sm:$0xff]   ;;  %v5872_v12 = vld [vmem:[#allocation7 + $0x5a0] ss:$48 sps:$4 sm:$0xff]   ;;  %v5903_v42 = vld [vmem:[#allocation7 + $0x78c] ss:$48 sps:$4 sm:$0xff]  }
 0x21b   : > { %4262 = vmatpush1.bf16.msra.mxu1 %v5825_v35  ;;  %4222 = vmatprep.subr.bf16.mxu0 %v5826_v43  ;;  %v5870_v11 = vld [vmem:[#allocation7 + $0xba4] ss:$48 sps:$4 sm:$0xff]   ;;  %v5873_v13 = vld [vmem:[#allocation7 + $0xba0] ss:$48 sps:$4 sm:$0xff]   ;;  %v5898_v35 = vld [vmem:[#allocation7 + $0x188] ss:$48 sps:$4 sm:$0xff]  }
 0x21c   : > { %4263 = vmatprep.subr.bf16.mxu1 %v5828_v44  ;;  %v5901_v43 = vld [vmem:[#allocation7 + $0x788] ss:$48 sps:$4 sm:$0xff]   ;;  %v5906_v44 = vld [vmem:[#allocation7 + $0x1ec] ss:$48 sps:$4 sm:$0xff]  }
 0x21e   : > { %4223 = vmatpush1.bf16.msra.mxu0 %v5830_v46  ;;  %v5909_v46 = vld [vmem:[#allocation7 + $0x7ec] ss:$48 sps:$4 sm:$0xff]  }
 0x21f   : > { %4264 = vmatpush1.bf16.msra.mxu1 %v5831_v48  ;;  %4224 = vmatprep.subr.bf16.mxu0 %v5832_v49  ;;  %v5904_v48 = vld [vmem:[#allocation7 + $0x1e8] ss:$48 sps:$4 sm:$0xff]  }
 0x220   : > { %4265 = vmatprep.subr.bf16.mxu1 %v5834_v50  ;;  %v5907_v49 = vld [vmem:[#allocation7 + $0x7e8] ss:$48 sps:$4 sm:$0xff]   ;;  %v5912_v50 = vld [vmem:[#allocation7 + $0x24c] ss:$48 sps:$4 sm:$0xff]  }
 0x222   : > { %4225 = vmatpush1.bf16.msra.mxu0 %v5836_v51  ;;  %v5915_v51 = vld [vmem:[#allocation7 + $0x84c] ss:$48 sps:$4 sm:$0xff]  }
 0x223   : > { %4266 = vmatpush1.bf16.msra.mxu1 %v5837_v15  ;;  %4226 = vmatprep.subr.bf16.mxu0 %v5838_v52  ;;  %v5910_v15 = vld [vmem:[#allocation7 + $0x248] ss:$48 sps:$4 sm:$0xff]  }
 0x224   : > { %4267 = vmatprep.subr.bf16.mxu1 %v5840_v53  ;;  %v5913_v52 = vld [vmem:[#allocation7 + $0x848] ss:$48 sps:$4 sm:$0xff]   ;;  %v5918_v53 = vld [vmem:[#allocation7 + $0x2ac] ss:$48 sps:$4 sm:$0xff]  }
 0x226   : > { %4227 = vmatpush1.bf16.msra.mxu0 %v5842_v54  ;;  %v5921_v54 = vld [vmem:[#allocation7 + $0x8ac] ss:$48 sps:$4 sm:$0xff]  }
 0x227   : > { %4268 = vmatpush1.bf16.msra.mxu1 %v5843_v55  ;;  %4228 = vmatprep.subr.bf16.mxu0 %v5844_v45  ;;  %v5916_v55 = vld [vmem:[#allocation7 + $0x2a8] ss:$48 sps:$4 sm:$0xff]  }
 0x228   : > { %4269 = vmatprep.subr.bf16.mxu1 %v5846_v23  ;;  %v5919_v45 = vld [vmem:[#allocation7 + $0x8a8] ss:$48 sps:$4 sm:$0xff]   ;;  %v5924_v23 = vld [vmem:[#allocation7 + $0x30c] ss:$48 sps:$4 sm:$0xff]  }
 0x22a   : > { %4229 = vmatpush1.bf16.msra.mxu0 %v5848_v28  ;;  %v5927_v28 = vld [vmem:[#allocation7 + $0x90c] ss:$48 sps:$4 sm:$0xff]  }
 0x22b   : > { %4270 = vmatpush1.bf16.msra.mxu1 %v5849_v58  ;;  %4230 = vmatprep.subr.bf16.mxu0 %v5850_v59  ;;  %v5922_v58 = vld [vmem:[#allocation7 + $0x308] ss:$48 sps:$4 sm:$0xff]  }
 0x22c   : > { %4271 = vmatprep.subr.bf16.mxu1 %v5852_v60  ;;  %v5925_v59 = vld [vmem:[#allocation7 + $0x908] ss:$48 sps:$4 sm:$0xff]   ;;  %v5930_v60 = vld [vmem:[#allocation7 + $0x36c] ss:$48 sps:$4 sm:$0xff]  }
 0x22e   : > { %4231 = vmatpush1.bf16.msra.mxu0 %v5854_v61  ;;  %v5933_v61 = vld [vmem:[#allocation7 + $0x96c] ss:$48 sps:$4 sm:$0xff]  }
 0x22f   : > { %4272 = vmatpush1.bf16.msra.mxu1 %v5855_v62  ;;  %4232 = vmatprep.subr.bf16.mxu0 %v5856_v47  ;;  %v5928_v62 = vld [vmem:[#allocation7 + $0x368] ss:$48 sps:$4 sm:$0xff]  }
 0x230   : > { %4273 = vmatprep.subr.bf16.mxu1 %v5858_v26  ;;  %v5931_v47 = vld [vmem:[#allocation7 + $0x968] ss:$48 sps:$4 sm:$0xff]   ;;  %v5936_v26 = vld [vmem:[#allocation7 + $0x3cc] ss:$48 sps:$4 sm:$0xff]  }
 0x232   : > { %4233 = vmatpush1.bf16.msra.mxu0 %v5860_v57  ;;  %v5939_v57 = vld [vmem:[#allocation7 + $0x9cc] ss:$48 sps:$4 sm:$0xff]  }
 0x233   : > { %4274 = vmatpush1.bf16.msra.mxu1 %v5861_v27  ;;  %4234 = vmatprep.subr.bf16.mxu0 %v5862_v3  ;;  %v5934_v27 = vld [vmem:[#allocation7 + $0x3c8] ss:$48 sps:$4 sm:$0xff]  }
 0x234   : > { %4275 = vmatprep.subr.bf16.mxu1 %v5864_v7  ;;  %v5937_v3 = vld [vmem:[#allocation7 + $0x9c8] ss:$48 sps:$4 sm:$0xff]   ;;  %v5942_v7 = vld [vmem:[#allocation7 + $0x42c] ss:$48 sps:$4 sm:$0xff]  }
 0x236   : > { %4235 = vmatpush1.bf16.msra.mxu0 %v5866_v8  ;;  %v5945_v8 = vld [vmem:[#allocation7 + $0xa2c] ss:$48 sps:$4 sm:$0xff]  }
 0x237   : > { %4276 = vmatpush1.bf16.msra.mxu1 %v5867_v9  ;;  %4236 = vmatprep.subr.bf16.mxu0 %v5868_v10  ;;  %v5940_v9 = vld [vmem:[#allocation7 + $0x428] ss:$48 sps:$4 sm:$0xff]  }
 0x238   : > { %4277 = vmatprep.subr.bf16.mxu1 %v5870_v11  ;;  %v5943_v10 = vld [vmem:[#allocation7 + $0xa28] ss:$48 sps:$4 sm:$0xff]   ;;  %v5948_v11 = vld [vmem:[#allocation7 + $0x48c] ss:$48 sps:$4 sm:$0xff]  }
 0x23a   : > { %4237 = vmatpush1.bf16.msra.mxu0 %v5872_v12  ;;  %v5951_v12 = vld [vmem:[#allocation7 + $0xa8c] ss:$48 sps:$4 sm:$0xff]  }
 0x23b   : > { %4278 = vmatpush1.bf16.msra.mxu1 %v5873_v13  ;;  %4288 = vmatprep.subr.bf16.mxu0 %v5876_v14  ;;  %v5946_v13 = vld [vmem:[#allocation7 + $0x488] ss:$48 sps:$4 sm:$0xff]  }
 0x23c   : > { %4329 = vmatprep.subr.bf16.mxu1 %v5879_v17  ;;  %v5949_v14 = vld [vmem:[#allocation7 + $0xa88] ss:$48 sps:$4 sm:$0xff]   ;;  %v5954_v17 = vld [vmem:[#allocation7 + $0x4ec] ss:$48 sps:$4 sm:$0xff]  }
 0x23d   : > { %4239 = vmatmul.mubr.bf16.vlgmr.msra.gmra.mrb[0].mxu0 %v6902_v18 }
 0x23e   : > { %4280 = vmatmul.mubr.bf16.vlgmr.msra.gmra.mrb[0].mxu1 %v6906_v19  ;;  %4289 = vmatpush1.bf16.msra.mxu0 %v5874_v20  ;;  %v5957_v20 = vld [vmem:[#allocation7 + $0xaec] ss:$48 sps:$4 sm:$0xff]  }
 0x23f   : > { %4330 = vmatpush1.bf16.msra.mxu1 %v5877_v21  ;;  %4290 = vmatprep.subr.bf16.mxu0 %v5882_v22  ;;  %v5952_v21 = vld [vmem:[#allocation7 + $0x4e8] ss:$48 sps:$4 sm:$0xff]  }
 0x240   : > { %4331 = vmatprep.subr.bf16.mxu1 %v5885_v5  ;;  %4320 = vmatprep.mubr.bf16.mxu0 %v6892_v4  ;;  %v5955_v22 = vld [vmem:[#allocation7 + $0xae8] ss:$48 sps:$4 sm:$0xff]   ;;  %v5960_v5 = vld [vmem:[#allocation7 + $0x54c] ss:$48 sps:$4 sm:$0xff]  }
 0x241   : > { %4361 = vmatprep.mubr.bf16.mxu1 %v6896_v6 }
 0x242   : > { %4291 = vmatpush1.bf16.msra.mxu0 %v5880_v29  ;;  %v5963_v29 = vld [vmem:[#allocation7 + $0xb4c] ss:$48 sps:$4 sm:$0xff]  }
 0x243   : > { %4332 = vmatpush1.bf16.msra.mxu1 %v5883_v30  ;;  %4292 = vmatprep.subr.bf16.mxu0 %v5888_v31  ;;  %v5958_v30 = vld [vmem:[#allocation7 + $0x548] ss:$48 sps:$4 sm:$0xff]  }
 0x244   : > { %4333 = vmatprep.subr.bf16.mxu1 %v5891_v32  ;;  %v5961_v31 = vld [vmem:[#allocation7 + $0xb48] ss:$48 sps:$4 sm:$0xff]   ;;  %v5966_v32 = vld [vmem:[#allocation7 + $0x5ac] ss:$48 sps:$4 sm:$0xff]  }
 0x246   : > { %4293 = vmatpush1.bf16.msra.mxu0 %v5886_v34  ;;  %v5969_v34 = vld [vmem:[#allocation7 + $0xbac] ss:$48 sps:$4 sm:$0xff]  }
 0x247   : > { %4334 = vmatpush1.bf16.msra.mxu1 %v5889_v36  ;;  %4294 = vmatprep.subr.bf16.mxu0 %v5894_v37  ;;  %v5964_v36 = vld [vmem:[#allocation7 + $0x5a8] ss:$48 sps:$4 sm:$0xff]  }
 0x248   : > { %4335 = vmatprep.subr.bf16.mxu1 %v5897_v38  ;;  %v5967_v37 = vld [vmem:[#allocation7 + $0xba8] ss:$48 sps:$4 sm:$0xff]   ;;  %v5972_v38 = vld [vmem:[#allocation7 + $0x14] ss:$48 sps:$4 sm:$0xff]  }
 0x24a   : > { %4295 = vmatpush1.bf16.msra.mxu0 %v5892_v39  ;;  %v5975_v39 = vld [vmem:[#allocation7 + $0x614] ss:$48 sps:$4 sm:$0xff]  }
 0x24b   : > { %4336 = vmatpush1.bf16.msra.mxu1 %v5895_v40  ;;  %4296 = vmatprep.subr.bf16.mxu0 %v5900_v41  ;;  %v5970_v40 = vld [vmem:[#allocation7 + $0x10] ss:$48 sps:$4 sm:$0xff]  }
 0x24c   : > { %4337 = vmatprep.subr.bf16.mxu1 %v5903_v42  ;;  %v5973_v41 = vld [vmem:[#allocation7 + $0x610] ss:$48 sps:$4 sm:$0xff]   ;;  %v5978_v42 = vld [vmem:[#allocation7 + $0x74] ss:$48 sps:$4 sm:$0xff]  }
 0x24e   : > { %4297 = vmatpush1.bf16.msra.mxu0 %v5898_v35  ;;  %v5981_v35 = vld [vmem:[#allocation7 + $0x674] ss:$48 sps:$4 sm:$0xff]  }
 0x24f   : > { %4338 = vmatpush1.bf16.msra.mxu1 %v5901_v43  ;;  %4298 = vmatprep.subr.bf16.mxu0 %v5906_v44  ;;  %v5976_v43 = vld [vmem:[#allocation7 + $0x70] ss:$48 sps:$4 sm:$0xff]  }
 0x250   : > { %4339 = vmatprep.subr.bf16.mxu1 %v5909_v46  ;;  %v5979_v44 = vld [vmem:[#allocation7 + $0x670] ss:$48 sps:$4 sm:$0xff]   ;;  %v5984_v46 = vld [vmem:[#allocation7 + $0xd4] ss:$48 sps:$4 sm:$0xff]  }
 0x252   : > { %4299 = vmatpush1.bf16.msra.mxu0 %v5904_v48  ;;  %v5987_v48 = vld [vmem:[#allocation7 + $0x6d4] ss:$48 sps:$4 sm:$0xff]  }
 0x253   : > { %4340 = vmatpush1.bf16.msra.mxu1 %v5907_v49  ;;  %4300 = vmatprep.subr.bf16.mxu0 %v5912_v50  ;;  %v5982_v49 = vld [vmem:[#allocation7 + $0xd0] ss:$48 sps:$4 sm:$0xff]  }
 0x254   : > { %4341 = vmatprep.subr.bf16.mxu1 %v5915_v51  ;;  %v5985_v50 = vld [vmem:[#allocation7 + $0x6d0] ss:$48 sps:$4 sm:$0xff]   ;;  %v5990_v51 = vld [vmem:[#allocation7 + $0x134] ss:$48 sps:$4 sm:$0xff]  }
 0x256   : > { %4301 = vmatpush1.bf16.msra.mxu0 %v5910_v15  ;;  %v5993_v15 = vld [vmem:[#allocation7 + $0x734] ss:$48 sps:$4 sm:$0xff]  }
 0x257   : > { %4342 = vmatpush1.bf16.msra.mxu1 %v5913_v52  ;;  %4302 = vmatprep.subr.bf16.mxu0 %v5918_v53  ;;  %v5988_v52 = vld [vmem:[#allocation7 + $0x130] ss:$48 sps:$4 sm:$0xff]  }
 0x258   : > { %4343 = vmatprep.subr.bf16.mxu1 %v5921_v54  ;;  %v5991_v53 = vld [vmem:[#allocation7 + $0x730] ss:$48 sps:$4 sm:$0xff]   ;;  %v5996_v54 = vld [vmem:[#allocation7 + $0x194] ss:$48 sps:$4 sm:$0xff]  }
 0x25a   : > { %4303 = vmatpush1.bf16.msra.mxu0 %v5916_v55  ;;  %v5999_v55 = vld [vmem:[#allocation7 + $0x794] ss:$48 sps:$4 sm:$0xff]  }
 0x25b   : > { %4344 = vmatpush1.bf16.msra.mxu1 %v5919_v45  ;;  %4304 = vmatprep.subr.bf16.mxu0 %v5924_v23  ;;  %v5994_v45 = vld [vmem:[#allocation7 + $0x190] ss:$48 sps:$4 sm:$0xff]  }
 0x25c   : > { %4345 = vmatprep.subr.bf16.mxu1 %v5927_v28  ;;  %v5997_v23 = vld [vmem:[#allocation7 + $0x790] ss:$48 sps:$4 sm:$0xff]   ;;  %v6002_v28 = vld [vmem:[#allocation7 + $0x1f4] ss:$48 sps:$4 sm:$0xff]  }
 0x25e   : > { %4305 = vmatpush1.bf16.msra.mxu0 %v5922_v58  ;;  %v6005_v58 = vld [vmem:[#allocation7 + $0x7f4] ss:$48 sps:$4 sm:$0xff]  }
 0x25f   : > { %4346 = vmatpush1.bf16.msra.mxu1 %v5925_v59  ;;  %4306 = vmatprep.subr.bf16.mxu0 %v5930_v60  ;;  %v6000_v59 = vld [vmem:[#allocation7 + $0x1f0] ss:$48 sps:$4 sm:$0xff]  }
 0x260   : > { %4347 = vmatprep.subr.bf16.mxu1 %v5933_v61  ;;  %v6003_v60 = vld [vmem:[#allocation7 + $0x7f0] ss:$48 sps:$4 sm:$0xff]   ;;  %v6008_v61 = vld [vmem:[#allocation7 + $0x254] ss:$48 sps:$4 sm:$0xff]  }
 0x262   : > { %4307 = vmatpush1.bf16.msra.mxu0 %v5928_v62  ;;  %v6011_v62 = vld [vmem:[#allocation7 + $0x854] ss:$48 sps:$4 sm:$0xff]  }
 0x263   : > { %4348 = vmatpush1.bf16.msra.mxu1 %v5931_v47  ;;  %4308 = vmatprep.subr.bf16.mxu0 %v5936_v26  ;;  %v6006_v47 = vld [vmem:[#allocation7 + $0x250] ss:$48 sps:$4 sm:$0xff]  }
 0x264   : > { %4349 = vmatprep.subr.bf16.mxu1 %v5939_v57  ;;  %v6009_v26 = vld [vmem:[#allocation7 + $0x850] ss:$48 sps:$4 sm:$0xff]   ;;  %v6014_v57 = vld [vmem:[#allocation7 + $0x2b4] ss:$48 sps:$4 sm:$0xff]  }
 0x266   : > { %4309 = vmatpush1.bf16.msra.mxu0 %v5934_v27  ;;  %v6017_v27 = vld [vmem:[#allocation7 + $0x8b4] ss:$48 sps:$4 sm:$0xff]  }
 0x267   : > { %4350 = vmatpush1.bf16.msra.mxu1 %v5937_v3  ;;  %4310 = vmatprep.subr.bf16.mxu0 %v5942_v7  ;;  %v6012_v3 = vld [vmem:[#allocation7 + $0x2b0] ss:$48 sps:$4 sm:$0xff]  }
 0x268   : > { %4351 = vmatprep.subr.bf16.mxu1 %v5945_v8  ;;  %v6015_v7 = vld [vmem:[#allocation7 + $0x8b0] ss:$48 sps:$4 sm:$0xff]   ;;  %v6020_v8 = vld [vmem:[#allocation7 + $0x314] ss:$48 sps:$4 sm:$0xff]  }
 0x26a   : > { %4311 = vmatpush1.bf16.msra.mxu0 %v5940_v9  ;;  %v6023_v9 = vld [vmem:[#allocation7 + $0x914] ss:$48 sps:$4 sm:$0xff]  }
 0x26b   : > { %4352 = vmatpush1.bf16.msra.mxu1 %v5943_v10  ;;  %4312 = vmatprep.subr.bf16.mxu0 %v5948_v11  ;;  %v6018_v10 = vld [vmem:[#allocation7 + $0x310] ss:$48 sps:$4 sm:$0xff]  }
 0x26c   : > { %4353 = vmatprep.subr.bf16.mxu1 %v5951_v12  ;;  %v6021_v11 = vld [vmem:[#allocation7 + $0x910] ss:$48 sps:$4 sm:$0xff]   ;;  %v6026_v12 = vld [vmem:[#allocation7 + $0x374] ss:$48 sps:$4 sm:$0xff]  }
 0x26e   : > { %4313 = vmatpush1.bf16.msra.mxu0 %v5946_v13  ;;  %v6029_v13 = vld [vmem:[#allocation7 + $0x974] ss:$48 sps:$4 sm:$0xff]  }
 0x26f   : > { %4354 = vmatpush1.bf16.msra.mxu1 %v5949_v14  ;;  %4314 = vmatprep.subr.bf16.mxu0 %v5954_v17  ;;  %v6024_v14 = vld [vmem:[#allocation7 + $0x370] ss:$48 sps:$4 sm:$0xff]  }
 0x270   : > { %4355 = vmatprep.subr.bf16.mxu1 %v5957_v20  ;;  %v6027_v17 = vld [vmem:[#allocation7 + $0x970] ss:$48 sps:$4 sm:$0xff]   ;;  %v6032_v20 = vld [vmem:[#allocation7 + $0x3d4] ss:$48 sps:$4 sm:$0xff]  }
 0x272   : > { %4315 = vmatpush1.bf16.msra.mxu0 %v5952_v21  ;;  %v6035_v21 = vld [vmem:[#allocation7 + $0x9d4] ss:$48 sps:$4 sm:$0xff]  }
 0x273   : > { %4356 = vmatpush1.bf16.msra.mxu1 %v5955_v22  ;;  %4316 = vmatprep.subr.bf16.mxu0 %v5960_v5  ;;  %v6030_v22 = vld [vmem:[#allocation7 + $0x3d0] ss:$48 sps:$4 sm:$0xff]  }
 0x274   : > { %4357 = vmatprep.subr.bf16.mxu1 %v5963_v29  ;;  %v6033_v5 = vld [vmem:[#allocation7 + $0x9d0] ss:$48 sps:$4 sm:$0xff]   ;;  %v6038_v29 = vld [vmem:[#allocation7 + $0x434] ss:$48 sps:$4 sm:$0xff]  }
 0x276   : > { %4317 = vmatpush1.bf16.msra.mxu0 %v5958_v30  ;;  %v6041_v30 = vld [vmem:[#allocation7 + $0xa34] ss:$48 sps:$4 sm:$0xff]  }
 0x277   : > { %4358 = vmatpush1.bf16.msra.mxu1 %v5961_v31  ;;  %4318 = vmatprep.subr.bf16.mxu0 %v5966_v32  ;;  %v6036_v31 = vld [vmem:[#allocation7 + $0x430] ss:$48 sps:$4 sm:$0xff]  }
 0x278   : > { %4359 = vmatprep.subr.bf16.mxu1 %v5969_v34  ;;  %v6039_v32 = vld [vmem:[#allocation7 + $0xa30] ss:$48 sps:$4 sm:$0xff]   ;;  %v6044_v34 = vld [vmem:[#allocation7 + $0x494] ss:$48 sps:$4 sm:$0xff]  }
 0x27a   : > { %4319 = vmatpush1.bf16.msra.mxu0 %v5964_v36  ;;  %v6047_v36 = vld [vmem:[#allocation7 + $0xa94] ss:$48 sps:$4 sm:$0xff]  }
 0x27b   : > { %4360 = vmatpush1.bf16.msra.mxu1 %v5967_v37  ;;  %4370 = vmatprep.subr.bf16.mxu0 %v5972_v38  ;;  %v6042_v37 = vld [vmem:[#allocation7 + $0x490] ss:$48 sps:$4 sm:$0xff]  }
 0x27c   : > { %4411 = vmatprep.subr.bf16.mxu1 %v5975_v39  ;;  %v6045_v38 = vld [vmem:[#allocation7 + $0xa90] ss:$48 sps:$4 sm:$0xff]   ;;  %v6050_v39 = vld [vmem:[#allocation7 + $0x4f4] ss:$48 sps:$4 sm:$0xff]  }
 0x27d   : > { %4321 = vmatmul.mubr.bf16.vlgmr.msra.gmra.mrb[4].mxu0 %v6902_v18 }
 0x27e   : > { %4362 = vmatmul.mubr.bf16.vlgmr.msra.gmra.mrb[4].mxu1 %v6906_v19  ;;  %4371 = vmatpush1.bf16.msra.mxu0 %v5970_v40  ;;  %v6053_v40 = vld [vmem:[#allocation7 + $0xaf4] ss:$48 sps:$4 sm:$0xff]  }
 0x27f   : > { %4412 = vmatpush1.bf16.msra.mxu1 %v5973_v41  ;;  %4372 = vmatprep.subr.bf16.mxu0 %v5978_v42  ;;  %v6048_v41 = vld [vmem:[#allocation7 + $0x4f0] ss:$48 sps:$4 sm:$0xff]  }
 0x280   : > { %4413 = vmatprep.subr.bf16.mxu1 %v5981_v35  ;;  %4402 = vmatprep.mubr.bf16.mxu0 %v6892_v4  ;;  %v6051_v42 = vld [vmem:[#allocation7 + $0xaf0] ss:$48 sps:$4 sm:$0xff]   ;;  %v6056_v35 = vld [vmem:[#allocation7 + $0x554] ss:$48 sps:$4 sm:$0xff]  }
 0x281   : > { %4443 = vmatprep.mubr.bf16.mxu1 %v6896_v6 }
 0x282   : > { %4373 = vmatpush1.bf16.msra.mxu0 %v5976_v43  ;;  %v6059_v43 = vld [vmem:[#allocation7 + $0xb54] ss:$48 sps:$4 sm:$0xff]  }
 0x283   : > { %4414 = vmatpush1.bf16.msra.mxu1 %v5979_v44  ;;  %4374 = vmatprep.subr.bf16.mxu0 %v5984_v46  ;;  %v6054_v44 = vld [vmem:[#allocation7 + $0x550] ss:$48 sps:$4 sm:$0xff]  }
 0x284   : > { %4415 = vmatprep.subr.bf16.mxu1 %v5987_v48  ;;  %v6057_v46 = vld [vmem:[#allocation7 + $0xb50] ss:$48 sps:$4 sm:$0xff]   ;;  %v6062_v48 = vld [vmem:[#allocation7 + $0x5b4] ss:$48 sps:$4 sm:$0xff]  }
 0x286   : > { %4375 = vmatpush1.bf16.msra.mxu0 %v5982_v49  ;;  %v6065_v49 = vld [vmem:[#allocation7 + $0xbb4] ss:$48 sps:$4 sm:$0xff]  }
 0x287   : > { %4416 = vmatpush1.bf16.msra.mxu1 %v5985_v50  ;;  %4376 = vmatprep.subr.bf16.mxu0 %v5990_v51  ;;  %v6060_v50 = vld [vmem:[#allocation7 + $0x5b0] ss:$48 sps:$4 sm:$0xff]  }
 0x288   : > { %4417 = vmatprep.subr.bf16.mxu1 %v5993_v15  ;;  %v6063_v51 = vld [vmem:[#allocation7 + $0xbb0] ss:$48 sps:$4 sm:$0xff]   ;;  %v6068_v15 = vld [vmem:[#allocation7 + $0x1c] ss:$48 sps:$4 sm:$0xff]  }
 0x28a   : > { %4377 = vmatpush1.bf16.msra.mxu0 %v5988_v52  ;;  %v6071_v52 = vld [vmem:[#allocation7 + $0x61c] ss:$48 sps:$4 sm:$0xff]  }
 0x28b   : > { %4418 = vmatpush1.bf16.msra.mxu1 %v5991_v53  ;;  %4378 = vmatprep.subr.bf16.mxu0 %v5996_v54  ;;  %v6066_v53 = vld [vmem:[#allocation7 + $0x18] ss:$48 sps:$4 sm:$0xff]  }
 0x28c   : > { %4419 = vmatprep.subr.bf16.mxu1 %v5999_v55  ;;  %v6069_v54 = vld [vmem:[#allocation7 + $0x618] ss:$48 sps:$4 sm:$0xff]   ;;  %v6074_v55 = vld [vmem:[#allocation7 + $0x7c] ss:$48 sps:$4 sm:$0xff]  }
 0x28e   : > { %4379 = vmatpush1.bf16.msra.mxu0 %v5994_v45  ;;  %v6077_v45 = vld [vmem:[#allocation7 + $0x67c] ss:$48 sps:$4 sm:$0xff]  }
 0x28f   : > { %4420 = vmatpush1.bf16.msra.mxu1 %v5997_v23  ;;  %4380 = vmatprep.subr.bf16.mxu0 %v6002_v28  ;;  %v6072_v23 = vld [vmem:[#allocation7 + $0x78] ss:$48 sps:$4 sm:$0xff]  }
 0x290   : > { %4421 = vmatprep.subr.bf16.mxu1 %v6005_v58  ;;  %v6075_v28 = vld [vmem:[#allocation7 + $0x678] ss:$48 sps:$4 sm:$0xff]   ;;  %v6080_v58 = vld [vmem:[#allocation7 + $0xdc] ss:$48 sps:$4 sm:$0xff]  }
 0x292   : > { %4381 = vmatpush1.bf16.msra.mxu0 %v6000_v59  ;;  %v6083_v59 = vld [vmem:[#allocation7 + $0x6dc] ss:$48 sps:$4 sm:$0xff]  }
 0x293   : > { %4422 = vmatpush1.bf16.msra.mxu1 %v6003_v60  ;;  %4382 = vmatprep.subr.bf16.mxu0 %v6008_v61  ;;  %v6078_v60 = vld [vmem:[#allocation7 + $0xd8] ss:$48 sps:$4 sm:$0xff]  }
 0x294   : > { %4423 = vmatprep.subr.bf16.mxu1 %v6011_v62  ;;  %v6081_v61 = vld [vmem:[#allocation7 + $0x6d8] ss:$48 sps:$4 sm:$0xff]   ;;  %v6086_v62 = vld [vmem:[#allocation7 + $0x13c] ss:$48 sps:$4 sm:$0xff]  }
 0x296   : > { %4383 = vmatpush1.bf16.msra.mxu0 %v6006_v47  ;;  %v6089_v47 = vld [vmem:[#allocation7 + $0x73c] ss:$48 sps:$4 sm:$0xff]  }
 0x297   : > { %4424 = vmatpush1.bf16.msra.mxu1 %v6009_v26  ;;  %4384 = vmatprep.subr.bf16.mxu0 %v6014_v57  ;;  %v6084_v26 = vld [vmem:[#allocation7 + $0x138] ss:$48 sps:$4 sm:$0xff]  }
 0x298   : > { %4425 = vmatprep.subr.bf16.mxu1 %v6017_v27  ;;  %v6087_v57 = vld [vmem:[#allocation7 + $0x738] ss:$48 sps:$4 sm:$0xff]   ;;  %v6092_v27 = vld [vmem:[#allocation7 + $0x19c] ss:$48 sps:$4 sm:$0xff]  }
 0x29a   : > { %4385 = vmatpush1.bf16.msra.mxu0 %v6012_v3  ;;  %v6095_v3 = vld [vmem:[#allocation7 + $0x79c] ss:$48 sps:$4 sm:$0xff]  }
 0x29b   : > { %4426 = vmatpush1.bf16.msra.mxu1 %v6015_v7  ;;  %4386 = vmatprep.subr.bf16.mxu0 %v6020_v8  ;;  %v6090_v7 = vld [vmem:[#allocation7 + $0x198] ss:$48 sps:$4 sm:$0xff]  }
 0x29c   : > { %4427 = vmatprep.subr.bf16.mxu1 %v6023_v9  ;;  %v6093_v8 = vld [vmem:[#allocation7 + $0x798] ss:$48 sps:$4 sm:$0xff]   ;;  %v6098_v9 = vld [vmem:[#allocation7 + $0x1fc] ss:$48 sps:$4 sm:$0xff]  }
 0x29e   : > { %4387 = vmatpush1.bf16.msra.mxu0 %v6018_v10  ;;  %v6101_v10 = vld [vmem:[#allocation7 + $0x7fc] ss:$48 sps:$4 sm:$0xff]  }
 0x29f   : > { %4428 = vmatpush1.bf16.msra.mxu1 %v6021_v11  ;;  %4388 = vmatprep.subr.bf16.mxu0 %v6026_v12  ;;  %v6096_v11 = vld [vmem:[#allocation7 + $0x1f8] ss:$48 sps:$4 sm:$0xff]  }
 0x2a0   : > { %4429 = vmatprep.subr.bf16.mxu1 %v6029_v13  ;;  %v6099_v12 = vld [vmem:[#allocation7 + $0x7f8] ss:$48 sps:$4 sm:$0xff]   ;;  %v6104_v13 = vld [vmem:[#allocation7 + $0x25c] ss:$48 sps:$4 sm:$0xff]  }
 0x2a2   : > { %4389 = vmatpush1.bf16.msra.mxu0 %v6024_v14  ;;  %v6107_v14 = vld [vmem:[#allocation7 + $0x85c] ss:$48 sps:$4 sm:$0xff]  }
 0x2a3   : > { %4430 = vmatpush1.bf16.msra.mxu1 %v6027_v17  ;;  %4390 = vmatprep.subr.bf16.mxu0 %v6032_v20  ;;  %v6102_v17 = vld [vmem:[#allocation7 + $0x258] ss:$48 sps:$4 sm:$0xff]  }
 0x2a4   : > { %4431 = vmatprep.subr.bf16.mxu1 %v6035_v21  ;;  %v6105_v20 = vld [vmem:[#allocation7 + $0x858] ss:$48 sps:$4 sm:$0xff]   ;;  %v6110_v21 = vld [vmem:[#allocation7 + $0x2bc] ss:$48 sps:$4 sm:$0xff]  }
 0x2a6   : > { %4391 = vmatpush1.bf16.msra.mxu0 %v6030_v22  ;;  %v6113_v22 = vld [vmem:[#allocation7 + $0x8bc] ss:$48 sps:$4 sm:$0xff]  }
 0x2a7   : > { %4432 = vmatpush1.bf16.msra.mxu1 %v6033_v5  ;;  %4392 = vmatprep.subr.bf16.mxu0 %v6038_v29  ;;  %v6108_v5 = vld [vmem:[#allocation7 + $0x2b8] ss:$48 sps:$4 sm:$0xff]  }
 0x2a8   : > { %4433 = vmatprep.subr.bf16.mxu1 %v6041_v30  ;;  %v6111_v29 = vld [vmem:[#allocation7 + $0x8b8] ss:$48 sps:$4 sm:$0xff]   ;;  %v6116_v30 = vld [vmem:[#allocation7 + $0x31c] ss:$48 sps:$4 sm:$0xff]  }
 0x2aa   : > { %4393 = vmatpush1.bf16.msra.mxu0 %v6036_v31  ;;  %v6119_v31 = vld [vmem:[#allocation7 + $0x91c] ss:$48 sps:$4 sm:$0xff]  }
 0x2ab   : > { %4434 = vmatpush1.bf16.msra.mxu1 %v6039_v32  ;;  %4394 = vmatprep.subr.bf16.mxu0 %v6044_v34  ;;  %v6114_v32 = vld [vmem:[#allocation7 + $0x318] ss:$48 sps:$4 sm:$0xff]  }
 0x2ac   : > { %4435 = vmatprep.subr.bf16.mxu1 %v6047_v36  ;;  %v6117_v34 = vld [vmem:[#allocation7 + $0x918] ss:$48 sps:$4 sm:$0xff]   ;;  %v6122_v36 = vld [vmem:[#allocation7 + $0x37c] ss:$48 sps:$4 sm:$0xff]  }
 0x2ae   : > { %4395 = vmatpush1.bf16.msra.mxu0 %v6042_v37  ;;  %v6125_v37 = vld [vmem:[#allocation7 + $0x97c] ss:$48 sps:$4 sm:$0xff]  }
 0x2af   : > { %4436 = vmatpush1.bf16.msra.mxu1 %v6045_v38  ;;  %4396 = vmatprep.subr.bf16.mxu0 %v6050_v39  ;;  %v6120_v38 = vld [vmem:[#allocation7 + $0x378] ss:$48 sps:$4 sm:$0xff]  }
 0x2b0   : > { %4437 = vmatprep.subr.bf16.mxu1 %v6053_v40  ;;  %v6123_v39 = vld [vmem:[#allocation7 + $0x978] ss:$48 sps:$4 sm:$0xff]   ;;  %v6128_v40 = vld [vmem:[#allocation7 + $0x3dc] ss:$48 sps:$4 sm:$0xff]  }
 0x2b2   : > { %4397 = vmatpush1.bf16.msra.mxu0 %v6048_v41  ;;  %v6131_v41 = vld [vmem:[#allocation7 + $0x9dc] ss:$48 sps:$4 sm:$0xff]  }
 0x2b3   : > { %4438 = vmatpush1.bf16.msra.mxu1 %v6051_v42  ;;  %4398 = vmatprep.subr.bf16.mxu0 %v6056_v35  ;;  %v6126_v42 = vld [vmem:[#allocation7 + $0x3d8] ss:$48 sps:$4 sm:$0xff]  }
 0x2b4   : > { %4439 = vmatprep.subr.bf16.mxu1 %v6059_v43  ;;  %v6129_v35 = vld [vmem:[#allocation7 + $0x9d8] ss:$48 sps:$4 sm:$0xff]   ;;  %v6134_v43 = vld [vmem:[#allocation7 + $0x43c] ss:$48 sps:$4 sm:$0xff]  }
 0x2b6   : > { %4399 = vmatpush1.bf16.msra.mxu0 %v6054_v44  ;;  %v6137_v44 = vld [vmem:[#allocation7 + $0xa3c] ss:$48 sps:$4 sm:$0xff]  }
 0x2b7   : > { %4440 = vmatpush1.bf16.msra.mxu1 %v6057_v46  ;;  %4400 = vmatprep.subr.bf16.mxu0 %v6062_v48  ;;  %v6132_v46 = vld [vmem:[#allocation7 + $0x438] ss:$48 sps:$4 sm:$0xff]  }
 0x2b8   : > { %4441 = vmatprep.subr.bf16.mxu1 %v6065_v49  ;;  %v6135_v48 = vld [vmem:[#allocation7 + $0xa38] ss:$48 sps:$4 sm:$0xff]   ;;  %v6140_v49 = vld [vmem:[#allocation7 + $0x49c] ss:$48 sps:$4 sm:$0xff]  }
 0x2ba   : > { %4401 = vmatpush1.bf16.msra.mxu0 %v6060_v50  ;;  %v6143_v50 = vld [vmem:[#allocation7 + $0xa9c] ss:$48 sps:$4 sm:$0xff]  }
 0x2bb   : > { %4442 = vmatpush1.bf16.msra.mxu1 %v6063_v51  ;;  %4452 = vmatprep.subr.bf16.mxu0 %v6068_v15  ;;  %v6138_v51 = vld [vmem:[#allocation7 + $0x498] ss:$48 sps:$4 sm:$0xff]  }
 0x2bc   : > { %4493 = vmatprep.subr.bf16.mxu1 %v6071_v52  ;;  %v6141_v15 = vld [vmem:[#allocation7 + $0xa98] ss:$48 sps:$4 sm:$0xff]   ;;  %v6146_v52 = vld [vmem:[#allocation7 + $0x4fc] ss:$48 sps:$4 sm:$0xff]  }
 0x2bd   : > { %4403 = vmatmul.mubr.bf16.vlgmr.msra.gmra.mrb[8].mxu0 %v6902_v18 }
 0x2be   : > { %4444 = vmatmul.mubr.bf16.vlgmr.msra.gmra.mrb[8].mxu1 %v6906_v19  ;;  %4453 = vmatpush1.bf16.msra.mxu0 %v6066_v53  ;;  %v6149_v53 = vld [vmem:[#allocation7 + $0xafc] ss:$48 sps:$4 sm:$0xff]  }
 0x2bf   : > { %4494 = vmatpush1.bf16.msra.mxu1 %v6069_v54  ;;  %4454 = vmatprep.subr.bf16.mxu0 %v6074_v55  ;;  %v6144_v54 = vld [vmem:[#allocation7 + $0x4f8] ss:$48 sps:$4 sm:$0xff]  }
 0x2c0   : > { %4495 = vmatprep.subr.bf16.mxu1 %v6077_v45  ;;  %4484 = vmatprep.mubr.bf16.mxu0 %v6892_v4  ;;  %v6147_v55 = vld [vmem:[#allocation7 + $0xaf8] ss:$48 sps:$4 sm:$0xff]   ;;  %v6152_v45 = vld [vmem:[#allocation7 + $0x55c] ss:$48 sps:$4 sm:$0xff]  }
 0x2c1   : > { %4525 = vmatprep.mubr.bf16.mxu1 %v6896_v6 }
 0x2c2   : > { %4455 = vmatpush1.bf16.msra.mxu0 %v6072_v23  ;;  %v6155_v23 = vld [vmem:[#allocation7 + $0xb5c] ss:$48 sps:$4 sm:$0xff]  }
 0x2c3   : > { %4496 = vmatpush1.bf16.msra.mxu1 %v6075_v28  ;;  %4456 = vmatprep.subr.bf16.mxu0 %v6080_v58  ;;  %v6150_v28 = vld [vmem:[#allocation7 + $0x558] ss:$48 sps:$4 sm:$0xff]  }
 0x2c4   : > { %4497 = vmatprep.subr.bf16.mxu1 %v6083_v59  ;;  %v6153_v58 = vld [vmem:[#allocation7 + $0xb58] ss:$48 sps:$4 sm:$0xff]   ;;  %v6158_v59 = vld [vmem:[#allocation7 + $0x5bc] ss:$48 sps:$4 sm:$0xff]  }
 0x2c6   : > { %4457 = vmatpush1.bf16.msra.mxu0 %v6078_v60  ;;  %v6161_v60 = vld [vmem:[#allocation7 + $0xbbc] ss:$48 sps:$4 sm:$0xff]  }
 0x2c7   : > { %4498 = vmatpush1.bf16.msra.mxu1 %v6081_v61  ;;  %4458 = vmatprep.subr.bf16.mxu0 %v6086_v62  ;;  %v6156_v61 = vld [vmem:[#allocation7 + $0x5b8] ss:$48 sps:$4 sm:$0xff]  }
 0x2c8   : > { %4499 = vmatprep.subr.bf16.mxu1 %v6089_v47  ;;  %v6159_v62 = vld [vmem:[#allocation7 + $0xbb8] ss:$48 sps:$4 sm:$0xff]   ;;  %v6164_v47 = vld [vmem:[#allocation7 + $0x24] ss:$48 sps:$4 sm:$0xff]  }
 0x2ca   : > { %4459 = vmatpush1.bf16.msra.mxu0 %v6084_v26  ;;  %v6167_v26 = vld [vmem:[#allocation7 + $0x624] ss:$48 sps:$4 sm:$0xff]  }
 0x2cb   : > { %4500 = vmatpush1.bf16.msra.mxu1 %v6087_v57  ;;  %4460 = vmatprep.subr.bf16.mxu0 %v6092_v27  ;;  %v6162_v57 = vld [vmem:[#allocation7 + $0x20] ss:$48 sps:$4 sm:$0xff]  }
 0x2cc   : > { %4501 = vmatprep.subr.bf16.mxu1 %v6095_v3  ;;  %v6165_v27 = vld [vmem:[#allocation7 + $0x620] ss:$48 sps:$4 sm:$0xff]   ;;  %v6170_v3 = vld [vmem:[#allocation7 + $0x84] ss:$48 sps:$4 sm:$0xff]  }
 0x2ce   : > { %4461 = vmatpush1.bf16.msra.mxu0 %v6090_v7  ;;  %v6173_v7 = vld [vmem:[#allocation7 + $0x684] ss:$48 sps:$4 sm:$0xff]  }
 0x2cf   : > { %4502 = vmatpush1.bf16.msra.mxu1 %v6093_v8  ;;  %4462 = vmatprep.subr.bf16.mxu0 %v6098_v9  ;;  %v6168_v8 = vld [vmem:[#allocation7 + $0x80] ss:$48 sps:$4 sm:$0xff]  }
 0x2d0   : > { %4503 = vmatprep.subr.bf16.mxu1 %v6101_v10  ;;  %v6171_v9 = vld [vmem:[#allocation7 + $0x680] ss:$48 sps:$4 sm:$0xff]   ;;  %v6176_v10 = vld [vmem:[#allocation7 + $0xe4] ss:$48 sps:$4 sm:$0xff]  }
 0x2d2   : > { %4463 = vmatpush1.bf16.msra.mxu0 %v6096_v11  ;;  %v6179_v11 = vld [vmem:[#allocation7 + $0x6e4] ss:$48 sps:$4 sm:$0xff]  }
 0x2d3   : > { %4504 = vmatpush1.bf16.msra.mxu1 %v6099_v12  ;;  %4464 = vmatprep.subr.bf16.mxu0 %v6104_v13  ;;  %v6174_v12 = vld [vmem:[#allocation7 + $0xe0] ss:$48 sps:$4 sm:$0xff]  }
 0x2d4   : > { %4505 = vmatprep.subr.bf16.mxu1 %v6107_v14  ;;  %v6177_v13 = vld [vmem:[#allocation7 + $0x6e0] ss:$48 sps:$4 sm:$0xff]   ;;  %v6182_v14 = vld [vmem:[#allocation7 + $0x144] ss:$48 sps:$4 sm:$0xff]  }
 0x2d6   : > { %4465 = vmatpush1.bf16.msra.mxu0 %v6102_v17  ;;  %v6185_v17 = vld [vmem:[#allocation7 + $0x744] ss:$48 sps:$4 sm:$0xff]  }
 0x2d7   : > { %4506 = vmatpush1.bf16.msra.mxu1 %v6105_v20  ;;  %4466 = vmatprep.subr.bf16.mxu0 %v6110_v21  ;;  %v6180_v20 = vld [vmem:[#allocation7 + $0x140] ss:$48 sps:$4 sm:$0xff]  }
 0x2d8   : > { %4507 = vmatprep.subr.bf16.mxu1 %v6113_v22  ;;  %v6183_v21 = vld [vmem:[#allocation7 + $0x740] ss:$48 sps:$4 sm:$0xff]   ;;  %v6188_v22 = vld [vmem:[#allocation7 + $0x1a4] ss:$48 sps:$4 sm:$0xff]  }
 0x2da   : > { %4467 = vmatpush1.bf16.msra.mxu0 %v6108_v5  ;;  %v6191_v5 = vld [vmem:[#allocation7 + $0x7a4] ss:$48 sps:$4 sm:$0xff]  }
 0x2db   : > { %4508 = vmatpush1.bf16.msra.mxu1 %v6111_v29  ;;  %4468 = vmatprep.subr.bf16.mxu0 %v6116_v30  ;;  %v6186_v29 = vld [vmem:[#allocation7 + $0x1a0] ss:$48 sps:$4 sm:$0xff]  }
 0x2dc   : > { %4509 = vmatprep.subr.bf16.mxu1 %v6119_v31  ;;  %v6189_v30 = vld [vmem:[#allocation7 + $0x7a0] ss:$48 sps:$4 sm:$0xff]   ;;  %v6194_v31 = vld [vmem:[#allocation7 + $0x204] ss:$48 sps:$4 sm:$0xff]  }
 0x2de   : > { %4469 = vmatpush1.bf16.msra.mxu0 %v6114_v32  ;;  %v6197_v32 = vld [vmem:[#allocation7 + $0x804] ss:$48 sps:$4 sm:$0xff]  }
 0x2df   : > { %4510 = vmatpush1.bf16.msra.mxu1 %v6117_v34  ;;  %4470 = vmatprep.subr.bf16.mxu0 %v6122_v36  ;;  %v6192_v34 = vld [vmem:[#allocation7 + $0x200] ss:$48 sps:$4 sm:$0xff]  }
 0x2e0   : > { %4511 = vmatprep.subr.bf16.mxu1 %v6125_v37  ;;  %v6195_v36 = vld [vmem:[#allocation7 + $0x800] ss:$48 sps:$4 sm:$0xff]   ;;  %v6200_v37 = vld [vmem:[#allocation7 + $0x264] ss:$48 sps:$4 sm:$0xff]  }
 0x2e2   : > { %4471 = vmatpush1.bf16.msra.mxu0 %v6120_v38  ;;  %v6203_v38 = vld [vmem:[#allocation7 + $0x864] ss:$48 sps:$4 sm:$0xff]  }
 0x2e3   : > { %4512 = vmatpush1.bf16.msra.mxu1 %v6123_v39  ;;  %4472 = vmatprep.subr.bf16.mxu0 %v6128_v40 }
 0x2e4   : > { %4513 = vmatprep.subr.bf16.mxu1 %v6131_v41 }
 0x2e6   : > { %4473 = vmatpush1.bf16.msra.mxu0 %v6126_v42 }
 0x2e7   : > { %4514 = vmatpush1.bf16.msra.mxu1 %v6129_v35  ;;  %4474 = vmatprep.subr.bf16.mxu0 %v6134_v43 }
 0x2e8   : > { %4515 = vmatprep.subr.bf16.mxu1 %v6137_v44 }
 0x2ea   : > { %4475 = vmatpush1.bf16.msra.mxu0 %v6132_v46 }
 0x2eb   : > { %4516 = vmatpush1.bf16.msra.mxu1 %v6135_v48  ;;  %4476 = vmatprep.subr.bf16.mxu0 %v6140_v49  ;;  %v6198_v48 = vld [vmem:[#allocation7 + $0x260] ss:$48 sps:$4 sm:$0xff]  }
 0x2ec   : > { %4517 = vmatprep.subr.bf16.mxu1 %v6143_v50  ;;  %v6201_v49 = vld [vmem:[#allocation7 + $0x860] ss:$48 sps:$4 sm:$0xff]  }
 0x2ee   : > { %4477 = vmatpush1.bf16.msra.mxu0 %v6138_v51 }
 0x2ef   : > { %4518 = vmatpush1.bf16.msra.mxu1 %v6141_v15  ;;  %4478 = vmatprep.subr.bf16.mxu0 %v6146_v52  ;;  %v6206_v15 = vld [vmem:[#allocation7 + $0x2c4] ss:$48 sps:$4 sm:$0xff]  }
 0x2f0   : > { %4519 = vmatprep.subr.bf16.mxu1 %v6149_v53  ;;  %v6209_v52 = vld [vmem:[#allocation7 + $0x8c4] ss:$48 sps:$4 sm:$0xff]   ;;  %v6204_v53 = vld [vmem:[#allocation7 + $0x2c0] ss:$48 sps:$4 sm:$0xff]  }
 0x2f2   : > { %4479 = vmatpush1.bf16.msra.mxu0 %v6144_v54  ;;  %v6207_v54 = vld [vmem:[#allocation7 + $0x8c0] ss:$48 sps:$4 sm:$0xff]  }
 0x2f3   : > { %4520 = vmatpush1.bf16.msra.mxu1 %v6147_v55  ;;  %4480 = vmatprep.subr.bf16.mxu0 %v6152_v45  ;;  %v6212_v55 = vld [vmem:[#allocation7 + $0x324] ss:$48 sps:$4 sm:$0xff]  }
 0x2f4   : > { %4521 = vmatprep.subr.bf16.mxu1 %v6155_v23  ;;  %v6215_v45 = vld [vmem:[#allocation7 + $0x924] ss:$48 sps:$4 sm:$0xff]   ;;  %v6210_v23 = vld [vmem:[#allocation7 + $0x320] ss:$48 sps:$4 sm:$0xff]  }
 0x2f6   : > { %4481 = vmatpush1.bf16.msra.mxu0 %v6150_v28  ;;  %v6213_v28 = vld [vmem:[#allocation7 + $0x920] ss:$48 sps:$4 sm:$0xff]  }
 0x2f7   : > { %4522 = vmatpush1.bf16.msra.mxu1 %v6153_v58  ;;  %4482 = vmatprep.subr.bf16.mxu0 %v6158_v59  ;;  %v6218_v58 = vld [vmem:[#allocation7 + $0x384] ss:$48 sps:$4 sm:$0xff]  }
 0x2f8   : > { %4523 = vmatprep.subr.bf16.mxu1 %v6161_v60  ;;  %v6221_v59 = vld [vmem:[#allocation7 + $0x984] ss:$48 sps:$4 sm:$0xff]   ;;  %v6216_v60 = vld [vmem:[#allocation7 + $0x380] ss:$48 sps:$4 sm:$0xff]  }
 0x2fa   : > { %4483 = vmatpush1.bf16.msra.mxu0 %v6156_v61  ;;  %v6219_v61 = vld [vmem:[#allocation7 + $0x980] ss:$48 sps:$4 sm:$0xff]  }
 0x2fb   : > { %4524 = vmatpush1.bf16.msra.mxu1 %v6159_v62  ;;  %4534 = vmatprep.subr.bf16.mxu0 %v6164_v47  ;;  %v6224_v62 = vld [vmem:[#allocation7 + $0x3e4] ss:$48 sps:$4 sm:$0xff]  }
 0x2fc   : > { %4575 = vmatprep.subr.bf16.mxu1 %v6167_v26  ;;  %v6227_v47 = vld [vmem:[#allocation7 + $0x9e4] ss:$48 sps:$4 sm:$0xff]   ;;  %v6222_v26 = vld [vmem:[#allocation7 + $0x3e0] ss:$48 sps:$4 sm:$0xff]  }
 0x2fd   : > { %4485 = vmatmul.mubr.bf16.vlgmr.msra.gmra.mrb[12].mxu0 %v6902_v18 }
 0x2fe   : > { %4526 = vmatmul.mubr.bf16.vlgmr.msra.gmra.mrb[12].mxu1 %v6906_v19  ;;  %4535 = vmatpush1.bf16.msra.mxu0 %v6162_v57  ;;  %v6225_v57 = vld [vmem:[#allocation7 + $0x9e0] ss:$48 sps:$4 sm:$0xff]  }
 0x2ff   : > { %4576 = vmatpush1.bf16.msra.mxu1 %v6165_v27  ;;  %4536 = vmatprep.subr.bf16.mxu0 %v6170_v3  ;;  %v6230_v27 = vld [vmem:[#allocation7 + $0x444] ss:$48 sps:$4 sm:$0xff]  }
 0x300   : > { %4577 = vmatprep.subr.bf16.mxu1 %v6173_v7  ;;  %4566 = vmatprep.mubr.bf16.mxu0 %v6892_v4  ;;  %v6233_v3 = vld [vmem:[#allocation7 + $0xa44] ss:$48 sps:$4 sm:$0xff]   ;;  %v6228_v7 = vld [vmem:[#allocation7 + $0x440] ss:$48 sps:$4 sm:$0xff]  }
 0x301   : > { %4607 = vmatprep.mubr.bf16.mxu1 %v6896_v6 }
 0x302   : > { %4537 = vmatpush1.bf16.msra.mxu0 %v6168_v8  ;;  %v6231_v8 = vld [vmem:[#allocation7 + $0xa40] ss:$48 sps:$4 sm:$0xff]  }
 0x303   : > { %4578 = vmatpush1.bf16.msra.mxu1 %v6171_v9  ;;  %4538 = vmatprep.subr.bf16.mxu0 %v6176_v10  ;;  %v6236_v9 = vld [vmem:[#allocation7 + $0x4a4] ss:$48 sps:$4 sm:$0xff]  }
 0x304   : > { %4579 = vmatprep.subr.bf16.mxu1 %v6179_v11  ;;  %v6239_v10 = vld [vmem:[#allocation7 + $0xaa4] ss:$48 sps:$4 sm:$0xff]   ;;  %v6234_v11 = vld [vmem:[#allocation7 + $0x4a0] ss:$48 sps:$4 sm:$0xff]  }
 0x306   : > { %4539 = vmatpush1.bf16.msra.mxu0 %v6174_v12  ;;  %v6237_v12 = vld [vmem:[#allocation7 + $0xaa0] ss:$48 sps:$4 sm:$0xff]  }
 0x307   : > { %4580 = vmatpush1.bf16.msra.mxu1 %v6177_v13  ;;  %4540 = vmatprep.subr.bf16.mxu0 %v6182_v14  ;;  %v6242_v13 = vld [vmem:[#allocation7 + $0x504] ss:$48 sps:$4 sm:$0xff]  }
 0x308   : > { %4581 = vmatprep.subr.bf16.mxu1 %v6185_v17  ;;  %v6245_v14 = vld [vmem:[#allocation7 + $0xb04] ss:$48 sps:$4 sm:$0xff]   ;;  %v6240_v17 = vld [vmem:[#allocation7 + $0x500] ss:$48 sps:$4 sm:$0xff]  }
 0x30a   : > { %4541 = vmatpush1.bf16.msra.mxu0 %v6180_v20  ;;  %v6243_v20 = vld [vmem:[#allocation7 + $0xb00] ss:$48 sps:$4 sm:$0xff]  }
 0x30b   : > { %4582 = vmatpush1.bf16.msra.mxu1 %v6183_v21  ;;  %4542 = vmatprep.subr.bf16.mxu0 %v6188_v22  ;;  %v6248_v21 = vld [vmem:[#allocation7 + $0x564] ss:$48 sps:$4 sm:$0xff]  }
 0x30c   : > { %4583 = vmatprep.subr.bf16.mxu1 %v6191_v5  ;;  %v6251_v22 = vld [vmem:[#allocation7 + $0xb64] ss:$48 sps:$4 sm:$0xff]   ;;  %v6246_v5 = vld [vmem:[#allocation7 + $0x560] ss:$48 sps:$4 sm:$0xff]  }
 0x30e   : > { %4543 = vmatpush1.bf16.msra.mxu0 %v6186_v29  ;;  %v6249_v29 = vld [vmem:[#allocation7 + $0xb60] ss:$48 sps:$4 sm:$0xff]  }
 0x30f   : > { %4584 = vmatpush1.bf16.msra.mxu1 %v6189_v30  ;;  %4544 = vmatprep.subr.bf16.mxu0 %v6194_v31  ;;  %v6254_v30 = vld [vmem:[#allocation7 + $0x5c4] ss:$48 sps:$4 sm:$0xff]  }
 0x310   : > { %4585 = vmatprep.subr.bf16.mxu1 %v6197_v32  ;;  %v4240_v39 = vpop.f32.mrb[0].mxu0  ;;  %v6257_v31 = vld [vmem:[#allocation7 + $0xbc4] ss:$48 sps:$4 sm:$0xff]   ;;  %v6252_v32 = vld [vmem:[#allocation7 + $0x5c0] ss:$48 sps:$4 sm:$0xff]  }
 0x311   : > { %v4281_v40 = vpop.f32.mrb[0].mxu1  ;;  %v4242_v42 = vpop.f32.mrb[1].mxu0 }
 0x312   : > { %v6924_v41 = vadd.f32 %v4281_v40, %v4240_v39  ;;  %v4283_v35 = vpop.f32.mrb[1].mxu1  ;;  %v4244_v44 = vpop.f32.mrb[2].mxu0  ;;  %4545 = vmatpush1.bf16.msra.mxu0 %v6192_v34  ;;  %v6255_v34 = vld [vmem:[#allocation7 + $0xbc0] ss:$48 sps:$4 sm:$0xff]   ;;  %v6261_v39 = vld [vmem:[#allocation7 + $0x628] ss:$48 sps:$4 sm:$0xff]  }
 0x313   : > { %v6926_v43 = vadd.f32 %v4283_v35, %v4242_v42  ;;  %v4285_v46 = vpop.f32.mrb[2].mxu1  ;;  %4586 = vmatpush1.bf16.msra.mxu1 %v6195_v36  ;;  %v4245_v50 = vpop.f32.mrb[3].mxu0  ;;  %4546 = vmatprep.subr.bf16.mxu0 %v6200_v37  ;;  %v6260_v36 = vld [vmem:[#allocation7 + $0x2c] ss:$48 sps:$4 sm:$0xff]   ;;  %v6264_v35 = vld [vmem:[#allocation7 + $0x88] ss:$48 sps:$4 sm:$0xff]  }
 0x314   : > { %v4286_v51 = vpop.f32.mrb[3].mxu1  ;;  %4587 = vmatprep.subr.bf16.mxu1 %v6203_v38  ;;  %v6263_v37 = vld [vmem:[#allocation7 + $0x62c] ss:$48 sps:$4 sm:$0xff]   ;;  %v6258_v38 = vld [vmem:[#allocation7 + $0x28] ss:$48 sps:$4 sm:$0xff]  }
 0x315   : > { %v6266_v40 = vld [vmem:[#allocation7 + $0x8c] ss:$48 sps:$4 sm:$0xff]   ;;  %v6267_v44 = vld [vmem:[#allocation7 + $0x688] ss:$48 sps:$4 sm:$0xff]  }
 0x316   : > { %4547 = vmatpush1.bf16.msra.mxu0 %v6198_v48  ;;  %v6269_v42 = vld [vmem:[#allocation7 + $0x68c] ss:$48 sps:$4 sm:$0xff]   ;;  %v6273_v50 = vld [vmem:[#allocation7 + $0x6e8] ss:$48 sps:$4 sm:$0xff]  }
 0x317   : > { %4588 = vmatpush1.bf16.msra.mxu1 %v6201_v49  ;;  %4548 = vmatprep.subr.bf16.mxu0 %v6206_v15  ;;  %v6272_v46 = vld [vmem:[#allocation7 + $0xec] ss:$48 sps:$4 sm:$0xff]   ;;  %v6270_v49 = vld [vmem:[#allocation7 + $0xe8] ss:$48 sps:$4 sm:$0xff]  }
 0x318   : > { %4589 = vmatprep.subr.bf16.mxu1 %v6209_v52  ;;  %v6275_v48 = vld [vmem:[#allocation7 + $0x6ec] ss:$48 sps:$4 sm:$0xff]   ;;  %v6276_v52 = vld [vmem:[#allocation7 + $0x148] ss:$48 sps:$4 sm:$0xff]  }
 0x319   : > { %v6278_v51 = vld [vmem:[#allocation7 + $0x14c] ss:$48 sps:$4 sm:$0xff]  }
 0x31a   : > { %4549 = vmatpush1.bf16.msra.mxu0 %v6204_v53  ;;  %v6281_v15 = vld [vmem:[#allocation7 + $0x74c] ss:$48 sps:$4 sm:$0xff]   ;;  %v6279_v53 = vld [vmem:[#allocation7 + $0x748] ss:$48 sps:$4 sm:$0xff]  }
 0x31b   : > { %4590 = vmatpush1.bf16.msra.mxu1 %v6207_v54  ;;  %4550 = vmatprep.subr.bf16.mxu0 %v6212_v55  ;;  %v6284_v54 = vld [vmem:[#allocation7 + $0x1ac] ss:$48 sps:$4 sm:$0xff]  }
 0x31c   : > { %4591 = vmatprep.subr.bf16.mxu1 %v6215_v45  ;;  %v6287_v55 = vld [vmem:[#allocation7 + $0x7ac] ss:$48 sps:$4 sm:$0xff]  }
 0x31d   : > { %v6290_v45 = vld [vmem:[#allocation7 + $0x20c] ss:$48 sps:$4 sm:$0xff]  }
 0x31e   : > { %4551 = vmatpush1.bf16.msra.mxu0 %v6210_v23  ;;  %v6293_v23 = vld [vmem:[#allocation7 + $0x80c] ss:$48 sps:$4 sm:$0xff]  }
 0x31f   : > { %4592 = vmatpush1.bf16.msra.mxu1 %v6213_v28  ;;  %4552 = vmatprep.subr.bf16.mxu0 %v6218_v58  ;;  %v6288_v28 = vld [vmem:[#allocation7 + $0x208] ss:$48 sps:$4 sm:$0xff]  }
 0x320   : > { %4593 = vmatprep.subr.bf16.mxu1 %v6221_v59  ;;  %v6291_v58 = vld [vmem:[#allocation7 + $0x808] ss:$48 sps:$4 sm:$0xff]   ;;  %v6296_v59 = vld [vmem:[#allocation7 + $0x26c] ss:$48 sps:$4 sm:$0xff]  }
 0x322   : > { %4553 = vmatpush1.bf16.msra.mxu0 %v6216_v60  ;;  %v6299_v60 = vld [vmem:[#allocation7 + $0x86c] ss:$48 sps:$4 sm:$0xff]  }
 0x323   : > { %4594 = vmatpush1.bf16.msra.mxu1 %v6219_v61  ;;  %4554 = vmatprep.subr.bf16.mxu0 %v6224_v62 }
 0x324   : > { %4595 = vmatprep.subr.bf16.mxu1 %v6227_v47 }
 0x326   : > { %4555 = vmatpush1.bf16.msra.mxu0 %v6222_v26 }
 0x327   : > { %4596 = vmatpush1.bf16.msra.mxu1 %v6225_v57  ;;  %4556 = vmatprep.subr.bf16.mxu0 %v6230_v27 }
 0x328   : > { %4597 = vmatprep.subr.bf16.mxu1 %v6233_v3 }
 0x32a   : > { %4557 = vmatpush1.bf16.msra.mxu0 %v6228_v7 }
 0x32b   : > { %4598 = vmatpush1.bf16.msra.mxu1 %v6231_v8  ;;  %4558 = vmatprep.subr.bf16.mxu0 %v6236_v9  ;;  %v6294_v8 = vld [vmem:[#allocation7 + $0x268] ss:$48 sps:$4 sm:$0xff]  }
 0x32c   : > { %4599 = vmatprep.subr.bf16.mxu1 %v6239_v10  ;;  %v6297_v9 = vld [vmem:[#allocation7 + $0x868] ss:$48 sps:$4 sm:$0xff]  }
 0x32e   : > { %4559 = vmatpush1.bf16.msra.mxu0 %v6234_v11 }
 0x32f   : > { %4600 = vmatpush1.bf16.msra.mxu1 %v6237_v12  ;;  %4560 = vmatprep.subr.bf16.mxu0 %v6242_v13  ;;  %v6302_v12 = vld [vmem:[#allocation7 + $0x2cc] ss:$48 sps:$4 sm:$0xff]  }
 0x330   : > { %4601 = vmatprep.subr.bf16.mxu1 %v6245_v14  ;;  %v6305_v13 = vld [vmem:[#allocation7 + $0x8cc] ss:$48 sps:$4 sm:$0xff]   ;;  %v6300_v14 = vld [vmem:[#allocation7 + $0x2c8] ss:$48 sps:$4 sm:$0xff]  }
 0x332   : > { %4561 = vmatpush1.bf16.msra.mxu0 %v6240_v17  ;;  %v6303_v17 = vld [vmem:[#allocation7 + $0x8c8] ss:$48 sps:$4 sm:$0xff]  }
 0x333   : > { %4602 = vmatpush1.bf16.msra.mxu1 %v6243_v20  ;;  %4562 = vmatprep.subr.bf16.mxu0 %v6248_v21  ;;  %v6308_v20 = vld [vmem:[#allocation7 + $0x32c] ss:$48 sps:$4 sm:$0xff]  }
 0x334   : > { %4603 = vmatprep.subr.bf16.mxu1 %v6251_v22  ;;  %v6311_v21 = vld [vmem:[#allocation7 + $0x92c] ss:$48 sps:$4 sm:$0xff]   ;;  %v6306_v22 = vld [vmem:[#allocation7 + $0x328] ss:$48 sps:$4 sm:$0xff]  }
 0x336   : > { %4563 = vmatpush1.bf16.msra.mxu0 %v6246_v5  ;;  %v6309_v5 = vld [vmem:[#allocation7 + $0x928] ss:$48 sps:$4 sm:$0xff]  }
 0x337   : > { %4604 = vmatpush1.bf16.msra.mxu1 %v6249_v29  ;;  %4564 = vmatprep.subr.bf16.mxu0 %v6254_v30  ;;  %v6314_v29 = vld [vmem:[#allocation7 + $0x38c] ss:$48 sps:$4 sm:$0xff]  }
 0x338   : > { %4605 = vmatprep.subr.bf16.mxu1 %v6257_v31  ;;  %v6317_v30 = vld [vmem:[#allocation7 + $0x98c] ss:$48 sps:$4 sm:$0xff]   ;;  %v6312_v31 = vld [vmem:[#allocation7 + $0x388] ss:$48 sps:$4 sm:$0xff]  }
 0x33a   : > { %4565 = vmatpush1.bf16.msra.mxu0 %v6252_v32  ;;  %v6315_v32 = vld [vmem:[#allocation7 + $0x988] ss:$48 sps:$4 sm:$0xff]  }
 0x33b   : > { %4606 = vmatpush1.bf16.msra.mxu1 %v6255_v34  ;;  %4616 = vmatprep.subr.bf16.mxu0 %v6260_v36  ;;  %v6320_v34 = vld [vmem:[#allocation7 + $0x3ec] ss:$48 sps:$4 sm:$0xff]  }
 0x33c   : > { %4657 = vmatprep.subr.bf16.mxu1 %v6263_v37  ;;  %v6323_v36 = vld [vmem:[#allocation7 + $0x9ec] ss:$48 sps:$4 sm:$0xff]   ;;  %v6318_v37 = vld [vmem:[#allocation7 + $0x3e8] ss:$48 sps:$4 sm:$0xff]  }
 0x33d   : > { %4567 = vmatmul.mubr.bf16.vlgmr.msra.gmra.mrb[16].mxu0 %v6902_v18 }
 0x33e   : > { %4608 = vmatmul.mubr.bf16.vlgmr.msra.gmra.mrb[16].mxu1 %v6906_v19  ;;  %4617 = vmatpush1.bf16.msra.mxu0 %v6258_v38  ;;  %v6321_v38 = vld [vmem:[#allocation7 + $0x9e8] ss:$48 sps:$4 sm:$0xff]  }
 0x33f   : > { %4658 = vmatpush1.bf16.msra.mxu1 %v6261_v39  ;;  %4618 = vmatprep.subr.bf16.mxu0 %v6266_v40  ;;  %v6326_v39 = vld [vmem:[#allocation7 + $0x44c] ss:$48 sps:$4 sm:$0xff]  }
 0x340   : > { %4659 = vmatprep.subr.bf16.mxu1 %v6269_v42  ;;  %4648 = vmatprep.mubr.bf16.mxu0 %v6892_v4  ;;  %v6282_v4 = vld [vmem:[#allocation7 + $0x1a8] ss:$48 sps:$4 sm:$0xff]   ;;  %v6329_v40 = vld [vmem:[#allocation7 + $0xa4c] ss:$48 sps:$4 sm:$0xff]  }
 0x341   : > { %4689 = vmatprep.mubr.bf16.mxu1 %v6896_v6  ;;  %v6285_v6 = vld [vmem:[#allocation7 + $0x7a8] ss:$48 sps:$4 sm:$0xff]  }
 0x342   : > { %4619 = vmatpush1.bf16.msra.mxu0 %v6264_v35  ;;  %v6324_v42 = vld [vmem:[#allocation7 + $0x448] ss:$48 sps:$4 sm:$0xff]  }
 0x343   : > { %4660 = vmatpush1.bf16.msra.mxu1 %v6267_v44  ;;  %4620 = vmatprep.subr.bf16.mxu0 %v6272_v46  ;;  %v6327_v35 = vld [vmem:[#allocation7 + $0xa48] ss:$48 sps:$4 sm:$0xff]   ;;  %v6332_v44 = vld [vmem:[#allocation7 + $0x4ac] ss:$48 sps:$4 sm:$0xff]  }
 0x344   : > { %4661 = vmatprep.subr.bf16.mxu1 %v6275_v48  ;;  %v6335_v46 = vld [vmem:[#allocation7 + $0xaac] ss:$48 sps:$4 sm:$0xff]   ;;  %v6330_v48 = vld [vmem:[#allocation7 + $0x4a8] ss:$48 sps:$4 sm:$0xff]  }
 0x346   : > { %4621 = vmatpush1.bf16.msra.mxu0 %v6270_v49  ;;  %v6333_v49 = vld [vmem:[#allocation7 + $0xaa8] ss:$48 sps:$4 sm:$0xff]  }
 0x347   : > { %4662 = vmatpush1.bf16.msra.mxu1 %v6273_v50  ;;  %4622 = vmatprep.subr.bf16.mxu0 %v6278_v51  ;;  %v6338_v50 = vld [vmem:[#allocation7 + $0x50c] ss:$48 sps:$4 sm:$0xff]  }
 0x348   : > { %4663 = vmatprep.subr.bf16.mxu1 %v6281_v15  ;;  %v6341_v51 = vld [vmem:[#allocation7 + $0xb0c] ss:$48 sps:$4 sm:$0xff]   ;;  %v6336_v15 = vld [vmem:[#allocation7 + $0x508] ss:$48 sps:$4 sm:$0xff]  }
 0x34a   : > { %4623 = vmatpush1.bf16.msra.mxu0 %v6276_v52  ;;  %v6339_v52 = vld [vmem:[#allocation7 + $0xb08] ss:$48 sps:$4 sm:$0xff]  }
 0x34b   : > { %4664 = vmatpush1.bf16.msra.mxu1 %v6279_v53  ;;  %4624 = vmatprep.subr.bf16.mxu0 %v6284_v54  ;;  %v6344_v53 = vld [vmem:[#allocation7 + $0x56c] ss:$48 sps:$4 sm:$0xff]  }
 0x34c   : > { %4665 = vmatprep.subr.bf16.mxu1 %v6287_v55  ;;  %v6347_v54 = vld [vmem:[#allocation7 + $0xb6c] ss:$48 sps:$4 sm:$0xff]   ;;  %v6342_v55 = vld [vmem:[#allocation7 + $0x568] ss:$48 sps:$4 sm:$0xff]  }
 0x34e   : > { %4625 = vmatpush1.bf16.msra.mxu0 %v6282_v4  ;;  %v6345_v4 = vld [vmem:[#allocation7 + $0xb68] ss:$48 sps:$4 sm:$0xff]  }
 0x34f   : > { %4666 = vmatpush1.bf16.msra.mxu1 %v6285_v6  ;;  %4626 = vmatprep.subr.bf16.mxu0 %v6290_v45  ;;  %v6350_v6 = vld [vmem:[#allocation7 + $0x5cc] ss:$48 sps:$4 sm:$0xff]  }
 0x350   : > { %4667 = vmatprep.subr.bf16.mxu1 %v6293_v23  ;;  %v4322_v61 = vpop.f32.mrb[4].mxu0  ;;  %v6353_v45 = vld [vmem:[#allocation7 + $0xbcc] ss:$48 sps:$4 sm:$0xff]   ;;  %v6348_v23 = vld [vmem:[#allocation7 + $0x5c8] ss:$48 sps:$4 sm:$0xff]  }
 0x351   : > { %v4363_v62 = vpop.f32.mrb[4].mxu1  ;;  %v4324_v26 = vpop.f32.mrb[5].mxu0 }
 0x352   : > { %v6932_v47 = vadd.f32 %v4363_v62, %v4322_v61  ;;  %v4365_v57 = vpop.f32.mrb[5].mxu1  ;;  %v4326_v3 = vpop.f32.mrb[6].mxu0  ;;  %4627 = vmatpush1.bf16.msra.mxu0 %v6288_v28  ;;  %v6351_v28 = vld [vmem:[#allocation7 + $0xbc8] ss:$48 sps:$4 sm:$0xff]  }
 0x353   : > { %v6934_v27 = vadd.f32 %v4365_v57, %v4324_v26  ;;  %v4367_v7 = vpop.f32.mrb[6].mxu1  ;;  %4668 = vmatpush1.bf16.msra.mxu1 %v6291_v58  ;;  %v4327_v10 = vpop.f32.mrb[7].mxu0  ;;  %4628 = vmatprep.subr.bf16.mxu0 %v6296_v59 }
 0x354   : > { %v4368_v11 = vpop.f32.mrb[7].mxu1  ;;  %4669 = vmatprep.subr.bf16.mxu1 %v6299_v60 }
 0x356   : > { %4629 = vmatpush1.bf16.msra.mxu0 %v6294_v8 }
 0x357   : > { %4670 = vmatpush1.bf16.msra.mxu1 %v6297_v9  ;;  %4630 = vmatprep.subr.bf16.mxu0 %v6302_v12 }
 0x358   : > { %4671 = vmatprep.subr.bf16.mxu1 %v6305_v13 }
 0x35a   : > { %4631 = vmatpush1.bf16.msra.mxu0 %v6300_v14 }
 0x35b   : > { %4672 = vmatpush1.bf16.msra.mxu1 %v6303_v17  ;;  %4632 = vmatprep.subr.bf16.mxu0 %v6308_v20 }
 0x35c   : > { %4673 = vmatprep.subr.bf16.mxu1 %v6311_v21  ;;  %v1886_v21 = vld [vmem:[%s6943_s6] sm:$0xff] }
 0x35e   : > { %4633 = vmatpush1.bf16.msra.mxu0 %v6306_v22  ;;  %v1887_v22 = vld [vmem:[%s6943_s6 + $0x8] sm:$0xff] }
 0x35f   : > { %4674 = vmatpush1.bf16.msra.mxu1 %v6309_v5  ;;  %4634 = vmatprep.subr.bf16.mxu0 %v6314_v29  ;;  %v4698_v5 = vadd.f32 %v6924_v41, %v1886_v21  ;;  %v4699_v29 = vadd.f32 %v6926_v43, %v1887_v22 }
 0x360   : > { %4675 = vmatprep.subr.bf16.mxu1 %v6317_v30 }
 0x361   : > { %v5423_v30 = vmul.f32 -1.442695, %v4698_v5 }
 0x362   : > { %4635 = vmatpush1.bf16.msra.mxu0 %v6312_v31  ;;  %v5424_v31 = vmul.f32 -1.442695, %v4699_v29  ;;  %v1888_v29 = vld [vmem:[%s6943_s6 + $0x10] sm:$0xff] }
 0x363   : > { %4676 = vmatpush1.bf16.msra.mxu1 %v6315_v32  ;;  %4636 = vmatprep.subr.bf16.mxu0 %v6320_v34  ;;  %6354 = vpow2.f32 %v5423_v30  ;;  %v1890_v32 = vld [vmem:[%s6943_s6 + $0x20] sm:$0xff]  ;;  %v1891_v34 = vld [vmem:[%s6943_s6 + $0x28] sm:$0xff]  ;;  %v1889_v30 = vld [vmem:[%s6943_s6 + $0x18] sm:$0xff] }
 0x364   : > { %4677 = vmatprep.subr.bf16.mxu1 %v6323_v36  ;;  %6356 = vpow2.f32 %v5424_v31  ;;  %v4700_v31 = vadd.f32 %v6932_v47, %v1888_v29 }
 0x366   : > { %4637 = vmatpush1.bf16.msra.mxu0 %v6318_v37 }
 0x367   : > { %4678 = vmatpush1.bf16.msra.mxu1 %v6321_v38  ;;  %4638 = vmatprep.subr.bf16.mxu0 %v6326_v39 }
 0x368   : > { %4679 = vmatprep.subr.bf16.mxu1 %v6329_v40 }
 0x36a   : > { %4639 = vmatpush1.bf16.msra.mxu0 %v6324_v42 }
 0x36b   : > { %4680 = vmatpush1.bf16.msra.mxu1 %v6327_v35  ;;  %4640 = vmatprep.subr.bf16.mxu0 %v6332_v44 }
 0x36c   : > { %4681 = vmatprep.subr.bf16.mxu1 %v6335_v46  ;;  %v4758_v46 = vrot.slane %v6619_v0, %v6712_v16 }
 0x36d   : > { %v6355_v40 = vpop.eup %6354 }
 0x36e   : > { %4641 = vmatpush1.bf16.msra.mxu0 %v6330_v48  ;;  %v6357_v42 = vpop.eup %6356  ;;  %v4730_v35 = vadd.f32 1.0, %v6355_v40 }
 0x36f   : > { %4682 = vmatpush1.bf16.msra.mxu1 %v6333_v49  ;;  %4642 = vmatprep.subr.bf16.mxu0 %v6338_v50  ;;  %v4731_v44 = vadd.f32 1.0, %v6357_v42  ;;  %v4762_v50 = vrot.slane %v6619_v0, %v6720_v25 }
 0x370   : > { %4683 = vmatprep.subr.bf16.mxu1 %v6341_v51 }
 0x372   : > { %4643 = vmatpush1.bf16.msra.mxu0 %v6336_v15 }
 0x373   : > { %4684 = vmatpush1.bf16.msra.mxu1 %v6339_v52  ;;  %4644 = vmatprep.subr.bf16.mxu0 %v6344_v53 }
 0x374   : > { %4685 = vmatprep.subr.bf16.mxu1 %v6347_v54 }
 0x376   : > { %4645 = vmatpush1.bf16.msra.mxu0 %v6342_v55 }
 0x377   : > { %4686 = vmatpush1.bf16.msra.mxu1 %v6345_v4  ;;  %4646 = vmatprep.subr.bf16.mxu0 %v6350_v6 }
 0x378   : > { %4687 = vmatprep.subr.bf16.mxu1 %v6353_v45 }
 0x37a   : > { %4647 = vmatpush1.bf16.msra.mxu0 %v6348_v23 }
 0x37b   : > { %4688 = vmatpush1.bf16.msra.mxu1 %v6351_v28 }
 0x37d   : > { %4649 = vmatmul.mubr.bf16.vlgmr.msra.gmra.mrb[20].mxu0 %v6902_v18 }
 0x37e   : > { %4690 = vmatmul.mubr.bf16.vlgmr.msra.gmra.mrb[20].mxu1 %v6906_v19 }
 0x390   : > { %v4404_v58 = vpop.f32.mrb[8].mxu0 }
 0x391   : > { %v4445_v59 = vpop.f32.mrb[8].mxu1  ;;  %v4406_v61 = vpop.f32.mrb[9].mxu0 }
 0x392   : > { %v4446_v60 = vadd.f32 %v4445_v59, %v4404_v58  ;;  %v4447_v62 = vpop.f32.mrb[9].mxu1  ;;  %v4408_v57 = vpop.f32.mrb[10].mxu0  ;;  %v1894_v59 = vld [vmem:[%s6943_s6 + $0x40] sm:$0xff] }
 0x393   : > { %v4448_v26 = vadd.f32 %v4447_v62, %v4406_v61  ;;  %v4449_v3 = vpop.f32.mrb[10].mxu1  ;;  %v4409_v7 = vpop.f32.mrb[11].mxu0 }
 0x394   : > { %v4450_v8 = vpop.f32.mrb[11].mxu1  ;;  %v4702_v36 = vadd.f32 %v4446_v60, %v1890_v32  ;;  %v4701_v32 = vadd.f32 %v6934_v27, %v1889_v30 }
 0x395   : > { %v4703_v37 = vadd.f32 %v4448_v26, %v1891_v34  ;;  %v1895_v26 = vld [vmem:[%s6943_s6 + $0x48] sm:$0xff]  ;;  %v5425_v34 = vmul.f32 -1.442695, %v4700_v31 }
 0x396   : > { %v5427_v38 = vmul.f32 -1.442695, %v4702_v36  ;;  %v5426_v36 = vmul.f32 -1.442695, %v4701_v32 }
 0x397   : > { %v5428_v39 = vmul.f32 -1.442695, %v4703_v37  ;;  %v1892_v37 = vld [vmem:[%s6943_s6 + $0x30] sm:$0xff] }
 0x398   : > { %6358 = vpow2.f32 %v5427_v38  ;;  %v1893_v38 = vld [vmem:[%s6943_s6 + $0x38] sm:$0xff] }
 0x399   : > { %6360 = vpow2.f32 %v5428_v39 }
 0x39a   : > { %6362 = vrcp.f32 %v4730_v35 }
 0x39b   : > { %6364 = vrcp.f32 %v4731_v44 }
 0x3a2   : > { %v6359_v41 = vpop.eup %6358 }
 0x3a3   : > { %v6361_v43 = vpop.eup %6360  ;;  %v4734_v51 = vadd.f32 1.0, %v6359_v41 }
 0x3a4   : > { %v4735_v54 = vadd.f32 1.0, %v6361_v43  ;;  %v6363_v58 = vpop.eup %6362  ;;  %v4766_v43 = vrot.slane %v6619_v0, %v6717_v24 }
 0x3a5   : > { %v6365_v61 = vpop.eup %6364  ;;  %6366 = vrcp.f32 %v4734_v51 }
 0x3a6   : > { %6368 = vrcp.f32 %v4735_v54 }
 0x3af   : > { %v6367_v8 = vpop.eup %6366 }
 0x3d0   : > { %v4486_v9 = vpop.f32.mrb[12].mxu0 }
 0x3d1   : > { %v4527_v10 = vpop.f32.mrb[12].mxu1  ;;  %v4488_v12 = vpop.f32.mrb[13].mxu0 }
 0x3d2   : > { %v6938_v11 = vadd.f32 %v4527_v10, %v4486_v9  ;;  %v4529_v13 = vpop.f32.mrb[13].mxu1  ;;  %v4490_v19 = vpop.f32.mrb[14].mxu0  ;;  %v4791_v10 = vsub.f32 1.0, %v6367_v8 }
 0x3d3   : > { %v6940_v18 = vadd.f32 %v4529_v13, %v4488_v12  ;;  %v4531_v14 = vpop.f32.mrb[14].mxu1  ;;  %v4491_v17 = vpop.f32.mrb[15].mxu0 }
 0x3d4   : > { %v4532_v20 = vpop.f32.mrb[15].mxu1  ;;  %v6369_v9 = vpop.eup %6368  ;;  %v4799_v14 = vmul.f32 %v6522_v2, %v6367_v8  ;;  %v4704_v39 = vadd.f32 %v6938_v11, %v1892_v37 }
 0x3d5   : > { %v4792_v13 = vsub.f32 1.0, %v6369_v9  ;;  %v4800_v20 = vmul.f32 %v6518_v56, %v6369_v9  ;;  %v4705_v40 = vadd.f32 %v6940_v18, %v1893_v38  ;;  %v4770_v18 = vrot.slane %v6619_v0, %v6723_v33 }
 0x3d6   : > { %v5429_v42 = vmul.f32 -1.442695, %v4704_v39 }
 0x410   : > { %v4568_v48 = vpop.f32.mrb[16].mxu0 }
 0x411   : > { %v4609_v49 = vpop.f32.mrb[16].mxu1  ;;  %v4570_v52 = vpop.f32.mrb[17].mxu0 }
 0x412   : > { %v4610_v15 = vadd.f32 %v4609_v49, %v4568_v48  ;;  %v4611_v53 = vpop.f32.mrb[17].mxu1  ;;  %v4572_v4 = vpop.f32.mrb[18].mxu0 }
 0x413   : > { %v4612_v55 = vadd.f32 %v4611_v53, %v4570_v52  ;;  %v4613_v6 = vpop.f32.mrb[18].mxu1  ;;  %v4573_v23 = vpop.f32.mrb[19].mxu0 }
 0x414   : > { %v4775_v45 = vadd.f32 %v4758_v46, %v4610_v15  ;;  %v4614_v28 = vpop.f32.mrb[19].mxu1  ;;  %v1896_v23 = vld [vmem:[%s6943_s6 + $0x50] sm:$0xff] }
 0x415   : > { %v4776_v60 = vadd.f32 %v4762_v50, %v4612_v55 }
 0x416   : > { %v4779_v62 = vmul.f32 %v6363_v58, %v4775_v45 }
 0x417   : > { %v4780_v57 = vmul.f32 %v6365_v61, %v4776_v60  ;;  %v1897_v60 = vld [vmem:[%s6943_s6 + $0x58] sm:$0xff] }
 0x418   : > { %v4783_v3 = vadd.f32 %v4779_v62, %v1894_v59 }
 0x419   : > { %v4784_v7 = vadd.f32 %v4780_v57, %v1895_v26 }
 0x41a   : > { %6370 = vtanh.f32 %v4783_v3 }
 0x41b   : > { %6372 = vtanh.f32 %v4784_v7 }
 0x41c   : > { %6374 = vpow2.f32 %v5425_v34 }
 0x41d   : > { %6376 = vpow2.f32 %v5426_v36 }
 0x41e   : > { %6378 = vpow2.f32 %v5429_v42 }
 0x424   : > { %v6371_v12 = vpop.eup %6370 }
 0x425   : > { %v6373_v19 = vpop.eup %6372  ;;  %v4795_v17 = vmul.f32 %v6371_v12, %v4791_v10 }
 0x426   : > { %v4796_v21 = vmul.f32 %v6373_v19, %v4792_v13  ;;  %v6375_v35 = vpop.eup %6374 }
 0x427   : > { %v6959_v2 = vadd.f32 %v4799_v14, %v4795_v17   ;;  %v4732_v44 = vadd.f32 1.0, %v6375_v35 }
 0x428   : > { %v6961_v56 = vadd.f32 %v4800_v20, %v4796_v21  }
 0x429   : > { %v7012_v22 = vmov %v6959_v2  ;;  %v5430_v2 = vmul.f32 -1.442695, %v4705_v40 }
 0x42a   : > { %v7013_v5 = vmov %v6961_v56  ;;  %v6377_v56 = vpop.eup %6376  ;;  %4807 = vst [vmem:[%s7011_s5] sm:$0xff] (%p1872_p4), %v7012_v22 }
 0x42b   : > { %6380 = vpow2.f32 %v5430_v2  ;;  %v4733_v47 = vadd.f32 1.0, %v6377_v56  ;;  %v6379_v27 = vpop.eup %6378  ;;  %v7016_v56 = vmov %v7013_v5  ;;  %v7017_v2 = vmov %v7012_v22  ;;  %4808 = vst [vmem:[%s7011_s5 + $0x8] sm:$0xff] (%p1872_p4), %v7013_v5 }
 0x42c   : > { %6382 = vrcp.f32 %v4732_v44  ;;  %v4736_v48 = vadd.f32 1.0, %v6379_v27 }
 0x42d   : > { %6384 = vrcp.f32 %v4733_v47 }
 0x42e   : > { %6386 = vrcp.f32 %v4736_v48 }
 0x435   : > { %v6381_v41 = vpop.eup %6380 }
 0x436   : > { %v4737_v15 = vadd.f32 1.0, %v6381_v41  ;;  %v6383_v45 = vpop.eup %6382 }
 0x437   : > { %v6385_v58 = vpop.eup %6384 }
 0x438   : > { %6388 = vrcp.f32 %v4737_v15  ;;  %v6387_v57 = vpop.eup %6386 }
 0x439   : > { %v4793_v7 = vsub.f32 1.0, %v6387_v57  ;;  %v4801_v12 = vmul.f32 %v6514_v1, %v6387_v57 }
 0x442   : > { %v6389_v3 = vpop.eup %6388 }
 0x443   : > { %v4794_v9 = vsub.f32 1.0, %v6389_v3  ;;  %v4802_v19 = vmul.f32 %v6510_v63, %v6389_v3 }
 0x450   : > { %v4650_v46 = vpop.f32.mrb[20].mxu0 }
 0x451   : > { %v4691_v11 = vpop.f32.mrb[20].mxu1  ;;  %v4652_v50 = vpop.f32.mrb[21].mxu0 }
 0x452   : > { %v4692_v49 = vadd.f32 %v4691_v11, %v4650_v46  ;;  %v4693_v51 = vpop.f32.mrb[21].mxu1  ;;  %v4654_v53 = vpop.f32.mrb[22].mxu0 }
 0x453   : > { %v4694_v52 = vadd.f32 %v4693_v51, %v4652_v50  ;;  %v4695_v54 = vpop.f32.mrb[22].mxu1  ;;  %v4655_v4 = vpop.f32.mrb[23].mxu0 }
 0x454   : > { %v4777_v55 = vadd.f32 %v4766_v43, %v4692_v49  ;;  %v4696_v6 = vpop.f32.mrb[23].mxu1 }
 0x455   : > { %v4778_v28 = vadd.f32 %v4770_v18, %v4694_v52 }
 0x456   : > { %v4781_v59 = vmul.f32 %v6383_v45, %v4777_v55 }
 0x457   : > { %v4782_v61 = vmul.f32 %v6385_v58, %v4778_v28 }
 0x458   : > { %v4785_v62 = vadd.f32 %v4781_v59, %v1896_v23 }
 0x459   : > { %v4786_v26 = vadd.f32 %v4782_v61, %v1897_v60 }
 0x45a   : > { %6390 = vtanh.f32 %v4785_v62 }
 0x45b   : > { %6392 = vtanh.f32 %v4786_v26 }
 0x464   : > { %v6391_v8 = vpop.eup %6390  ;;  %1874 = sbr.rel (!%p1872_p4) target bundleno = 508 (0x1fc), region = 64 }
 0x465   : > { %v6393_v10 = vpop.eup %6392  ;;  %v4797_v13 = vmul.f32 %v6391_v8, %v4793_v7 }
 0x466   : > { %v4798_v14 = vmul.f32 %v6393_v10, %v4794_v9 }
 0x467   : > { %v4805_v17 = vadd.f32 %v4801_v12, %v4797_v13  }
 0x468   : > { %v4806_v20 = vadd.f32 %v4802_v19, %v4798_v14  }
 0x469   : > { %v7015_v1 = vmov %v4805_v17  ;;  %4809 = vst [vmem:[%s7011_s5 + $0x10] sm:$0xff] (%p1872_p4), %v4805_v17 }
 0x46a   : > { %v7014_v63 = vmov %v4806_v20  ;;  %4810 = vst [vmem:[%s7011_s5 + $0x18] sm:$0xff] (%p1872_p4), %v4806_v20 }
 0x46b   :  { %4815 = vsyncpa [#allocation4], 1 }
 0x46c   :  { %4816 = vsyncpa [#allocation6], 1 }
 0x46d   :  { %4817 = vsyncpa [#allocation9], 1 }

// kernel: seq2seq_forward.3
= control target key start
LH: loop header
LB: loop body
LE: loop exit
PB: predicated region body
PF: predicated region fallthrough
CT: control target
= control target key end

     0   :  { %15 = vsyncpa [#allocation4], 0  ;;  %s10837_s0 = inlined_call_operand.hbm [shape: s32[6], index: 0, kind: input, shape index: {}]   ;;  %s10838_s1 = inlined_call_operand.vmem [shape: s32[5,8], index: 1, kind: input, shape index: {}]   ;;  %s10839_s2 = inlined_call_operand.vmem [shape: f32[8,512], index: 2, kind: input, shape index: {}]   ;;  %s10840_s3 = inlined_call_operand.hbm [shape: bf16[128,1536], index: 3, kind: input, shape index: {}]   ;;  %s10841_s4 = inlined_call_operand.hbm [shape: bf16[512,3200], index: 4, kind: input, shape index: {}]   ;;  %s10842_s5 = inlined_call_operand.hbm [shape: f32[1,1024], index: 5, kind: input, shape index: {}]   ;;  %s10843_s6 = inlined_call_operand.hbm [shape: f32[1,512], index: 6, kind: input, shape index: {}]   ;;  %s10844_s7 = inlined_call_operand.hbm [shape: f32[1,512], index: 7, kind: input, shape index: {}]   ;;  %s10845_s8 = inlined_call_operand.hbm [shape: bf16[512,128], index: 8, kind: input, shape index: {}]   ;;  %s10846_s9 = inlined_call_operand.hbm [shape: f32[1,128], index: 9, kind: input, shape index: {}]   ;;  %s10847_s10 = inlined_call_operand.vmem [shape: f32[6,8,128], index: 10, kind: output, shape index: {}]  }
   0x1   :  { %16 = vsyncpa [#allocation5], 0 }
   0x2   :  { %17 = vsyncpa [#allocation3], 0 }
   0x3   :  { %18 = vsyncpa [#allocation9], 0 }
   0x4   :  { %19 = vsyncpa [#allocation12], 0 }
   0x5   :  { %20 = vsyncpa [#allocation15], 0  ;;  %s10306_s13 = smov [#allocation8]   ;;  %s10070_s17 = scalar_lea.hbm %s10841_s4, 102400 }
   0x6   :  { %s58_s14 = sshll.u32 %s10306_s13, 4  ;;  %p10071_p0 = scmp.ne.s32.totalorder %s10841_s4, %s10070_s17  ;;  %s59_s14 = int_to_ptr.vmem [resolvable:$true] %s58_s14 }
   0x7   :  { %p10074_p1 = scmp.lt.u32.totalorder %s10070_s17, %s10841_s4 }
   0x9   :  { %p10076_p2 = pnand %p10074_p1, %p10071_p0 }
   0xb   :  { %10079 = shalt.err (!%p10076_p2)
}
   0xc   :  { %s10080_s22 = scalar_lea.vmem %s59_s14, 102400  ;;  %p10085_p4 = scmp.lt.s32.totalorder %s59_s14, %s59_s14 }
   0xd   :  { %p10081_p3 = scmp.ne.s32.totalorder %s59_s14, %s10080_s22  ;;  %p10086_p5 = scmp.lt.s32.totalorder %s10080_s22, %s10080_s22 }
   0xf   :  { %p10087_p6 = por %p10086_p5, %p10085_p4 }
  0x11   :  { %p10088_p7 = pnand %p10087_p6, %p10081_p3 }
  0x13   :  { %10091 = shalt.err (!%p10088_p7)
}
  0x14   :  { %s10307_s23 = smov 1600   ;;  %s10308_s24 = smov 100  }
  0x15   :  { %64 = dma.hbm_to_vmem [thread:$0]  %s10841_s4, 102400, %s59_s14, [#allocation9], %s10307_s23, %s10307_s23, %s10308_s24  }
  0x16   :  { %s10309_s27 = smov [#allocation11]   ;;  %s10310_s29 = smov [#allocation14]  }
  0x17   :  { %s81_s28 = sshll.u32 %s10309_s27, 4  ;;  %s100_s30 = sshll.u32 %s10310_s29, 4  ;;  %s82_s28 = int_to_ptr.vmem [resolvable:$true] %s81_s28  ;;  %s101_s30 = int_to_ptr.vmem [resolvable:$true] %s100_s30 }
  0x18   :  { %s10092_s13 = scalar_lea.hbm %s10843_s6, 64 }
  0x19   :  { %p10093_p8 = scmp.ne.s32.totalorder %s10843_s6, %s10092_s13  ;;  %p10096_p9 = scmp.lt.u32.totalorder %s10092_s13, %s10843_s6 }
  0x1b   :  { %p10098_p10 = pnand %p10096_p9, %p10093_p8 }
  0x1d   :  { %10101 = shalt.err (!%p10098_p10)
}
  0x1e   :  { %s10102_s4 = scalar_lea.vmem %s82_s28, 64  ;;  %p10107_p12 = scmp.lt.s32.totalorder %s82_s28, %s82_s28 }
  0x1f   :  { %p10103_p11 = scmp.ne.s32.totalorder %s82_s28, %s10102_s4  ;;  %p10108_p13 = scmp.lt.s32.totalorder %s10102_s4, %s10102_s4 }
  0x21   :  { %p10109_p0 = por %p10108_p13, %p10107_p12 }
  0x23   :  { %p10110_p1 = pnand %p10109_p0, %p10103_p11 }
  0x25   :  { %10113 = shalt.err (!%p10110_p1)
}
  0x26   :  { %84 = dma.hbm_to_vmem [thread:$0]  %s10843_s6, 64, %s82_s28, [#allocation12]  }
  0x27   :  { %s10114_s22 = scalar_lea.hbm %s10845_s8, 4096 }
  0x28   :  { %p10115_p2 = scmp.ne.s32.totalorder %s10845_s8, %s10114_s22  ;;  %p10118_p3 = scmp.lt.u32.totalorder %s10114_s22, %s10845_s8 }
  0x2a   :  { %p10120_p4 = pnand %p10118_p3, %p10115_p2 }
  0x2c   :  { %10123 = shalt.err (!%p10120_p4)
}
  0x2d   :  { %s10124_s27 = scalar_lea.vmem %s101_s30, 4096  ;;  %p10129_p6 = scmp.lt.s32.totalorder %s101_s30, %s101_s30 }
  0x2e   :  { %p10125_p5 = scmp.ne.s32.totalorder %s101_s30, %s10124_s27  ;;  %p10130_p7 = scmp.lt.s32.totalorder %s10124_s27, %s10124_s27 }
  0x30   :  { %p10131_p8 = por %p10130_p7, %p10129_p6 }
  0x32   :  { %p10132_p9 = pnand %p10131_p8, %p10125_p5 }
  0x34   :  { %10135 = shalt.err (!%p10132_p9)
}
  0x35   :  { %s10311_s6 = smov 64   ;;  %s10312_s28 = smov 4  }
  0x36   :  { %106 = dma.hbm_to_vmem [thread:$0]  %s10845_s8, 4096, %s101_s30, [#allocation15], %s10311_s6, %s10311_s6, %s10312_s28  }
  0x37   :  { %s10136_s15 = scalar_lea.hbm %s10837_s0, 16 }
  0x38   :  { %p10137_p10 = scmp.ne.s32.totalorder %s10837_s0, %s10136_s15  ;;  %p10140_p11 = scmp.lt.u32.totalorder %s10136_s15, %s10837_s0 }
  0x3a   :  { %p10142_p12 = pnand %p10140_p11, %p10137_p10 }
  0x3c   :  { %10145 = shalt.err (!%p10142_p12)
}
  0x3d   :  { %s10313_s14 = smov [#allocation2]   ;;  %s35_s21 = sshll.u32 %s10838_s1, 4  ;;  %s36_s21 = int_to_ptr.vmem [resolvable:$true] %s35_s21 }
  0x3e   :  { %28 = dma.hbm_to_smem %s10837_s0, 16, %s10313_s14, [#allocation4]  }
  0x3f   :  { %s10146_s22 = scalar_lea.vmem %s36_s21, 128  ;;  %p10151_p0 = scmp.lt.s32.totalorder %s36_s21, %s36_s21 }
  0x40   :  { %p10147_p13 = scmp.ne.s32.totalorder %s36_s21, %s10146_s22  ;;  %p10152_p1 = scmp.lt.s32.totalorder %s10146_s22, %s10146_s22 }
  0x42   :  { %p10153_p2 = por %p10152_p1, %p10151_p0 }
  0x44   :  { %p10154_p3 = pnand %p10153_p2, %p10147_p13 }
  0x46   :  { %10157 = shalt.err (!%p10154_p3)
}
  0x47   :  { %s10314_s23 = smov [#allocation6]   ;;  %s10315_s24 = smov [#allocation7]  }
  0x48   :  { %38 = dma.vmem_to_smem %s36_s21, 128, %s10314_s23, [#allocation5]  }
  0x49   :  { %s46_s25 = sshll.u32 %s10315_s24, 4  ;;  %s10158_s0 = scalar_lea.hbm %s10840_s3, 12288  ;;  %s47_s25 = int_to_ptr.vmem [resolvable:$true] %s46_s25 }
  0x4a   :  { %p10159_p4 = scmp.ne.s32.totalorder %s10840_s3, %s10158_s0  ;;  %p10162_p5 = scmp.lt.u32.totalorder %s10158_s0, %s10840_s3 }
  0x4c   :  { %p10164_p6 = pnand %p10162_p5, %p10159_p4 }
  0x4e   :  { %10167 = shalt.err (!%p10164_p6)
}
  0x4f   :  { %s10168_s11 = scalar_lea.vmem %s47_s25, 12288  ;;  %p10173_p8 = scmp.lt.s32.totalorder %s47_s25, %s47_s25 }
  0x50   :  { %p10169_p7 = scmp.ne.s32.totalorder %s47_s25, %s10168_s11  ;;  %p10174_p9 = scmp.lt.s32.totalorder %s10168_s11, %s10168_s11 }
  0x52   :  { %p10175_p10 = por %p10174_p9, %p10173_p8 }
  0x54   :  { %p10176_p11 = pnand %p10175_p10, %p10169_p7 }
  0x56   :  { %10179 = shalt.err (!%p10176_p11)
}
  0x57   :  { %s10316_s12 = smov 768   ;;  %s10317_s13 = smov 48  }
  0x58   :  { %52 = dma.hbm_to_vmem [thread:$0]  %s10840_s3, 12288, %s47_s25, [#allocation3], %s10316_s12, %s10316_s12, %s10317_s13  }
  0x59   :  { %s10318_s17 = smov [#allocation10]   ;;  %s10319_s4 = smov [#allocation13]  }
  0x5a   :  { %s71_s18 = sshll.u32 %s10318_s17, 4  ;;  %s91_s14 = sshll.u32 %s10319_s4, 4  ;;  %s72_s18 = int_to_ptr.vmem [resolvable:$true] %s71_s18  ;;  %s92_s14 = int_to_ptr.vmem [resolvable:$true] %s91_s14 }
  0x5b   :  { %s10180_s8 = scalar_lea.hbm %s10842_s5, 128 }
  0x5c   :  { %p10181_p12 = scmp.ne.s32.totalorder %s10842_s5, %s10180_s8  ;;  %p10184_p13 = scmp.lt.u32.totalorder %s10180_s8, %s10842_s5 }
  0x5e   :  { %p10186_p0 = pnand %p10184_p13, %p10181_p12 }
  0x60   :  { %10189 = shalt.err (!%p10186_p0)
}
  0x61   :  { %s10190_s3 = scalar_lea.vmem %s72_s18, 128  ;;  %p10195_p2 = scmp.lt.s32.totalorder %s72_s18, %s72_s18 }
  0x62   :  { %p10191_p1 = scmp.ne.s32.totalorder %s72_s18, %s10190_s3  ;;  %p10196_p3 = scmp.lt.s32.totalorder %s10190_s3, %s10190_s3 }
  0x64   :  { %p10197_p4 = por %p10196_p3, %p10195_p2 }
  0x66   :  { %p10198_p5 = pnand %p10197_p4, %p10191_p1 }
  0x68   :  { %10201 = shalt.err (!%p10198_p5)
}
  0x69   :  { %74 = dma.hbm_to_vmem [thread:$0]  %s10842_s5, 128, %s72_s18, [#allocation9]  }
  0x6a   :  { %s10202_s0 = scalar_lea.hbm %s10844_s7, 64 }
  0x6b   :  { %p10203_p6 = scmp.ne.s32.totalorder %s10844_s7, %s10202_s0  ;;  %p10206_p7 = scmp.lt.u32.totalorder %s10202_s0, %s10844_s7 }
  0x6d   :  { %p10208_p8 = pnand %p10206_p7, %p10203_p6 }
  0x6f   :  { %10211 = shalt.err (!%p10208_p8)
}
  0x70   :  { %s10212_s11 = scalar_lea.vmem %s92_s14, 64  ;;  %p10217_p10 = scmp.lt.s32.totalorder %s92_s14, %s92_s14 }
  0x71   :  { %p10213_p9 = scmp.ne.s32.totalorder %s92_s14, %s10212_s11  ;;  %p10218_p11 = scmp.lt.s32.totalorder %s10212_s11, %s10212_s11 }
  0x73   :  { %p10219_p12 = por %p10218_p11, %p10217_p10 }
  0x75   :  { %p10220_p13 = pnand %p10219_p12, %p10213_p9 }
  0x77   :  { %10223 = shalt.err (!%p10220_p13)
}
  0x78   :  { %94 = dma.hbm_to_vmem [thread:$0]  %s10844_s7, 64, %s92_s14, [#allocation12]  }
  0x79   :  { %s10320_s13 = smov [#allocation16]   ;;  %s10224_s18 = scalar_lea.hbm %s10846_s9, 16 }
  0x7a   :  { %s113_s15 = sshll.u32 %s10320_s13, 4  ;;  %p10225_p0 = scmp.ne.s32.totalorder %s10846_s9, %s10224_s18  ;;  %s114_s15 = int_to_ptr.vmem [resolvable:$true] %s113_s15 }
  0x7b   :  { %p10228_p1 = scmp.lt.u32.totalorder %s10224_s18, %s10846_s9 }
  0x7d   :  { %p10230_p2 = pnand %p10228_p1, %p10225_p0 }
  0x7f   :  { %10233 = shalt.err (!%p10230_p2)
}
  0x80   :  { %s10234_s30 = scalar_lea.vmem %s114_s15, 16  ;;  %s10238_s7 = scalar_lea.vmem %s114_s15, 32 }
  0x81   :  { %p10235_p3 = scmp.ne.s32.totalorder %s114_s15, %s10234_s30  ;;  %p10239_p4 = scmp.lt.s32.totalorder %s114_s15, %s114_s15 }
  0x82   :  { %p10240_p5 = scmp.lt.s32.totalorder %s10238_s7, %s10234_s30 }
  0x84   :  { %p10241_p6 = por %p10240_p5, %p10239_p4 }
  0x86   :  { %p10242_p7 = pnand %p10241_p6, %p10235_p3 }
  0x88   :  { %10245 = shalt.err (!%p10242_p7)
}
  0x89   :  { %116 = dma.hbm_to_vmem [thread:$0]  %s10846_s9, 16, %s114_s15, [#allocation15]  }
  0x8a   :  { %10270 = dma.done.wait [#allocation4], 16  }
  0x8b   :  { %10271 = vsyncadd [#allocation4], 4294967280 }
  0x8c   :  { %10272 = dma.done.wait [#allocation5], 128  }
  0x8d   :  { %10273 = vsyncadd [#allocation5], 4294967168 }
  0x8e   :  { %10274 = dma.done.wait [#allocation3], 12288  }
  0x8f   :  { %10275 = vsyncadd [#allocation3], 4294955008 }
  0x90   :  { %10276 = dma.done.wait [#allocation9], 102528  }
  0x91   :  { %10277 = vsyncadd [#allocation9], 4294864768 }
  0x92   :  { %10278 = dma.done.wait [#allocation12], 128  }
  0x93   :  { %10279 = vsyncadd [#allocation12], 4294967168 }
  0x94   :  { %10280 = dma.done.wait [#allocation15], 4112  }
  0x95   :  { %10281 = vsyncadd [#allocation15], 4294963184 }
  0x96   :  { %144 = sfence }
  0x97   :  { %v10478_v0 = vld [vmem:[#allocation10] sm:$0xff]  ;;  %v10480_v1 = vld [vmem:[#allocation11] sm:$0xf]  ;;  %v10482_v2 = vld [vmem:[#allocation13] sm:$0xf]  ;;  %v151_v3 = vlaneseq  ;;  %v10321_v4 = vmov 0.0  }
  0x98   :  { %146 = vst [vmem:[%s10847_s10] sm:$0xff] %v10321_v4  ;;  %v10487_v5 = vld [vmem:[#allocation16] ss:$0 sm:$0xff]  ;;  %v155_v6 = vld [vmem:[%s10839_s2] sm:$0xff]   ;;  %v156_v7 = vld [vmem:[%s10839_s2 + $0x8] sm:$0xff]   ;;  %v10505_v12 = vmov 0   ;;  %s10515_s28 = smov 0  }
  0x99   :  { %v10495_v8 = vand.u32 127, %v151_v3  ;;  %v10497_v9 = vshrl.u32 %v151_v3, 7  ;;  %v157_v10 = vld [vmem:[%s10839_s2 + $0x10] sm:$0xff]   ;;  %v158_v11 = vld [vmem:[%s10839_s2 + $0x18] sm:$0xff]  }
  0x9a LB: > { %v8670_v13 = vld [vmem:[#allocation8 + $0x4] ss:$100 sps:$4 sm:$0xff]   ;;  %v10537_v17 = vpack.c.bf16 %v10296_v7, %v10296_v7  ;;  %v10541_v18 = vpack.c.bf16 %v10288_v11, %v10288_v11  ;;  %v8676_v19 = vld [vmem:[#allocation8 + $0xcc] ss:$100 sps:$4 sm:$0xff]   ;;  %v8682_v23 = vld [vmem:[#allocation8 + $0x194] ss:$100 sps:$4 sm:$0xff]   ;;  %s10304_s28 = sphi %s10515_s28, %s164_s28   ;;  %v10300_v6 = vphi %v155_v6, %v7155_v6   ;;  %v10296_v7 = vphi %v156_v7, %v7156_v7   ;;  %v10292_v10 = vphi %v157_v10, %v7157_v10   ;;  %v10288_v11 = vphi %v158_v11, %v7158_v11   ;;  %v10284_v12 = vphi %v10505_v12, %v7529_v12  }
  0x9b   : > { %v8672_v14 = vld [vmem:[#allocation8 + $0xc84] ss:$100 sps:$4 sm:$0xff]   ;;  %5186 = vmatprep.subr.bf16.mxu0 %v8670_v13  ;;  %v8678_v20 = vld [vmem:[#allocation8 + $0xd4c] ss:$100 sps:$4 sm:$0xff]   ;;  %v8684_v24 = vld [vmem:[#allocation8 + $0xe14] ss:$100 sps:$4 sm:$0xff]  }
  0x9c   : > { %v8674_v15 = vld [vmem:[#allocation8] ss:$100 sps:$4 sm:$0xff]   ;;  %5227 = vmatprep.subr.bf16.mxu1 %v8672_v14  ;;  %v8680_v21 = vld [vmem:[#allocation8 + $0xc8] ss:$100 sps:$4 sm:$0xff]   ;;  %5218 = vmatprep.mubr.bf16.mxu0 %v10537_v17  ;;  %v8686_v25 = vld [vmem:[#allocation8 + $0x190] ss:$100 sps:$4 sm:$0xff]  }
  0x9d   : > { %v8675_v16 = vld [vmem:[#allocation8 + $0xc80] ss:$100 sps:$4 sm:$0xff]   ;;  %5187 = vmatpush1.bf16.msra.mxu0 %v8674_v15  ;;  %v8681_v22 = vld [vmem:[#allocation8 + $0xd48] ss:$100 sps:$4 sm:$0xff]   ;;  %5259 = vmatprep.mubr.bf16.mxu1 %v10541_v18  ;;  %v8687_v26 = vld [vmem:[#allocation8 + $0xe10] ss:$100 sps:$4 sm:$0xff]  }
  0x9e   : > { %5228 = vmatpush1.bf16.msra.mxu1 %v8675_v16  ;;  %5188 = vmatprep.subr.bf16.mxu0 %v8676_v19  ;;  %v8688_v27 = vld [vmem:[#allocation8 + $0x25c] ss:$100 sps:$4 sm:$0xff]   ;;  %v8694_v31 = vld [vmem:[#allocation8 + $0x324] ss:$100 sps:$4 sm:$0xff]   ;;  %v8700_v35 = vld [vmem:[#allocation8 + $0x3ec] ss:$100 sps:$4 sm:$0xff]  }
  0x9f   : > { %5229 = vmatprep.subr.bf16.mxu1 %v8678_v20  ;;  %v8690_v28 = vld [vmem:[#allocation8 + $0xedc] ss:$100 sps:$4 sm:$0xff]   ;;  %v8696_v32 = vld [vmem:[#allocation8 + $0xfa4] ss:$100 sps:$4 sm:$0xff]   ;;  %v8702_v36 = vld [vmem:[#allocation8 + $0x106c] ss:$100 sps:$4 sm:$0xff]  }
  0xa0   : > { %v8692_v29 = vld [vmem:[#allocation8 + $0x258] ss:$100 sps:$4 sm:$0xff]   ;;  %v8698_v33 = vld [vmem:[#allocation8 + $0x320] ss:$100 sps:$4 sm:$0xff]   ;;  %v8704_v37 = vld [vmem:[#allocation8 + $0x3e8] ss:$100 sps:$4 sm:$0xff]  }
  0xa1   : > { %5189 = vmatpush1.bf16.msra.mxu0 %v8680_v21  ;;  %v8693_v30 = vld [vmem:[#allocation8 + $0xed8] ss:$100 sps:$4 sm:$0xff]   ;;  %v8699_v34 = vld [vmem:[#allocation8 + $0xfa0] ss:$100 sps:$4 sm:$0xff]   ;;  %v8705_v38 = vld [vmem:[#allocation8 + $0x1068] ss:$100 sps:$4 sm:$0xff]  }
  0xa2   : > { %5230 = vmatpush1.bf16.msra.mxu1 %v8681_v22  ;;  %5190 = vmatprep.subr.bf16.mxu0 %v8682_v23  ;;  %v8706_v39 = vld [vmem:[#allocation8 + $0x4b4] ss:$100 sps:$4 sm:$0xff]   ;;  %v8712_v43 = vld [vmem:[#allocation8 + $0x57c] ss:$100 sps:$4 sm:$0xff]   ;;  %v8718_v47 = vld [vmem:[#allocation8 + $0x644] ss:$100 sps:$4 sm:$0xff]  }
  0xa3   : > { %5231 = vmatprep.subr.bf16.mxu1 %v8684_v24  ;;  %v8708_v40 = vld [vmem:[#allocation8 + $0x1134] ss:$100 sps:$4 sm:$0xff]   ;;  %v8714_v44 = vld [vmem:[#allocation8 + $0x11fc] ss:$100 sps:$4 sm:$0xff]   ;;  %v8720_v48 = vld [vmem:[#allocation8 + $0x12c4] ss:$100 sps:$4 sm:$0xff]  }
  0xa4   : > { %v8710_v41 = vld [vmem:[#allocation8 + $0x4b0] ss:$100 sps:$4 sm:$0xff]   ;;  %v8716_v45 = vld [vmem:[#allocation8 + $0x578] ss:$100 sps:$4 sm:$0xff]   ;;  %v8722_v49 = vld [vmem:[#allocation8 + $0x640] ss:$100 sps:$4 sm:$0xff]  }
  0xa5   : > { %5191 = vmatpush1.bf16.msra.mxu0 %v8686_v25  ;;  %v8711_v42 = vld [vmem:[#allocation8 + $0x1130] ss:$100 sps:$4 sm:$0xff]   ;;  %v8717_v46 = vld [vmem:[#allocation8 + $0x11f8] ss:$100 sps:$4 sm:$0xff]   ;;  %v8723_v50 = vld [vmem:[#allocation8 + $0x12c0] ss:$100 sps:$4 sm:$0xff]  }
  0xa6   : > { %5232 = vmatpush1.bf16.msra.mxu1 %v8687_v26  ;;  %5192 = vmatprep.subr.bf16.mxu0 %v8688_v27  ;;  %v8724_v51 = vld [vmem:[#allocation8 + $0x70c] ss:$100 sps:$4 sm:$0xff]   ;;  %v8730_v55 = vld [vmem:[#allocation8 + $0x7d4] ss:$100 sps:$4 sm:$0xff]   ;;  %v8736_v59 = vld [vmem:[#allocation8 + $0x89c] ss:$100 sps:$4 sm:$0xff]  }
  0xa7   : > { %5233 = vmatprep.subr.bf16.mxu1 %v8690_v28  ;;  %v8726_v52 = vld [vmem:[#allocation8 + $0x138c] ss:$100 sps:$4 sm:$0xff]   ;;  %v8732_v56 = vld [vmem:[#allocation8 + $0x1454] ss:$100 sps:$4 sm:$0xff]   ;;  %v8738_v60 = vld [vmem:[#allocation8 + $0x151c] ss:$100 sps:$4 sm:$0xff]  }
  0xa8   : > { %v8728_v53 = vld [vmem:[#allocation8 + $0x708] ss:$100 sps:$4 sm:$0xff]   ;;  %v8734_v57 = vld [vmem:[#allocation8 + $0x7d0] ss:$100 sps:$4 sm:$0xff]   ;;  %v8740_v61 = vld [vmem:[#allocation8 + $0x898] ss:$100 sps:$4 sm:$0xff]  }
  0xa9   : > { %5193 = vmatpush1.bf16.msra.mxu0 %v8692_v29  ;;  %v8729_v54 = vld [vmem:[#allocation8 + $0x1388] ss:$100 sps:$4 sm:$0xff]   ;;  %v8735_v58 = vld [vmem:[#allocation8 + $0x1450] ss:$100 sps:$4 sm:$0xff]   ;;  %v8741_v62 = vld [vmem:[#allocation8 + $0x1518] ss:$100 sps:$4 sm:$0xff]  }
  0xaa   : > { %5234 = vmatpush1.bf16.msra.mxu1 %v8693_v30  ;;  %5194 = vmatprep.subr.bf16.mxu0 %v8694_v31  ;;  %v8742_v63 = vld [vmem:[#allocation8 + $0x964] ss:$100 sps:$4 sm:$0xff]   ;;  %v8748_v14 = vld [vmem:[#allocation8 + $0xa2c] ss:$100 sps:$4 sm:$0xff]   ;;  %v8754_v20 = vld [vmem:[#allocation8 + $0xaf4] ss:$100 sps:$4 sm:$0xff]   ;;  %v10547_v30 = vpack.c.bf16 %v10300_v6, %v10300_v6  ;;  %v10551_v31 = vpack.c.bf16 %v10292_v10, %v10292_v10 }
  0xab   : > { %5235 = vmatprep.subr.bf16.mxu1 %v8696_v32  ;;  %v8744_v3 = vld [vmem:[#allocation8 + $0x15e4] ss:$100 sps:$4 sm:$0xff]   ;;  %v8750_v15 = vld [vmem:[#allocation8 + $0x16ac] ss:$100 sps:$4 sm:$0xff]   ;;  %v8756_v21 = vld [vmem:[#allocation8 + $0x1774] ss:$100 sps:$4 sm:$0xff]  }
  0xac   : > { %v8746_v4 = vld [vmem:[#allocation8 + $0x960] ss:$100 sps:$4 sm:$0xff]   ;;  %v8752_v16 = vld [vmem:[#allocation8 + $0xa28] ss:$100 sps:$4 sm:$0xff]   ;;  %v8758_v22 = vld [vmem:[#allocation8 + $0xaf0] ss:$100 sps:$4 sm:$0xff]  }
  0xad   : > { %5195 = vmatpush1.bf16.msra.mxu0 %v8698_v33  ;;  %v8747_v13 = vld [vmem:[#allocation8 + $0x15e0] ss:$100 sps:$4 sm:$0xff]   ;;  %v8753_v19 = vld [vmem:[#allocation8 + $0x16a8] ss:$100 sps:$4 sm:$0xff]   ;;  %v8759_v23 = vld [vmem:[#allocation8 + $0x1770] ss:$100 sps:$4 sm:$0xff]  }
  0xae   : > { %5236 = vmatpush1.bf16.msra.mxu1 %v8699_v34  ;;  %5196 = vmatprep.subr.bf16.mxu0 %v8700_v35  ;;  %v8760_v24 = vld [vmem:[#allocation8 + $0xbbc] ss:$100 sps:$4 sm:$0xff]   ;;  %v8768_v28 = vld [vmem:[#allocation8 + $0xc] ss:$100 sps:$4 sm:$0xff]   ;;  %v8774_v34 = vld [vmem:[#allocation8 + $0xd4] ss:$100 sps:$4 sm:$0xff]  }
  0xaf   : > { %5237 = vmatprep.subr.bf16.mxu1 %v8702_v36  ;;  %v8762_v25 = vld [vmem:[#allocation8 + $0x183c] ss:$100 sps:$4 sm:$0xff]   ;;  %v8771_v29 = vld [vmem:[#allocation8 + $0xc8c] ss:$100 sps:$4 sm:$0xff]   ;;  %v8777_v35 = vld [vmem:[#allocation8 + $0xd54] ss:$100 sps:$4 sm:$0xff]  }
  0xb0   : > { %v8764_v26 = vld [vmem:[#allocation8 + $0xbb8] ss:$100 sps:$4 sm:$0xff]   ;;  %v8766_v32 = vld [vmem:[#allocation8 + $0x8] ss:$100 sps:$4 sm:$0xff]   ;;  %v8772_v36 = vld [vmem:[#allocation8 + $0xd0] ss:$100 sps:$4 sm:$0xff]  }
  0xb1   : > { %5197 = vmatpush1.bf16.msra.mxu0 %v8704_v37  ;;  %v8765_v27 = vld [vmem:[#allocation8 + $0x1838] ss:$100 sps:$4 sm:$0xff]   ;;  %v8769_v33 = vld [vmem:[#allocation8 + $0xc88] ss:$100 sps:$4 sm:$0xff]   ;;  %v8775_v37 = vld [vmem:[#allocation8 + $0xd50] ss:$100 sps:$4 sm:$0xff]  }
  0xb2   : > { %5238 = vmatpush1.bf16.msra.mxu1 %v8705_v38  ;;  %5198 = vmatprep.subr.bf16.mxu0 %v8706_v39  ;;  %v8780_v38 = vld [vmem:[#allocation8 + $0x19c] ss:$100 sps:$4 sm:$0xff]   ;;  %s10634_s2 = sshll.u32 %s10304_s28, 7  ;;  %vm170_vm0 = vcmp.eq.s32.totalorder %v10497_v9, 0  ;;  %s10656_s17 = sld [smem:[#allocation2 + %s10304_s28]]  ;;  %vm175_vm1 = vcmp.eq.s32.totalorder %v10497_v9, 1 }
  0xb3   : > { %5239 = vmatprep.subr.bf16.mxu1 %v8708_v40  ;;  %v8783_v39 = vld [vmem:[#allocation8 + $0xe1c] ss:$100 sps:$4 sm:$0xff]   ;;  %s10639_s1 = sld [smem:[#allocation6 + %s10634_s2]]  ;;  %s176_s29 = sadd.s32 1, %s10634_s2  ;;  %vm180_vm2 = vcmp.eq.s32.totalorder %v10497_v9, 2  ;;  %vm185_vm3 = vcmp.eq.s32.totalorder %v10497_v9, 3 }
  0xb4   : > { %v8778_v40 = vld [vmem:[#allocation8 + $0x198] ss:$100 sps:$4 sm:$0xff]   ;;  %s10644_s11 = sld [smem:[#allocation6 + %s176_s29]]  ;;  %s181_s5 = sadd.s32 2, %s10634_s2  ;;  %vm190_vm4 = vcmp.eq.s32.totalorder %v10497_v9, 4  ;;  %vm195_vm5 = vcmp.eq.s32.totalorder %v10497_v9, 5 }
  0xb5   : > { %5199 = vmatpush1.bf16.msra.mxu0 %v8710_v41  ;;  %v8781_v41 = vld [vmem:[#allocation8 + $0xe18] ss:$100 sps:$4 sm:$0xff]   ;;  %s186_s12 = sadd.s32 3, %s10634_s2  ;;  %s10648_s13 = sld [smem:[#allocation6 + %s181_s5]]  ;;  %vm200_vm6 = vcmp.eq.s32.totalorder %v10497_v9, 6  ;;  %vm205_vm7 = vcmp.eq.s32.totalorder %v10497_v9, 7 }
  0xb6   : > { %5240 = vmatpush1.bf16.msra.mxu1 %v8711_v42  ;;  %5200 = vmatprep.subr.bf16.mxu0 %v8712_v43  ;;  %v8786_v42 = vld [vmem:[#allocation8 + $0x264] ss:$100 sps:$4 sm:$0xff]   ;;  %s10652_s15 = sld [smem:[#allocation6 + %s186_s12]]  ;;  %s191_s16 = sadd.s32 4, %s10634_s2  ;;  %vm7510_vm11 = vcmp.lt.s32.totalorder %v10495_v8, 40 }
  0xb7   : > { %5241 = vmatprep.subr.bf16.mxu1 %v8714_v44  ;;  %v8789_v43 = vld [vmem:[#allocation8 + $0xee4] ss:$100 sps:$4 sm:$0xff]   ;;  %s10662_s18 = sld [smem:[#allocation6 + %s191_s16]]  ;;  %s196_s4 = sadd.s32 5, %s10634_s2 }
  0xb8   : > { %v8784_v44 = vld [vmem:[#allocation8 + $0x260] ss:$100 sps:$4 sm:$0xff]   ;;  %s10669_s19 = sld [smem:[#allocation6 + %s196_s4]]  ;;  %s201_s20 = sadd.s32 6, %s10634_s2 }
  0xb9   : > { %5201 = vmatpush1.bf16.msra.mxu0 %v8716_v45  ;;  %v8787_v45 = vld [vmem:[#allocation8 + $0xee0] ss:$100 sps:$4 sm:$0xff]   ;;  %p210_p8 = scmp.eq.s32.totalorder %s10304_s28, 0  ;;  %p212_p9 = scmp.gt.s32.totalorder %s10656_s17, 0 }
  0xba   : > { %5242 = vmatpush1.bf16.msra.mxu1 %v8717_v46  ;;  %5202 = vmatprep.subr.bf16.mxu0 %v8718_v47  ;;  %v8792_v46 = vld [vmem:[#allocation8 + $0x32c] ss:$100 sps:$4 sm:$0xff]   ;;  %s10676_s8 = sld [smem:[#allocation6 + %s201_s20]]  ;;  %s206_s30 = sadd.s32 7, %s10634_s2 }
  0xbb   : > { %5243 = vmatprep.subr.bf16.mxu1 %v8720_v48  ;;  %v8795_v47 = vld [vmem:[#allocation8 + $0xfac] ss:$100 sps:$4 sm:$0xff]   ;;  %s10681_s7 = sld [smem:[#allocation6 + %s206_s30]]  ;;  %p10687_p10 = por %p212_p9, %p210_p8 }
  0xbc   : > { %v8790_v48 = vld [vmem:[#allocation8 + $0x328] ss:$100 sps:$4 sm:$0xff]   ;;  %s8514_s9 = sshll.u32 %s10304_s28, 3  ;;  %s164_s28 = sadd.s32 1, %s10304_s28  }
  0xbd   : > { %5203 = vmatpush1.bf16.msra.mxu0 %v8722_v49  ;;  %v8793_v49 = vld [vmem:[#allocation8 + $0xfa8] ss:$100 sps:$4 sm:$0xff]   ;;  %s214_s21 = scalar_select %p10687_p10, 1, 0 }
  0xbe   : > { %5244 = vmatpush1.bf16.msra.mxu1 %v8723_v50  ;;  %5204 = vmatprep.subr.bf16.mxu0 %v8724_v51  ;;  %v8798_v50 = vld [vmem:[#allocation8 + $0x3f4] ss:$100 sps:$4 sm:$0xff]   ;;  %s7541_s3 = scalar_lea.vmem %s10847_s10, %s8514_s9  ;;  %p161_p11 = scmp.ge.s32.totalorder %s164_s28, 5  }
  0xbf   : > { %5245 = vmatprep.subr.bf16.mxu1 %v8726_v52  ;;  %v8801_v51 = vld [vmem:[#allocation8 + $0x1074] ss:$100 sps:$4 sm:$0xff]  }
  0xc0   : > { %v8796_v52 = vld [vmem:[#allocation8 + $0x3f0] ss:$100 sps:$4 sm:$0xff]  }
  0xc1   : > { %5205 = vmatpush1.bf16.msra.mxu0 %v8728_v53  ;;  %v8799_v53 = vld [vmem:[#allocation8 + $0x1070] ss:$100 sps:$4 sm:$0xff]  }
  0xc2   : > { %5246 = vmatpush1.bf16.msra.mxu1 %v8729_v54  ;;  %5206 = vmatprep.subr.bf16.mxu0 %v8730_v55  ;;  %v8804_v54 = vld [vmem:[#allocation8 + $0x4bc] ss:$100 sps:$4 sm:$0xff]  }
  0xc3   : > { %5247 = vmatprep.subr.bf16.mxu1 %v8732_v56  ;;  %v8807_v55 = vld [vmem:[#allocation8 + $0x113c] ss:$100 sps:$4 sm:$0xff]  }
  0xc4   : > { %v8802_v56 = vld [vmem:[#allocation8 + $0x4b8] ss:$100 sps:$4 sm:$0xff]  }
  0xc5   : > { %5207 = vmatpush1.bf16.msra.mxu0 %v8734_v57  ;;  %v8805_v57 = vld [vmem:[#allocation8 + $0x1138] ss:$100 sps:$4 sm:$0xff]  }
  0xc6   : > { %5248 = vmatpush1.bf16.msra.mxu1 %v8735_v58  ;;  %5208 = vmatprep.subr.bf16.mxu0 %v8736_v59  ;;  %v8810_v58 = vld [vmem:[#allocation8 + $0x584] ss:$100 sps:$4 sm:$0xff]  }
  0xc7   : > { %5249 = vmatprep.subr.bf16.mxu1 %v8738_v60  ;;  %v8813_v59 = vld [vmem:[#allocation8 + $0x1204] ss:$100 sps:$4 sm:$0xff]  }
  0xc8   : > { %v8808_v60 = vld [vmem:[#allocation8 + $0x580] ss:$100 sps:$4 sm:$0xff]  }
  0xc9   : > { %5209 = vmatpush1.bf16.msra.mxu0 %v8740_v61  ;;  %v8811_v61 = vld [vmem:[#allocation8 + $0x1200] ss:$100 sps:$4 sm:$0xff]  }
  0xca   : > { %5250 = vmatpush1.bf16.msra.mxu1 %v8741_v62  ;;  %5210 = vmatprep.subr.bf16.mxu0 %v8742_v63  ;;  %v8816_v62 = vld [vmem:[#allocation8 + $0x64c] ss:$100 sps:$4 sm:$0xff]  }
  0xcb   : > { %5251 = vmatprep.subr.bf16.mxu1 %v8744_v3  ;;  %v8819_v63 = vld [vmem:[#allocation8 + $0x12cc] ss:$100 sps:$4 sm:$0xff]  }
  0xcc   : > { %v8814_v3 = vld [vmem:[#allocation8 + $0x648] ss:$100 sps:$4 sm:$0xff]  }
  0xcd   : > { %5211 = vmatpush1.bf16.msra.mxu0 %v8746_v4  ;;  %v8817_v4 = vld [vmem:[#allocation8 + $0x12c8] ss:$100 sps:$4 sm:$0xff]  }
  0xce   : > { %5252 = vmatpush1.bf16.msra.mxu1 %v8747_v13  ;;  %5212 = vmatprep.subr.bf16.mxu0 %v8748_v14  ;;  %v8822_v13 = vld [vmem:[#allocation8 + $0x714] ss:$100 sps:$4 sm:$0xff]  }
  0xcf   : > { %5253 = vmatprep.subr.bf16.mxu1 %v8750_v15  ;;  %v8825_v14 = vld [vmem:[#allocation8 + $0x1394] ss:$100 sps:$4 sm:$0xff]  }
  0xd0   : > { %v8820_v15 = vld [vmem:[#allocation8 + $0x710] ss:$100 sps:$4 sm:$0xff]  }
  0xd1   : > { %5213 = vmatpush1.bf16.msra.mxu0 %v8752_v16  ;;  %v8823_v16 = vld [vmem:[#allocation8 + $0x1390] ss:$100 sps:$4 sm:$0xff]  }
  0xd2   : > { %5254 = vmatpush1.bf16.msra.mxu1 %v8753_v19  ;;  %5214 = vmatprep.subr.bf16.mxu0 %v8754_v20  ;;  %v8828_v19 = vld [vmem:[#allocation8 + $0x7dc] ss:$100 sps:$4 sm:$0xff]  }
  0xd3   : > { %5255 = vmatprep.subr.bf16.mxu1 %v8756_v21  ;;  %v8831_v20 = vld [vmem:[#allocation8 + $0x145c] ss:$100 sps:$4 sm:$0xff]  }
  0xd4   : > { %v8826_v21 = vld [vmem:[#allocation8 + $0x7d8] ss:$100 sps:$4 sm:$0xff]  }
  0xd5   : > { %5215 = vmatpush1.bf16.msra.mxu0 %v8758_v22  ;;  %v8829_v22 = vld [vmem:[#allocation8 + $0x1458] ss:$100 sps:$4 sm:$0xff]  }
  0xd6   : > { %5256 = vmatpush1.bf16.msra.mxu1 %v8759_v23  ;;  %5216 = vmatprep.subr.bf16.mxu0 %v8760_v24  ;;  %v8834_v23 = vld [vmem:[#allocation8 + $0x8a4] ss:$100 sps:$4 sm:$0xff]  }
  0xd7   : > { %5257 = vmatprep.subr.bf16.mxu1 %v8762_v25  ;;  %v8837_v24 = vld [vmem:[#allocation8 + $0x1524] ss:$100 sps:$4 sm:$0xff]  }
  0xd8   : > { %v8832_v25 = vld [vmem:[#allocation8 + $0x8a0] ss:$100 sps:$4 sm:$0xff]  }
  0xd9   : > { %5217 = vmatpush1.bf16.msra.mxu0 %v8764_v26  ;;  %v8835_v26 = vld [vmem:[#allocation8 + $0x1520] ss:$100 sps:$4 sm:$0xff]  }
  0xda   : > { %5258 = vmatpush1.bf16.msra.mxu1 %v8765_v27  ;;  %5268 = vmatprep.subr.bf16.mxu0 %v8768_v28  ;;  %v8840_v27 = vld [vmem:[#allocation8 + $0x96c] ss:$100 sps:$4 sm:$0xff]  }
  0xdb   : > { %5309 = vmatprep.subr.bf16.mxu1 %v8771_v29  ;;  %v8843_v28 = vld [vmem:[#allocation8 + $0x15ec] ss:$100 sps:$4 sm:$0xff]  }
  0xdc   : > { %5219 = vmatmul.mubr.bf16.vlgmr.msra.gmra.mrb[0].mxu0 %v10547_v30  ;;  %v8838_v29 = vld [vmem:[#allocation8 + $0x968] ss:$100 sps:$4 sm:$0xff]  }
  0xdd   : > { %5260 = vmatmul.mubr.bf16.vlgmr.msra.gmra.mrb[0].mxu1 %v10551_v31  ;;  %5269 = vmatpush1.bf16.msra.mxu0 %v8766_v32  ;;  %v8841_v32 = vld [vmem:[#allocation8 + $0x15e8] ss:$100 sps:$4 sm:$0xff]  }
  0xde   : > { %5310 = vmatpush1.bf16.msra.mxu1 %v8769_v33  ;;  %5270 = vmatprep.subr.bf16.mxu0 %v8774_v34  ;;  %v8846_v33 = vld [vmem:[#allocation8 + $0xa34] ss:$100 sps:$4 sm:$0xff]  }
  0xdf   : > { %5311 = vmatprep.subr.bf16.mxu1 %v8777_v35  ;;  %5300 = vmatprep.mubr.bf16.mxu0 %v10537_v17  ;;  %v8849_v34 = vld [vmem:[#allocation8 + $0x16b4] ss:$100 sps:$4 sm:$0xff]  }
  0xe0   : > { %5341 = vmatprep.mubr.bf16.mxu1 %v10541_v18  ;;  %v8844_v35 = vld [vmem:[#allocation8 + $0xa30] ss:$100 sps:$4 sm:$0xff]  }
  0xe1   : > { %5271 = vmatpush1.bf16.msra.mxu0 %v8772_v36  ;;  %v8847_v36 = vld [vmem:[#allocation8 + $0x16b0] ss:$100 sps:$4 sm:$0xff]  }
  0xe2   : > { %5312 = vmatpush1.bf16.msra.mxu1 %v8775_v37  ;;  %5272 = vmatprep.subr.bf16.mxu0 %v8780_v38  ;;  %v8852_v37 = vld [vmem:[#allocation8 + $0xafc] ss:$100 sps:$4 sm:$0xff]  }
  0xe3   : > { %5313 = vmatprep.subr.bf16.mxu1 %v8783_v39  ;;  %v8855_v38 = vld [vmem:[#allocation8 + $0x177c] ss:$100 sps:$4 sm:$0xff]  }
  0xe4   : > { %v8850_v39 = vld [vmem:[#allocation8 + $0xaf8] ss:$100 sps:$4 sm:$0xff]  }
  0xe5   : > { %5273 = vmatpush1.bf16.msra.mxu0 %v8778_v40  ;;  %v8853_v40 = vld [vmem:[#allocation8 + $0x1778] ss:$100 sps:$4 sm:$0xff]  }
  0xe6   : > { %5314 = vmatpush1.bf16.msra.mxu1 %v8781_v41  ;;  %5274 = vmatprep.subr.bf16.mxu0 %v8786_v42  ;;  %v8858_v41 = vld [vmem:[#allocation8 + $0xbc4] ss:$100 sps:$4 sm:$0xff]  }
  0xe7   : > { %5315 = vmatprep.subr.bf16.mxu1 %v8789_v43  ;;  %v8861_v42 = vld [vmem:[#allocation8 + $0x1844] ss:$100 sps:$4 sm:$0xff]  }
  0xe8   : > { %v8856_v43 = vld [vmem:[#allocation8 + $0xbc0] ss:$100 sps:$4 sm:$0xff]  }
  0xe9   : > { %5275 = vmatpush1.bf16.msra.mxu0 %v8784_v44  ;;  %v8859_v44 = vld [vmem:[#allocation8 + $0x1840] ss:$100 sps:$4 sm:$0xff]  }
  0xea   : > { %5316 = vmatpush1.bf16.msra.mxu1 %v8787_v45  ;;  %5276 = vmatprep.subr.bf16.mxu0 %v8792_v46  ;;  %v8864_v45 = vld [vmem:[#allocation8 + $0x14] ss:$100 sps:$4 sm:$0xff]  }
  0xeb   : > { %5317 = vmatprep.subr.bf16.mxu1 %v8795_v47  ;;  %v8867_v46 = vld [vmem:[#allocation8 + $0xc94] ss:$100 sps:$4 sm:$0xff]  }
  0xec   : > { %v8862_v47 = vld [vmem:[#allocation8 + $0x10] ss:$100 sps:$4 sm:$0xff]  }
  0xed   : > { %5277 = vmatpush1.bf16.msra.mxu0 %v8790_v48  ;;  %v8865_v48 = vld [vmem:[#allocation8 + $0xc90] ss:$100 sps:$4 sm:$0xff]  }
  0xee   : > { %5318 = vmatpush1.bf16.msra.mxu1 %v8793_v49  ;;  %5278 = vmatprep.subr.bf16.mxu0 %v8798_v50  ;;  %v8870_v49 = vld [vmem:[#allocation8 + $0xdc] ss:$100 sps:$4 sm:$0xff]  }
  0xef   : > { %5319 = vmatprep.subr.bf16.mxu1 %v8801_v51  ;;  %v8873_v50 = vld [vmem:[#allocation8 + $0xd5c] ss:$100 sps:$4 sm:$0xff]  }
  0xf0   : > { %v8868_v51 = vld [vmem:[#allocation8 + $0xd8] ss:$100 sps:$4 sm:$0xff]  }
  0xf1   : > { %5279 = vmatpush1.bf16.msra.mxu0 %v8796_v52  ;;  %v8871_v52 = vld [vmem:[#allocation8 + $0xd58] ss:$100 sps:$4 sm:$0xff]  }
  0xf2   : > { %5320 = vmatpush1.bf16.msra.mxu1 %v8799_v53  ;;  %5280 = vmatprep.subr.bf16.mxu0 %v8804_v54  ;;  %v8876_v53 = vld [vmem:[#allocation8 + $0x1a4] ss:$100 sps:$4 sm:$0xff]  }
  0xf3   : > { %5321 = vmatprep.subr.bf16.mxu1 %v8807_v55  ;;  %v8879_v54 = vld [vmem:[#allocation8 + $0xe24] ss:$100 sps:$4 sm:$0xff]  }
  0xf4   : > { %v8874_v55 = vld [vmem:[#allocation8 + $0x1a0] ss:$100 sps:$4 sm:$0xff]  }
  0xf5   : > { %5281 = vmatpush1.bf16.msra.mxu0 %v8802_v56  ;;  %v8877_v56 = vld [vmem:[#allocation8 + $0xe20] ss:$100 sps:$4 sm:$0xff]  }
  0xf6   : > { %5322 = vmatpush1.bf16.msra.mxu1 %v8805_v57  ;;  %5282 = vmatprep.subr.bf16.mxu0 %v8810_v58  ;;  %v8882_v57 = vld [vmem:[#allocation8 + $0x26c] ss:$100 sps:$4 sm:$0xff]  }
  0xf7   : > { %5323 = vmatprep.subr.bf16.mxu1 %v8813_v59  ;;  %v8885_v58 = vld [vmem:[#allocation8 + $0xeec] ss:$100 sps:$4 sm:$0xff]  }
  0xf8   : > { %v8880_v59 = vld [vmem:[#allocation8 + $0x268] ss:$100 sps:$4 sm:$0xff]  }
  0xf9   : > { %5283 = vmatpush1.bf16.msra.mxu0 %v8808_v60  ;;  %v8883_v60 = vld [vmem:[#allocation8 + $0xee8] ss:$100 sps:$4 sm:$0xff]  }
  0xfa   : > { %5324 = vmatpush1.bf16.msra.mxu1 %v8811_v61  ;;  %5284 = vmatprep.subr.bf16.mxu0 %v8816_v62  ;;  %v8888_v61 = vld [vmem:[#allocation8 + $0x334] ss:$100 sps:$4 sm:$0xff]  }
  0xfb   : > { %5325 = vmatprep.subr.bf16.mxu1 %v8819_v63  ;;  %v8891_v62 = vld [vmem:[#allocation8 + $0xfb4] ss:$100 sps:$4 sm:$0xff]  }
  0xfc   : > { %v8886_v63 = vld [vmem:[#allocation8 + $0x330] ss:$100 sps:$4 sm:$0xff]  }
  0xfd   : > { %5285 = vmatpush1.bf16.msra.mxu0 %v8814_v3  ;;  %v8889_v3 = vld [vmem:[#allocation8 + $0xfb0] ss:$100 sps:$4 sm:$0xff]  }
  0xfe   : > { %5326 = vmatpush1.bf16.msra.mxu1 %v8817_v4  ;;  %5286 = vmatprep.subr.bf16.mxu0 %v8822_v13  ;;  %v8894_v4 = vld [vmem:[#allocation8 + $0x3fc] ss:$100 sps:$4 sm:$0xff]  }
  0xff   : > { %5327 = vmatprep.subr.bf16.mxu1 %v8825_v14  ;;  %v8897_v13 = vld [vmem:[#allocation8 + $0x107c] ss:$100 sps:$4 sm:$0xff]  }
 0x100   : > { %v8892_v14 = vld [vmem:[#allocation8 + $0x3f8] ss:$100 sps:$4 sm:$0xff]  }
 0x101   : > { %5287 = vmatpush1.bf16.msra.mxu0 %v8820_v15  ;;  %v8895_v15 = vld [vmem:[#allocation8 + $0x1078] ss:$100 sps:$4 sm:$0xff]  }
 0x102   : > { %5328 = vmatpush1.bf16.msra.mxu1 %v8823_v16  ;;  %5288 = vmatprep.subr.bf16.mxu0 %v8828_v19  ;;  %v8900_v16 = vld [vmem:[#allocation8 + $0x4c4] ss:$100 sps:$4 sm:$0xff]  }
 0x103   : > { %5329 = vmatprep.subr.bf16.mxu1 %v8831_v20  ;;  %v8903_v19 = vld [vmem:[#allocation8 + $0x1144] ss:$100 sps:$4 sm:$0xff]  }
 0x104   : > { %v8898_v20 = vld [vmem:[#allocation8 + $0x4c0] ss:$100 sps:$4 sm:$0xff]  }
 0x105   : > { %5289 = vmatpush1.bf16.msra.mxu0 %v8826_v21  ;;  %v8901_v21 = vld [vmem:[#allocation8 + $0x1140] ss:$100 sps:$4 sm:$0xff]  }
 0x106   : > { %5330 = vmatpush1.bf16.msra.mxu1 %v8829_v22  ;;  %5290 = vmatprep.subr.bf16.mxu0 %v8834_v23  ;;  %v8906_v22 = vld [vmem:[#allocation8 + $0x58c] ss:$100 sps:$4 sm:$0xff]  }
 0x107   : > { %5331 = vmatprep.subr.bf16.mxu1 %v8837_v24  ;;  %v8909_v23 = vld [vmem:[#allocation8 + $0x120c] ss:$100 sps:$4 sm:$0xff]  }
 0x108   : > { %v8904_v24 = vld [vmem:[#allocation8 + $0x588] ss:$100 sps:$4 sm:$0xff]  }
 0x109   : > { %5291 = vmatpush1.bf16.msra.mxu0 %v8832_v25  ;;  %v8907_v25 = vld [vmem:[#allocation8 + $0x1208] ss:$100 sps:$4 sm:$0xff]  }
 0x10a   : > { %5332 = vmatpush1.bf16.msra.mxu1 %v8835_v26  ;;  %5292 = vmatprep.subr.bf16.mxu0 %v8840_v27  ;;  %v8912_v26 = vld [vmem:[#allocation8 + $0x654] ss:$100 sps:$4 sm:$0xff]  }
 0x10b   : > { %5333 = vmatprep.subr.bf16.mxu1 %v8843_v28  ;;  %v8915_v27 = vld [vmem:[#allocation8 + $0x12d4] ss:$100 sps:$4 sm:$0xff]  }
 0x10c   : > { %v8910_v28 = vld [vmem:[#allocation8 + $0x650] ss:$100 sps:$4 sm:$0xff]  }
 0x10d   : > { %5293 = vmatpush1.bf16.msra.mxu0 %v8838_v29  ;;  %v8913_v29 = vld [vmem:[#allocation8 + $0x12d0] ss:$100 sps:$4 sm:$0xff]  }
 0x10e   : > { %5334 = vmatpush1.bf16.msra.mxu1 %v8841_v32  ;;  %5294 = vmatprep.subr.bf16.mxu0 %v8846_v33  ;;  %v8918_v32 = vld [vmem:[#allocation8 + $0x71c] ss:$100 sps:$4 sm:$0xff]  }
 0x10f   : > { %5335 = vmatprep.subr.bf16.mxu1 %v8849_v34  ;;  %v8921_v33 = vld [vmem:[#allocation8 + $0x139c] ss:$100 sps:$4 sm:$0xff]  }
 0x110   : > { %v8916_v34 = vld [vmem:[#allocation8 + $0x718] ss:$100 sps:$4 sm:$0xff]  }
 0x111   : > { %5295 = vmatpush1.bf16.msra.mxu0 %v8844_v35  ;;  %v8919_v35 = vld [vmem:[#allocation8 + $0x1398] ss:$100 sps:$4 sm:$0xff]  }
 0x112   : > { %5336 = vmatpush1.bf16.msra.mxu1 %v8847_v36  ;;  %5296 = vmatprep.subr.bf16.mxu0 %v8852_v37  ;;  %v8924_v36 = vld [vmem:[#allocation8 + $0x7e4] ss:$100 sps:$4 sm:$0xff]  }
 0x113   : > { %5337 = vmatprep.subr.bf16.mxu1 %v8855_v38  ;;  %v8927_v37 = vld [vmem:[#allocation8 + $0x1464] ss:$100 sps:$4 sm:$0xff]  }
 0x114   : > { %v8922_v38 = vld [vmem:[#allocation8 + $0x7e0] ss:$100 sps:$4 sm:$0xff]  }
 0x115   : > { %5297 = vmatpush1.bf16.msra.mxu0 %v8850_v39  ;;  %v8925_v39 = vld [vmem:[#allocation8 + $0x1460] ss:$100 sps:$4 sm:$0xff]  }
 0x116   : > { %5338 = vmatpush1.bf16.msra.mxu1 %v8853_v40  ;;  %5298 = vmatprep.subr.bf16.mxu0 %v8858_v41  ;;  %v8930_v40 = vld [vmem:[#allocation8 + $0x8ac] ss:$100 sps:$4 sm:$0xff]  }
 0x117   : > { %5339 = vmatprep.subr.bf16.mxu1 %v8861_v42  ;;  %v8933_v41 = vld [vmem:[#allocation8 + $0x152c] ss:$100 sps:$4 sm:$0xff]  }
 0x118   : > { %v8928_v42 = vld [vmem:[#allocation8 + $0x8a8] ss:$100 sps:$4 sm:$0xff]  }
 0x119   : > { %5299 = vmatpush1.bf16.msra.mxu0 %v8856_v43  ;;  %v8931_v43 = vld [vmem:[#allocation8 + $0x1528] ss:$100 sps:$4 sm:$0xff]  }
 0x11a   : > { %5340 = vmatpush1.bf16.msra.mxu1 %v8859_v44  ;;  %5350 = vmatprep.subr.bf16.mxu0 %v8864_v45  ;;  %v8936_v44 = vld [vmem:[#allocation8 + $0x974] ss:$100 sps:$4 sm:$0xff]  }
 0x11b   : > { %5391 = vmatprep.subr.bf16.mxu1 %v8867_v46  ;;  %v8939_v45 = vld [vmem:[#allocation8 + $0x15f4] ss:$100 sps:$4 sm:$0xff]  }
 0x11c   : > { %5301 = vmatmul.mubr.bf16.vlgmr.msra.gmra.mrb[4].mxu0 %v10547_v30  ;;  %v8934_v46 = vld [vmem:[#allocation8 + $0x970] ss:$100 sps:$4 sm:$0xff]  }
 0x11d   : > { %5342 = vmatmul.mubr.bf16.vlgmr.msra.gmra.mrb[4].mxu1 %v10551_v31  ;;  %5351 = vmatpush1.bf16.msra.mxu0 %v8862_v47  ;;  %v8937_v47 = vld [vmem:[#allocation8 + $0x15f0] ss:$100 sps:$4 sm:$0xff]  }
 0x11e   : > { %5392 = vmatpush1.bf16.msra.mxu1 %v8865_v48  ;;  %5352 = vmatprep.subr.bf16.mxu0 %v8870_v49  ;;  %v8942_v48 = vld [vmem:[#allocation8 + $0xa3c] ss:$100 sps:$4 sm:$0xff]  }
 0x11f   : > { %5393 = vmatprep.subr.bf16.mxu1 %v8873_v50  ;;  %5382 = vmatprep.mubr.bf16.mxu0 %v10537_v17  ;;  %v8945_v49 = vld [vmem:[#allocation8 + $0x16bc] ss:$100 sps:$4 sm:$0xff]  }
 0x120   : > { %5423 = vmatprep.mubr.bf16.mxu1 %v10541_v18  ;;  %v8940_v50 = vld [vmem:[#allocation8 + $0xa38] ss:$100 sps:$4 sm:$0xff]  }
 0x121   : > { %5353 = vmatpush1.bf16.msra.mxu0 %v8868_v51  ;;  %v8943_v51 = vld [vmem:[#allocation8 + $0x16b8] ss:$100 sps:$4 sm:$0xff]  }
 0x122   : > { %5394 = vmatpush1.bf16.msra.mxu1 %v8871_v52  ;;  %5354 = vmatprep.subr.bf16.mxu0 %v8876_v53  ;;  %v8948_v52 = vld [vmem:[#allocation8 + $0xb04] ss:$100 sps:$4 sm:$0xff]  }
 0x123   : > { %5395 = vmatprep.subr.bf16.mxu1 %v8879_v54  ;;  %v8951_v53 = vld [vmem:[#allocation8 + $0x1784] ss:$100 sps:$4 sm:$0xff]  }
 0x124   : > { %v8946_v54 = vld [vmem:[#allocation8 + $0xb00] ss:$100 sps:$4 sm:$0xff]  }
 0x125   : > { %5355 = vmatpush1.bf16.msra.mxu0 %v8874_v55  ;;  %v8949_v55 = vld [vmem:[#allocation8 + $0x1780] ss:$100 sps:$4 sm:$0xff]  }
 0x126   : > { %5396 = vmatpush1.bf16.msra.mxu1 %v8877_v56  ;;  %5356 = vmatprep.subr.bf16.mxu0 %v8882_v57  ;;  %v8954_v56 = vld [vmem:[#allocation8 + $0xbcc] ss:$100 sps:$4 sm:$0xff]  }
 0x127   : > { %5397 = vmatprep.subr.bf16.mxu1 %v8885_v58  ;;  %v8957_v57 = vld [vmem:[#allocation8 + $0x184c] ss:$100 sps:$4 sm:$0xff]  }
 0x128   : > { %v8952_v58 = vld [vmem:[#allocation8 + $0xbc8] ss:$100 sps:$4 sm:$0xff]  }
 0x129   : > { %5357 = vmatpush1.bf16.msra.mxu0 %v8880_v59  ;;  %v8955_v59 = vld [vmem:[#allocation8 + $0x1848] ss:$100 sps:$4 sm:$0xff]  }
 0x12a   : > { %5398 = vmatpush1.bf16.msra.mxu1 %v8883_v60  ;;  %5358 = vmatprep.subr.bf16.mxu0 %v8888_v61  ;;  %v8960_v60 = vld [vmem:[#allocation8 + $0x1c] ss:$100 sps:$4 sm:$0xff]  }
 0x12b   : > { %5399 = vmatprep.subr.bf16.mxu1 %v8891_v62  ;;  %v8963_v61 = vld [vmem:[#allocation8 + $0xc9c] ss:$100 sps:$4 sm:$0xff]  }
 0x12c   : > { %v8958_v62 = vld [vmem:[#allocation8 + $0x18] ss:$100 sps:$4 sm:$0xff]  }
 0x12d   : > { %5359 = vmatpush1.bf16.msra.mxu0 %v8886_v63  ;;  %v8961_v63 = vld [vmem:[#allocation8 + $0xc98] ss:$100 sps:$4 sm:$0xff]  }
 0x12e   : > { %5400 = vmatpush1.bf16.msra.mxu1 %v8889_v3  ;;  %5360 = vmatprep.subr.bf16.mxu0 %v8894_v4  ;;  %v8966_v3 = vld [vmem:[#allocation8 + $0xe4] ss:$100 sps:$4 sm:$0xff]  }
 0x12f   : > { %5401 = vmatprep.subr.bf16.mxu1 %v8897_v13  ;;  %v8969_v4 = vld [vmem:[#allocation8 + $0xd64] ss:$100 sps:$4 sm:$0xff]  }
 0x130   : > { %v8964_v13 = vld [vmem:[#allocation8 + $0xe0] ss:$100 sps:$4 sm:$0xff]  }
 0x131   : > { %5361 = vmatpush1.bf16.msra.mxu0 %v8892_v14  ;;  %v8967_v14 = vld [vmem:[#allocation8 + $0xd60] ss:$100 sps:$4 sm:$0xff]  }
 0x132   : > { %5402 = vmatpush1.bf16.msra.mxu1 %v8895_v15  ;;  %5362 = vmatprep.subr.bf16.mxu0 %v8900_v16  ;;  %v8972_v15 = vld [vmem:[#allocation8 + $0x1ac] ss:$100 sps:$4 sm:$0xff]  }
 0x133   : > { %5403 = vmatprep.subr.bf16.mxu1 %v8903_v19  ;;  %v8975_v16 = vld [vmem:[#allocation8 + $0xe2c] ss:$100 sps:$4 sm:$0xff]  }
 0x134   : > { %v8970_v19 = vld [vmem:[#allocation8 + $0x1a8] ss:$100 sps:$4 sm:$0xff]  }
 0x135   : > { %5363 = vmatpush1.bf16.msra.mxu0 %v8898_v20  ;;  %v8973_v20 = vld [vmem:[#allocation8 + $0xe28] ss:$100 sps:$4 sm:$0xff]  }
 0x136   : > { %5404 = vmatpush1.bf16.msra.mxu1 %v8901_v21  ;;  %5364 = vmatprep.subr.bf16.mxu0 %v8906_v22  ;;  %v8978_v21 = vld [vmem:[#allocation8 + $0x274] ss:$100 sps:$4 sm:$0xff]  }
 0x137   : > { %5405 = vmatprep.subr.bf16.mxu1 %v8909_v23  ;;  %v8981_v22 = vld [vmem:[#allocation8 + $0xef4] ss:$100 sps:$4 sm:$0xff]  }
 0x138   : > { %v8976_v23 = vld [vmem:[#allocation8 + $0x270] ss:$100 sps:$4 sm:$0xff]  }
 0x139   : > { %5365 = vmatpush1.bf16.msra.mxu0 %v8904_v24  ;;  %v8979_v24 = vld [vmem:[#allocation8 + $0xef0] ss:$100 sps:$4 sm:$0xff]  }
 0x13a   : > { %5406 = vmatpush1.bf16.msra.mxu1 %v8907_v25  ;;  %5366 = vmatprep.subr.bf16.mxu0 %v8912_v26  ;;  %v8984_v25 = vld [vmem:[#allocation8 + $0x33c] ss:$100 sps:$4 sm:$0xff]  }
 0x13b   : > { %5407 = vmatprep.subr.bf16.mxu1 %v8915_v27  ;;  %v8987_v26 = vld [vmem:[#allocation8 + $0xfbc] ss:$100 sps:$4 sm:$0xff]  }
 0x13c   : > { %v8982_v27 = vld [vmem:[#allocation8 + $0x338] ss:$100 sps:$4 sm:$0xff]  }
 0x13d   : > { %5367 = vmatpush1.bf16.msra.mxu0 %v8910_v28  ;;  %v8985_v28 = vld [vmem:[#allocation8 + $0xfb8] ss:$100 sps:$4 sm:$0xff]  }
 0x13e   : > { %5408 = vmatpush1.bf16.msra.mxu1 %v8913_v29  ;;  %5368 = vmatprep.subr.bf16.mxu0 %v8918_v32  ;;  %v8990_v29 = vld [vmem:[#allocation8 + $0x404] ss:$100 sps:$4 sm:$0xff]  }
 0x13f   : > { %5409 = vmatprep.subr.bf16.mxu1 %v8921_v33  ;;  %v8993_v32 = vld [vmem:[#allocation8 + $0x1084] ss:$100 sps:$4 sm:$0xff]  }
 0x140   : > { %v8988_v33 = vld [vmem:[#allocation8 + $0x400] ss:$100 sps:$4 sm:$0xff]  }
 0x141   : > { %5369 = vmatpush1.bf16.msra.mxu0 %v8916_v34  ;;  %v8991_v34 = vld [vmem:[#allocation8 + $0x1080] ss:$100 sps:$4 sm:$0xff]  }
 0x142   : > { %5410 = vmatpush1.bf16.msra.mxu1 %v8919_v35  ;;  %5370 = vmatprep.subr.bf16.mxu0 %v8924_v36  ;;  %v8996_v35 = vld [vmem:[#allocation8 + $0x4cc] ss:$100 sps:$4 sm:$0xff]  }
 0x143   : > { %5411 = vmatprep.subr.bf16.mxu1 %v8927_v37  ;;  %v8999_v36 = vld [vmem:[#allocation8 + $0x114c] ss:$100 sps:$4 sm:$0xff]  }
 0x144   : > { %v8994_v37 = vld [vmem:[#allocation8 + $0x4c8] ss:$100 sps:$4 sm:$0xff]  }
 0x145   : > { %5371 = vmatpush1.bf16.msra.mxu0 %v8922_v38  ;;  %v8997_v38 = vld [vmem:[#allocation8 + $0x1148] ss:$100 sps:$4 sm:$0xff]  }
 0x146   : > { %5412 = vmatpush1.bf16.msra.mxu1 %v8925_v39  ;;  %5372 = vmatprep.subr.bf16.mxu0 %v8930_v40  ;;  %v9002_v39 = vld [vmem:[#allocation8 + $0x594] ss:$100 sps:$4 sm:$0xff]  }
 0x147   : > { %5413 = vmatprep.subr.bf16.mxu1 %v8933_v41  ;;  %v9005_v40 = vld [vmem:[#allocation8 + $0x1214] ss:$100 sps:$4 sm:$0xff]  }
 0x148   : > { %v9000_v41 = vld [vmem:[#allocation8 + $0x590] ss:$100 sps:$4 sm:$0xff]  }
 0x149   : > { %5373 = vmatpush1.bf16.msra.mxu0 %v8928_v42  ;;  %v9003_v42 = vld [vmem:[#allocation8 + $0x1210] ss:$100 sps:$4 sm:$0xff]  }
 0x14a   : > { %5414 = vmatpush1.bf16.msra.mxu1 %v8931_v43  ;;  %5374 = vmatprep.subr.bf16.mxu0 %v8936_v44  ;;  %v9008_v43 = vld [vmem:[#allocation8 + $0x65c] ss:$100 sps:$4 sm:$0xff]  }
 0x14b   : > { %5415 = vmatprep.subr.bf16.mxu1 %v8939_v45  ;;  %v9011_v44 = vld [vmem:[#allocation8 + $0x12dc] ss:$100 sps:$4 sm:$0xff]  }
 0x14c   : > { %v9006_v45 = vld [vmem:[#allocation8 + $0x658] ss:$100 sps:$4 sm:$0xff]  }
 0x14d   : > { %5375 = vmatpush1.bf16.msra.mxu0 %v8934_v46  ;;  %v9009_v46 = vld [vmem:[#allocation8 + $0x12d8] ss:$100 sps:$4 sm:$0xff]  }
 0x14e   : > { %5416 = vmatpush1.bf16.msra.mxu1 %v8937_v47  ;;  %5376 = vmatprep.subr.bf16.mxu0 %v8942_v48  ;;  %v9014_v47 = vld [vmem:[#allocation8 + $0x724] ss:$100 sps:$4 sm:$0xff]  }
 0x14f   : > { %5417 = vmatprep.subr.bf16.mxu1 %v8945_v49  ;;  %v9017_v48 = vld [vmem:[#allocation8 + $0x13a4] ss:$100 sps:$4 sm:$0xff]  }
 0x150   : > { %v9012_v49 = vld [vmem:[#allocation8 + $0x720] ss:$100 sps:$4 sm:$0xff]  }
 0x151   : > { %5377 = vmatpush1.bf16.msra.mxu0 %v8940_v50  ;;  %v9015_v50 = vld [vmem:[#allocation8 + $0x13a0] ss:$100 sps:$4 sm:$0xff]  }
 0x152   : > { %5418 = vmatpush1.bf16.msra.mxu1 %v8943_v51  ;;  %5378 = vmatprep.subr.bf16.mxu0 %v8948_v52  ;;  %v9020_v51 = vld [vmem:[#allocation8 + $0x7ec] ss:$100 sps:$4 sm:$0xff]  }
 0x153   : > { %5419 = vmatprep.subr.bf16.mxu1 %v8951_v53  ;;  %v9023_v52 = vld [vmem:[#allocation8 + $0x146c] ss:$100 sps:$4 sm:$0xff]  }
 0x154   : > { %v9018_v53 = vld [vmem:[#allocation8 + $0x7e8] ss:$100 sps:$4 sm:$0xff]  }
 0x155   : > { %5379 = vmatpush1.bf16.msra.mxu0 %v8946_v54  ;;  %v9021_v54 = vld [vmem:[#allocation8 + $0x1468] ss:$100 sps:$4 sm:$0xff]  }
 0x156   : > { %5420 = vmatpush1.bf16.msra.mxu1 %v8949_v55  ;;  %5380 = vmatprep.subr.bf16.mxu0 %v8954_v56  ;;  %v9026_v55 = vld [vmem:[#allocation8 + $0x8b4] ss:$100 sps:$4 sm:$0xff]  }
 0x157   : > { %5421 = vmatprep.subr.bf16.mxu1 %v8957_v57  ;;  %v9029_v56 = vld [vmem:[#allocation8 + $0x1534] ss:$100 sps:$4 sm:$0xff]  }
 0x158   : > { %v9024_v57 = vld [vmem:[#allocation8 + $0x8b0] ss:$100 sps:$4 sm:$0xff]  }
 0x159   : > { %5381 = vmatpush1.bf16.msra.mxu0 %v8952_v58  ;;  %v9027_v58 = vld [vmem:[#allocation8 + $0x1530] ss:$100 sps:$4 sm:$0xff]  }
 0x15a   : > { %5422 = vmatpush1.bf16.msra.mxu1 %v8955_v59  ;;  %5432 = vmatprep.subr.bf16.mxu0 %v8960_v60  ;;  %v9032_v59 = vld [vmem:[#allocation8 + $0x97c] ss:$100 sps:$4 sm:$0xff]  }
 0x15b   : > { %5473 = vmatprep.subr.bf16.mxu1 %v8963_v61  ;;  %v9035_v60 = vld [vmem:[#allocation8 + $0x15fc] ss:$100 sps:$4 sm:$0xff]  }
 0x15c   : > { %5383 = vmatmul.mubr.bf16.vlgmr.msra.gmra.mrb[8].mxu0 %v10547_v30  ;;  %v9030_v61 = vld [vmem:[#allocation8 + $0x978] ss:$100 sps:$4 sm:$0xff]  }
 0x15d   : > { %5424 = vmatmul.mubr.bf16.vlgmr.msra.gmra.mrb[8].mxu1 %v10551_v31  ;;  %5433 = vmatpush1.bf16.msra.mxu0 %v8958_v62  ;;  %v9033_v62 = vld [vmem:[#allocation8 + $0x15f8] ss:$100 sps:$4 sm:$0xff]  }
 0x15e   : > { %5474 = vmatpush1.bf16.msra.mxu1 %v8961_v63  ;;  %5434 = vmatprep.subr.bf16.mxu0 %v8966_v3  ;;  %v9038_v63 = vld [vmem:[#allocation8 + $0xa44] ss:$100 sps:$4 sm:$0xff]  }
 0x15f   : > { %5475 = vmatprep.subr.bf16.mxu1 %v8969_v4  ;;  %5464 = vmatprep.mubr.bf16.mxu0 %v10537_v17  ;;  %v9041_v3 = vld [vmem:[#allocation8 + $0x16c4] ss:$100 sps:$4 sm:$0xff]  }
 0x160   : > { %5505 = vmatprep.mubr.bf16.mxu1 %v10541_v18  ;;  %v9036_v4 = vld [vmem:[#allocation8 + $0xa40] ss:$100 sps:$4 sm:$0xff]  }
 0x161   : > { %5435 = vmatpush1.bf16.msra.mxu0 %v8964_v13  ;;  %v9039_v13 = vld [vmem:[#allocation8 + $0x16c0] ss:$100 sps:$4 sm:$0xff]  }
 0x162   : > { %5476 = vmatpush1.bf16.msra.mxu1 %v8967_v14  ;;  %5436 = vmatprep.subr.bf16.mxu0 %v8972_v15  ;;  %v9044_v14 = vld [vmem:[#allocation8 + $0xb0c] ss:$100 sps:$4 sm:$0xff]  }
 0x163   : > { %5477 = vmatprep.subr.bf16.mxu1 %v8975_v16  ;;  %v9047_v15 = vld [vmem:[#allocation8 + $0x178c] ss:$100 sps:$4 sm:$0xff]  }
 0x164   : > { %v9042_v16 = vld [vmem:[#allocation8 + $0xb08] ss:$100 sps:$4 sm:$0xff]  }
 0x165   : > { %5437 = vmatpush1.bf16.msra.mxu0 %v8970_v19  ;;  %v9045_v19 = vld [vmem:[#allocation8 + $0x1788] ss:$100 sps:$4 sm:$0xff]  }
 0x166   : > { %5478 = vmatpush1.bf16.msra.mxu1 %v8973_v20  ;;  %5438 = vmatprep.subr.bf16.mxu0 %v8978_v21  ;;  %v9050_v20 = vld [vmem:[#allocation8 + $0xbd4] ss:$100 sps:$4 sm:$0xff]  }
 0x167   : > { %5479 = vmatprep.subr.bf16.mxu1 %v8981_v22  ;;  %v9053_v21 = vld [vmem:[#allocation8 + $0x1854] ss:$100 sps:$4 sm:$0xff]  }
 0x168   : > { %v9048_v22 = vld [vmem:[#allocation8 + $0xbd0] ss:$100 sps:$4 sm:$0xff]  }
 0x169   : > { %5439 = vmatpush1.bf16.msra.mxu0 %v8976_v23  ;;  %v9051_v23 = vld [vmem:[#allocation8 + $0x1850] ss:$100 sps:$4 sm:$0xff]  }
 0x16a   : > { %5480 = vmatpush1.bf16.msra.mxu1 %v8979_v24  ;;  %5440 = vmatprep.subr.bf16.mxu0 %v8984_v25  ;;  %v9056_v24 = vld [vmem:[#allocation8 + $0x24] ss:$100 sps:$4 sm:$0xff]  }
 0x16b   : > { %5481 = vmatprep.subr.bf16.mxu1 %v8987_v26  ;;  %v9059_v25 = vld [vmem:[#allocation8 + $0xca4] ss:$100 sps:$4 sm:$0xff]  }
 0x16c   : > { %v9054_v26 = vld [vmem:[#allocation8 + $0x20] ss:$100 sps:$4 sm:$0xff]  }
 0x16d   : > { %5441 = vmatpush1.bf16.msra.mxu0 %v8982_v27  ;;  %v9057_v27 = vld [vmem:[#allocation8 + $0xca0] ss:$100 sps:$4 sm:$0xff]  }
 0x16e   : > { %5482 = vmatpush1.bf16.msra.mxu1 %v8985_v28  ;;  %5442 = vmatprep.subr.bf16.mxu0 %v8990_v29  ;;  %v9062_v28 = vld [vmem:[#allocation8 + $0xec] ss:$100 sps:$4 sm:$0xff]  }
 0x16f   : > { %5483 = vmatprep.subr.bf16.mxu1 %v8993_v32  ;;  %v9065_v29 = vld [vmem:[#allocation8 + $0xd6c] ss:$100 sps:$4 sm:$0xff]  }
 0x170   : > { %v9060_v32 = vld [vmem:[#allocation8 + $0xe8] ss:$100 sps:$4 sm:$0xff]  }
 0x171   : > { %5443 = vmatpush1.bf16.msra.mxu0 %v8988_v33  ;;  %v9063_v33 = vld [vmem:[#allocation8 + $0xd68] ss:$100 sps:$4 sm:$0xff]  }
 0x172   : > { %5484 = vmatpush1.bf16.msra.mxu1 %v8991_v34  ;;  %5444 = vmatprep.subr.bf16.mxu0 %v8996_v35  ;;  %v9068_v34 = vld [vmem:[#allocation8 + $0x1b4] ss:$100 sps:$4 sm:$0xff]  }
 0x173   : > { %5485 = vmatprep.subr.bf16.mxu1 %v8999_v36  ;;  %v9071_v35 = vld [vmem:[#allocation8 + $0xe34] ss:$100 sps:$4 sm:$0xff]  }
 0x174   : > { %v9066_v36 = vld [vmem:[#allocation8 + $0x1b0] ss:$100 sps:$4 sm:$0xff]  }
 0x175   : > { %5445 = vmatpush1.bf16.msra.mxu0 %v8994_v37  ;;  %v9069_v37 = vld [vmem:[#allocation8 + $0xe30] ss:$100 sps:$4 sm:$0xff]  }
 0x176   : > { %5486 = vmatpush1.bf16.msra.mxu1 %v8997_v38  ;;  %5446 = vmatprep.subr.bf16.mxu0 %v9002_v39  ;;  %v9074_v38 = vld [vmem:[#allocation8 + $0x27c] ss:$100 sps:$4 sm:$0xff]  }
 0x177   : > { %5487 = vmatprep.subr.bf16.mxu1 %v9005_v40  ;;  %v9077_v39 = vld [vmem:[#allocation8 + $0xefc] ss:$100 sps:$4 sm:$0xff]  }
 0x178   : > { %v9072_v40 = vld [vmem:[#allocation8 + $0x278] ss:$100 sps:$4 sm:$0xff]  }
 0x179   : > { %5447 = vmatpush1.bf16.msra.mxu0 %v9000_v41  ;;  %v9075_v41 = vld [vmem:[#allocation8 + $0xef8] ss:$100 sps:$4 sm:$0xff]  }
 0x17a   : > { %5488 = vmatpush1.bf16.msra.mxu1 %v9003_v42  ;;  %5448 = vmatprep.subr.bf16.mxu0 %v9008_v43  ;;  %v9080_v42 = vld [vmem:[#allocation8 + $0x344] ss:$100 sps:$4 sm:$0xff]  }
 0x17b   : > { %5489 = vmatprep.subr.bf16.mxu1 %v9011_v44  ;;  %v9083_v43 = vld [vmem:[#allocation8 + $0xfc4] ss:$100 sps:$4 sm:$0xff]  }
 0x17c   : > { %v9078_v44 = vld [vmem:[#allocation8 + $0x340] ss:$100 sps:$4 sm:$0xff]  }
 0x17d   : > { %5449 = vmatpush1.bf16.msra.mxu0 %v9006_v45  ;;  %v9081_v45 = vld [vmem:[#allocation8 + $0xfc0] ss:$100 sps:$4 sm:$0xff]  }
 0x17e   : > { %5490 = vmatpush1.bf16.msra.mxu1 %v9009_v46  ;;  %5450 = vmatprep.subr.bf16.mxu0 %v9014_v47  ;;  %v9086_v46 = vld [vmem:[#allocation8 + $0x40c] ss:$100 sps:$4 sm:$0xff]  }
 0x17f   : > { %5491 = vmatprep.subr.bf16.mxu1 %v9017_v48  ;;  %v9089_v47 = vld [vmem:[#allocation8 + $0x108c] ss:$100 sps:$4 sm:$0xff]  }
 0x180   : > { %v9084_v48 = vld [vmem:[#allocation8 + $0x408] ss:$100 sps:$4 sm:$0xff]  }
 0x181   : > { %5451 = vmatpush1.bf16.msra.mxu0 %v9012_v49  ;;  %v9087_v49 = vld [vmem:[#allocation8 + $0x1088] ss:$100 sps:$4 sm:$0xff]  }
 0x182   : > { %5492 = vmatpush1.bf16.msra.mxu1 %v9015_v50  ;;  %5452 = vmatprep.subr.bf16.mxu0 %v9020_v51  ;;  %v9092_v50 = vld [vmem:[#allocation8 + $0x4d4] ss:$100 sps:$4 sm:$0xff]  }
 0x183   : > { %5493 = vmatprep.subr.bf16.mxu1 %v9023_v52  ;;  %v9095_v51 = vld [vmem:[#allocation8 + $0x1154] ss:$100 sps:$4 sm:$0xff]  }
 0x185   : > { %5453 = vmatpush1.bf16.msra.mxu0 %v9018_v53 }
 0x186   : > { %5494 = vmatpush1.bf16.msra.mxu1 %v9021_v54  ;;  %5454 = vmatprep.subr.bf16.mxu0 %v9026_v55  ;;  %v9090_v54 = vld [vmem:[#allocation8 + $0x4d0] ss:$100 sps:$4 sm:$0xff]  }
 0x187   : > { %5495 = vmatprep.subr.bf16.mxu1 %v9029_v56  ;;  %v9093_v55 = vld [vmem:[#allocation8 + $0x1150] ss:$100 sps:$4 sm:$0xff]  }
 0x189   : > { %5455 = vmatpush1.bf16.msra.mxu0 %v9024_v57 }
 0x18a   : > { %5496 = vmatpush1.bf16.msra.mxu1 %v9027_v58  ;;  %5456 = vmatprep.subr.bf16.mxu0 %v9032_v59 }
 0x18b   : > { %5497 = vmatprep.subr.bf16.mxu1 %v9035_v60 }
 0x18d   : > { %5457 = vmatpush1.bf16.msra.mxu0 %v9030_v61 }
 0x18e   : > { %5498 = vmatpush1.bf16.msra.mxu1 %v9033_v62  ;;  %5458 = vmatprep.subr.bf16.mxu0 %v9038_v63 }
 0x18f   : > { %5499 = vmatprep.subr.bf16.mxu1 %v9041_v3  ;;  %v9098_v3 = vld [vmem:[#allocation8 + $0x59c] ss:$100 sps:$4 sm:$0xff]  }
 0x191   : > { %5459 = vmatpush1.bf16.msra.mxu0 %v9036_v4  ;;  %v9101_v4 = vld [vmem:[#allocation8 + $0x121c] ss:$100 sps:$4 sm:$0xff]  }
 0x192   : > { %5500 = vmatpush1.bf16.msra.mxu1 %v9039_v13  ;;  %5460 = vmatprep.subr.bf16.mxu0 %v9044_v14  ;;  %v9096_v13 = vld [vmem:[#allocation8 + $0x598] ss:$100 sps:$4 sm:$0xff]  }
 0x193   : > { %5501 = vmatprep.subr.bf16.mxu1 %v9047_v15  ;;  %v9099_v14 = vld [vmem:[#allocation8 + $0x1218] ss:$100 sps:$4 sm:$0xff]   ;;  %v9104_v15 = vld [vmem:[#allocation8 + $0x664] ss:$100 sps:$4 sm:$0xff]  }
 0x195   : > { %5461 = vmatpush1.bf16.msra.mxu0 %v9042_v16  ;;  %v9107_v16 = vld [vmem:[#allocation8 + $0x12e4] ss:$100 sps:$4 sm:$0xff]  }
 0x196   : > { %5502 = vmatpush1.bf16.msra.mxu1 %v9045_v19  ;;  %5462 = vmatprep.subr.bf16.mxu0 %v9050_v20  ;;  %v9102_v19 = vld [vmem:[#allocation8 + $0x660] ss:$100 sps:$4 sm:$0xff]  }
 0x197   : > { %5503 = vmatprep.subr.bf16.mxu1 %v9053_v21  ;;  %v9105_v20 = vld [vmem:[#allocation8 + $0x12e0] ss:$100 sps:$4 sm:$0xff]   ;;  %v9110_v21 = vld [vmem:[#allocation8 + $0x72c] ss:$100 sps:$4 sm:$0xff]  }
 0x199   : > { %5463 = vmatpush1.bf16.msra.mxu0 %v9048_v22  ;;  %v9113_v22 = vld [vmem:[#allocation8 + $0x13ac] ss:$100 sps:$4 sm:$0xff]  }
 0x19a   : > { %5504 = vmatpush1.bf16.msra.mxu1 %v9051_v23  ;;  %5514 = vmatprep.subr.bf16.mxu0 %v9056_v24  ;;  %v9108_v23 = vld [vmem:[#allocation8 + $0x728] ss:$100 sps:$4 sm:$0xff]  }
 0x19b   : > { %5555 = vmatprep.subr.bf16.mxu1 %v9059_v25  ;;  %v9111_v24 = vld [vmem:[#allocation8 + $0x13a8] ss:$100 sps:$4 sm:$0xff]   ;;  %v9116_v25 = vld [vmem:[#allocation8 + $0x7f4] ss:$100 sps:$4 sm:$0xff]  }
 0x19c   : > { %5465 = vmatmul.mubr.bf16.vlgmr.msra.gmra.mrb[12].mxu0 %v10547_v30 }
 0x19d   : > { %5506 = vmatmul.mubr.bf16.vlgmr.msra.gmra.mrb[12].mxu1 %v10551_v31  ;;  %5515 = vmatpush1.bf16.msra.mxu0 %v9054_v26  ;;  %v9119_v26 = vld [vmem:[#allocation8 + $0x1474] ss:$100 sps:$4 sm:$0xff]  }
 0x19e   : > { %5556 = vmatpush1.bf16.msra.mxu1 %v9057_v27  ;;  %5516 = vmatprep.subr.bf16.mxu0 %v9062_v28  ;;  %v9114_v27 = vld [vmem:[#allocation8 + $0x7f0] ss:$100 sps:$4 sm:$0xff]  }
 0x19f   : > { %5557 = vmatprep.subr.bf16.mxu1 %v9065_v29  ;;  %5546 = vmatprep.mubr.bf16.mxu0 %v10537_v17  ;;  %v9117_v28 = vld [vmem:[#allocation8 + $0x1470] ss:$100 sps:$4 sm:$0xff]   ;;  %v9122_v29 = vld [vmem:[#allocation8 + $0x8bc] ss:$100 sps:$4 sm:$0xff]  }
 0x1a0   : > { %5587 = vmatprep.mubr.bf16.mxu1 %v10541_v18 }
 0x1a1   : > { %5517 = vmatpush1.bf16.msra.mxu0 %v9060_v32  ;;  %v9125_v32 = vld [vmem:[#allocation8 + $0x153c] ss:$100 sps:$4 sm:$0xff]  }
 0x1a2   : > { %5558 = vmatpush1.bf16.msra.mxu1 %v9063_v33  ;;  %5518 = vmatprep.subr.bf16.mxu0 %v9068_v34  ;;  %v9120_v33 = vld [vmem:[#allocation8 + $0x8b8] ss:$100 sps:$4 sm:$0xff]  }
 0x1a3   : > { %5559 = vmatprep.subr.bf16.mxu1 %v9071_v35  ;;  %v9123_v34 = vld [vmem:[#allocation8 + $0x1538] ss:$100 sps:$4 sm:$0xff]   ;;  %v9128_v35 = vld [vmem:[#allocation8 + $0x984] ss:$100 sps:$4 sm:$0xff]  }
 0x1a5   : > { %5519 = vmatpush1.bf16.msra.mxu0 %v9066_v36  ;;  %v9131_v36 = vld [vmem:[#allocation8 + $0x1604] ss:$100 sps:$4 sm:$0xff]  }
 0x1a6   : > { %5560 = vmatpush1.bf16.msra.mxu1 %v9069_v37  ;;  %5520 = vmatprep.subr.bf16.mxu0 %v9074_v38  ;;  %v9126_v37 = vld [vmem:[#allocation8 + $0x980] ss:$100 sps:$4 sm:$0xff]  }
 0x1a7   : > { %5561 = vmatprep.subr.bf16.mxu1 %v9077_v39  ;;  %v9129_v38 = vld [vmem:[#allocation8 + $0x1600] ss:$100 sps:$4 sm:$0xff]   ;;  %v9134_v39 = vld [vmem:[#allocation8 + $0xa4c] ss:$100 sps:$4 sm:$0xff]  }
 0x1a9   : > { %5521 = vmatpush1.bf16.msra.mxu0 %v9072_v40  ;;  %v9137_v40 = vld [vmem:[#allocation8 + $0x16cc] ss:$100 sps:$4 sm:$0xff]  }
 0x1aa   : > { %5562 = vmatpush1.bf16.msra.mxu1 %v9075_v41  ;;  %5522 = vmatprep.subr.bf16.mxu0 %v9080_v42  ;;  %v9132_v41 = vld [vmem:[#allocation8 + $0xa48] ss:$100 sps:$4 sm:$0xff]  }
 0x1ab   : > { %5563 = vmatprep.subr.bf16.mxu1 %v9083_v43  ;;  %v9135_v42 = vld [vmem:[#allocation8 + $0x16c8] ss:$100 sps:$4 sm:$0xff]   ;;  %v9140_v43 = vld [vmem:[#allocation8 + $0xb14] ss:$100 sps:$4 sm:$0xff]  }
 0x1ad   : > { %5523 = vmatpush1.bf16.msra.mxu0 %v9078_v44  ;;  %v9143_v44 = vld [vmem:[#allocation8 + $0x1794] ss:$100 sps:$4 sm:$0xff]  }
 0x1ae   : > { %5564 = vmatpush1.bf16.msra.mxu1 %v9081_v45  ;;  %5524 = vmatprep.subr.bf16.mxu0 %v9086_v46  ;;  %v9138_v45 = vld [vmem:[#allocation8 + $0xb10] ss:$100 sps:$4 sm:$0xff]  }
 0x1af   : > { %5565 = vmatprep.subr.bf16.mxu1 %v9089_v47  ;;  %v5220_v52 = vpop.f32.mrb[0].mxu0  ;;  %v9141_v46 = vld [vmem:[#allocation8 + $0x1790] ss:$100 sps:$4 sm:$0xff]   ;;  %v9146_v47 = vld [vmem:[#allocation8 + $0xbdc] ss:$100 sps:$4 sm:$0xff]  }
 0x1b0   : > { %v5261_v53 = vpop.f32.mrb[0].mxu1  ;;  %v5222_v57 = vpop.f32.mrb[1].mxu0 }
 0x1b1   : > { %v10569_v56 = vadd.f32 %v5261_v53, %v5220_v52  ;;  %v5263_v58 = vpop.f32.mrb[1].mxu1  ;;  %v5224_v60 = vpop.f32.mrb[2].mxu0  ;;  %5525 = vmatpush1.bf16.msra.mxu0 %v9084_v48  ;;  %v9149_v48 = vld [vmem:[#allocation8 + $0x185c] ss:$100 sps:$4 sm:$0xff]   ;;  %v9155_v52 = vld [vmem:[#allocation8 + $0xcac] ss:$100 sps:$4 sm:$0xff]  }
 0x1b2   : > { %v10571_v59 = vadd.f32 %v5263_v58, %v5222_v57  ;;  %v5265_v61 = vpop.f32.mrb[2].mxu1  ;;  %5566 = vmatpush1.bf16.msra.mxu1 %v9087_v49  ;;  %v5225_v62 = vpop.f32.mrb[3].mxu0  ;;  %5526 = vmatprep.subr.bf16.mxu0 %v9092_v50  ;;  %v9144_v49 = vld [vmem:[#allocation8 + $0xbd8] ss:$100 sps:$4 sm:$0xff]   ;;  %v9150_v53 = vld [vmem:[#allocation8 + $0x28] ss:$100 sps:$4 sm:$0xff]  }
 0x1b3   : > { %v5266_v63 = vpop.f32.mrb[3].mxu1  ;;  %5567 = vmatprep.subr.bf16.mxu1 %v9095_v51  ;;  %v9147_v50 = vld [vmem:[#allocation8 + $0x1858] ss:$100 sps:$4 sm:$0xff]   ;;  %v9152_v51 = vld [vmem:[#allocation8 + $0x2c] ss:$100 sps:$4 sm:$0xff]  }
 0x1b4   : > { %v9161_v57 = vld [vmem:[#allocation8 + $0xd74] ss:$100 sps:$4 sm:$0xff]   ;;  %v9164_v61 = vld [vmem:[#allocation8 + $0x1bc] ss:$100 sps:$4 sm:$0xff]  }
 0x1b5   : > { %5527 = vmatpush1.bf16.msra.mxu0 %v9090_v54  ;;  %v9153_v54 = vld [vmem:[#allocation8 + $0xca8] ss:$100 sps:$4 sm:$0xff]   ;;  %v9156_v58 = vld [vmem:[#allocation8 + $0xf0] ss:$100 sps:$4 sm:$0xff]   ;;  %v9167_v62 = vld [vmem:[#allocation8 + $0xe3c] ss:$100 sps:$4 sm:$0xff]  }
 0x1b6   : > { %5568 = vmatpush1.bf16.msra.mxu1 %v9093_v55  ;;  %5528 = vmatprep.subr.bf16.mxu0 %v9098_v3  ;;  %v9158_v55 = vld [vmem:[#allocation8 + $0xf4] ss:$100 sps:$4 sm:$0xff]  }
 0x1b7   : > { %5569 = vmatprep.subr.bf16.mxu1 %v9101_v4  ;;  %v9159_v60 = vld [vmem:[#allocation8 + $0xd70] ss:$100 sps:$4 sm:$0xff]   ;;  %v9162_v63 = vld [vmem:[#allocation8 + $0x1b8] ss:$100 sps:$4 sm:$0xff]   ;;  %v9170_v4 = vld [vmem:[#allocation8 + $0x284] ss:$100 sps:$4 sm:$0xff]  }
 0x1b8   : > { %v9165_v3 = vld [vmem:[#allocation8 + $0xe38] ss:$100 sps:$4 sm:$0xff]  }
 0x1b9   : > { %5529 = vmatpush1.bf16.msra.mxu0 %v9096_v13  ;;  %v9173_v13 = vld [vmem:[#allocation8 + $0xf04] ss:$100 sps:$4 sm:$0xff]  }
 0x1ba   : > { %5570 = vmatpush1.bf16.msra.mxu1 %v9099_v14  ;;  %5530 = vmatprep.subr.bf16.mxu0 %v9104_v15  ;;  %v9168_v14 = vld [vmem:[#allocation8 + $0x280] ss:$100 sps:$4 sm:$0xff]  }
 0x1bb   : > { %5571 = vmatprep.subr.bf16.mxu1 %v9107_v16  ;;  %v9171_v15 = vld [vmem:[#allocation8 + $0xf00] ss:$100 sps:$4 sm:$0xff]   ;;  %v9176_v16 = vld [vmem:[#allocation8 + $0x34c] ss:$100 sps:$4 sm:$0xff]  }
 0x1bd   : > { %5531 = vmatpush1.bf16.msra.mxu0 %v9102_v19  ;;  %v9179_v19 = vld [vmem:[#allocation8 + $0xfcc] ss:$100 sps:$4 sm:$0xff]  }
 0x1be   : > { %5572 = vmatpush1.bf16.msra.mxu1 %v9105_v20  ;;  %5532 = vmatprep.subr.bf16.mxu0 %v9110_v21  ;;  %v9174_v20 = vld [vmem:[#allocation8 + $0x348] ss:$100 sps:$4 sm:$0xff]  }
 0x1bf   : > { %5573 = vmatprep.subr.bf16.mxu1 %v9113_v22  ;;  %v9177_v21 = vld [vmem:[#allocation8 + $0xfc8] ss:$100 sps:$4 sm:$0xff]   ;;  %v9182_v22 = vld [vmem:[#allocation8 + $0x414] ss:$100 sps:$4 sm:$0xff]  }
 0x1c1   : > { %5533 = vmatpush1.bf16.msra.mxu0 %v9108_v23  ;;  %v9185_v23 = vld [vmem:[#allocation8 + $0x1094] ss:$100 sps:$4 sm:$0xff]  }
 0x1c2   : > { %5574 = vmatpush1.bf16.msra.mxu1 %v9111_v24  ;;  %5534 = vmatprep.subr.bf16.mxu0 %v9116_v25  ;;  %v9180_v24 = vld [vmem:[#allocation8 + $0x410] ss:$100 sps:$4 sm:$0xff]  }
 0x1c3   : > { %5575 = vmatprep.subr.bf16.mxu1 %v9119_v26  ;;  %v9183_v25 = vld [vmem:[#allocation8 + $0x1090] ss:$100 sps:$4 sm:$0xff]   ;;  %v9188_v26 = vld [vmem:[#allocation8 + $0x4dc] ss:$100 sps:$4 sm:$0xff]  }
 0x1c5   : > { %5535 = vmatpush1.bf16.msra.mxu0 %v9114_v27  ;;  %v9191_v27 = vld [vmem:[#allocation8 + $0x115c] ss:$100 sps:$4 sm:$0xff]  }
 0x1c6   : > { %5576 = vmatpush1.bf16.msra.mxu1 %v9117_v28  ;;  %5536 = vmatprep.subr.bf16.mxu0 %v9122_v29 }
 0x1c7   : > { %5577 = vmatprep.subr.bf16.mxu1 %v9125_v32  ;;  %v9186_v32 = vld [vmem:[#allocation8 + $0x4d8] ss:$100 sps:$4 sm:$0xff]  }
 0x1c9   : > { %5537 = vmatpush1.bf16.msra.mxu0 %v9120_v33  ;;  %v9189_v33 = vld [vmem:[#allocation8 + $0x1158] ss:$100 sps:$4 sm:$0xff]  }
 0x1ca   : > { %5578 = vmatpush1.bf16.msra.mxu1 %v9123_v34  ;;  %5538 = vmatprep.subr.bf16.mxu0 %v9128_v35 }
 0x1cb   : > { %5579 = vmatprep.subr.bf16.mxu1 %v9131_v36 }
 0x1cd   : > { %5539 = vmatpush1.bf16.msra.mxu0 %v9126_v37 }
 0x1ce   : > { %5580 = vmatpush1.bf16.msra.mxu1 %v9129_v38  ;;  %5540 = vmatprep.subr.bf16.mxu0 %v9134_v39 }
 0x1cf   : > { %5581 = vmatprep.subr.bf16.mxu1 %v9137_v40 }
 0x1d1   : > { %5541 = vmatpush1.bf16.msra.mxu0 %v9132_v41 }
 0x1d2   : > { %5582 = vmatpush1.bf16.msra.mxu1 %v9135_v42  ;;  %5542 = vmatprep.subr.bf16.mxu0 %v9140_v43  ;;  %v9194_v42 = vld [vmem:[#allocation8 + $0x5a4] ss:$100 sps:$4 sm:$0xff]  }
 0x1d3   : > { %5583 = vmatprep.subr.bf16.mxu1 %v9143_v44  ;;  %v9197_v43 = vld [vmem:[#allocation8 + $0x1224] ss:$100 sps:$4 sm:$0xff]  }
 0x1d4   : > { %v9192_v44 = vld [vmem:[#allocation8 + $0x5a0] ss:$100 sps:$4 sm:$0xff]  }
 0x1d5   : > { %5543 = vmatpush1.bf16.msra.mxu0 %v9138_v45  ;;  %v9195_v45 = vld [vmem:[#allocation8 + $0x1220] ss:$100 sps:$4 sm:$0xff]  }
 0x1d6   : > { %5584 = vmatpush1.bf16.msra.mxu1 %v9141_v46  ;;  %5544 = vmatprep.subr.bf16.mxu0 %v9146_v47  ;;  %v9200_v46 = vld [vmem:[#allocation8 + $0x66c] ss:$100 sps:$4 sm:$0xff]  }
 0x1d7   : > { %5585 = vmatprep.subr.bf16.mxu1 %v9149_v48  ;;  %v9203_v47 = vld [vmem:[#allocation8 + $0x12ec] ss:$100 sps:$4 sm:$0xff]  }
 0x1d8   : > { %v9198_v48 = vld [vmem:[#allocation8 + $0x668] ss:$100 sps:$4 sm:$0xff]  }
 0x1d9   : > { %5545 = vmatpush1.bf16.msra.mxu0 %v9144_v49  ;;  %v9201_v49 = vld [vmem:[#allocation8 + $0x12e8] ss:$100 sps:$4 sm:$0xff]  }
 0x1da   : > { %5586 = vmatpush1.bf16.msra.mxu1 %v9147_v50  ;;  %5596 = vmatprep.subr.bf16.mxu0 %v9152_v51  ;;  %v9206_v50 = vld [vmem:[#allocation8 + $0x734] ss:$100 sps:$4 sm:$0xff]  }
 0x1db   : > { %5637 = vmatprep.subr.bf16.mxu1 %v9155_v52  ;;  %v9209_v51 = vld [vmem:[#allocation8 + $0x13b4] ss:$100 sps:$4 sm:$0xff]  }
 0x1dc   : > { %5547 = vmatmul.mubr.bf16.vlgmr.msra.gmra.mrb[16].mxu0 %v10547_v30  ;;  %v9204_v52 = vld [vmem:[#allocation8 + $0x730] ss:$100 sps:$4 sm:$0xff]  }
 0x1dd   : > { %5588 = vmatmul.mubr.bf16.vlgmr.msra.gmra.mrb[16].mxu1 %v10551_v31  ;;  %5597 = vmatpush1.bf16.msra.mxu0 %v9150_v53  ;;  %v9207_v53 = vld [vmem:[#allocation8 + $0x13b0] ss:$100 sps:$4 sm:$0xff]  }
 0x1de   : > { %5638 = vmatpush1.bf16.msra.mxu1 %v9153_v54  ;;  %5598 = vmatprep.subr.bf16.mxu0 %v9158_v55  ;;  %v9212_v54 = vld [vmem:[#allocation8 + $0x7fc] ss:$100 sps:$4 sm:$0xff]  }
 0x1df   : > { %5639 = vmatprep.subr.bf16.mxu1 %v9161_v57  ;;  %5628 = vmatprep.mubr.bf16.mxu0 %v10537_v17  ;;  %v9215_v55 = vld [vmem:[#allocation8 + $0x147c] ss:$100 sps:$4 sm:$0xff]  }
 0x1e0   : > { %5669 = vmatprep.mubr.bf16.mxu1 %v10541_v18  ;;  %v9210_v57 = vld [vmem:[#allocation8 + $0x7f8] ss:$100 sps:$4 sm:$0xff]  }
 0x1e1   : > { %5599 = vmatpush1.bf16.msra.mxu0 %v9156_v58  ;;  %v9213_v58 = vld [vmem:[#allocation8 + $0x1478] ss:$100 sps:$4 sm:$0xff]  }
 0x1e2   : > { %5640 = vmatpush1.bf16.msra.mxu1 %v9159_v60  ;;  %5600 = vmatprep.subr.bf16.mxu0 %v9164_v61  ;;  %v9218_v60 = vld [vmem:[#allocation8 + $0x8c4] ss:$100 sps:$4 sm:$0xff]  }
 0x1e3   : > { %5641 = vmatprep.subr.bf16.mxu1 %v9167_v62  ;;  %v9221_v61 = vld [vmem:[#allocation8 + $0x1544] ss:$100 sps:$4 sm:$0xff]  }
 0x1e4   : > { %v9216_v62 = vld [vmem:[#allocation8 + $0x8c0] ss:$100 sps:$4 sm:$0xff]  }
 0x1e5   : > { %5601 = vmatpush1.bf16.msra.mxu0 %v9162_v63  ;;  %v9219_v63 = vld [vmem:[#allocation8 + $0x1540] ss:$100 sps:$4 sm:$0xff]  }
 0x1e6   : > { %5642 = vmatpush1.bf16.msra.mxu1 %v9165_v3  ;;  %5602 = vmatprep.subr.bf16.mxu0 %v9170_v4  ;;  %v9224_v3 = vld [vmem:[#allocation8 + $0x98c] ss:$100 sps:$4 sm:$0xff]  }
 0x1e7   : > { %5643 = vmatprep.subr.bf16.mxu1 %v9173_v13  ;;  %v9227_v4 = vld [vmem:[#allocation8 + $0x160c] ss:$100 sps:$4 sm:$0xff]  }
 0x1e8   : > { %v9222_v13 = vld [vmem:[#allocation8 + $0x988] ss:$100 sps:$4 sm:$0xff]  }
 0x1e9   : > { %5603 = vmatpush1.bf16.msra.mxu0 %v9168_v14  ;;  %v9225_v14 = vld [vmem:[#allocation8 + $0x1608] ss:$100 sps:$4 sm:$0xff]  }
 0x1ea   : > { %5644 = vmatpush1.bf16.msra.mxu1 %v9171_v15  ;;  %5604 = vmatprep.subr.bf16.mxu0 %v9176_v16  ;;  %v9230_v15 = vld [vmem:[#allocation8 + $0xa54] ss:$100 sps:$4 sm:$0xff]  }
 0x1eb   : > { %5645 = vmatprep.subr.bf16.mxu1 %v9179_v19  ;;  %v9233_v16 = vld [vmem:[#allocation8 + $0x16d4] ss:$100 sps:$4 sm:$0xff]  }
 0x1ec   : > { %v9228_v19 = vld [vmem:[#allocation8 + $0xa50] ss:$100 sps:$4 sm:$0xff]  }
 0x1ed   : > { %5605 = vmatpush1.bf16.msra.mxu0 %v9174_v20  ;;  %v9231_v20 = vld [vmem:[#allocation8 + $0x16d0] ss:$100 sps:$4 sm:$0xff]  }
 0x1ee   : > { %5646 = vmatpush1.bf16.msra.mxu1 %v9177_v21  ;;  %5606 = vmatprep.subr.bf16.mxu0 %v9182_v22  ;;  %v9236_v21 = vld [vmem:[#allocation8 + $0xb1c] ss:$100 sps:$4 sm:$0xff]  }
 0x1ef   : > { %5647 = vmatprep.subr.bf16.mxu1 %v9185_v23  ;;  %v5302_v28 = vpop.f32.mrb[4].mxu0  ;;  %v9239_v22 = vld [vmem:[#allocation8 + $0x179c] ss:$100 sps:$4 sm:$0xff]  }
 0x1f0   : > { %v5343_v29 = vpop.f32.mrb[4].mxu1  ;;  %v5304_v35 = vpop.f32.mrb[5].mxu0  ;;  %v9234_v23 = vld [vmem:[#allocation8 + $0xb18] ss:$100 sps:$4 sm:$0xff]  }
 0x1f1   : > { %v10577_v34 = vadd.f32 %v5343_v29, %v5302_v28  ;;  %v5345_v36 = vpop.f32.mrb[5].mxu1  ;;  %v5306_v38 = vpop.f32.mrb[6].mxu0  ;;  %5607 = vmatpush1.bf16.msra.mxu0 %v9180_v24  ;;  %v9237_v24 = vld [vmem:[#allocation8 + $0x1798] ss:$100 sps:$4 sm:$0xff]   ;;  %v9243_v28 = vld [vmem:[#allocation8 + $0x1860] ss:$100 sps:$4 sm:$0xff]  }
 0x1f2   : > { %v10579_v37 = vadd.f32 %v5345_v36, %v5304_v35  ;;  %v5347_v39 = vpop.f32.mrb[6].mxu1  ;;  %5648 = vmatpush1.bf16.msra.mxu1 %v9183_v25  ;;  %v5307_v40 = vpop.f32.mrb[7].mxu0  ;;  %5608 = vmatprep.subr.bf16.mxu0 %v9188_v26  ;;  %v9242_v25 = vld [vmem:[#allocation8 + $0xbe4] ss:$100 sps:$4 sm:$0xff]   ;;  %v9248_v29 = vld [vmem:[#allocation8 + $0x34] ss:$100 sps:$4 sm:$0xff]  }
 0x1f3   : > { %v5348_v41 = vpop.f32.mrb[7].mxu1  ;;  %5649 = vmatprep.subr.bf16.mxu1 %v9191_v27  ;;  %v9245_v26 = vld [vmem:[#allocation8 + $0x1864] ss:$100 sps:$4 sm:$0xff]   ;;  %v9249_v35 = vld [vmem:[#allocation8 + $0xcb0] ss:$100 sps:$4 sm:$0xff]  }
 0x1f4   : > { %v9240_v27 = vld [vmem:[#allocation8 + $0xbe0] ss:$100 sps:$4 sm:$0xff]   ;;  %v9252_v39 = vld [vmem:[#allocation8 + $0xf8] ss:$100 sps:$4 sm:$0xff]  }
 0x1f5   : > { %5609 = vmatpush1.bf16.msra.mxu0 %v9186_v32  ;;  %v9251_v32 = vld [vmem:[#allocation8 + $0xcb4] ss:$100 sps:$4 sm:$0xff]   ;;  %v9254_v36 = vld [vmem:[#allocation8 + $0xfc] ss:$100 sps:$4 sm:$0xff]   ;;  %v9260_v41 = vld [vmem:[#allocation8 + $0x1c4] ss:$100 sps:$4 sm:$0xff]  }
 0x1f6   : > { %5650 = vmatpush1.bf16.msra.mxu1 %v9189_v33  ;;  %5610 = vmatprep.subr.bf16.mxu0 %v9194_v42  ;;  %v9246_v33 = vld [vmem:[#allocation8 + $0x30] ss:$100 sps:$4 sm:$0xff]   ;;  %v9257_v38 = vld [vmem:[#allocation8 + $0xd7c] ss:$100 sps:$4 sm:$0xff]   ;;  %v9263_v42 = vld [vmem:[#allocation8 + $0xe44] ss:$100 sps:$4 sm:$0xff]  }
 0x1f7   : > { %5651 = vmatprep.subr.bf16.mxu1 %v9197_v43  ;;  %v9255_v40 = vld [vmem:[#allocation8 + $0xd78] ss:$100 sps:$4 sm:$0xff]   ;;  %v9258_v43 = vld [vmem:[#allocation8 + $0x1c0] ss:$100 sps:$4 sm:$0xff]  }
 0x1f9   : > { %5611 = vmatpush1.bf16.msra.mxu0 %v9192_v44  ;;  %v9261_v44 = vld [vmem:[#allocation8 + $0xe40] ss:$100 sps:$4 sm:$0xff]  }
 0x1fa   : > { %5652 = vmatpush1.bf16.msra.mxu1 %v9195_v45  ;;  %5612 = vmatprep.subr.bf16.mxu0 %v9200_v46  ;;  %v9266_v45 = vld [vmem:[#allocation8 + $0x28c] ss:$100 sps:$4 sm:$0xff]  }
 0x1fb   : > { %5653 = vmatprep.subr.bf16.mxu1 %v9203_v47  ;;  %v9269_v46 = vld [vmem:[#allocation8 + $0xf0c] ss:$100 sps:$4 sm:$0xff]  }
 0x1fc   : > { %v9264_v47 = vld [vmem:[#allocation8 + $0x288] ss:$100 sps:$4 sm:$0xff]  }
 0x1fd   : > { %5613 = vmatpush1.bf16.msra.mxu0 %v9198_v48  ;;  %v9267_v48 = vld [vmem:[#allocation8 + $0xf08] ss:$100 sps:$4 sm:$0xff]  }
 0x1fe   : > { %5654 = vmatpush1.bf16.msra.mxu1 %v9201_v49  ;;  %5614 = vmatprep.subr.bf16.mxu0 %v9206_v50  ;;  %v9272_v49 = vld [vmem:[#allocation8 + $0x354] ss:$100 sps:$4 sm:$0xff]  }
 0x1ff   : > { %5655 = vmatprep.subr.bf16.mxu1 %v9209_v51  ;;  %v9275_v50 = vld [vmem:[#allocation8 + $0xfd4] ss:$100 sps:$4 sm:$0xff]  }
 0x200   : > { %v9270_v51 = vld [vmem:[#allocation8 + $0x350] ss:$100 sps:$4 sm:$0xff]  }
 0x201   : > { %5615 = vmatpush1.bf16.msra.mxu0 %v9204_v52  ;;  %v9273_v52 = vld [vmem:[#allocation8 + $0xfd0] ss:$100 sps:$4 sm:$0xff]  }
 0x202   : > { %5656 = vmatpush1.bf16.msra.mxu1 %v9207_v53  ;;  %5616 = vmatprep.subr.bf16.mxu0 %v9212_v54  ;;  %v9278_v53 = vld [vmem:[#allocation8 + $0x41c] ss:$100 sps:$4 sm:$0xff]  }
 0x203   : > { %5657 = vmatprep.subr.bf16.mxu1 %v9215_v55  ;;  %v9281_v54 = vld [vmem:[#allocation8 + $0x109c] ss:$100 sps:$4 sm:$0xff]  }
 0x204   : > { %v9276_v55 = vld [vmem:[#allocation8 + $0x418] ss:$100 sps:$4 sm:$0xff]  }
 0x205   : > { %5617 = vmatpush1.bf16.msra.mxu0 %v9210_v57  ;;  %v9279_v57 = vld [vmem:[#allocation8 + $0x1098] ss:$100 sps:$4 sm:$0xff]  }
 0x206   : > { %5658 = vmatpush1.bf16.msra.mxu1 %v9213_v58  ;;  %5618 = vmatprep.subr.bf16.mxu0 %v9218_v60  ;;  %v9284_v58 = vld [vmem:[#allocation8 + $0x4e4] ss:$100 sps:$4 sm:$0xff]  }
 0x207   : > { %5659 = vmatprep.subr.bf16.mxu1 %v9221_v61  ;;  %v9287_v60 = vld [vmem:[#allocation8 + $0x1164] ss:$100 sps:$4 sm:$0xff]  }
 0x209   : > { %5619 = vmatpush1.bf16.msra.mxu0 %v9216_v62 }
 0x20a   : > { %5660 = vmatpush1.bf16.msra.mxu1 %v9219_v63  ;;  %5620 = vmatprep.subr.bf16.mxu0 %v9224_v3  ;;  %v9282_v63 = vld [vmem:[#allocation8 + $0x4e0] ss:$100 sps:$4 sm:$0xff]  }
 0x20b   : > { %5661 = vmatprep.subr.bf16.mxu1 %v9227_v4  ;;  %v9285_v3 = vld [vmem:[#allocation8 + $0x1160] ss:$100 sps:$4 sm:$0xff]  }
 0x20d   : > { %5621 = vmatpush1.bf16.msra.mxu0 %v9222_v13 }
 0x20e   : > { %5662 = vmatpush1.bf16.msra.mxu1 %v9225_v14  ;;  %5622 = vmatprep.subr.bf16.mxu0 %v9230_v15 }
 0x20f   : > { %5663 = vmatprep.subr.bf16.mxu1 %v9233_v16 }
 0x211   : > { %5623 = vmatpush1.bf16.msra.mxu0 %v9228_v19 }
 0x212   : > { %5664 = vmatpush1.bf16.msra.mxu1 %v9231_v20  ;;  %5624 = vmatprep.subr.bf16.mxu0 %v9236_v21 }
 0x213   : > { %5665 = vmatprep.subr.bf16.mxu1 %v9239_v22  ;;  %v9290_v22 = vld [vmem:[#allocation8 + $0x5ac] ss:$100 sps:$4 sm:$0xff]  }
 0x215   : > { %5625 = vmatpush1.bf16.msra.mxu0 %v9234_v23  ;;  %v9293_v23 = vld [vmem:[#allocation8 + $0x122c] ss:$100 sps:$4 sm:$0xff]  }
 0x216   : > { %5666 = vmatpush1.bf16.msra.mxu1 %v9237_v24  ;;  %5626 = vmatprep.subr.bf16.mxu0 %v9242_v25  ;;  %v9288_v24 = vld [vmem:[#allocation8 + $0x5a8] ss:$100 sps:$4 sm:$0xff]  }
 0x217   : > { %5667 = vmatprep.subr.bf16.mxu1 %v9245_v26  ;;  %v9291_v25 = vld [vmem:[#allocation8 + $0x1228] ss:$100 sps:$4 sm:$0xff]   ;;  %v9296_v26 = vld [vmem:[#allocation8 + $0x674] ss:$100 sps:$4 sm:$0xff]  }
 0x219   : > { %5627 = vmatpush1.bf16.msra.mxu0 %v9240_v27  ;;  %v9299_v27 = vld [vmem:[#allocation8 + $0x12f4] ss:$100 sps:$4 sm:$0xff]  }
 0x21a   : > { %5668 = vmatpush1.bf16.msra.mxu1 %v9243_v28  ;;  %5678 = vmatprep.subr.bf16.mxu0 %v9248_v29  ;;  %v9294_v28 = vld [vmem:[#allocation8 + $0x670] ss:$100 sps:$4 sm:$0xff]  }
 0x21b   : > { %5719 = vmatprep.subr.bf16.mxu1 %v9251_v32  ;;  %v9297_v29 = vld [vmem:[#allocation8 + $0x12f0] ss:$100 sps:$4 sm:$0xff]   ;;  %v9302_v32 = vld [vmem:[#allocation8 + $0x73c] ss:$100 sps:$4 sm:$0xff]  }
 0x21c   : > { %5629 = vmatmul.mubr.bf16.vlgmr.msra.gmra.mrb[20].mxu0 %v10547_v30 }
 0x21d   : > { %5670 = vmatmul.mubr.bf16.vlgmr.msra.gmra.mrb[20].mxu1 %v10551_v31  ;;  %5679 = vmatpush1.bf16.msra.mxu0 %v9246_v33  ;;  %v9305_v33 = vld [vmem:[#allocation8 + $0x13bc] ss:$100 sps:$4 sm:$0xff]  }
 0x21e   : > { %5720 = vmatpush1.bf16.msra.mxu1 %v9249_v35  ;;  %5680 = vmatprep.subr.bf16.mxu0 %v9254_v36  ;;  %v9300_v35 = vld [vmem:[#allocation8 + $0x738] ss:$100 sps:$4 sm:$0xff]  }
 0x21f   : > { %5721 = vmatprep.subr.bf16.mxu1 %v9257_v38  ;;  %5710 = vmatprep.mubr.bf16.mxu0 %v10537_v17  ;;  %v9303_v36 = vld [vmem:[#allocation8 + $0x13b8] ss:$100 sps:$4 sm:$0xff]   ;;  %v9308_v38 = vld [vmem:[#allocation8 + $0x804] ss:$100 sps:$4 sm:$0xff]  }
 0x220   : > { %5751 = vmatprep.mubr.bf16.mxu1 %v10541_v18 }
 0x221   : > { %5681 = vmatpush1.bf16.msra.mxu0 %v9252_v39  ;;  %v9311_v39 = vld [vmem:[#allocation8 + $0x1484] ss:$100 sps:$4 sm:$0xff]  }
 0x222   : > { %5722 = vmatpush1.bf16.msra.mxu1 %v9255_v40  ;;  %5682 = vmatprep.subr.bf16.mxu0 %v9260_v41  ;;  %v9306_v40 = vld [vmem:[#allocation8 + $0x800] ss:$100 sps:$4 sm:$0xff]  }
 0x223   : > { %5723 = vmatprep.subr.bf16.mxu1 %v9263_v42  ;;  %v9309_v41 = vld [vmem:[#allocation8 + $0x1480] ss:$100 sps:$4 sm:$0xff]   ;;  %v9314_v42 = vld [vmem:[#allocation8 + $0x8cc] ss:$100 sps:$4 sm:$0xff]  }
 0x225   : > { %5683 = vmatpush1.bf16.msra.mxu0 %v9258_v43  ;;  %v9317_v43 = vld [vmem:[#allocation8 + $0x154c] ss:$100 sps:$4 sm:$0xff]  }
 0x226   : > { %5724 = vmatpush1.bf16.msra.mxu1 %v9261_v44  ;;  %5684 = vmatprep.subr.bf16.mxu0 %v9266_v45  ;;  %v9312_v44 = vld [vmem:[#allocation8 + $0x8c8] ss:$100 sps:$4 sm:$0xff]  }
 0x227   : > { %5725 = vmatprep.subr.bf16.mxu1 %v9269_v46  ;;  %v9315_v45 = vld [vmem:[#allocation8 + $0x1548] ss:$100 sps:$4 sm:$0xff]   ;;  %v9320_v46 = vld [vmem:[#allocation8 + $0x994] ss:$100 sps:$4 sm:$0xff]  }
 0x229   : > { %5685 = vmatpush1.bf16.msra.mxu0 %v9264_v47  ;;  %v9323_v47 = vld [vmem:[#allocation8 + $0x1614] ss:$100 sps:$4 sm:$0xff]  }
 0x22a   : > { %5726 = vmatpush1.bf16.msra.mxu1 %v9267_v48  ;;  %5686 = vmatprep.subr.bf16.mxu0 %v9272_v49  ;;  %v9318_v48 = vld [vmem:[#allocation8 + $0x990] ss:$100 sps:$4 sm:$0xff]  }
 0x22b   : > { %5727 = vmatprep.subr.bf16.mxu1 %v9275_v50  ;;  %v9321_v49 = vld [vmem:[#allocation8 + $0x1610] ss:$100 sps:$4 sm:$0xff]   ;;  %v9326_v50 = vld [vmem:[#allocation8 + $0xa5c] ss:$100 sps:$4 sm:$0xff]  }
 0x22d   : > { %5687 = vmatpush1.bf16.msra.mxu0 %v9270_v51  ;;  %v9329_v51 = vld [vmem:[#allocation8 + $0x16dc] ss:$100 sps:$4 sm:$0xff]  }
 0x22e   : > { %5728 = vmatpush1.bf16.msra.mxu1 %v9273_v52  ;;  %5688 = vmatprep.subr.bf16.mxu0 %v9278_v53  ;;  %v9324_v52 = vld [vmem:[#allocation8 + $0xa58] ss:$100 sps:$4 sm:$0xff]  }
 0x22f   : > { %5729 = vmatprep.subr.bf16.mxu1 %v9281_v54  ;;  %v5384_v61 = vpop.f32.mrb[8].mxu0  ;;  %v9327_v53 = vld [vmem:[#allocation8 + $0x16d8] ss:$100 sps:$4 sm:$0xff]   ;;  %v9332_v54 = vld [vmem:[#allocation8 + $0xb24] ss:$100 sps:$4 sm:$0xff]  }
 0x230   : > { %v5425_v62 = vpop.f32.mrb[8].mxu1  ;;  %v5386_v13 = vpop.f32.mrb[9].mxu0 }
 0x231   : > { %v10585_v4 = vadd.f32 %v5425_v62, %v5384_v61  ;;  %v5427_v14 = vpop.f32.mrb[9].mxu1  ;;  %v5388_v16 = vpop.f32.mrb[10].mxu0  ;;  %5689 = vmatpush1.bf16.msra.mxu0 %v9276_v55  ;;  %v9335_v55 = vld [vmem:[#allocation8 + $0x17a4] ss:$100 sps:$4 sm:$0xff]   ;;  %v9341_v61 = vld [vmem:[#allocation8 + $0x186c] ss:$100 sps:$4 sm:$0xff]  }
 0x232   : > { %v10587_v15 = vadd.f32 %v5427_v14, %v5386_v13  ;;  %v5429_v19 = vpop.f32.mrb[10].mxu1  ;;  %5730 = vmatpush1.bf16.msra.mxu1 %v9279_v57  ;;  %v5389_v20 = vpop.f32.mrb[11].mxu0  ;;  %5690 = vmatprep.subr.bf16.mxu0 %v9284_v58  ;;  %v9330_v57 = vld [vmem:[#allocation8 + $0xb20] ss:$100 sps:$4 sm:$0xff]   ;;  %v9336_v62 = vld [vmem:[#allocation8 + $0xbe8] ss:$100 sps:$4 sm:$0xff]  }
 0x233   : > { %v5430_v21 = vpop.f32.mrb[11].mxu1  ;;  %5731 = vmatprep.subr.bf16.mxu1 %v9287_v60  ;;  %v9333_v58 = vld [vmem:[#allocation8 + $0x17a0] ss:$100 sps:$4 sm:$0xff]   ;;  %v9338_v60 = vld [vmem:[#allocation8 + $0xbec] ss:$100 sps:$4 sm:$0xff]  }
 0x234   : > { %v9347_v13 = vld [vmem:[#allocation8 + $0xcbc] ss:$100 sps:$4 sm:$0xff]   ;;  %v9350_v19 = vld [vmem:[#allocation8 + $0x104] ss:$100 sps:$4 sm:$0xff]  }
 0x235   : > { %5691 = vmatpush1.bf16.msra.mxu0 %v9282_v63  ;;  %v9339_v63 = vld [vmem:[#allocation8 + $0x1868] ss:$100 sps:$4 sm:$0xff]   ;;  %v9342_v14 = vld [vmem:[#allocation8 + $0x38] ss:$100 sps:$4 sm:$0xff]   ;;  %v9348_v21 = vld [vmem:[#allocation8 + $0x100] ss:$100 sps:$4 sm:$0xff]  }
 0x236   : > { %5732 = vmatpush1.bf16.msra.mxu1 %v9285_v3  ;;  %5692 = vmatprep.subr.bf16.mxu0 %v9290_v22  ;;  %v9344_v3 = vld [vmem:[#allocation8 + $0x3c] ss:$100 sps:$4 sm:$0xff]   ;;  %v9353_v20 = vld [vmem:[#allocation8 + $0xd84] ss:$100 sps:$4 sm:$0xff]  }
 0x237   : > { %5733 = vmatprep.subr.bf16.mxu1 %v9293_v23  ;;  %v9345_v16 = vld [vmem:[#allocation8 + $0xcb8] ss:$100 sps:$4 sm:$0xff]   ;;  %v9351_v22 = vld [vmem:[#allocation8 + $0xd80] ss:$100 sps:$4 sm:$0xff]   ;;  %v9356_v23 = vld [vmem:[#allocation8 + $0x1cc] ss:$100 sps:$4 sm:$0xff]  }
 0x239   : > { %5693 = vmatpush1.bf16.msra.mxu0 %v9288_v24  ;;  %v9359_v24 = vld [vmem:[#allocation8 + $0xe4c] ss:$100 sps:$4 sm:$0xff]  }
 0x23a   : > { %5734 = vmatpush1.bf16.msra.mxu1 %v9291_v25  ;;  %5694 = vmatprep.subr.bf16.mxu0 %v9296_v26  ;;  %v9354_v25 = vld [vmem:[#allocation8 + $0x1c8] ss:$100 sps:$4 sm:$0xff]  }
 0x23b   : > { %5735 = vmatprep.subr.bf16.mxu1 %v9299_v27  ;;  %v9357_v26 = vld [vmem:[#allocation8 + $0xe48] ss:$100 sps:$4 sm:$0xff]   ;;  %v9362_v27 = vld [vmem:[#allocation8 + $0x294] ss:$100 sps:$4 sm:$0xff]  }
 0x23d   : > { %5695 = vmatpush1.bf16.msra.mxu0 %v9294_v28  ;;  %v9365_v28 = vld [vmem:[#allocation8 + $0xf14] ss:$100 sps:$4 sm:$0xff]  }
 0x23e   : > { %5736 = vmatpush1.bf16.msra.mxu1 %v9297_v29  ;;  %5696 = vmatprep.subr.bf16.mxu0 %v9302_v32  ;;  %v9360_v29 = vld [vmem:[#allocation8 + $0x290] ss:$100 sps:$4 sm:$0xff]  }
 0x23f   : > { %5737 = vmatprep.subr.bf16.mxu1 %v9305_v33  ;;  %v9363_v32 = vld [vmem:[#allocation8 + $0xf10] ss:$100 sps:$4 sm:$0xff]   ;;  %v9368_v33 = vld [vmem:[#allocation8 + $0x35c] ss:$100 sps:$4 sm:$0xff]  }
 0x241   : > { %5697 = vmatpush1.bf16.msra.mxu0 %v9300_v35  ;;  %v9371_v35 = vld [vmem:[#allocation8 + $0xfdc] ss:$100 sps:$4 sm:$0xff]  }
 0x242   : > { %5738 = vmatpush1.bf16.msra.mxu1 %v9303_v36  ;;  %5698 = vmatprep.subr.bf16.mxu0 %v9308_v38  ;;  %v9366_v36 = vld [vmem:[#allocation8 + $0x358] ss:$100 sps:$4 sm:$0xff]  }
 0x243   : > { %5739 = vmatprep.subr.bf16.mxu1 %v9311_v39  ;;  %v9369_v38 = vld [vmem:[#allocation8 + $0xfd8] ss:$100 sps:$4 sm:$0xff]   ;;  %v9374_v39 = vld [vmem:[#allocation8 + $0x424] ss:$100 sps:$4 sm:$0xff]  }
 0x245   : > { %5699 = vmatpush1.bf16.msra.mxu0 %v9306_v40  ;;  %v9377_v40 = vld [vmem:[#allocation8 + $0x10a4] ss:$100 sps:$4 sm:$0xff]  }
 0x246   : > { %5740 = vmatpush1.bf16.msra.mxu1 %v9309_v41  ;;  %5700 = vmatprep.subr.bf16.mxu0 %v9314_v42  ;;  %v9372_v41 = vld [vmem:[#allocation8 + $0x420] ss:$100 sps:$4 sm:$0xff]  }
 0x247   : > { %5741 = vmatprep.subr.bf16.mxu1 %v9317_v43  ;;  %v9375_v42 = vld [vmem:[#allocation8 + $0x10a0] ss:$100 sps:$4 sm:$0xff]   ;;  %v9380_v43 = vld [vmem:[#allocation8 + $0x4ec] ss:$100 sps:$4 sm:$0xff]  }
 0x249   : > { %5701 = vmatpush1.bf16.msra.mxu0 %v9312_v44  ;;  %v9383_v44 = vld [vmem:[#allocation8 + $0x116c] ss:$100 sps:$4 sm:$0xff]  }
 0x24a   : > { %5742 = vmatpush1.bf16.msra.mxu1 %v9315_v45  ;;  %5702 = vmatprep.subr.bf16.mxu0 %v9320_v46 }
 0x24b   : > { %5743 = vmatprep.subr.bf16.mxu1 %v9323_v47  ;;  %v9378_v47 = vld [vmem:[#allocation8 + $0x4e8] ss:$100 sps:$4 sm:$0xff]  }
 0x24d   : > { %5703 = vmatpush1.bf16.msra.mxu0 %v9318_v48  ;;  %v9381_v48 = vld [vmem:[#allocation8 + $0x1168] ss:$100 sps:$4 sm:$0xff]  }
 0x24e   : > { %5744 = vmatpush1.bf16.msra.mxu1 %v9321_v49  ;;  %5704 = vmatprep.subr.bf16.mxu0 %v9326_v50 }
 0x24f   : > { %5745 = vmatprep.subr.bf16.mxu1 %v9329_v51 }
 0x251   : > { %5705 = vmatpush1.bf16.msra.mxu0 %v9324_v52 }
 0x252   : > { %5746 = vmatpush1.bf16.msra.mxu1 %v9327_v53  ;;  %5706 = vmatprep.subr.bf16.mxu0 %v9332_v54 }
 0x253   : > { %5747 = vmatprep.subr.bf16.mxu1 %v9335_v55 }
 0x255   : > { %5707 = vmatpush1.bf16.msra.mxu0 %v9330_v57 }
 0x256   : > { %5748 = vmatpush1.bf16.msra.mxu1 %v9333_v58  ;;  %5708 = vmatprep.subr.bf16.mxu0 %v9338_v60  ;;  %v9386_v58 = vld [vmem:[#allocation8 + $0x5b4] ss:$100 sps:$4 sm:$0xff]  }
 0x257   : > { %5749 = vmatprep.subr.bf16.mxu1 %v9341_v61  ;;  %v9389_v60 = vld [vmem:[#allocation8 + $0x1234] ss:$100 sps:$4 sm:$0xff]  }
 0x258   : > { %v9384_v61 = vld [vmem:[#allocation8 + $0x5b0] ss:$100 sps:$4 sm:$0xff]  }
 0x259   : > { %5709 = vmatpush1.bf16.msra.mxu0 %v9336_v62  ;;  %v9387_v62 = vld [vmem:[#allocation8 + $0x1230] ss:$100 sps:$4 sm:$0xff]  }
 0x25a   : > { %5750 = vmatpush1.bf16.msra.mxu1 %v9339_v63  ;;  %5760 = vmatprep.subr.bf16.mxu0 %v9344_v3  ;;  %v9392_v63 = vld [vmem:[#allocation8 + $0x67c] ss:$100 sps:$4 sm:$0xff]  }
 0x25b   : > { %5801 = vmatprep.subr.bf16.mxu1 %v9347_v13  ;;  %v9395_v3 = vld [vmem:[#allocation8 + $0x12fc] ss:$100 sps:$4 sm:$0xff]  }
 0x25c   : > { %5711 = vmatmul.mubr.bf16.vlgmr.msra.gmra.mrb[24].mxu0 %v10547_v30  ;;  %v9390_v13 = vld [vmem:[#allocation8 + $0x678] ss:$100 sps:$4 sm:$0xff]  }
 0x25d   : > { %5752 = vmatmul.mubr.bf16.vlgmr.msra.gmra.mrb[24].mxu1 %v10551_v31  ;;  %5761 = vmatpush1.bf16.msra.mxu0 %v9342_v14  ;;  %v9393_v14 = vld [vmem:[#allocation8 + $0x12f8] ss:$100 sps:$4 sm:$0xff]  }
 0x25e   : > { %5802 = vmatpush1.bf16.msra.mxu1 %v9345_v16  ;;  %5762 = vmatprep.subr.bf16.mxu0 %v9350_v19  ;;  %v9398_v16 = vld [vmem:[#allocation8 + $0x744] ss:$100 sps:$4 sm:$0xff]  }
 0x25f   : > { %5803 = vmatprep.subr.bf16.mxu1 %v9353_v20  ;;  %5792 = vmatprep.mubr.bf16.mxu0 %v10537_v17  ;;  %v9401_v19 = vld [vmem:[#allocation8 + $0x13c4] ss:$100 sps:$4 sm:$0xff]  }
 0x260   : > { %5833 = vmatprep.mubr.bf16.mxu1 %v10541_v18  ;;  %v9396_v20 = vld [vmem:[#allocation8 + $0x740] ss:$100 sps:$4 sm:$0xff]  }
 0x261   : > { %5763 = vmatpush1.bf16.msra.mxu0 %v9348_v21  ;;  %v9399_v21 = vld [vmem:[#allocation8 + $0x13c0] ss:$100 sps:$4 sm:$0xff]  }
 0x262   : > { %5804 = vmatpush1.bf16.msra.mxu1 %v9351_v22  ;;  %5764 = vmatprep.subr.bf16.mxu0 %v9356_v23  ;;  %v9404_v22 = vld [vmem:[#allocation8 + $0x80c] ss:$100 sps:$4 sm:$0xff]  }
 0x263   : > { %5805 = vmatprep.subr.bf16.mxu1 %v9359_v24  ;;  %v9407_v23 = vld [vmem:[#allocation8 + $0x148c] ss:$100 sps:$4 sm:$0xff]  }
 0x264   : > { %v9402_v24 = vld [vmem:[#allocation8 + $0x808] ss:$100 sps:$4 sm:$0xff]  }
 0x265   : > { %5765 = vmatpush1.bf16.msra.mxu0 %v9354_v25  ;;  %v9405_v25 = vld [vmem:[#allocation8 + $0x1488] ss:$100 sps:$4 sm:$0xff]  }
 0x266   : > { %5806 = vmatpush1.bf16.msra.mxu1 %v9357_v26  ;;  %5766 = vmatprep.subr.bf16.mxu0 %v9362_v27  ;;  %v9410_v26 = vld [vmem:[#allocation8 + $0x8d4] ss:$100 sps:$4 sm:$0xff]  }
 0x267   : > { %5807 = vmatprep.subr.bf16.mxu1 %v9365_v28  ;;  %v9413_v27 = vld [vmem:[#allocation8 + $0x1554] ss:$100 sps:$4 sm:$0xff]  }
 0x268   : > { %v9408_v28 = vld [vmem:[#allocation8 + $0x8d0] ss:$100 sps:$4 sm:$0xff]  }
 0x269   : > { %5767 = vmatpush1.bf16.msra.mxu0 %v9360_v29  ;;  %v9411_v29 = vld [vmem:[#allocation8 + $0x1550] ss:$100 sps:$4 sm:$0xff]  }
 0x26a   : > { %5808 = vmatpush1.bf16.msra.mxu1 %v9363_v32  ;;  %5768 = vmatprep.subr.bf16.mxu0 %v9368_v33  ;;  %v9416_v32 = vld [vmem:[#allocation8 + $0x99c] ss:$100 sps:$4 sm:$0xff]  }
 0x26b   : > { %5809 = vmatprep.subr.bf16.mxu1 %v9371_v35  ;;  %v9419_v33 = vld [vmem:[#allocation8 + $0x161c] ss:$100 sps:$4 sm:$0xff]  }
 0x26c   : > { %v9414_v35 = vld [vmem:[#allocation8 + $0x998] ss:$100 sps:$4 sm:$0xff]  }
 0x26d   : > { %5769 = vmatpush1.bf16.msra.mxu0 %v9366_v36  ;;  %v9417_v36 = vld [vmem:[#allocation8 + $0x1618] ss:$100 sps:$4 sm:$0xff]  }
 0x26e   : > { %5810 = vmatpush1.bf16.msra.mxu1 %v9369_v38  ;;  %5770 = vmatprep.subr.bf16.mxu0 %v9374_v39  ;;  %v9422_v38 = vld [vmem:[#allocation8 + $0xa64] ss:$100 sps:$4 sm:$0xff]  }
 0x26f   : > { %5811 = vmatprep.subr.bf16.mxu1 %v9377_v40  ;;  %v5466_v45 = vpop.f32.mrb[12].mxu0  ;;  %v9425_v39 = vld [vmem:[#allocation8 + $0x16e4] ss:$100 sps:$4 sm:$0xff]  }
 0x270   : > { %v5507_v46 = vpop.f32.mrb[12].mxu1  ;;  %v5468_v50 = vpop.f32.mrb[13].mxu0  ;;  %v9420_v40 = vld [vmem:[#allocation8 + $0xa60] ss:$100 sps:$4 sm:$0xff]  }
 0x271   : > { %v10593_v49 = vadd.f32 %v5507_v46, %v5466_v45  ;;  %v5509_v51 = vpop.f32.mrb[13].mxu1  ;;  %v5470_v53 = vpop.f32.mrb[14].mxu0  ;;  %5771 = vmatpush1.bf16.msra.mxu0 %v9372_v41  ;;  %v9423_v41 = vld [vmem:[#allocation8 + $0x16e0] ss:$100 sps:$4 sm:$0xff]   ;;  %v9429_v45 = vld [vmem:[#allocation8 + $0x17a8] ss:$100 sps:$4 sm:$0xff]  }
 0x272   : > { %v10595_v52 = vadd.f32 %v5509_v51, %v5468_v50  ;;  %v5511_v54 = vpop.f32.mrb[14].mxu1  ;;  %5812 = vmatpush1.bf16.msra.mxu1 %v9375_v42  ;;  %v5471_v55 = vpop.f32.mrb[15].mxu0  ;;  %5772 = vmatprep.subr.bf16.mxu0 %v9380_v43  ;;  %v9428_v42 = vld [vmem:[#allocation8 + $0xb2c] ss:$100 sps:$4 sm:$0xff]   ;;  %v9434_v46 = vld [vmem:[#allocation8 + $0xbf4] ss:$100 sps:$4 sm:$0xff]  }
 0x273   : > { %v5512_v57 = vpop.f32.mrb[15].mxu1  ;;  %5813 = vmatprep.subr.bf16.mxu1 %v9383_v44  ;;  %v9431_v43 = vld [vmem:[#allocation8 + $0x17ac] ss:$100 sps:$4 sm:$0xff]   ;;  %v9440_v51 = vld [vmem:[#allocation8 + $0x44] ss:$100 sps:$4 sm:$0xff]  }
 0x274   : > { %v9426_v44 = vld [vmem:[#allocation8 + $0xb28] ss:$100 sps:$4 sm:$0xff]   ;;  %v9435_v50 = vld [vmem:[#allocation8 + $0x1870] ss:$100 sps:$4 sm:$0xff]   ;;  %v9438_v54 = vld [vmem:[#allocation8 + $0x40] ss:$100 sps:$4 sm:$0xff]  }
 0x275   : > { %5773 = vmatpush1.bf16.msra.mxu0 %v9378_v47  ;;  %v9437_v47 = vld [vmem:[#allocation8 + $0x1874] ss:$100 sps:$4 sm:$0xff]   ;;  %v9443_v53 = vld [vmem:[#allocation8 + $0xcc4] ss:$100 sps:$4 sm:$0xff]   ;;  %v9446_v57 = vld [vmem:[#allocation8 + $0x10c] ss:$100 sps:$4 sm:$0xff]  }
 0x276   : > { %5814 = vmatpush1.bf16.msra.mxu1 %v9381_v48  ;;  %5774 = vmatprep.subr.bf16.mxu0 %v9386_v58  ;;  %v9432_v48 = vld [vmem:[#allocation8 + $0xbf0] ss:$100 sps:$4 sm:$0xff]   ;;  %v9441_v55 = vld [vmem:[#allocation8 + $0xcc0] ss:$100 sps:$4 sm:$0xff]  }
 0x277   : > { %5815 = vmatprep.subr.bf16.mxu1 %v9389_v60  ;;  %v9449_v58 = vld [vmem:[#allocation8 + $0xd8c] ss:$100 sps:$4 sm:$0xff]  }
 0x278   : > { %v9444_v60 = vld [vmem:[#allocation8 + $0x108] ss:$100 sps:$4 sm:$0xff]  }
 0x279   : > { %5775 = vmatpush1.bf16.msra.mxu0 %v9384_v61  ;;  %v9447_v61 = vld [vmem:[#allocation8 + $0xd88] ss:$100 sps:$4 sm:$0xff]  }
 0x27a   : > { %5816 = vmatpush1.bf16.msra.mxu1 %v9387_v62  ;;  %5776 = vmatprep.subr.bf16.mxu0 %v9392_v63  ;;  %v9452_v62 = vld [vmem:[#allocation8 + $0x1d4] ss:$100 sps:$4 sm:$0xff]  }
 0x27b   : > { %5817 = vmatprep.subr.bf16.mxu1 %v9395_v3  ;;  %v9455_v63 = vld [vmem:[#allocation8 + $0xe54] ss:$100 sps:$4 sm:$0xff]  }
 0x27c   : > { %v9450_v3 = vld [vmem:[#allocation8 + $0x1d0] ss:$100 sps:$4 sm:$0xff]  }
 0x27d   : > { %5777 = vmatpush1.bf16.msra.mxu0 %v9390_v13  ;;  %v9453_v13 = vld [vmem:[#allocation8 + $0xe50] ss:$100 sps:$4 sm:$0xff]  }
 0x27e   : > { %5818 = vmatpush1.bf16.msra.mxu1 %v9393_v14  ;;  %5778 = vmatprep.subr.bf16.mxu0 %v9398_v16  ;;  %v9458_v14 = vld [vmem:[#allocation8 + $0x29c] ss:$100 sps:$4 sm:$0xff]  }
 0x27f   : > { %5819 = vmatprep.subr.bf16.mxu1 %v9401_v19  ;;  %v9461_v16 = vld [vmem:[#allocation8 + $0xf1c] ss:$100 sps:$4 sm:$0xff]  }
 0x280   : > { %v9456_v19 = vld [vmem:[#allocation8 + $0x298] ss:$100 sps:$4 sm:$0xff]  }
 0x281   : > { %5779 = vmatpush1.bf16.msra.mxu0 %v9396_v20  ;;  %v9459_v20 = vld [vmem:[#allocation8 + $0xf18] ss:$100 sps:$4 sm:$0xff]  }
 0x282   : > { %5820 = vmatpush1.bf16.msra.mxu1 %v9399_v21  ;;  %5780 = vmatprep.subr.bf16.mxu0 %v9404_v22  ;;  %v9464_v21 = vld [vmem:[#allocation8 + $0x364] ss:$100 sps:$4 sm:$0xff]  }
 0x283   : > { %5821 = vmatprep.subr.bf16.mxu1 %v9407_v23  ;;  %v9467_v22 = vld [vmem:[#allocation8 + $0xfe4] ss:$100 sps:$4 sm:$0xff]  }
 0x284   : > { %v9462_v23 = vld [vmem:[#allocation8 + $0x360] ss:$100 sps:$4 sm:$0xff]  }
 0x285   : > { %5781 = vmatpush1.bf16.msra.mxu0 %v9402_v24  ;;  %v9465_v24 = vld [vmem:[#allocation8 + $0xfe0] ss:$100 sps:$4 sm:$0xff]  }
 0x286   : > { %5822 = vmatpush1.bf16.msra.mxu1 %v9405_v25  ;;  %5782 = vmatprep.subr.bf16.mxu0 %v9410_v26  ;;  %v9470_v25 = vld [vmem:[#allocation8 + $0x42c] ss:$100 sps:$4 sm:$0xff]  }
 0x287   : > { %5823 = vmatprep.subr.bf16.mxu1 %v9413_v27  ;;  %v9473_v26 = vld [vmem:[#allocation8 + $0x10ac] ss:$100 sps:$4 sm:$0xff]  }
 0x288   : > { %v9468_v27 = vld [vmem:[#allocation8 + $0x428] ss:$100 sps:$4 sm:$0xff]  }
 0x289   : > { %5783 = vmatpush1.bf16.msra.mxu0 %v9408_v28  ;;  %v9471_v28 = vld [vmem:[#allocation8 + $0x10a8] ss:$100 sps:$4 sm:$0xff]  }
 0x28a   : > { %5824 = vmatpush1.bf16.msra.mxu1 %v9411_v29  ;;  %5784 = vmatprep.subr.bf16.mxu0 %v9416_v32  ;;  %v9476_v29 = vld [vmem:[#allocation8 + $0x4f4] ss:$100 sps:$4 sm:$0xff]  }
 0x28b   : > { %5825 = vmatprep.subr.bf16.mxu1 %v9419_v33  ;;  %v9479_v32 = vld [vmem:[#allocation8 + $0x1174] ss:$100 sps:$4 sm:$0xff]  }
 0x28d   : > { %5785 = vmatpush1.bf16.msra.mxu0 %v9414_v35 }
 0x28e   : > { %5826 = vmatpush1.bf16.msra.mxu1 %v9417_v36  ;;  %5786 = vmatprep.subr.bf16.mxu0 %v9422_v38  ;;  %v9474_v36 = vld [vmem:[#allocation8 + $0x4f0] ss:$100 sps:$4 sm:$0xff]  }
 0x28f   : > { %5827 = vmatprep.subr.bf16.mxu1 %v9425_v39  ;;  %v9477_v38 = vld [vmem:[#allocation8 + $0x1170] ss:$100 sps:$4 sm:$0xff]  }
 0x291   : > { %5787 = vmatpush1.bf16.msra.mxu0 %v9420_v40 }
 0x292   : > { %5828 = vmatpush1.bf16.msra.mxu1 %v9423_v41  ;;  %5788 = vmatprep.subr.bf16.mxu0 %v9428_v42 }
 0x293   : > { %5829 = vmatprep.subr.bf16.mxu1 %v9431_v43 }
 0x295   : > { %5789 = vmatpush1.bf16.msra.mxu0 %v9426_v44 }
 0x296   : > { %5830 = vmatpush1.bf16.msra.mxu1 %v9429_v45  ;;  %5790 = vmatprep.subr.bf16.mxu0 %v9434_v46 }
 0x297   : > { %5831 = vmatprep.subr.bf16.mxu1 %v9437_v47  ;;  %v9482_v47 = vld [vmem:[#allocation8 + $0x5bc] ss:$100 sps:$4 sm:$0xff]  }
 0x299   : > { %5791 = vmatpush1.bf16.msra.mxu0 %v9432_v48  ;;  %v9485_v48 = vld [vmem:[#allocation8 + $0x123c] ss:$100 sps:$4 sm:$0xff]  }
 0x29a   : > { %5832 = vmatpush1.bf16.msra.mxu1 %v9435_v50  ;;  %5842 = vmatprep.subr.bf16.mxu0 %v9440_v51  ;;  %v9480_v50 = vld [vmem:[#allocation8 + $0x5b8] ss:$100 sps:$4 sm:$0xff]  }
 0x29b   : > { %5883 = vmatprep.subr.bf16.mxu1 %v9443_v53  ;;  %v9483_v51 = vld [vmem:[#allocation8 + $0x1238] ss:$100 sps:$4 sm:$0xff]   ;;  %v9488_v53 = vld [vmem:[#allocation8 + $0x684] ss:$100 sps:$4 sm:$0xff]  }
 0x29c   : > { %5793 = vmatmul.mubr.bf16.vlgmr.msra.gmra.mrb[28].mxu0 %v10547_v30 }
 0x29d   : > { %5834 = vmatmul.mubr.bf16.vlgmr.msra.gmra.mrb[28].mxu1 %v10551_v31  ;;  %5843 = vmatpush1.bf16.msra.mxu0 %v9438_v54  ;;  %v9491_v54 = vld [vmem:[#allocation8 + $0x1304] ss:$100 sps:$4 sm:$0xff]  }
 0x29e   : > { %5884 = vmatpush1.bf16.msra.mxu1 %v9441_v55  ;;  %5844 = vmatprep.subr.bf16.mxu0 %v9446_v57  ;;  %v9486_v55 = vld [vmem:[#allocation8 + $0x680] ss:$100 sps:$4 sm:$0xff]  }
 0x29f   : > { %5885 = vmatprep.subr.bf16.mxu1 %v9449_v58  ;;  %5874 = vmatprep.mubr.bf16.mxu0 %v10537_v17  ;;  %v9489_v57 = vld [vmem:[#allocation8 + $0x1300] ss:$100 sps:$4 sm:$0xff]   ;;  %v9494_v58 = vld [vmem:[#allocation8 + $0x74c] ss:$100 sps:$4 sm:$0xff]  }
 0x2a0   : > { %5915 = vmatprep.mubr.bf16.mxu1 %v10541_v18 }
 0x2a1   : > { %5845 = vmatpush1.bf16.msra.mxu0 %v9444_v60  ;;  %v9497_v60 = vld [vmem:[#allocation8 + $0x13cc] ss:$100 sps:$4 sm:$0xff]  }
 0x2a2   : > { %5886 = vmatpush1.bf16.msra.mxu1 %v9447_v61  ;;  %5846 = vmatprep.subr.bf16.mxu0 %v9452_v62  ;;  %v9492_v61 = vld [vmem:[#allocation8 + $0x748] ss:$100 sps:$4 sm:$0xff]  }
 0x2a3   : > { %5887 = vmatprep.subr.bf16.mxu1 %v9455_v63  ;;  %v9495_v62 = vld [vmem:[#allocation8 + $0x13c8] ss:$100 sps:$4 sm:$0xff]   ;;  %v9500_v63 = vld [vmem:[#allocation8 + $0x814] ss:$100 sps:$4 sm:$0xff]  }
 0x2a5   : > { %5847 = vmatpush1.bf16.msra.mxu0 %v9450_v3  ;;  %v9503_v3 = vld [vmem:[#allocation8 + $0x1494] ss:$100 sps:$4 sm:$0xff]  }
 0x2a6   : > { %5888 = vmatpush1.bf16.msra.mxu1 %v9453_v13  ;;  %5848 = vmatprep.subr.bf16.mxu0 %v9458_v14  ;;  %v9498_v13 = vld [vmem:[#allocation8 + $0x810] ss:$100 sps:$4 sm:$0xff]  }
 0x2a7   : > { %5889 = vmatprep.subr.bf16.mxu1 %v9461_v16  ;;  %v9501_v14 = vld [vmem:[#allocation8 + $0x1490] ss:$100 sps:$4 sm:$0xff]   ;;  %v9506_v16 = vld [vmem:[#allocation8 + $0x8dc] ss:$100 sps:$4 sm:$0xff]  }
 0x2a9   : > { %5849 = vmatpush1.bf16.msra.mxu0 %v9456_v19  ;;  %v9509_v19 = vld [vmem:[#allocation8 + $0x155c] ss:$100 sps:$4 sm:$0xff]  }
 0x2aa   : > { %5890 = vmatpush1.bf16.msra.mxu1 %v9459_v20  ;;  %5850 = vmatprep.subr.bf16.mxu0 %v9464_v21  ;;  %v9504_v20 = vld [vmem:[#allocation8 + $0x8d8] ss:$100 sps:$4 sm:$0xff]  }
 0x2ab   : > { %5891 = vmatprep.subr.bf16.mxu1 %v9467_v22  ;;  %v9507_v21 = vld [vmem:[#allocation8 + $0x1558] ss:$100 sps:$4 sm:$0xff]   ;;  %v9512_v22 = vld [vmem:[#allocation8 + $0x9a4] ss:$100 sps:$4 sm:$0xff]  }
 0x2ad   : > { %5851 = vmatpush1.bf16.msra.mxu0 %v9462_v23  ;;  %v9515_v23 = vld [vmem:[#allocation8 + $0x1624] ss:$100 sps:$4 sm:$0xff]  }
 0x2ae   : > { %5892 = vmatpush1.bf16.msra.mxu1 %v9465_v24  ;;  %5852 = vmatprep.subr.bf16.mxu0 %v9470_v25  ;;  %v9510_v24 = vld [vmem:[#allocation8 + $0x9a0] ss:$100 sps:$4 sm:$0xff]  }
 0x2af   : > { %5893 = vmatprep.subr.bf16.mxu1 %v9473_v26  ;;  %v5548_v33 = vpop.f32.mrb[16].mxu0  ;;  %v9513_v25 = vld [vmem:[#allocation8 + $0x1620] ss:$100 sps:$4 sm:$0xff]   ;;  %v9518_v26 = vld [vmem:[#allocation8 + $0xa6c] ss:$100 sps:$4 sm:$0xff]  }
 0x2b0   : > { %v5589_v35 = vpop.f32.mrb[16].mxu1  ;;  %v5550_v40 = vpop.f32.mrb[17].mxu0 }
 0x2b1   : > { %v10601_v39 = vadd.f32 %v5589_v35, %v5548_v33  ;;  %v5591_v41 = vpop.f32.mrb[17].mxu1  ;;  %v5552_v43 = vpop.f32.mrb[18].mxu0  ;;  %5853 = vmatpush1.bf16.msra.mxu0 %v9468_v27  ;;  %v9521_v27 = vld [vmem:[#allocation8 + $0x16ec] ss:$100 sps:$4 sm:$0xff]   ;;  %v9527_v33 = vld [vmem:[#allocation8 + $0x17b4] ss:$100 sps:$4 sm:$0xff]  }
 0x2b2   : > { %v10603_v42 = vadd.f32 %v5591_v41, %v5550_v40  ;;  %v5593_v44 = vpop.f32.mrb[18].mxu1  ;;  %5894 = vmatpush1.bf16.msra.mxu1 %v9471_v28  ;;  %v5553_v45 = vpop.f32.mrb[19].mxu0  ;;  %5854 = vmatprep.subr.bf16.mxu0 %v9476_v29  ;;  %v9516_v28 = vld [vmem:[#allocation8 + $0xa68] ss:$100 sps:$4 sm:$0xff]   ;;  %v9522_v35 = vld [vmem:[#allocation8 + $0xb30] ss:$100 sps:$4 sm:$0xff]  }
 0x2b3   : > { %v5594_v46 = vpop.f32.mrb[19].mxu1  ;;  %5895 = vmatprep.subr.bf16.mxu1 %v9479_v32  ;;  %v9519_v29 = vld [vmem:[#allocation8 + $0x16e8] ss:$100 sps:$4 sm:$0xff]   ;;  %v9524_v32 = vld [vmem:[#allocation8 + $0xb34] ss:$100 sps:$4 sm:$0xff]  }
 0x2b4   : > { %v9533_v40 = vld [vmem:[#allocation8 + $0x187c] ss:$100 sps:$4 sm:$0xff]   ;;  %v9536_v44 = vld [vmem:[#allocation8 + $0x4c] ss:$100 sps:$4 sm:$0xff]  }
 0x2b5   : > { %5855 = vmatpush1.bf16.msra.mxu0 %v9474_v36  ;;  %v9525_v36 = vld [vmem:[#allocation8 + $0x17b0] ss:$100 sps:$4 sm:$0xff]   ;;  %v9528_v41 = vld [vmem:[#allocation8 + $0xbf8] ss:$100 sps:$4 sm:$0xff]   ;;  %v9534_v46 = vld [vmem:[#allocation8 + $0x48] ss:$100 sps:$4 sm:$0xff]  }
 0x2b6   : > { %5896 = vmatpush1.bf16.msra.mxu1 %v9477_v38  ;;  %5856 = vmatprep.subr.bf16.mxu0 %v9482_v47  ;;  %v9530_v38 = vld [vmem:[#allocation8 + $0xbfc] ss:$100 sps:$4 sm:$0xff]   ;;  %v9539_v45 = vld [vmem:[#allocation8 + $0xccc] ss:$100 sps:$4 sm:$0xff]  }
 0x2b7   : > { %5897 = vmatprep.subr.bf16.mxu1 %v9485_v48  ;;  %v9531_v43 = vld [vmem:[#allocation8 + $0x1878] ss:$100 sps:$4 sm:$0xff]   ;;  %v9537_v47 = vld [vmem:[#allocation8 + $0xcc8] ss:$100 sps:$4 sm:$0xff]  }
 0x2b8   : > { %v9542_v48 = vld [vmem:[#allocation8 + $0x114] ss:$100 sps:$4 sm:$0xff]  }
 0x2b9   : > { %5857 = vmatpush1.bf16.msra.mxu0 %v9480_v50  ;;  %v9545_v50 = vld [vmem:[#allocation8 + $0xd94] ss:$100 sps:$4 sm:$0xff]  }
 0x2ba   : > { %5898 = vmatpush1.bf16.msra.mxu1 %v9483_v51  ;;  %5858 = vmatprep.subr.bf16.mxu0 %v9488_v53  ;;  %v9540_v51 = vld [vmem:[#allocation8 + $0x110] ss:$100 sps:$4 sm:$0xff]  }
 0x2bb   : > { %5899 = vmatprep.subr.bf16.mxu1 %v9491_v54  ;;  %v9543_v53 = vld [vmem:[#allocation8 + $0xd90] ss:$100 sps:$4 sm:$0xff]   ;;  %v9548_v54 = vld [vmem:[#allocation8 + $0x1dc] ss:$100 sps:$4 sm:$0xff]  }
 0x2bd   : > { %5859 = vmatpush1.bf16.msra.mxu0 %v9486_v55  ;;  %v9551_v55 = vld [vmem:[#allocation8 + $0xe5c] ss:$100 sps:$4 sm:$0xff]  }
 0x2be   : > { %5900 = vmatpush1.bf16.msra.mxu1 %v9489_v57  ;;  %5860 = vmatprep.subr.bf16.mxu0 %v9494_v58  ;;  %v9546_v57 = vld [vmem:[#allocation8 + $0x1d8] ss:$100 sps:$4 sm:$0xff]  }
 0x2bf   : > { %5901 = vmatprep.subr.bf16.mxu1 %v9497_v60  ;;  %v9549_v58 = vld [vmem:[#allocation8 + $0xe58] ss:$100 sps:$4 sm:$0xff]   ;;  %v9554_v60 = vld [vmem:[#allocation8 + $0x2a4] ss:$100 sps:$4 sm:$0xff]  }
 0x2c1   : > { %5861 = vmatpush1.bf16.msra.mxu0 %v9492_v61  ;;  %v9557_v61 = vld [vmem:[#allocation8 + $0xf24] ss:$100 sps:$4 sm:$0xff]  }
 0x2c2   : > { %5902 = vmatpush1.bf16.msra.mxu1 %v9495_v62  ;;  %5862 = vmatprep.subr.bf16.mxu0 %v9500_v63  ;;  %v9552_v62 = vld [vmem:[#allocation8 + $0x2a0] ss:$100 sps:$4 sm:$0xff]  }
 0x2c3   : > { %5903 = vmatprep.subr.bf16.mxu1 %v9503_v3  ;;  %v9555_v63 = vld [vmem:[#allocation8 + $0xf20] ss:$100 sps:$4 sm:$0xff]   ;;  %v9560_v3 = vld [vmem:[#allocation8 + $0x36c] ss:$100 sps:$4 sm:$0xff]  }
 0x2c5   : > { %5863 = vmatpush1.bf16.msra.mxu0 %v9498_v13  ;;  %v9563_v13 = vld [vmem:[#allocation8 + $0xfec] ss:$100 sps:$4 sm:$0xff]  }
 0x2c6   : > { %5904 = vmatpush1.bf16.msra.mxu1 %v9501_v14  ;;  %5864 = vmatprep.subr.bf16.mxu0 %v9506_v16  ;;  %v9558_v14 = vld [vmem:[#allocation8 + $0x368] ss:$100 sps:$4 sm:$0xff]  }
 0x2c7   : > { %5905 = vmatprep.subr.bf16.mxu1 %v9509_v19  ;;  %v9561_v16 = vld [vmem:[#allocation8 + $0xfe8] ss:$100 sps:$4 sm:$0xff]   ;;  %v9566_v19 = vld [vmem:[#allocation8 + $0x434] ss:$100 sps:$4 sm:$0xff]  }
 0x2c9   : > { %5865 = vmatpush1.bf16.msra.mxu0 %v9504_v20  ;;  %v9569_v20 = vld [vmem:[#allocation8 + $0x10b4] ss:$100 sps:$4 sm:$0xff]  }
 0x2ca   : > { %5906 = vmatpush1.bf16.msra.mxu1 %v9507_v21  ;;  %5866 = vmatprep.subr.bf16.mxu0 %v9512_v22  ;;  %v9564_v21 = vld [vmem:[#allocation8 + $0x430] ss:$100 sps:$4 sm:$0xff]  }
 0x2cb   : > { %5907 = vmatprep.subr.bf16.mxu1 %v9515_v23  ;;  %v9567_v22 = vld [vmem:[#allocation8 + $0x10b0] ss:$100 sps:$4 sm:$0xff]   ;;  %v9572_v23 = vld [vmem:[#allocation8 + $0x4fc] ss:$100 sps:$4 sm:$0xff]  }
 0x2cd   : > { %5867 = vmatpush1.bf16.msra.mxu0 %v9510_v24  ;;  %v9575_v24 = vld [vmem:[#allocation8 + $0x117c] ss:$100 sps:$4 sm:$0xff]  }
 0x2ce   : > { %5908 = vmatpush1.bf16.msra.mxu1 %v9513_v25  ;;  %5868 = vmatprep.subr.bf16.mxu0 %v9518_v26 }
 0x2cf   : > { %5909 = vmatprep.subr.bf16.mxu1 %v9521_v27 }
 0x2d1   : > { %5869 = vmatpush1.bf16.msra.mxu0 %v9516_v28 }
 0x2d2   : > { %5910 = vmatpush1.bf16.msra.mxu1 %v9519_v29  ;;  %5870 = vmatprep.subr.bf16.mxu0 %v9524_v32 }
 0x2d3   : > { %5911 = vmatprep.subr.bf16.mxu1 %v9527_v33 }
 0x2d5   : > { %5871 = vmatpush1.bf16.msra.mxu0 %v9522_v35 }
 0x2d6   : > { %5912 = vmatpush1.bf16.msra.mxu1 %v9525_v36  ;;  %5872 = vmatprep.subr.bf16.mxu0 %v9530_v38  ;;  %v9570_v36 = vld [vmem:[#allocation8 + $0x4f8] ss:$100 sps:$4 sm:$0xff]  }
 0x2d7   : > { %5913 = vmatprep.subr.bf16.mxu1 %v9533_v40  ;;  %v9573_v38 = vld [vmem:[#allocation8 + $0x1178] ss:$100 sps:$4 sm:$0xff]  }
 0x2d9   : > { %5873 = vmatpush1.bf16.msra.mxu0 %v9528_v41 }
 0x2da   : > { %5914 = vmatpush1.bf16.msra.mxu1 %v9531_v43  ;;  %5924 = vmatprep.subr.bf16.mxu0 %v9536_v44  ;;  %v9578_v43 = vld [vmem:[#allocation8 + $0x5c4] ss:$100 sps:$4 sm:$0xff]  }
 0x2db   : > { %5965 = vmatprep.subr.bf16.mxu1 %v9539_v45  ;;  %v9581_v44 = vld [vmem:[#allocation8 + $0x1244] ss:$100 sps:$4 sm:$0xff]  }
 0x2dc   : > { %5875 = vmatmul.mubr.bf16.vlgmr.msra.gmra.mrb[32].mxu0 %v10547_v30  ;;  %v9576_v45 = vld [vmem:[#allocation8 + $0x5c0] ss:$100 sps:$4 sm:$0xff]  }
 0x2dd   : > { %5916 = vmatmul.mubr.bf16.vlgmr.msra.gmra.mrb[32].mxu1 %v10551_v31  ;;  %5925 = vmatpush1.bf16.msra.mxu0 %v9534_v46  ;;  %v9579_v46 = vld [vmem:[#allocation8 + $0x1240] ss:$100 sps:$4 sm:$0xff]  }
 0x2de   : > { %5966 = vmatpush1.bf16.msra.mxu1 %v9537_v47  ;;  %5926 = vmatprep.subr.bf16.mxu0 %v9542_v48  ;;  %v9584_v47 = vld [vmem:[#allocation8 + $0x68c] ss:$100 sps:$4 sm:$0xff]  }
 0x2df   : > { %5967 = vmatprep.subr.bf16.mxu1 %v9545_v50  ;;  %5956 = vmatprep.mubr.bf16.mxu0 %v10537_v17  ;;  %v9587_v48 = vld [vmem:[#allocation8 + $0x130c] ss:$100 sps:$4 sm:$0xff]  }
 0x2e0   : > { %5997 = vmatprep.mubr.bf16.mxu1 %v10541_v18  ;;  %v9582_v50 = vld [vmem:[#allocation8 + $0x688] ss:$100 sps:$4 sm:$0xff]  }
 0x2e1   : > { %5927 = vmatpush1.bf16.msra.mxu0 %v9540_v51  ;;  %v9585_v51 = vld [vmem:[#allocation8 + $0x1308] ss:$100 sps:$4 sm:$0xff]  }
 0x2e2   : > { %5968 = vmatpush1.bf16.msra.mxu1 %v9543_v53  ;;  %5928 = vmatprep.subr.bf16.mxu0 %v9548_v54  ;;  %v9590_v53 = vld [vmem:[#allocation8 + $0x754] ss:$100 sps:$4 sm:$0xff]  }
 0x2e3   : > { %5969 = vmatprep.subr.bf16.mxu1 %v9551_v55  ;;  %v9593_v54 = vld [vmem:[#allocation8 + $0x13d4] ss:$100 sps:$4 sm:$0xff]  }
 0x2e4   : > { %v9588_v55 = vld [vmem:[#allocation8 + $0x750] ss:$100 sps:$4 sm:$0xff]  }
 0x2e5   : > { %5929 = vmatpush1.bf16.msra.mxu0 %v9546_v57  ;;  %v9591_v57 = vld [vmem:[#allocation8 + $0x13d0] ss:$100 sps:$4 sm:$0xff]  }
 0x2e6   : > { %5970 = vmatpush1.bf16.msra.mxu1 %v9549_v58  ;;  %5930 = vmatprep.subr.bf16.mxu0 %v9554_v60  ;;  %v9596_v58 = vld [vmem:[#allocation8 + $0x81c] ss:$100 sps:$4 sm:$0xff]  }
 0x2e7   : > { %5971 = vmatprep.subr.bf16.mxu1 %v9557_v61  ;;  %v9599_v60 = vld [vmem:[#allocation8 + $0x149c] ss:$100 sps:$4 sm:$0xff]  }
 0x2e8   : > { %v9594_v61 = vld [vmem:[#allocation8 + $0x818] ss:$100 sps:$4 sm:$0xff]  }
 0x2e9   : > { %5931 = vmatpush1.bf16.msra.mxu0 %v9552_v62  ;;  %v9597_v62 = vld [vmem:[#allocation8 + $0x1498] ss:$100 sps:$4 sm:$0xff]  }
 0x2ea   : > { %5972 = vmatpush1.bf16.msra.mxu1 %v9555_v63  ;;  %5932 = vmatprep.subr.bf16.mxu0 %v9560_v3  ;;  %v9602_v63 = vld [vmem:[#allocation8 + $0x8e4] ss:$100 sps:$4 sm:$0xff]  }
 0x2eb   : > { %5973 = vmatprep.subr.bf16.mxu1 %v9563_v13  ;;  %v9605_v3 = vld [vmem:[#allocation8 + $0x1564] ss:$100 sps:$4 sm:$0xff]  }
 0x2ec   : > { %v9600_v13 = vld [vmem:[#allocation8 + $0x8e0] ss:$100 sps:$4 sm:$0xff]  }
 0x2ed   : > { %5933 = vmatpush1.bf16.msra.mxu0 %v9558_v14  ;;  %v9603_v14 = vld [vmem:[#allocation8 + $0x1560] ss:$100 sps:$4 sm:$0xff]  }
 0x2ee   : > { %5974 = vmatpush1.bf16.msra.mxu1 %v9561_v16  ;;  %5934 = vmatprep.subr.bf16.mxu0 %v9566_v19  ;;  %v9608_v16 = vld [vmem:[#allocation8 + $0x9ac] ss:$100 sps:$4 sm:$0xff]  }
 0x2ef   : > { %5975 = vmatprep.subr.bf16.mxu1 %v9569_v20  ;;  %v5630_v25 = vpop.f32.mrb[20].mxu0  ;;  %v9611_v19 = vld [vmem:[#allocation8 + $0x162c] ss:$100 sps:$4 sm:$0xff]  }
 0x2f0   : > { %v5671_v26 = vpop.f32.mrb[20].mxu1  ;;  %v5632_v28 = vpop.f32.mrb[21].mxu0  ;;  %v9606_v20 = vld [vmem:[#allocation8 + $0x9a8] ss:$100 sps:$4 sm:$0xff]  }
 0x2f1   : > { %v10609_v27 = vadd.f32 %v5671_v26, %v5630_v25  ;;  %v5673_v29 = vpop.f32.mrb[21].mxu1  ;;  %v5634_v33 = vpop.f32.mrb[22].mxu0  ;;  %5935 = vmatpush1.bf16.msra.mxu0 %v9564_v21  ;;  %v9609_v21 = vld [vmem:[#allocation8 + $0x1628] ss:$100 sps:$4 sm:$0xff]   ;;  %v9615_v25 = vld [vmem:[#allocation8 + $0x16f0] ss:$100 sps:$4 sm:$0xff]  }
 0x2f2   : > { %v10611_v32 = vadd.f32 %v5673_v29, %v5632_v28  ;;  %v5675_v35 = vpop.f32.mrb[22].mxu1  ;;  %5976 = vmatpush1.bf16.msra.mxu1 %v9567_v22  ;;  %v5635_v40 = vpop.f32.mrb[23].mxu0  ;;  %5936 = vmatprep.subr.bf16.mxu0 %v9572_v23  ;;  %v9614_v22 = vld [vmem:[#allocation8 + $0xa74] ss:$100 sps:$4 sm:$0xff]   ;;  %v9620_v26 = vld [vmem:[#allocation8 + $0xb3c] ss:$100 sps:$4 sm:$0xff]  }
 0x2f3   : > { %v5676_v41 = vpop.f32.mrb[23].mxu1  ;;  %5977 = vmatprep.subr.bf16.mxu1 %v9575_v24  ;;  %v9617_v23 = vld [vmem:[#allocation8 + $0x16f4] ss:$100 sps:$4 sm:$0xff]   ;;  %v9623_v28 = vld [vmem:[#allocation8 + $0x17bc] ss:$100 sps:$4 sm:$0xff]  }
 0x2f4   : > { %v9612_v24 = vld [vmem:[#allocation8 + $0xa70] ss:$100 sps:$4 sm:$0xff]   ;;  %v9618_v29 = vld [vmem:[#allocation8 + $0xb38] ss:$100 sps:$4 sm:$0xff]   ;;  %v9626_v35 = vld [vmem:[#allocation8 + $0xc04] ss:$100 sps:$4 sm:$0xff]  }
 0x2f5   : > { %5937 = vmatpush1.bf16.msra.mxu0 %v9570_v36  ;;  %v9621_v33 = vld [vmem:[#allocation8 + $0x17b8] ss:$100 sps:$4 sm:$0xff]   ;;  %v9629_v36 = vld [vmem:[#allocation8 + $0x1884] ss:$100 sps:$4 sm:$0xff]  }
 0x2f6   : > { %5978 = vmatpush1.bf16.msra.mxu1 %v9573_v38  ;;  %5938 = vmatprep.subr.bf16.mxu0 %v9578_v43  ;;  %v9624_v38 = vld [vmem:[#allocation8 + $0xc00] ss:$100 sps:$4 sm:$0xff]   ;;  %v9632_v41 = vld [vmem:[#allocation8 + $0x54] ss:$100 sps:$4 sm:$0xff]  }
 0x2f7   : > { %5979 = vmatprep.subr.bf16.mxu1 %v9581_v44  ;;  %v9627_v40 = vld [vmem:[#allocation8 + $0x1880] ss:$100 sps:$4 sm:$0xff]   ;;  %v9635_v43 = vld [vmem:[#allocation8 + $0xcd4] ss:$100 sps:$4 sm:$0xff]  }
 0x2f8   : > { %v9630_v44 = vld [vmem:[#allocation8 + $0x50] ss:$100 sps:$4 sm:$0xff]  }
 0x2f9   : > { %5939 = vmatpush1.bf16.msra.mxu0 %v9576_v45  ;;  %v9633_v45 = vld [vmem:[#allocation8 + $0xcd0] ss:$100 sps:$4 sm:$0xff]  }
 0x2fa   : > { %5980 = vmatpush1.bf16.msra.mxu1 %v9579_v46  ;;  %5940 = vmatprep.subr.bf16.mxu0 %v9584_v47  ;;  %v9638_v46 = vld [vmem:[#allocation8 + $0x11c] ss:$100 sps:$4 sm:$0xff]  }
 0x2fb   : > { %5981 = vmatprep.subr.bf16.mxu1 %v9587_v48  ;;  %v9641_v47 = vld [vmem:[#allocation8 + $0xd9c] ss:$100 sps:$4 sm:$0xff]  }
 0x2fc   : > { %v9636_v48 = vld [vmem:[#allocation8 + $0x118] ss:$100 sps:$4 sm:$0xff]  }
 0x2fd   : > { %5941 = vmatpush1.bf16.msra.mxu0 %v9582_v50  ;;  %v9639_v50 = vld [vmem:[#allocation8 + $0xd98] ss:$100 sps:$4 sm:$0xff]  }
 0x2fe   : > { %5982 = vmatpush1.bf16.msra.mxu1 %v9585_v51  ;;  %5942 = vmatprep.subr.bf16.mxu0 %v9590_v53  ;;  %v9644_v51 = vld [vmem:[#allocation8 + $0x1e4] ss:$100 sps:$4 sm:$0xff]  }
 0x2ff   : > { %5983 = vmatprep.subr.bf16.mxu1 %v9593_v54  ;;  %v9647_v53 = vld [vmem:[#allocation8 + $0xe64] ss:$100 sps:$4 sm:$0xff]  }
 0x300   : > { %v9642_v54 = vld [vmem:[#allocation8 + $0x1e0] ss:$100 sps:$4 sm:$0xff]  }
 0x301   : > { %5943 = vmatpush1.bf16.msra.mxu0 %v9588_v55  ;;  %v9645_v55 = vld [vmem:[#allocation8 + $0xe60] ss:$100 sps:$4 sm:$0xff]  }
 0x302   : > { %5984 = vmatpush1.bf16.msra.mxu1 %v9591_v57  ;;  %5944 = vmatprep.subr.bf16.mxu0 %v9596_v58  ;;  %v9650_v57 = vld [vmem:[#allocation8 + $0x2ac] ss:$100 sps:$4 sm:$0xff]  }
 0x303   : > { %5985 = vmatprep.subr.bf16.mxu1 %v9599_v60  ;;  %v9653_v58 = vld [vmem:[#allocation8 + $0xf2c] ss:$100 sps:$4 sm:$0xff]  }
 0x304   : > { %v9648_v60 = vld [vmem:[#allocation8 + $0x2a8] ss:$100 sps:$4 sm:$0xff]  }
 0x305   : > { %5945 = vmatpush1.bf16.msra.mxu0 %v9594_v61  ;;  %v9651_v61 = vld [vmem:[#allocation8 + $0xf28] ss:$100 sps:$4 sm:$0xff]  }
 0x306   : > { %5986 = vmatpush1.bf16.msra.mxu1 %v9597_v62  ;;  %5946 = vmatprep.subr.bf16.mxu0 %v9602_v63  ;;  %v9656_v62 = vld [vmem:[#allocation8 + $0x374] ss:$100 sps:$4 sm:$0xff]  }
 0x307   : > { %5987 = vmatprep.subr.bf16.mxu1 %v9605_v3  ;;  %v9659_v63 = vld [vmem:[#allocation8 + $0xff4] ss:$100 sps:$4 sm:$0xff]  }
 0x308   : > { %v9654_v3 = vld [vmem:[#allocation8 + $0x370] ss:$100 sps:$4 sm:$0xff]  }
 0x309   : > { %5947 = vmatpush1.bf16.msra.mxu0 %v9600_v13  ;;  %v9657_v13 = vld [vmem:[#allocation8 + $0xff0] ss:$100 sps:$4 sm:$0xff]  }
 0x30a   : > { %5988 = vmatpush1.bf16.msra.mxu1 %v9603_v14  ;;  %5948 = vmatprep.subr.bf16.mxu0 %v9608_v16  ;;  %v9662_v14 = vld [vmem:[#allocation8 + $0x43c] ss:$100 sps:$4 sm:$0xff]  }
 0x30b   : > { %5989 = vmatprep.subr.bf16.mxu1 %v9611_v19  ;;  %v9665_v16 = vld [vmem:[#allocation8 + $0x10bc] ss:$100 sps:$4 sm:$0xff]  }
 0x30c   : > { %v9660_v19 = vld [vmem:[#allocation8 + $0x438] ss:$100 sps:$4 sm:$0xff]  }
 0x30d   : > { %5949 = vmatpush1.bf16.msra.mxu0 %v9606_v20  ;;  %v9663_v20 = vld [vmem:[#allocation8 + $0x10b8] ss:$100 sps:$4 sm:$0xff]  }
 0x30e   : > { %5990 = vmatpush1.bf16.msra.mxu1 %v9609_v21  ;;  %5950 = vmatprep.subr.bf16.mxu0 %v9614_v22  ;;  %v9668_v21 = vld [vmem:[#allocation8 + $0x504] ss:$100 sps:$4 sm:$0xff]  }
 0x30f   : > { %5991 = vmatprep.subr.bf16.mxu1 %v9617_v23  ;;  %v9671_v22 = vld [vmem:[#allocation8 + $0x1184] ss:$100 sps:$4 sm:$0xff]  }
 0x311   : > { %5951 = vmatpush1.bf16.msra.mxu0 %v9612_v24 }
 0x312   : > { %5992 = vmatpush1.bf16.msra.mxu1 %v9615_v25  ;;  %5952 = vmatprep.subr.bf16.mxu0 %v9620_v26 }
 0x313   : > { %5993 = vmatprep.subr.bf16.mxu1 %v9623_v28 }
 0x315   : > { %5953 = vmatpush1.bf16.msra.mxu0 %v9618_v29 }
 0x316   : > { %5994 = vmatpush1.bf16.msra.mxu1 %v9621_v33  ;;  %5954 = vmatprep.subr.bf16.mxu0 %v9626_v35 }
 0x317   : > { %5995 = vmatprep.subr.bf16.mxu1 %v9629_v36  ;;  %v9666_v36 = vld [vmem:[#allocation8 + $0x500] ss:$100 sps:$4 sm:$0xff]  }
 0x319   : > { %5955 = vmatpush1.bf16.msra.mxu0 %v9624_v38  ;;  %v9669_v38 = vld [vmem:[#allocation8 + $0x1180] ss:$100 sps:$4 sm:$0xff]  }
 0x31a   : > { %5996 = vmatpush1.bf16.msra.mxu1 %v9627_v40  ;;  %6006 = vmatprep.subr.bf16.mxu0 %v9632_v41 }
 0x31b   : > { %6047 = vmatprep.subr.bf16.mxu1 %v9635_v43  ;;  %v9674_v43 = vld [vmem:[#allocation8 + $0x5cc] ss:$100 sps:$4 sm:$0xff]  }
 0x31c   : > { %5957 = vmatmul.mubr.bf16.vlgmr.msra.gmra.mrb[36].mxu0 %v10547_v30 }
 0x31d   : > { %5998 = vmatmul.mubr.bf16.vlgmr.msra.gmra.mrb[36].mxu1 %v10551_v31  ;;  %6007 = vmatpush1.bf16.msra.mxu0 %v9630_v44  ;;  %v9677_v44 = vld [vmem:[#allocation8 + $0x124c] ss:$100 sps:$4 sm:$0xff]  }
 0x31e   : > { %6048 = vmatpush1.bf16.msra.mxu1 %v9633_v45  ;;  %6008 = vmatprep.subr.bf16.mxu0 %v9638_v46  ;;  %v9672_v45 = vld [vmem:[#allocation8 + $0x5c8] ss:$100 sps:$4 sm:$0xff]  }
 0x31f   : > { %6049 = vmatprep.subr.bf16.mxu1 %v9641_v47  ;;  %6038 = vmatprep.mubr.bf16.mxu0 %v10537_v17  ;;  %v9675_v46 = vld [vmem:[#allocation8 + $0x1248] ss:$100 sps:$4 sm:$0xff]   ;;  %v9680_v47 = vld [vmem:[#allocation8 + $0x694] ss:$100 sps:$4 sm:$0xff]  }
 0x320   : > { %6079 = vmatprep.mubr.bf16.mxu1 %v10541_v18 }
 0x321   : > { %6009 = vmatpush1.bf16.msra.mxu0 %v9636_v48  ;;  %v9683_v48 = vld [vmem:[#allocation8 + $0x1314] ss:$100 sps:$4 sm:$0xff]  }
 0x322   : > { %6050 = vmatpush1.bf16.msra.mxu1 %v9639_v50  ;;  %6010 = vmatprep.subr.bf16.mxu0 %v9644_v51  ;;  %v9678_v50 = vld [vmem:[#allocation8 + $0x690] ss:$100 sps:$4 sm:$0xff]  }
 0x323   : > { %6051 = vmatprep.subr.bf16.mxu1 %v9647_v53  ;;  %v9681_v51 = vld [vmem:[#allocation8 + $0x1310] ss:$100 sps:$4 sm:$0xff]   ;;  %v9686_v53 = vld [vmem:[#allocation8 + $0x75c] ss:$100 sps:$4 sm:$0xff]  }
 0x325   : > { %6011 = vmatpush1.bf16.msra.mxu0 %v9642_v54  ;;  %v9689_v54 = vld [vmem:[#allocation8 + $0x13dc] ss:$100 sps:$4 sm:$0xff]  }
 0x326   : > { %6052 = vmatpush1.bf16.msra.mxu1 %v9645_v55  ;;  %6012 = vmatprep.subr.bf16.mxu0 %v9650_v57  ;;  %v9684_v55 = vld [vmem:[#allocation8 + $0x758] ss:$100 sps:$4 sm:$0xff]  }
 0x327   : > { %6053 = vmatprep.subr.bf16.mxu1 %v9653_v58  ;;  %v9687_v57 = vld [vmem:[#allocation8 + $0x13d8] ss:$100 sps:$4 sm:$0xff]   ;;  %v9692_v58 = vld [vmem:[#allocation8 + $0x824] ss:$100 sps:$4 sm:$0xff]  }
 0x329   : > { %6013 = vmatpush1.bf16.msra.mxu0 %v9648_v60  ;;  %v9695_v60 = vld [vmem:[#allocation8 + $0x14a4] ss:$100 sps:$4 sm:$0xff]  }
 0x32a   : > { %6054 = vmatpush1.bf16.msra.mxu1 %v9651_v61  ;;  %6014 = vmatprep.subr.bf16.mxu0 %v9656_v62  ;;  %v9690_v61 = vld [vmem:[#allocation8 + $0x820] ss:$100 sps:$4 sm:$0xff]  }
 0x32b   : > { %6055 = vmatprep.subr.bf16.mxu1 %v9659_v63  ;;  %v9693_v62 = vld [vmem:[#allocation8 + $0x14a0] ss:$100 sps:$4 sm:$0xff]   ;;  %v9698_v63 = vld [vmem:[#allocation8 + $0x8ec] ss:$100 sps:$4 sm:$0xff]  }
 0x32d   : > { %6015 = vmatpush1.bf16.msra.mxu0 %v9654_v3  ;;  %v9701_v3 = vld [vmem:[#allocation8 + $0x156c] ss:$100 sps:$4 sm:$0xff]  }
 0x32e   : > { %6056 = vmatpush1.bf16.msra.mxu1 %v9657_v13  ;;  %6016 = vmatprep.subr.bf16.mxu0 %v9662_v14  ;;  %v9696_v13 = vld [vmem:[#allocation8 + $0x8e8] ss:$100 sps:$4 sm:$0xff]  }
 0x32f   : > { %6057 = vmatprep.subr.bf16.mxu1 %v9665_v16  ;;  %v5712_v23 = vpop.f32.mrb[24].mxu0  ;;  %v9699_v14 = vld [vmem:[#allocation8 + $0x1568] ss:$100 sps:$4 sm:$0xff]   ;;  %v9704_v16 = vld [vmem:[#allocation8 + $0x9b4] ss:$100 sps:$4 sm:$0xff]  }
 0x330   : > { %v5753_v24 = vpop.f32.mrb[24].mxu1  ;;  %v5714_v26 = vpop.f32.mrb[25].mxu0 }
 0x331   : > { %v10617_v25 = vadd.f32 %v5753_v24, %v5712_v23  ;;  %v5755_v28 = vpop.f32.mrb[25].mxu1  ;;  %v5716_v33 = vpop.f32.mrb[26].mxu0  ;;  %6017 = vmatpush1.bf16.msra.mxu0 %v9660_v19  ;;  %v9707_v19 = vld [vmem:[#allocation8 + $0x1634] ss:$100 sps:$4 sm:$0xff]   ;;  %v9713_v23 = vld [vmem:[#allocation8 + $0x16fc] ss:$100 sps:$4 sm:$0xff]  }
 0x332   : > { %v10619_v29 = vadd.f32 %v5755_v28, %v5714_v26  ;;  %v5757_v35 = vpop.f32.mrb[26].mxu1  ;;  %6058 = vmatpush1.bf16.msra.mxu1 %v9663_v20  ;;  %v5717_v40 = vpop.f32.mrb[27].mxu0  ;;  %6018 = vmatprep.subr.bf16.mxu0 %v9668_v21  ;;  %v9702_v20 = vld [vmem:[#allocation8 + $0x9b0] ss:$100 sps:$4 sm:$0xff]   ;;  %v9708_v24 = vld [vmem:[#allocation8 + $0xa78] ss:$100 sps:$4 sm:$0xff]  }
 0x333   : > { %v5758_v41 = vpop.f32.mrb[27].mxu1  ;;  %6059 = vmatprep.subr.bf16.mxu1 %v9671_v22  ;;  %v9705_v21 = vld [vmem:[#allocation8 + $0x1630] ss:$100 sps:$4 sm:$0xff]   ;;  %v9710_v22 = vld [vmem:[#allocation8 + $0xa7c] ss:$100 sps:$4 sm:$0xff]  }
 0x334   : > { %v9711_v26 = vld [vmem:[#allocation8 + $0x16f8] ss:$100 sps:$4 sm:$0xff]   ;;  %v9716_v28 = vld [vmem:[#allocation8 + $0xb44] ss:$100 sps:$4 sm:$0xff]   ;;  %v9725_v40 = vld [vmem:[#allocation8 + $0x188c] ss:$100 sps:$4 sm:$0xff]  }
 0x335   : > { %6019 = vmatpush1.bf16.msra.mxu0 %v9666_v36  ;;  %v9719_v33 = vld [vmem:[#allocation8 + $0x17c4] ss:$100 sps:$4 sm:$0xff]  }
 0x336   : > { %6060 = vmatpush1.bf16.msra.mxu1 %v9669_v38  ;;  %6020 = vmatprep.subr.bf16.mxu0 %v9674_v43  ;;  %v9714_v35 = vld [vmem:[#allocation8 + $0xb40] ss:$100 sps:$4 sm:$0xff]   ;;  %v9722_v38 = vld [vmem:[#allocation8 + $0xc0c] ss:$100 sps:$4 sm:$0xff]  }
 0x337   : > { %6061 = vmatprep.subr.bf16.mxu1 %v9677_v44  ;;  %v9717_v36 = vld [vmem:[#allocation8 + $0x17c0] ss:$100 sps:$4 sm:$0xff]   ;;  %v9720_v41 = vld [vmem:[#allocation8 + $0xc08] ss:$100 sps:$4 sm:$0xff]  }
 0x338   : > { %v9723_v43 = vld [vmem:[#allocation8 + $0x1888] ss:$100 sps:$4 sm:$0xff]   ;;  %v9728_v44 = vld [vmem:[#allocation8 + $0x5c] ss:$100 sps:$4 sm:$0xff]  }
 0x339   : > { %6021 = vmatpush1.bf16.msra.mxu0 %v9672_v45  ;;  %v9731_v45 = vld [vmem:[#allocation8 + $0xcdc] ss:$100 sps:$4 sm:$0xff]  }
 0x33a   : > { %6062 = vmatpush1.bf16.msra.mxu1 %v9675_v46  ;;  %6022 = vmatprep.subr.bf16.mxu0 %v9680_v47  ;;  %v9726_v46 = vld [vmem:[#allocation8 + $0x58] ss:$100 sps:$4 sm:$0xff]  }
 0x33b   : > { %6063 = vmatprep.subr.bf16.mxu1 %v9683_v48  ;;  %v9729_v47 = vld [vmem:[#allocation8 + $0xcd8] ss:$100 sps:$4 sm:$0xff]   ;;  %v9734_v48 = vld [vmem:[#allocation8 + $0x124] ss:$100 sps:$4 sm:$0xff]  }
 0x33d   : > { %6023 = vmatpush1.bf16.msra.mxu0 %v9678_v50  ;;  %v9737_v50 = vld [vmem:[#allocation8 + $0xda4] ss:$100 sps:$4 sm:$0xff]  }
 0x33e   : > { %6064 = vmatpush1.bf16.msra.mxu1 %v9681_v51  ;;  %6024 = vmatprep.subr.bf16.mxu0 %v9686_v53  ;;  %v9732_v51 = vld [vmem:[#allocation8 + $0x120] ss:$100 sps:$4 sm:$0xff]  }
 0x33f   : > { %6065 = vmatprep.subr.bf16.mxu1 %v9689_v54  ;;  %v9735_v53 = vld [vmem:[#allocation8 + $0xda0] ss:$100 sps:$4 sm:$0xff]   ;;  %v9740_v54 = vld [vmem:[#allocation8 + $0x1ec] ss:$100 sps:$4 sm:$0xff]  }
 0x341   : > { %6025 = vmatpush1.bf16.msra.mxu0 %v9684_v55  ;;  %v9743_v55 = vld [vmem:[#allocation8 + $0xe6c] ss:$100 sps:$4 sm:$0xff]  }
 0x342   : > { %6066 = vmatpush1.bf16.msra.mxu1 %v9687_v57  ;;  %6026 = vmatprep.subr.bf16.mxu0 %v9692_v58  ;;  %v9738_v57 = vld [vmem:[#allocation8 + $0x1e8] ss:$100 sps:$4 sm:$0xff]  }
 0x343   : > { %6067 = vmatprep.subr.bf16.mxu1 %v9695_v60  ;;  %v9741_v58 = vld [vmem:[#allocation8 + $0xe68] ss:$100 sps:$4 sm:$0xff]   ;;  %v9746_v60 = vld [vmem:[#allocation8 + $0x2b4] ss:$100 sps:$4 sm:$0xff]  }
 0x345   : > { %6027 = vmatpush1.bf16.msra.mxu0 %v9690_v61  ;;  %v9749_v61 = vld [vmem:[#allocation8 + $0xf34] ss:$100 sps:$4 sm:$0xff]  }
 0x346   : > { %6068 = vmatpush1.bf16.msra.mxu1 %v9693_v62  ;;  %6028 = vmatprep.subr.bf16.mxu0 %v9698_v63  ;;  %v9744_v62 = vld [vmem:[#allocation8 + $0x2b0] ss:$100 sps:$4 sm:$0xff]  }
 0x347   : > { %6069 = vmatprep.subr.bf16.mxu1 %v9701_v3  ;;  %v9747_v63 = vld [vmem:[#allocation8 + $0xf30] ss:$100 sps:$4 sm:$0xff]   ;;  %v9752_v3 = vld [vmem:[#allocation8 + $0x37c] ss:$100 sps:$4 sm:$0xff]  }
 0x349   : > { %6029 = vmatpush1.bf16.msra.mxu0 %v9696_v13  ;;  %v9755_v13 = vld [vmem:[#allocation8 + $0xffc] ss:$100 sps:$4 sm:$0xff]  }
 0x34a   : > { %6070 = vmatpush1.bf16.msra.mxu1 %v9699_v14  ;;  %6030 = vmatprep.subr.bf16.mxu0 %v9704_v16  ;;  %v9750_v14 = vld [vmem:[#allocation8 + $0x378] ss:$100 sps:$4 sm:$0xff]  }
 0x34b   : > { %6071 = vmatprep.subr.bf16.mxu1 %v9707_v19  ;;  %v9753_v16 = vld [vmem:[#allocation8 + $0xff8] ss:$100 sps:$4 sm:$0xff]   ;;  %v9758_v19 = vld [vmem:[#allocation8 + $0x444] ss:$100 sps:$4 sm:$0xff]  }
 0x34d   : > { %6031 = vmatpush1.bf16.msra.mxu0 %v9702_v20  ;;  %v9761_v20 = vld [vmem:[#allocation8 + $0x10c4] ss:$100 sps:$4 sm:$0xff]  }
 0x34e   : > { %6072 = vmatpush1.bf16.msra.mxu1 %v9705_v21  ;;  %6032 = vmatprep.subr.bf16.mxu0 %v9710_v22  ;;  %v9756_v21 = vld [vmem:[#allocation8 + $0x440] ss:$100 sps:$4 sm:$0xff]  }
 0x34f   : > { %6073 = vmatprep.subr.bf16.mxu1 %v9713_v23  ;;  %v9759_v22 = vld [vmem:[#allocation8 + $0x10c0] ss:$100 sps:$4 sm:$0xff]   ;;  %v9764_v23 = vld [vmem:[#allocation8 + $0x50c] ss:$100 sps:$4 sm:$0xff]  }
 0x351   : > { %6033 = vmatpush1.bf16.msra.mxu0 %v9708_v24  ;;  %v9767_v24 = vld [vmem:[#allocation8 + $0x118c] ss:$100 sps:$4 sm:$0xff]  }
 0x352   : > { %6074 = vmatpush1.bf16.msra.mxu1 %v9711_v26  ;;  %6034 = vmatprep.subr.bf16.mxu0 %v9716_v28 }
 0x353   : > { %6075 = vmatprep.subr.bf16.mxu1 %v9719_v33 }
 0x355   : > { %6035 = vmatpush1.bf16.msra.mxu0 %v9714_v35 }
 0x356   : > { %6076 = vmatpush1.bf16.msra.mxu1 %v9717_v36  ;;  %6036 = vmatprep.subr.bf16.mxu0 %v9722_v38 }
 0x357   : > { %6077 = vmatprep.subr.bf16.mxu1 %v9725_v40 }
 0x359   : > { %6037 = vmatpush1.bf16.msra.mxu0 %v9720_v41 }
 0x35a   : > { %6078 = vmatpush1.bf16.msra.mxu1 %v9723_v43  ;;  %6088 = vmatprep.subr.bf16.mxu0 %v9728_v44  ;;  %v9762_v43 = vld [vmem:[#allocation8 + $0x508] ss:$100 sps:$4 sm:$0xff]  }
 0x35b   : > { %6129 = vmatprep.subr.bf16.mxu1 %v9731_v45  ;;  %v9765_v44 = vld [vmem:[#allocation8 + $0x1188] ss:$100 sps:$4 sm:$0xff]  }
 0x35c   : > { %6039 = vmatmul.mubr.bf16.vlgmr.msra.gmra.mrb[40].mxu0 %v10547_v30 }
 0x35d   : > { %6080 = vmatmul.mubr.bf16.vlgmr.msra.gmra.mrb[40].mxu1 %v10551_v31  ;;  %6089 = vmatpush1.bf16.msra.mxu0 %v9726_v46 }
 0x35e   : > { %6130 = vmatpush1.bf16.msra.mxu1 %v9729_v47  ;;  %6090 = vmatprep.subr.bf16.mxu0 %v9734_v48  ;;  %v9770_v47 = vld [vmem:[#allocation8 + $0x5d4] ss:$100 sps:$4 sm:$0xff]  }
 0x35f   : > { %6131 = vmatprep.subr.bf16.mxu1 %v9737_v50  ;;  %6120 = vmatprep.mubr.bf16.mxu0 %v10537_v17  ;;  %v9773_v48 = vld [vmem:[#allocation8 + $0x1254] ss:$100 sps:$4 sm:$0xff]  }
 0x360   : > { %6161 = vmatprep.mubr.bf16.mxu1 %v10541_v18  ;;  %v9768_v50 = vld [vmem:[#allocation8 + $0x5d0] ss:$100 sps:$4 sm:$0xff]  }
 0x361   : > { %6091 = vmatpush1.bf16.msra.mxu0 %v9732_v51  ;;  %v9771_v51 = vld [vmem:[#allocation8 + $0x1250] ss:$100 sps:$4 sm:$0xff]  }
 0x362   : > { %6132 = vmatpush1.bf16.msra.mxu1 %v9735_v53  ;;  %6092 = vmatprep.subr.bf16.mxu0 %v9740_v54  ;;  %v9776_v53 = vld [vmem:[#allocation8 + $0x69c] ss:$100 sps:$4 sm:$0xff]  }
 0x363   : > { %6133 = vmatprep.subr.bf16.mxu1 %v9743_v55  ;;  %v9779_v54 = vld [vmem:[#allocation8 + $0x131c] ss:$100 sps:$4 sm:$0xff]  }
 0x364   : > { %v9774_v55 = vld [vmem:[#allocation8 + $0x698] ss:$100 sps:$4 sm:$0xff]  }
 0x365   : > { %6093 = vmatpush1.bf16.msra.mxu0 %v9738_v57  ;;  %v9777_v57 = vld [vmem:[#allocation8 + $0x1318] ss:$100 sps:$4 sm:$0xff]  }
 0x366   : > { %6134 = vmatpush1.bf16.msra.mxu1 %v9741_v58  ;;  %6094 = vmatprep.subr.bf16.mxu0 %v9746_v60  ;;  %v9782_v58 = vld [vmem:[#allocation8 + $0x764] ss:$100 sps:$4 sm:$0xff]  }
 0x367   : > { %6135 = vmatprep.subr.bf16.mxu1 %v9749_v61  ;;  %v9785_v60 = vld [vmem:[#allocation8 + $0x13e4] ss:$100 sps:$4 sm:$0xff]  }
 0x368   : > { %v9780_v61 = vld [vmem:[#allocation8 + $0x760] ss:$100 sps:$4 sm:$0xff]  }
 0x369   : > { %6095 = vmatpush1.bf16.msra.mxu0 %v9744_v62  ;;  %v9783_v62 = vld [vmem:[#allocation8 + $0x13e0] ss:$100 sps:$4 sm:$0xff]  }
 0x36a   : > { %6136 = vmatpush1.bf16.msra.mxu1 %v9747_v63  ;;  %6096 = vmatprep.subr.bf16.mxu0 %v9752_v3  ;;  %v9788_v63 = vld [vmem:[#allocation8 + $0x82c] ss:$100 sps:$4 sm:$0xff]  }
 0x36b   : > { %6137 = vmatprep.subr.bf16.mxu1 %v9755_v13  ;;  %v9791_v3 = vld [vmem:[#allocation8 + $0x14ac] ss:$100 sps:$4 sm:$0xff]  }
 0x36c   : > { %v9786_v13 = vld [vmem:[#allocation8 + $0x828] ss:$100 sps:$4 sm:$0xff]  }
 0x36d   : > { %6097 = vmatpush1.bf16.msra.mxu0 %v9750_v14  ;;  %v9789_v14 = vld [vmem:[#allocation8 + $0x14a8] ss:$100 sps:$4 sm:$0xff]  }
 0x36e   : > { %6138 = vmatpush1.bf16.msra.mxu1 %v9753_v16  ;;  %6098 = vmatprep.subr.bf16.mxu0 %v9758_v19  ;;  %v9794_v16 = vld [vmem:[#allocation8 + $0x8f4] ss:$100 sps:$4 sm:$0xff]  }
 0x36f   : > { %6139 = vmatprep.subr.bf16.mxu1 %v9761_v20  ;;  %v5794_v26 = vpop.f32.mrb[28].mxu0  ;;  %v9797_v19 = vld [vmem:[#allocation8 + $0x1574] ss:$100 sps:$4 sm:$0xff]  }
 0x370   : > { %v5835_v28 = vpop.f32.mrb[28].mxu1  ;;  %v5796_v35 = vpop.f32.mrb[29].mxu0  ;;  %v9792_v20 = vld [vmem:[#allocation8 + $0x8f0] ss:$100 sps:$4 sm:$0xff]  }
 0x371   : > { %v10625_v33 = vadd.f32 %v5835_v28, %v5794_v26  ;;  %v5837_v36 = vpop.f32.mrb[29].mxu1  ;;  %v5798_v40 = vpop.f32.mrb[30].mxu0  ;;  %6099 = vmatpush1.bf16.msra.mxu0 %v9756_v21  ;;  %v9795_v21 = vld [vmem:[#allocation8 + $0x1570] ss:$100 sps:$4 sm:$0xff]   ;;  %v9801_v26 = vld [vmem:[#allocation8 + $0x1638] ss:$100 sps:$4 sm:$0xff]  }
 0x372   : > { %v10627_v38 = vadd.f32 %v5837_v36, %v5796_v35  ;;  %v5839_v41 = vpop.f32.mrb[30].mxu1  ;;  %6140 = vmatpush1.bf16.msra.mxu1 %v9759_v22  ;;  %v5799_v45 = vpop.f32.mrb[31].mxu0  ;;  %6100 = vmatprep.subr.bf16.mxu0 %v9764_v23  ;;  %v9800_v22 = vld [vmem:[#allocation8 + $0x9bc] ss:$100 sps:$4 sm:$0xff]   ;;  %v9806_v28 = vld [vmem:[#allocation8 + $0xa84] ss:$100 sps:$4 sm:$0xff]  }
 0x373   : > { %v5840_v46 = vpop.f32.mrb[31].mxu1  ;;  %6141 = vmatprep.subr.bf16.mxu1 %v9767_v24  ;;  %v9803_v23 = vld [vmem:[#allocation8 + $0x163c] ss:$100 sps:$4 sm:$0xff]   ;;  %v9809_v35 = vld [vmem:[#allocation8 + $0x1704] ss:$100 sps:$4 sm:$0xff]  }
 0x374   : > { %v9798_v24 = vld [vmem:[#allocation8 + $0x9b8] ss:$100 sps:$4 sm:$0xff]   ;;  %v9804_v36 = vld [vmem:[#allocation8 + $0xa80] ss:$100 sps:$4 sm:$0xff]   ;;  %v9812_v41 = vld [vmem:[#allocation8 + $0xb4c] ss:$100 sps:$4 sm:$0xff]  }
 0x375   : > { %6101 = vmatpush1.bf16.msra.mxu0 %v9762_v43  ;;  %v9807_v40 = vld [vmem:[#allocation8 + $0x1700] ss:$100 sps:$4 sm:$0xff]   ;;  %v9815_v43 = vld [vmem:[#allocation8 + $0x17cc] ss:$100 sps:$4 sm:$0xff]   ;;  %v9818_v46 = vld [vmem:[#allocation8 + $0xc14] ss:$100 sps:$4 sm:$0xff]  }
 0x376   : > { %6142 = vmatpush1.bf16.msra.mxu1 %v9765_v44  ;;  %6102 = vmatprep.subr.bf16.mxu0 %v9770_v47  ;;  %v9810_v44 = vld [vmem:[#allocation8 + $0xb48] ss:$100 sps:$4 sm:$0xff]   ;;  %v9821_v47 = vld [vmem:[#allocation8 + $0x1894] ss:$100 sps:$4 sm:$0xff]  }
 0x377   : > { %6143 = vmatprep.subr.bf16.mxu1 %v9773_v48  ;;  %v9813_v45 = vld [vmem:[#allocation8 + $0x17c8] ss:$100 sps:$4 sm:$0xff]   ;;  %v9816_v48 = vld [vmem:[#allocation8 + $0xc10] ss:$100 sps:$4 sm:$0xff]  }
 0x379   : > { %6103 = vmatpush1.bf16.msra.mxu0 %v9768_v50  ;;  %v9819_v50 = vld [vmem:[#allocation8 + $0x1890] ss:$100 sps:$4 sm:$0xff]  }
 0x37a   : > { %6144 = vmatpush1.bf16.msra.mxu1 %v9771_v51  ;;  %6104 = vmatprep.subr.bf16.mxu0 %v9776_v53  ;;  %v9822_v51 = vld [vmem:[#allocation8 + $0x6a0] ss:$100 sps:$4 sm:$0xff]  }
 0x37b   : > { %6145 = vmatprep.subr.bf16.mxu1 %v9779_v54  ;;  %v9823_v53 = vld [vmem:[#allocation8 + $0x1320] ss:$100 sps:$4 sm:$0xff]  }
 0x37c   : > { %v9824_v54 = vld [vmem:[#allocation8 + $0x60] ss:$100 sps:$4 sm:$0xff]  }
 0x37d   : > { %6105 = vmatpush1.bf16.msra.mxu0 %v9774_v55  ;;  %v9825_v55 = vld [vmem:[#allocation8 + $0xce0] ss:$100 sps:$4 sm:$0xff]  }
 0x37e   : > { %6146 = vmatpush1.bf16.msra.mxu1 %v9777_v57  ;;  %6106 = vmatprep.subr.bf16.mxu0 %v9782_v58  ;;  %v9826_v57 = vld [vmem:[#allocation8 + $0x768] ss:$100 sps:$4 sm:$0xff]  }
 0x37f   : > { %6147 = vmatprep.subr.bf16.mxu1 %v9785_v60  ;;  %v9827_v58 = vld [vmem:[#allocation8 + $0x13e8] ss:$100 sps:$4 sm:$0xff]  }
 0x380   : > { %v9828_v60 = vld [vmem:[#allocation8 + $0x128] ss:$100 sps:$4 sm:$0xff]  }
 0x381   : > { %6107 = vmatpush1.bf16.msra.mxu0 %v9780_v61  ;;  %v9829_v61 = vld [vmem:[#allocation8 + $0xda8] ss:$100 sps:$4 sm:$0xff]  }
 0x382   : > { %6148 = vmatpush1.bf16.msra.mxu1 %v9783_v62  ;;  %6108 = vmatprep.subr.bf16.mxu0 %v9788_v63  ;;  %v9830_v62 = vld [vmem:[#allocation8 + $0x830] ss:$100 sps:$4 sm:$0xff]  }
 0x383   : > { %6149 = vmatprep.subr.bf16.mxu1 %v9791_v3  ;;  %v9831_v63 = vld [vmem:[#allocation8 + $0x14b0] ss:$100 sps:$4 sm:$0xff]  }
 0x384   : > { %v9832_v3 = vld [vmem:[#allocation8 + $0x1f0] ss:$100 sps:$4 sm:$0xff]  }
 0x385   : > { %6109 = vmatpush1.bf16.msra.mxu0 %v9786_v13  ;;  %v9833_v13 = vld [vmem:[#allocation8 + $0xe70] ss:$100 sps:$4 sm:$0xff]  }
 0x386   : > { %6150 = vmatpush1.bf16.msra.mxu1 %v9789_v14  ;;  %6110 = vmatprep.subr.bf16.mxu0 %v9794_v16  ;;  %v9834_v14 = vld [vmem:[#allocation8 + $0x8f8] ss:$100 sps:$4 sm:$0xff]  }
 0x387   : > { %6151 = vmatprep.subr.bf16.mxu1 %v9797_v19  ;;  %v9835_v16 = vld [vmem:[#allocation8 + $0x1578] ss:$100 sps:$4 sm:$0xff]  }
 0x388   : > { %v9836_v19 = vld [vmem:[#allocation8 + $0x2b8] ss:$100 sps:$4 sm:$0xff]  }
 0x389   : > { %6111 = vmatpush1.bf16.msra.mxu0 %v9792_v20  ;;  %v9837_v20 = vld [vmem:[#allocation8 + $0xf38] ss:$100 sps:$4 sm:$0xff]  }
 0x38a   : > { %6152 = vmatpush1.bf16.msra.mxu1 %v9795_v21  ;;  %6112 = vmatprep.subr.bf16.mxu0 %v9800_v22  ;;  %v9838_v21 = vld [vmem:[#allocation8 + $0x9c0] ss:$100 sps:$4 sm:$0xff]  }
 0x38b   : > { %6153 = vmatprep.subr.bf16.mxu1 %v9803_v23  ;;  %v9839_v22 = vld [vmem:[#allocation8 + $0x1640] ss:$100 sps:$4 sm:$0xff]   ;;  %v9842_v23 = vld [vmem:[#allocation8 + $0xa88] ss:$100 sps:$4 sm:$0xff]  }
 0x38d   : > { %6113 = vmatpush1.bf16.msra.mxu0 %v9798_v24  ;;  %v9843_v24 = vld [vmem:[#allocation8 + $0x1708] ss:$100 sps:$4 sm:$0xff]  }
 0x38e   : > { %6154 = vmatpush1.bf16.msra.mxu1 %v9801_v26  ;;  %6114 = vmatprep.subr.bf16.mxu0 %v9806_v28  ;;  %v9844_v26 = vld [vmem:[#allocation8 + $0x448] ss:$100 sps:$4 sm:$0xff]  }
 0x38f   : > { %6155 = vmatprep.subr.bf16.mxu1 %v9809_v35  ;;  %v9845_v28 = vld [vmem:[#allocation8 + $0x10c8] ss:$100 sps:$4 sm:$0xff]   ;;  %v9846_v35 = vld [vmem:[#allocation8 + $0xb50] ss:$100 sps:$4 sm:$0xff]  }
 0x391   : > { %6115 = vmatpush1.bf16.msra.mxu0 %v9804_v36  ;;  %v9847_v36 = vld [vmem:[#allocation8 + $0x17d0] ss:$100 sps:$4 sm:$0xff]  }
 0x392   : > { %6156 = vmatpush1.bf16.msra.mxu1 %v9807_v40  ;;  %6116 = vmatprep.subr.bf16.mxu0 %v9812_v41 }
 0x393   : > { %6157 = vmatprep.subr.bf16.mxu1 %v9815_v43 }
 0x395   : > { %6117 = vmatpush1.bf16.msra.mxu0 %v9810_v44 }
 0x396   : > { %6158 = vmatpush1.bf16.msra.mxu1 %v9813_v45  ;;  %6118 = vmatprep.subr.bf16.mxu0 %v9818_v46 }
 0x397   : > { %6159 = vmatprep.subr.bf16.mxu1 %v9821_v47 }
 0x399   : > { %6119 = vmatpush1.bf16.msra.mxu0 %v9816_v48 }
 0x39a   : > { %6160 = vmatpush1.bf16.msra.mxu1 %v9819_v50  ;;  %8516 = vmatprep.subr.bf16.mxu0 %v9822_v51  ;;  %v9848_v50 = vld [vmem:[#allocation8 + $0x510] ss:$100 sps:$4 sm:$0xff]  }
 0x39b   : > { %8538 = vmatprep.subr.bf16.mxu1 %v9823_v53  ;;  %v9849_v51 = vld [vmem:[#allocation8 + $0x1190] ss:$100 sps:$4 sm:$0xff]  }
 0x39c   : > { %6121 = vmatmul.mubr.bf16.vlgmr.msra.gmra.mrb[44].mxu0 %v10547_v30 }
 0x39d   : > { %6162 = vmatmul.mubr.bf16.vlgmr.msra.gmra.mrb[44].mxu1 %v10551_v31  ;;  %8517 = vmatpush3.bf16.msra.mxu0 %v9824_v54 }
 0x39e   : > { %8539 = vmatpush3.bf16.msra.mxu1 %v9825_v55  ;;  %8518 = vmatprep.subr.bf16.mxu0 %v9826_v57  ;;  %v9850_v55 = vld [vmem:[#allocation8 + $0xc18] ss:$100 sps:$4 sm:$0xff]  }
 0x39f   : > { %8540 = vmatprep.subr.bf16.mxu1 %v9827_v58  ;;  %6202 = vmatprep.mubr.bf16.mxu0 %v10537_v17  ;;  %v9840_v17 = vld [vmem:[#allocation8 + $0x380] ss:$100 sps:$4 sm:$0xff]   ;;  %v9851_v57 = vld [vmem:[#allocation8 + $0x1898] ss:$100 sps:$4 sm:$0xff]  }
 0x3a0   : > { %6242 = vmatprep.mubr.bf16.mxu1 %v10541_v18  ;;  %v9841_v18 = vld [vmem:[#allocation8 + $0x1000] ss:$100 sps:$4 sm:$0xff]   ;;  %v9852_v58 = vld [vmem:[#allocation8 + $0x5d8] ss:$100 sps:$4 sm:$0xff]  }
 0x3a1   : > { %8519 = vmatpush3.bf16.msra.mxu0 %v9828_v60  ;;  %v9853_v60 = vld [vmem:[#allocation8 + $0x1258] ss:$100 sps:$4 sm:$0xff]  }
 0x3a2   : > { %8541 = vmatpush3.bf16.msra.mxu1 %v9829_v61  ;;  %8520 = vmatprep.subr.bf16.mxu0 %v9830_v62  ;;  %v9856_v61 = vld [vmem:[#allocation7 + $0x4] ss:$48 sps:$4 sm:$0xff]   ;;  %v9859_v62 = vld [vmem:[#allocation7 + $0xc] ss:$48 sps:$4 sm:$0xff]  }
 0x3a3   : > { %8542 = vmatprep.subr.bf16.mxu1 %v9831_v63  ;;  %v173_v63 = vstv %s10639_s1 }
 0x3a5   : > { %8521 = vmatpush3.bf16.msra.mxu0 %v9832_v3  ;;  %v9854_v3 = vld [vmem:[#allocation7] ss:$48 sps:$4 sm:$0xff]  }
 0x3a6   : > { %8543 = vmatpush3.bf16.msra.mxu1 %v9833_v13  ;;  %8522 = vmatprep.subr.bf16.mxu0 %v9834_v14  ;;  %v9857_v13 = vld [vmem:[#allocation7 + $0x8] ss:$48 sps:$4 sm:$0xff]   ;;  %v9862_v14 = vld [vmem:[#allocation7 + $0x64] ss:$48 sps:$4 sm:$0xff]  }
 0x3a7   : > { %8544 = vmatprep.subr.bf16.mxu1 %v9835_v16  ;;  %v9865_v16 = vld [vmem:[#allocation7 + $0x6c] ss:$48 sps:$4 sm:$0xff]  }
 0x3a9   : > { %8523 = vmatpush3.bf16.msra.mxu0 %v9836_v19  ;;  %v174_v19 = vsel %vm170_vm0, %v173_v63, 0  ;;  %v9887_v63 = vld [vmem:[#allocation7 + $0x1e8] ss:$48 sps:$4 sm:$0xff]  }
 0x3aa   : > { %8545 = vmatpush3.bf16.msra.mxu1 %v9837_v20  ;;  %8524 = vmatprep.subr.bf16.mxu0 %v9838_v21  ;;  %v178_v20 = vstv %s10644_s11  ;;  %v9860_v21 = vld [vmem:[#allocation7 + $0x60] ss:$48 sps:$4 sm:$0xff]  }
 0x3ab   : > { %8546 = vmatprep.subr.bf16.mxu1 %v9839_v22  ;;  %v9863_v22 = vld [vmem:[#allocation7 + $0x68] ss:$48 sps:$4 sm:$0xff]  }
 0x3ad   : > { %8525 = vmatpush3.bf16.msra.mxu0 %v9840_v17  ;;  %v9868_v17 = vld [vmem:[#allocation7 + $0xc4] ss:$48 sps:$4 sm:$0xff]  }
 0x3ae   : > { %8547 = vmatpush3.bf16.msra.mxu1 %v9841_v18  ;;  %8526 = vmatprep.subr.bf16.mxu0 %v9842_v23  ;;  %v9871_v18 = vld [vmem:[#allocation7 + $0xcc] ss:$48 sps:$4 sm:$0xff]   ;;  %v179_v23 = vsel %vm175_vm1, %v178_v20, %v174_v19 }
 0x3af   : > { %8548 = vmatprep.subr.bf16.mxu1 %v9843_v24  ;;  %v5876_v40 = vpop.f32.mrb[32].mxu0  ;;  %v9866_v24 = vld [vmem:[#allocation7 + $0xc0] ss:$48 sps:$4 sm:$0xff]   ;;  %v9895_v19 = vld [vmem:[#allocation7 + $0x24c] ss:$48 sps:$4 sm:$0xff]  }
 0x3b0   : > { %v5917_v41 = vpop.f32.mrb[32].mxu1  ;;  %v5878_v44 = vpop.f32.mrb[33].mxu0 }
 0x3b1   : > { %v10636_v43 = vadd.f32 %v5917_v41, %v5876_v40  ;;  %v5919_v45 = vpop.f32.mrb[33].mxu1  ;;  %v5880_v47 = vpop.f32.mrb[34].mxu0  ;;  %8527 = vmatpush3.bf16.msra.mxu0 %v9844_v26  ;;  %v9869_v26 = vld [vmem:[#allocation7 + $0xc8] ss:$48 sps:$4 sm:$0xff]   ;;  %v9877_v40 = vld [vmem:[#allocation7 + $0x12c] ss:$48 sps:$4 sm:$0xff]  }
 0x3b2   : > { %v10642_v46 = vadd.f32 %v5919_v45, %v5878_v44  ;;  %v5921_v48 = vpop.f32.mrb[34].mxu1  ;;  %8549 = vmatpush3.bf16.msra.mxu1 %v9845_v28  ;;  %v5881_v53 = vpop.f32.mrb[35].mxu0  ;;  %8528 = vmatprep.subr.bf16.mxu0 %v9846_v35  ;;  %v188_v35 = vstv %s10652_s15  ;;  %v193_v44 = vstv %s10662_s18  ;;  %v9872_v45 = vld [vmem:[#allocation7 + $0x120] ss:$48 sps:$4 sm:$0xff]   ;;  %v9875_v47 = vld [vmem:[#allocation7 + $0x128] ss:$48 sps:$4 sm:$0xff]  }
 0x3b3   : > { %v5922_v54 = vpop.f32.mrb[35].mxu1  ;;  %8550 = vmatprep.subr.bf16.mxu1 %v9847_v36  ;;  %v9874_v36 = vld [vmem:[#allocation7 + $0x124] ss:$48 sps:$4 sm:$0xff]   ;;  %v198_v53 = vstv %s10669_s19 }
 0x3b4   : > { %v9880_v48 = vld [vmem:[#allocation7 + $0x184] ss:$48 sps:$4 sm:$0xff]   ;;  %v9878_v54 = vld [vmem:[#allocation7 + $0x180] ss:$48 sps:$4 sm:$0xff]  }
 0x3b5   : > { %8529 = vmatpush3.bf16.msra.mxu0 %v9848_v50  ;;  %v9883_v50 = vld [vmem:[#allocation7 + $0x18c] ss:$48 sps:$4 sm:$0xff]  }
 0x3b6   : > { %8551 = vmatpush3.bf16.msra.mxu1 %v9849_v51  ;;  %8530 = vmatprep.subr.bf16.mxu0 %v9850_v55  ;;  %v9881_v55 = vld [vmem:[#allocation7 + $0x188] ss:$48 sps:$4 sm:$0xff]  }
 0x3b7   : > { %8552 = vmatprep.subr.bf16.mxu1 %v9851_v57  ;;  %v9886_v57 = vld [vmem:[#allocation7 + $0x1e4] ss:$48 sps:$4 sm:$0xff]  }
 0x3b9   : > { %8531 = vmatpush3.bf16.msra.mxu0 %v9852_v58  ;;  %v9889_v58 = vld [vmem:[#allocation7 + $0x1ec] ss:$48 sps:$4 sm:$0xff]  }
 0x3ba   : > { %8553 = vmatpush3.bf16.msra.mxu1 %v9853_v60  ;;  %6730 = vmatprep.subr.bf16.mxu0 %v9856_v61  ;;  %v203_v61 = vstv %s10676_s8 }
 0x3bb   : > { %6771 = vmatprep.subr.bf16.mxu1 %v9859_v62  ;;  %v9884_v62 = vld [vmem:[#allocation7 + $0x1e0] ss:$48 sps:$4 sm:$0xff]  }
 0x3bc   : > { %6203 = vmatmul.mubr.bf16.vlgmr.msra.gmra.mrb[48].mxu0 %v10547_v30  ;;  %v183_v30 = vstv %s10648_s13 }
 0x3bd   : > { %6243 = vmatmul.mubr.bf16.vlgmr.msra.gmra.mrb[48].mxu1 %v10551_v31  ;;  %6731 = vmatpush1.bf16.msra.mxu0 %v9854_v3  ;;  %v10322_v31 = vmov 0   ;;  %v184_v28 = vsel %vm180_vm2, %v183_v30, %v179_v23  ;;  %v9896_v30 = vld [vmem:[#allocation7 + $0x2a0] ss:$48 sps:$4 sm:$0xff]  }
 0x3be   : > { %6772 = vmatpush1.bf16.msra.mxu1 %v9857_v13  ;;  %6732 = vmatprep.subr.bf16.mxu0 %v9862_v14  ;;  %v189_v41 = vsel %vm185_vm3, %v188_v35, %v184_v28  ;;  %v208_v13 = vstv %s10681_s7  ;;  %v215_v14 = vstv %s214_s21  ;;  %v9907_v28 = vld [vmem:[#allocation7 + $0x1c] ss:$48 sps:$4 sm:$0xff]  }
 0x3bf   : > { %6773 = vmatprep.subr.bf16.mxu1 %v9865_v16  ;;  %6762 = vmatprep.mubr.bf16.mxu0 %v10322_v31  ;;  %v194_v51 = vsel %vm190_vm4, %v193_v44, %v189_v41  ;;  %v9892_v16 = vld [vmem:[#allocation7 + $0x244] ss:$48 sps:$4 sm:$0xff]   ;;  %vm216_vm8 = vcmp.eq.s32.totalorder %v215_v14, 1  ;;  %v9913_v41 = vld [vmem:[#allocation7 + $0x7c] ss:$48 sps:$4 sm:$0xff]  }
 0x3c0   : > { %6803 = vmatprep.mubr.bf16.mxu1 %v10322_v31  ;;  %v199_v60 = vsel %vm195_vm5, %v198_v53, %v194_v51  ;;  %v10323_v44 = vmov 1.0|1.0   ;;  %v9914_v51 = vld [vmem:[#allocation7 + $0xd0] ss:$48 sps:$4 sm:$0xff]   ;;  %v9917_v53 = vld [vmem:[#allocation7 + $0xd8] ss:$48 sps:$4 sm:$0xff]  }
 0x3c1   : > { %6733 = vmatpush1.bf16.msra.mxu0 %v9860_v21  ;;  %v204_v3 = vsel %vm200_vm6, %v203_v61, %v199_v60  ;;  %v9890_v21 = vld [vmem:[#allocation7 + $0x240] ss:$48 sps:$4 sm:$0xff]   ;;  %v9928_v60 = vld [vmem:[#allocation7 + $0x194] ss:$48 sps:$4 sm:$0xff]   ;;  %v9931_v61 = vld [vmem:[#allocation7 + $0x19c] ss:$48 sps:$4 sm:$0xff]  }
 0x3c2   : > { %6774 = vmatpush1.bf16.msra.mxu1 %v9863_v22  ;;  %6734 = vmatprep.subr.bf16.mxu0 %v9868_v17  ;;  %v209_v20 = vsel %vm205_vm7, %v208_v13, %v204_v3  ;;  %v9893_v22 = vld [vmem:[#allocation7 + $0x248] ss:$48 sps:$4 sm:$0xff]   ;;  %v9898_v17 = vld [vmem:[#allocation7 + $0x2a4] ss:$48 sps:$4 sm:$0xff]   ;;  %v9937_v13 = vld [vmem:[#allocation7 + $0x1fc] ss:$48 sps:$4 sm:$0xff]  }
 0x3c3   : > { %6775 = vmatprep.subr.bf16.mxu1 %v9871_v18  ;;  %v9901_v18 = vld [vmem:[#allocation7 + $0x2ac] ss:$48 sps:$4 sm:$0xff]   ;;  %v217_v23 = vsel %vm216_vm8, %v209_v20, %v10284_v12  ;;  %v9910_v12 = vld [vmem:[#allocation7 + $0x74] ss:$48 sps:$4 sm:$0xff]   ;;  %v9932_v14 = vld [vmem:[#allocation7 + $0x1f0] ss:$48 sps:$4 sm:$0xff]  }
 0x3c4   : > { %vm218_vm9 = vcmp.eq.s32.totalorder %v10495_v8, %v217_v23  ;;  %v9934_v3 = vld [vmem:[#allocation7 + $0x1f4] ss:$48 sps:$4 sm:$0xff]   ;;  %v9943_v20 = vld [vmem:[#allocation7 + $0x25c] ss:$48 sps:$4 sm:$0xff]  }
 0x3c5   : > { %6735 = vmatpush1.bf16.msra.mxu0 %v9866_v24  ;;  %v9899_v24 = vld [vmem:[#allocation7 + $0x2a8] ss:$48 sps:$4 sm:$0xff]   ;;  %vm10701_vm10 = vmpackc.low %vm218_vm9, %vm218_vm9 }
 0x3c6   : > { %6776 = vmatpush1.bf16.msra.mxu1 %v9869_v26  ;;  %6736 = vmatprep.subr.bf16.mxu0 %v9874_v36  ;;  %v9904_v26 = vld [vmem:[#allocation7 + $0x14] ss:$48 sps:$4 sm:$0xff]   ;;  %v9902_v36 = vld [vmem:[#allocation7 + $0x10] ss:$48 sps:$4 sm:$0xff]   ;;  %v10004_v35 = vld [vmem:[#allocation14 + $0x8] sm:$0xff]  }
 0x3c7   : > { %6777 = vmatprep.subr.bf16.mxu1 %v9877_v40  ;;  %v9905_v40 = vld [vmem:[#allocation7 + $0x18] ss:$48 sps:$4 sm:$0xff]  }
 0x3c9   : > { %6737 = vmatpush1.bf16.msra.mxu0 %v9872_v45  ;;  %v9908_v45 = vld [vmem:[#allocation7 + $0x70] ss:$48 sps:$4 sm:$0xff]  }
 0x3ca   : > { %6778 = vmatpush1.bf16.msra.mxu1 %v9875_v47  ;;  %6738 = vmatprep.subr.bf16.mxu0 %v9880_v48  ;;  %v9911_v47 = vld [vmem:[#allocation7 + $0x78] ss:$48 sps:$4 sm:$0xff]   ;;  %v9916_v48 = vld [vmem:[#allocation7 + $0xd4] ss:$48 sps:$4 sm:$0xff]  }
 0x3cb   : > { %6779 = vmatprep.subr.bf16.mxu1 %v9883_v50  ;;  %v9919_v50 = vld [vmem:[#allocation7 + $0xdc] ss:$48 sps:$4 sm:$0xff]  }
 0x3cd   : > { %6739 = vmatpush1.bf16.msra.mxu0 %v9878_v54  ;;  %v9922_v54 = vld [vmem:[#allocation7 + $0x134] ss:$48 sps:$4 sm:$0xff]  }
 0x3ce   : > { %6780 = vmatpush1.bf16.msra.mxu1 %v9881_v55  ;;  %6740 = vmatprep.subr.bf16.mxu0 %v9886_v57  ;;  %v9925_v55 = vld [vmem:[#allocation7 + $0x13c] ss:$48 sps:$4 sm:$0xff]   ;;  %v9920_v57 = vld [vmem:[#allocation7 + $0x130] ss:$48 sps:$4 sm:$0xff]  }
 0x3cf   : > { %6781 = vmatprep.subr.bf16.mxu1 %v9889_v58  ;;  %v9923_v58 = vld [vmem:[#allocation7 + $0x138] ss:$48 sps:$4 sm:$0xff]  }
 0x3d1   : > { %6741 = vmatpush1.bf16.msra.mxu0 %v9884_v62  ;;  %v9926_v62 = vld [vmem:[#allocation7 + $0x190] ss:$48 sps:$4 sm:$0xff]  }
 0x3d2   : > { %6782 = vmatpush1.bf16.msra.mxu1 %v9887_v63  ;;  %6742 = vmatprep.subr.bf16.mxu0 %v9892_v16  ;;  %v9929_v63 = vld [vmem:[#allocation7 + $0x198] ss:$48 sps:$4 sm:$0xff]  }
 0x3d3   : > { %6783 = vmatprep.subr.bf16.mxu1 %v9895_v19  ;;  %v9935_v16 = vld [vmem:[#allocation7 + $0x1f8] ss:$48 sps:$4 sm:$0xff]   ;;  %v9940_v19 = vld [vmem:[#allocation7 + $0x254] ss:$48 sps:$4 sm:$0xff]  }
 0x3d5   : > { %6743 = vmatpush1.bf16.msra.mxu0 %v9890_v21 }
 0x3d6   : > { %6784 = vmatpush1.bf16.msra.mxu1 %v9893_v22  ;;  %6744 = vmatprep.subr.bf16.mxu0 %v9898_v17 }
 0x3d7   : > { %6785 = vmatprep.subr.bf16.mxu1 %v9901_v18 }
 0x3d9   : > { %6745 = vmatpush1.bf16.msra.mxu0 %v9896_v30 }
 0x3da   : > { %6786 = vmatpush1.bf16.msra.mxu1 %v9899_v24  ;;  %6812 = vmatprep.subr.bf16.mxu0 %v9904_v26 }
 0x3db   : > { %6853 = vmatprep.subr.bf16.mxu1 %v9907_v28  ;;  %v9938_v28 = vld [vmem:[#allocation7 + $0x250] ss:$48 sps:$4 sm:$0xff]  }
 0x3dc   : > { %8462 = vmatmul.mubr.msk.bf16.vlgmr.msra.gmra.mrb[52].mxu0 %vm10701_vm10, %v10323_v44 }
 0x3dd   : > { %8464 = vmatmul.mubr.msk.bf16.vlgmr.msra.gmra.mrb[52].mxu1 %vm10701_vm10, %v10323_v44  ;;  %6813 = vmatpush1.bf16.msra.mxu0 %v9902_v36  ;;  %v9941_v36 = vld [vmem:[#allocation7 + $0x258] ss:$48 sps:$4 sm:$0xff]  }
 0x3de   : > { %6854 = vmatpush1.bf16.msra.mxu1 %v9905_v40  ;;  %6814 = vmatprep.subr.bf16.mxu0 %v9910_v12 }
 0x3df   : > { %6855 = vmatprep.subr.bf16.mxu1 %v9913_v41  ;;  %6844 = vmatprep.mubr.bf16.mxu0 %v10322_v31  ;;  %v9946_v41 = vld [vmem:[#allocation7 + $0x2b4] ss:$48 sps:$4 sm:$0xff]  }
 0x3e0   : > { %6885 = vmatprep.mubr.bf16.mxu1 %v10322_v31 }
 0x3e1   : > { %6815 = vmatpush1.bf16.msra.mxu0 %v9908_v45  ;;  %v9949_v45 = vld [vmem:[#allocation7 + $0x2bc] ss:$48 sps:$4 sm:$0xff]  }
 0x3e2   : > { %6856 = vmatpush1.bf16.msra.mxu1 %v9911_v47  ;;  %6816 = vmatprep.subr.bf16.mxu0 %v9916_v48  ;;  %v9944_v47 = vld [vmem:[#allocation7 + $0x2b0] ss:$48 sps:$4 sm:$0xff]   ;;  %v9947_v48 = vld [vmem:[#allocation7 + $0x2b8] ss:$48 sps:$4 sm:$0xff]  }
 0x3e3   : > { %6857 = vmatprep.subr.bf16.mxu1 %v9919_v50  ;;  %v9952_v50 = vld [vmem:[#allocation7 + $0x24] ss:$48 sps:$4 sm:$0xff]  }
 0x3e5   : > { %6817 = vmatpush1.bf16.msra.mxu0 %v9914_v51  ;;  %v9955_v51 = vld [vmem:[#allocation7 + $0x2c] ss:$48 sps:$4 sm:$0xff]  }
 0x3e6   : > { %6858 = vmatpush1.bf16.msra.mxu1 %v9917_v53  ;;  %6818 = vmatprep.subr.bf16.mxu0 %v9922_v54  ;;  %v9950_v53 = vld [vmem:[#allocation7 + $0x20] ss:$48 sps:$4 sm:$0xff]   ;;  %v9953_v54 = vld [vmem:[#allocation7 + $0x28] ss:$48 sps:$4 sm:$0xff]  }
 0x3e7   : > { %6859 = vmatprep.subr.bf16.mxu1 %v9925_v55  ;;  %v9958_v55 = vld [vmem:[#allocation7 + $0x84] ss:$48 sps:$4 sm:$0xff]  }
 0x3e9   : > { %6819 = vmatpush1.bf16.msra.mxu0 %v9920_v57  ;;  %v9961_v57 = vld [vmem:[#allocation7 + $0x8c] ss:$48 sps:$4 sm:$0xff]  }
 0x3ea   : > { %6860 = vmatpush1.bf16.msra.mxu1 %v9923_v58  ;;  %6820 = vmatprep.subr.bf16.mxu0 %v9928_v60  ;;  %v9956_v58 = vld [vmem:[#allocation7 + $0x80] ss:$48 sps:$4 sm:$0xff]   ;;  %v9959_v60 = vld [vmem:[#allocation7 + $0x88] ss:$48 sps:$4 sm:$0xff]  }
 0x3eb   : > { %6861 = vmatprep.subr.bf16.mxu1 %v9931_v61  ;;  %v9964_v61 = vld [vmem:[#allocation7 + $0xe4] ss:$48 sps:$4 sm:$0xff]  }
 0x3ed   : > { %6821 = vmatpush1.bf16.msra.mxu0 %v9926_v62  ;;  %v9967_v62 = vld [vmem:[#allocation7 + $0xec] ss:$48 sps:$4 sm:$0xff]  }
 0x3ee   : > { %6862 = vmatpush1.bf16.msra.mxu1 %v9929_v63  ;;  %6822 = vmatprep.subr.bf16.mxu0 %v9934_v3  ;;  %v9962_v63 = vld [vmem:[#allocation7 + $0xe0] ss:$48 sps:$4 sm:$0xff]   ;;  %v9965_v3 = vld [vmem:[#allocation7 + $0xe8] ss:$48 sps:$4 sm:$0xff]  }
 0x3ef   : > { %6863 = vmatprep.subr.bf16.mxu1 %v9937_v13  ;;  %v5958_v21 = vpop.f32.mrb[36].mxu0  ;;  %v9970_v13 = vld [vmem:[#allocation7 + $0x144] ss:$48 sps:$4 sm:$0xff]  }
 0x3f0   : > { %v5999_v22 = vpop.f32.mrb[36].mxu1  ;;  %v5960_v18 = vpop.f32.mrb[37].mxu0 }
 0x3f1   : > { %v10713_v17 = vadd.f32 %v5999_v22, %v5958_v21  ;;  %v6001_v23 = vpop.f32.mrb[37].mxu1  ;;  %v5962_v24 = vpop.f32.mrb[38].mxu0  ;;  %6823 = vmatpush1.bf16.msra.mxu0 %v9932_v14  ;;  %v9973_v14 = vld [vmem:[#allocation7 + $0x14c] ss:$48 sps:$4 sm:$0xff]   ;;  %v9974_v22 = vld [vmem:[#allocation7 + $0x1a0] ss:$48 sps:$4 sm:$0xff]  }
 0x3f2   : > { %v10715_v30 = vadd.f32 %v6001_v23, %v5960_v18  ;;  %v6003_v26 = vpop.f32.mrb[38].mxu1  ;;  %6864 = vmatpush1.bf16.msra.mxu1 %v9935_v16  ;;  %v5963_v40 = vpop.f32.mrb[39].mxu0  ;;  %6824 = vmatprep.subr.bf16.mxu0 %v9940_v19  ;;  %v9968_v16 = vld [vmem:[#allocation7 + $0x140] ss:$48 sps:$4 sm:$0xff]   ;;  %v9971_v19 = vld [vmem:[#allocation7 + $0x148] ss:$48 sps:$4 sm:$0xff]  }
 0x3f3   : > { %v6004_v12 = vpop.f32.mrb[39].mxu1  ;;  %6865 = vmatprep.subr.bf16.mxu1 %v9943_v20  ;;  %v9976_v20 = vld [vmem:[#allocation7 + $0x1a4] ss:$48 sps:$4 sm:$0xff]   ;;  %v9979_v21 = vld [vmem:[#allocation7 + $0x1ac] ss:$48 sps:$4 sm:$0xff]  }
 0x3f4   : > { %v9982_v18 = vld [vmem:[#allocation7 + $0x204] ss:$48 sps:$4 sm:$0xff]   ;;  %v9985_v23 = vld [vmem:[#allocation7 + $0x20c] ss:$48 sps:$4 sm:$0xff]   ;;  %v9980_v24 = vld [vmem:[#allocation7 + $0x200] ss:$48 sps:$4 sm:$0xff]  }
 0x3f5   : > { %6825 = vmatpush1.bf16.msra.mxu0 %v9938_v28  ;;  %v9983_v26 = vld [vmem:[#allocation7 + $0x208] ss:$48 sps:$4 sm:$0xff]   ;;  %v9988_v28 = vld [vmem:[#allocation7 + $0x264] ss:$48 sps:$4 sm:$0xff]   ;;  %v9986_v40 = vld [vmem:[#allocation7 + $0x260] ss:$48 sps:$4 sm:$0xff]  }
 0x3f6   : > { %6866 = vmatpush1.bf16.msra.mxu1 %v9941_v36  ;;  %6826 = vmatprep.subr.bf16.mxu0 %v9946_v41  ;;  %v9991_v36 = vld [vmem:[#allocation7 + $0x26c] ss:$48 sps:$4 sm:$0xff]   ;;  %v9989_v12 = vld [vmem:[#allocation7 + $0x268] ss:$48 sps:$4 sm:$0xff]   ;;  %v9994_v41 = vld [vmem:[#allocation7 + $0x2c4] ss:$48 sps:$4 sm:$0xff]  }
 0x3f7   : > { %6867 = vmatprep.subr.bf16.mxu1 %v9949_v45  ;;  %v9997_v45 = vld [vmem:[#allocation7 + $0x2cc] ss:$48 sps:$4 sm:$0xff]  }
 0x3f9   : > { %6827 = vmatpush1.bf16.msra.mxu0 %v9944_v47  ;;  %v9992_v47 = vld [vmem:[#allocation7 + $0x2c0] ss:$48 sps:$4 sm:$0xff]  }
 0x3fa   : > { %6868 = vmatpush1.bf16.msra.mxu1 %v9947_v48  ;;  %6894 = vmatprep.subr.bf16.mxu0 %v9952_v50  ;;  %v9995_v48 = vld [vmem:[#allocation7 + $0x2c8] ss:$48 sps:$4 sm:$0xff]  }
 0x3fb   : > { %6935 = vmatprep.subr.bf16.mxu1 %v9955_v51 }
 0x3fc   : > { %8466 = vmatmul.mubr.msk.bf16.vlgmr.msra.gmra.mrb[56].mxu0 %vm10701_vm10, %v10323_v44 }
 0x3fd   : > { %8468 = vmatmul.mubr.msk.bf16.vlgmr.msra.gmra.mrb[56].mxu1 %vm10701_vm10, %v10323_v44  ;;  %6895 = vmatpush1.bf16.msra.mxu0 %v9950_v53 }
 0x3fe   : > { %6936 = vmatpush1.bf16.msra.mxu1 %v9953_v54  ;;  %6896 = vmatprep.subr.bf16.mxu0 %v9958_v55 }
 0x3ff   : > { %6937 = vmatprep.subr.bf16.mxu1 %v9961_v57  ;;  %6926 = vmatprep.mubr.bf16.mxu0 %v10322_v31 }
 0x400   : > { %6967 = vmatprep.mubr.bf16.mxu1 %v10322_v31  ;;  %v9977_v31 = vld [vmem:[#allocation7 + $0x1a8] ss:$48 sps:$4 sm:$0xff]  }
 0x401   : > { %6897 = vmatpush1.bf16.msra.mxu0 %v9956_v58 }
 0x402   : > { %6938 = vmatpush1.bf16.msra.mxu1 %v9959_v60  ;;  %6898 = vmatprep.subr.bf16.mxu0 %v9964_v61 }
 0x403   : > { %6939 = vmatprep.subr.bf16.mxu1 %v9967_v62 }
 0x405   : > { %6899 = vmatpush1.bf16.msra.mxu0 %v9962_v63  ;;  %v9998_v63 = vld [vmem:[#allocation14 + $0x40] sm:$0xff]  }
 0x406   : > { %6940 = vmatpush1.bf16.msra.mxu1 %v9965_v3  ;;  %6900 = vmatprep.subr.bf16.mxu0 %v9970_v13  ;;  %v9999_v3 = vld [vmem:[#allocation14 + $0xc0] sm:$0xff]  }
 0x407   : > { %6941 = vmatprep.subr.bf16.mxu1 %v9973_v14  ;;  %v10000_v13 = vld [vmem:[#allocation14] sm:$0xff]  }
 0x408   : > { %v10001_v14 = vld [vmem:[#allocation14 + $0x80] sm:$0xff]  }
 0x409   : > { %6901 = vmatpush1.bf16.msra.mxu0 %v9968_v16  ;;  %v10002_v16 = vld [vmem:[#allocation14 + $0x48] sm:$0xff]  }
 0x40a   : > { %6942 = vmatpush1.bf16.msra.mxu1 %v9971_v19  ;;  %6902 = vmatprep.subr.bf16.mxu0 %v9976_v20  ;;  %v10003_v19 = vld [vmem:[#allocation14 + $0xc8] sm:$0xff]  }
 0x40b   : > { %6943 = vmatprep.subr.bf16.mxu1 %v9979_v21 }
 0x40d   : > { %6903 = vmatpush1.bf16.msra.mxu0 %v9974_v22 }
 0x40e   : > { %6944 = vmatpush1.bf16.msra.mxu1 %v9977_v31  ;;  %6904 = vmatprep.subr.bf16.mxu0 %v9982_v18 }
 0x40f   : > { %6945 = vmatprep.subr.bf16.mxu1 %v9985_v23 }
 0x411   : > { %6905 = vmatpush1.bf16.msra.mxu0 %v9980_v24 }
 0x412   : > { %6946 = vmatpush1.bf16.msra.mxu1 %v9983_v26  ;;  %6906 = vmatprep.subr.bf16.mxu0 %v9988_v28  ;;  %v10006_v28 = vld [vmem:[#allocation14 + $0x50] sm:$0xff]  }
 0x413   : > { %6947 = vmatprep.subr.bf16.mxu1 %v9991_v36  ;;  %v10007_v36 = vld [vmem:[#allocation14 + $0xd0] sm:$0xff]  }
 0x415   : > { %6907 = vmatpush1.bf16.msra.mxu0 %v9986_v40 }
 0x416   : > { %6948 = vmatpush1.bf16.msra.mxu1 %v9989_v12  ;;  %6908 = vmatprep.subr.bf16.mxu0 %v9994_v41  ;;  %v10008_v41 = vld [vmem:[#allocation14 + $0x10] sm:$0xff]  }
 0x417   : > { %6949 = vmatprep.subr.bf16.mxu1 %v9997_v45  ;;  %v10009_v45 = vld [vmem:[#allocation14 + $0x90] sm:$0xff]  }
 0x419   : > { %6909 = vmatpush1.bf16.msra.mxu0 %v9992_v47  ;;  %v10010_v47 = vld [vmem:[#allocation14 + $0x58] sm:$0xff]  }
 0x41a   : > { %6950 = vmatpush1.bf16.msra.mxu1 %v9995_v48  ;;  %8560 = vmatprep.subr.bf16.mxu0 %v9998_v63  ;;  %v10011_v48 = vld [vmem:[#allocation14 + $0xd8] sm:$0xff]   ;;  %v10020_v63 = vld [vmem:[#allocation14 + $0x28] sm:$0xff]  }
 0x41b   : > { %8582 = vmatprep.subr.bf16.mxu1 %v9999_v3  ;;  %v10021_v3 = vld [vmem:[#allocation14 + $0xa8] sm:$0xff]  }
 0x41c   : > { %8470 = vmatmul.mubr.msk.bf16.vlgmr.msra.gmra.mrb[60].mxu0 %vm10701_vm10, %v10323_v44 }
 0x41d   : > { %8472 = vmatmul.mubr.msk.bf16.vlgmr.msra.gmra.mrb[60].mxu1 %vm10701_vm10, %v10323_v44  ;;  %8561 = vmatpush3.bf16.msra.mxu0 %v10000_v13  ;;  %v10005_v44 = vld [vmem:[#allocation14 + $0x88] sm:$0xff]   ;;  %v10022_v13 = vld [vmem:[#allocation14 + $0x70] sm:$0xff]  }
 0x41e   : > { %8583 = vmatpush3.bf16.msra.mxu1 %v10001_v14  ;;  %8562 = vmatprep.subr.bf16.mxu0 %v10002_v16  ;;  %v10023_v14 = vld [vmem:[#allocation14 + $0xf0] sm:$0xff]  }
 0x41f   : > { %8584 = vmatprep.subr.bf16.mxu1 %v10003_v19  ;;  %v10024_v16 = vld [vmem:[#allocation14 + $0x30] sm:$0xff]  }
 0x420   : > { %v10025_v19 = vld [vmem:[#allocation14 + $0xb0] sm:$0xff]  }
 0x421   : > { %8563 = vmatpush3.bf16.msra.mxu0 %v10004_v35  ;;  %v10026_v35 = vld [vmem:[#allocation14 + $0x78] sm:$0xff]  }
 0x422   : > { %8585 = vmatpush3.bf16.msra.mxu1 %v10005_v44  ;;  %8564 = vmatprep.subr.bf16.mxu0 %v10006_v28  ;;  %v10027_v44 = vld [vmem:[#allocation14 + $0xf8] sm:$0xff]  }
 0x423   : > { %8586 = vmatprep.subr.bf16.mxu1 %v10007_v36 }
 0x425   : > { %8565 = vmatpush3.bf16.msra.mxu0 %v10008_v41 }
 0x426   : > { %8587 = vmatpush3.bf16.msra.mxu1 %v10009_v45  ;;  %8566 = vmatprep.subr.bf16.mxu0 %v10010_v47 }
 0x427   : > { %8588 = vmatprep.subr.bf16.mxu1 %v10011_v48  ;;  %v10742_v48 = vsub.s32 0, %v10497_v9 }
 0x42f   : > { %v6040_v50 = vpop.f32.mrb[40].mxu0 }
 0x430   : > { %v6081_v51 = vpop.f32.mrb[40].mxu1  ;;  %v6042_v54 = vpop.f32.mrb[41].mxu0 }
 0x431   : > { %v10731_v53 = vadd.f32 %v6081_v51, %v6040_v50  ;;  %v6083_v55 = vpop.f32.mrb[41].mxu1  ;;  %v6044_v58 = vpop.f32.mrb[42].mxu0  ;;  %v10012_v50 = vld [vmem:[#allocation14 + $0x18] sm:$0xff]  }
 0x432   : > { %v10733_v57 = vadd.f32 %v6083_v55, %v6042_v54  ;;  %v6085_v60 = vpop.f32.mrb[42].mxu1  ;;  %v6045_v61 = vpop.f32.mrb[43].mxu0  ;;  %v10013_v51 = vld [vmem:[#allocation14 + $0x98] sm:$0xff]   ;;  %8567 = vmatpush3.bf16.msra.mxu0 %v10012_v50  ;;  %v10014_v54 = vld [vmem:[#allocation14 + $0x60] sm:$0xff]   ;;  %v10745_v50 = vsub.s32 2, %v10497_v9 }
 0x433   : > { %v6086_v62 = vpop.f32.mrb[43].mxu1  ;;  %8589 = vmatpush3.bf16.msra.mxu1 %v10013_v51  ;;  %v10015_v55 = vld [vmem:[#allocation14 + $0xe0] sm:$0xff]   ;;  %v10018_v61 = vld [vmem:[#allocation14 + $0x68] sm:$0xff]   ;;  %8568 = vmatprep.subr.bf16.mxu0 %v10014_v54  ;;  %v10748_v51 = vsub.s32 1, %v10497_v9  ;;  %v10751_v54 = vsub.s32 3, %v10497_v9 }
 0x434   : > { %v10016_v58 = vld [vmem:[#allocation14 + $0x20] sm:$0xff]   ;;  %v10019_v62 = vld [vmem:[#allocation14 + $0xe8] sm:$0xff]   ;;  %8590 = vmatprep.subr.bf16.mxu1 %v10015_v55 }
 0x435   : > { %v10017_v60 = vld [vmem:[#allocation14 + $0xa0] sm:$0xff]  }
 0x436   : > { %8569 = vmatpush3.bf16.msra.mxu0 %v10016_v58 }
 0x437   : > { %8591 = vmatpush3.bf16.msra.mxu1 %v10017_v60  ;;  %8570 = vmatprep.subr.bf16.mxu0 %v10018_v61  ;;  %v6988_v61 = vrot.slane %v10478_v0, %v10742_v48 }
 0x438   : > { %8592 = vmatprep.subr.bf16.mxu1 %v10019_v62 }
 0x43a   : > { %8571 = vmatpush3.bf16.msra.mxu0 %v10020_v63  ;;  %v6996_v63 = vrot.slane %v10478_v0, %v10745_v50 }
 0x43b   : > { %8593 = vmatpush3.bf16.msra.mxu1 %v10021_v3  ;;  %8572 = vmatprep.subr.bf16.mxu0 %v10022_v13 }
 0x43c   : > { %8594 = vmatprep.subr.bf16.mxu1 %v10023_v14 }
 0x43e   : > { %8573 = vmatpush3.bf16.msra.mxu0 %v10024_v16  ;;  %v6992_v16 = vrot.slane %v10478_v0, %v10748_v51 }
 0x43f   : > { %8595 = vmatpush3.bf16.msra.mxu1 %v10025_v19  ;;  %8574 = vmatprep.subr.bf16.mxu0 %v10026_v35 }
 0x440   : > { %8596 = vmatprep.subr.bf16.mxu1 %v10027_v44 }
 0x46f   : > { %v6122_v20 = vpop.f32.mrb[44].mxu0 }
 0x470   : > { %v6163_v21 = vpop.f32.mrb[44].mxu1  ;;  %v6124_v31 = vpop.f32.mrb[45].mxu0 }
 0x471   : > { %v10735_v22 = vadd.f32 %v6163_v21, %v6122_v20  ;;  %v6165_v18 = vpop.f32.mrb[45].mxu1  ;;  %v6126_v24 = vpop.f32.mrb[46].mxu0  ;;  %v10028_v20 = vld [vmem:[#allocation14 + $0x38] sm:$0xff]  }
 0x472   : > { %v10737_v23 = vadd.f32 %v6165_v18, %v6124_v31  ;;  %v6167_v26 = vpop.f32.mrb[46].mxu1  ;;  %v6127_v40 = vpop.f32.mrb[47].mxu0  ;;  %v10029_v21 = vld [vmem:[#allocation14 + $0xb8] sm:$0xff]   ;;  %8575 = vmatpush3.bf16.msra.mxu0 %v10028_v20 }
 0x473   : > { %v6168_v12 = vpop.f32.mrb[47].mxu1  ;;  %8597 = vmatpush3.bf16.msra.mxu1 %v10029_v21 }
 0x48f   : > { %v8532_v31 = vpop.f32.mrb[48].mxu0 }
 0x490   : > { %v8554_v18 = vpop.f32.mrb[48].mxu1  ;;  %v8533_v24 = vpop.f32.mrb[49].mxu0 }
 0x491   : > { %v8555_v26 = vpop.f32.mrb[49].mxu1  ;;  %v8534_v28 = vadd.f32 %v8533_v24, %v8532_v31  ;;  %v8535_v40 = vpop.f32.mrb[50].mxu0 }
 0x492   : > { %v8556_v36 = vadd.f32 %v8555_v26, %v8554_v18  ;;  %v8557_v12 = vpop.f32.mrb[50].mxu1  ;;  %v8536_v41 = vpop.f32.mrb[51].mxu0 }
 0x493   : > { %v8558_v45 = vpop.f32.mrb[51].mxu1 }
 0x494   : > { %v10739_v47 = vadd.f32 %v8556_v36, %v8534_v28 }
 0x4af   : > { %v6764_v55 = vpop.f32.mrb[52].mxu0 }
 0x4b0   : > { %v6805_v58 = vpop.f32.mrb[52].mxu1  ;;  %v6765_v60 = vadd.f32 %v6764_v55, %v10569_v56  ;;  %v6766_v3 = vpop.f32.mrb[53].mxu0  ;;  %v7000_v56 = vrot.slane %v10478_v0, %v10751_v54 }
 0x4b1   : > { %v6806_v62 = vadd.f32 %v6805_v58, %v10577_v34  ;;  %v6807_v13 = vpop.f32.mrb[53].mxu1  ;;  %v6767_v14 = vadd.f32 %v6766_v3, %v10571_v59  ;;  %v6768_v35 = vpop.f32.mrb[54].mxu0  ;;  %v7122_v3 = vrot.slane %v10482_v2, %v10751_v54 }
 0x4b2   : > { %v6808_v19 = vadd.f32 %v6807_v13, %v10579_v37  ;;  %v6809_v44 = vpop.f32.mrb[54].mxu1  ;;  %v6976_v20 = vadd.f32 %v6765_v60, %v10617_v25  ;;  %v6769_v21 = vpop.f32.mrb[55].mxu0 }
 0x4b3   : > { %v6978_v34 = vadd.f32 %v6806_v62, %v10625_v33  ;;  %v6810_v31 = vpop.f32.mrb[55].mxu1  ;;  %v6977_v18 = vadd.f32 %v6767_v14, %v10619_v29  ;;  %v7114_v62 = vrot.slane %v10482_v2, %v10748_v51 }
 0x4b4   : > { %v6979_v59 = vadd.f32 %v6808_v19, %v10627_v38  ;;  %v7025_v24 = vadd.f32 %v6988_v61, %v6976_v20  ;;  %v7110_v61 = vrot.slane %v10482_v2, %v10742_v48 }
 0x4b5   : > { %v7027_v26 = vadd.f32 %v6996_v63, %v6978_v34  ;;  %v7026_v28 = vadd.f32 %v6992_v16, %v6977_v18  ;;  %v7118_v63 = vrot.slane %v10482_v2, %v10745_v50  ;;  %v7128_v16 = vadd.f32 %v7114_v62, %v10733_v57 }
 0x4b6   : > { %v7028_v36 = vadd.f32 %v7000_v56, %v6979_v59  ;;  %v8473_v37 = vmul.f32 -1.442695, %v7025_v24  ;;  %v7127_v13 = vadd.f32 %v7110_v61, %v10731_v53  ;;  %v7003_v34 = vsub.s32 4, %v10497_v9 }
 0x4b7   : > { %v8475_v40 = vmul.f32 -1.442695, %v7027_v26  ;;  %v8474_v12 = vmul.f32 -1.442695, %v7026_v28  ;;  %v7129_v19 = vadd.f32 %v7118_v63, %v10735_v22  ;;  %v7130_v53 = vadd.f32 %v7122_v3, %v10737_v23 }
 0x4b8   : > { %v8476_v41 = vmul.f32 -1.442695, %v7028_v36  ;;  %10030 = vpow2.f32 %v8473_v37  ;;  %v7007_v23 = vsub.s32 5, %v10497_v9 }
 0x4b9   : > { %10032 = vpow2.f32 %v8475_v40 }
 0x4ba   : > { %10034 = vpow2.f32 %v8474_v12 }
 0x4bb   : > { %10036 = vpow2.f32 %v8476_v41 }
 0x4c2   : > { %v10031_v25 = vpop.eup %10030 }
 0x4c3   : > { %v10033_v33 = vpop.eup %10032  ;;  %v7057_v45 = vadd.f32 1.0, %v10031_v25 }
 0x4c4   : > { %v10035_v55 = vpop.eup %10034  ;;  %v7059_v58 = vadd.f32 1.0, %v10033_v33 }
 0x4c5   : > { %v10037_v29 = vpop.eup %10036  ;;  %10038 = vrcp.f32 %v7057_v45  ;;  %v7058_v38 = vadd.f32 1.0, %v10035_v55  ;;  %v7015_v45 = vsub.s32 7, %v10497_v9  ;;  %v7004_v55 = vrot.slane %v10478_v0, %v7003_v34 }
 0x4c6   : > { %10040 = vrcp.f32 %v7059_v58  ;;  %v7060_v60 = vadd.f32 1.0, %v10037_v29 }
 0x4c7   : > { %10042 = vrcp.f32 %v7058_v38  ;;  %v7016_v58 = vrot.slane %v10478_v0, %v7015_v45 }
 0x4c8   : > { %10044 = vrcp.f32 %v7060_v60 }
 0x4cf   : > { %v10039_v14 = vpop.eup %10038  ;;  %v6846_v56 = vpop.f32.mrb[56].mxu0 }
 0x4d0   : > { %v6887_v35 = vpop.f32.mrb[56].mxu1  ;;  %v10041_v44 = vpop.eup %10040  ;;  %v6847_v20 = vadd.f32 %v6846_v56, %v10585_v4  ;;  %v10783_v59 = vmul.f32 %v10039_v14, %v7127_v13  ;;  %v7085_v56 = vrot.slane %v10480_v1, %v10742_v48 }
 0x4d1   : > { %v6888_v21 = vadd.f32 %v6887_v35, %v10593_v49  ;;  %v6848_v31 = vpop.f32.mrb[57].mxu0  ;;  %v6889_v18 = vpop.f32.mrb[57].mxu1  ;;  %v7133_v36 = vmul.f32 %v10041_v44, %v7129_v19  ;;  %v7011_v49 = vsub.s32 6, %v10497_v9  ;;  %v7093_v35 = vrot.slane %v10480_v1, %v10745_v50 }
 0x4d2   : > { %v10043_v24 = vpop.eup %10042  ;;  %v6849_v57 = vadd.f32 %v6848_v31, %v10587_v15  ;;  %v6890_v22 = vadd.f32 %v6889_v18, %v10595_v52  ;;  %v6850_v26 = vpop.f32.mrb[58].mxu0  ;;  %v6980_v4 = vadd.f32 %v6847_v20, %v10636_v43  ;;  %v7097_v31 = vrot.slane %v10480_v1, %v10751_v54 }
 0x4d3   : > { %v6891_v28 = vpop.f32.mrb[58].mxu1  ;;  %v10045_v37 = vpop.eup %10044  ;;  %v6982_v40 = vadd.f32 %v6888_v21, %v10713_v17  ;;  %v7132_v25 = vmul.f32 %v10043_v24, %v7128_v16  ;;  %v7012_v43 = vrot.slane %v10478_v0, %v7011_v49  ;;  %v7008_v17 = vrot.slane %v10478_v0, %v7007_v23 }
 0x4d4   : > { %v6851_v12 = vpop.f32.mrb[59].mxu0  ;;  %v6892_v41 = vpop.f32.mrb[59].mxu1  ;;  %v6981_v33 = vadd.f32 %v6849_v57, %v10642_v46  ;;  %v6983_v15 = vadd.f32 %v6890_v22, %v10715_v30  ;;  %v7134_v52 = vmul.f32 %v10045_v37, %v7130_v53  ;;  %v7029_v29 = vadd.f32 %v7004_v55, %v6980_v4 }
 0x4d5   : > { %v7031_v38 = vadd.f32 %v7012_v43, %v6982_v40  ;;  %v7089_v21 = vrot.slane %v10480_v1, %v10748_v51 }
 0x4d6   : > { %v7030_v60 = vadd.f32 %v7008_v17, %v6981_v33  ;;  %v7032_v61 = vadd.f32 %v7016_v58, %v6983_v15  ;;  %v8477_v46 = vmul.f32 -1.442695, %v7029_v29 }
 0x4d7   : > { %v8479_v62 = vmul.f32 -1.442695, %v7031_v38 }
 0x4d8   : > { %v8478_v63 = vmul.f32 -1.442695, %v7030_v60  ;;  %v8480_v3 = vmul.f32 -1.442695, %v7032_v61  ;;  %10046 = vpow2.f32 %v8477_v46 }
 0x4d9   : > { %10048 = vpow2.f32 %v8479_v62 }
 0x4da   : > { %10050 = vpow2.f32 %v8478_v63 }
 0x4db   : > { %10052 = vpow2.f32 %v8480_v3 }
 0x4e2   : > { %v10047_v30 = vpop.eup %10046 }
 0x4e3   : > { %v10049_v13 = vpop.eup %10048  ;;  %v7061_v19 = vadd.f32 1.0, %v10047_v30 }
 0x4e4   : > { %v10051_v14 = vpop.eup %10050  ;;  %v7063_v44 = vadd.f32 1.0, %v10049_v13 }
 0x4e5   : > { %v10053_v16 = vpop.eup %10052  ;;  %v7062_v18 = vadd.f32 1.0, %v10051_v14  ;;  %10054 = vrcp.f32 %v7061_v19 }
 0x4e6   : > { %v7064_v48 = vadd.f32 1.0, %v10053_v16  ;;  %10056 = vrcp.f32 %v7063_v44 }
 0x4e7   : > { %10058 = vrcp.f32 %v7062_v18 }
 0x4e8   : > { %10060 = vrcp.f32 %v7064_v48 }
 0x4ef   : > { %v6928_v20 = vpop.f32.mrb[60].mxu0 }
 0x4f0   : > { %v6969_v34 = vpop.f32.mrb[60].mxu1  ;;  %v6929_v24 = vadd.f32 %v6928_v20, %v10601_v39  ;;  %v6930_v57 = vpop.f32.mrb[61].mxu0 }
 0x4f1   : > { %v6970_v53 = vadd.f32 %v6969_v34, %v10609_v27  ;;  %v6971_v22 = vpop.f32.mrb[61].mxu1  ;;  %v6931_v26 = vadd.f32 %v6930_v57, %v10603_v42  ;;  %v6932_v28 = vpop.f32.mrb[62].mxu0 }
 0x4f2   : > { %v6972_v50 = vadd.f32 %v6971_v22, %v10611_v32  ;;  %v6973_v37 = vpop.f32.mrb[62].mxu1  ;;  %v7102_v4 = vadd.f32 %v7085_v56, %v6929_v24  ;;  %v6933_v40 = vpop.f32.mrb[63].mxu0 }
 0x4f3   : > { %v7104_v51 = vadd.f32 %v7093_v35, %v6970_v53  ;;  %v6974_v49 = vpop.f32.mrb[63].mxu1  ;;  %v7103_v54 = vadd.f32 %v7089_v21, %v6931_v26  ;;  %v10055_v42 = vpop.eup %10054 }
 0x4f4   : > { %v7105_v12 = vadd.f32 %v7097_v31, %v6972_v50  ;;  %v7135_v39 = vadd.f32 %v10783_v59, %v7102_v4  ;;  %v10057_v32 = vpop.eup %10056  ;;  %v7143_v45 = vsub.f32 1.0, %v10055_v42  ;;  %v7151_v59 = vmul.f32 %v10300_v6, %v10055_v42 }
 0x4f5   : > { %v7137_v27 = vadd.f32 %v7133_v36, %v7104_v51  ;;  %v7136_v41 = vadd.f32 %v7132_v25, %v7103_v54  ;;  %v10059_v23 = vpop.eup %10058  ;;  %v7145_v43 = vsub.f32 1.0, %v10057_v32 }
 0x4f6   : > { %v7138_v33 = vadd.f32 %v7134_v52, %v7105_v12  ;;  %10062 = vtanh.f32 %v7135_v39  ;;  %v10061_v15 = vpop.eup %10060  ;;  %v7144_v58 = vsub.f32 1.0, %v10059_v23  ;;  %v7153_v52 = vmul.f32 %v10292_v10, %v10057_v32 }
 0x4f7   : > { %10064 = vtanh.f32 %v7137_v27  ;;  %v7146_v38 = vsub.f32 1.0, %v10061_v15  ;;  %v7152_v46 = vmul.f32 %v10296_v7, %v10059_v23  ;;  %v7154_v63 = vmul.f32 %v10288_v11, %v10061_v15 }
 0x4f8   : > { %10066 = vtanh.f32 %v7136_v41 }
 0x4f9   : > { %10068 = vtanh.f32 %v7138_v33 }
 0x500   : > { %v10063_v55 = vpop.eup %10062 }
 0x501   : > { %v10065_v17 = vpop.eup %10064  ;;  %v7147_v29 = vmul.f32 %v10063_v55, %v7143_v45 }
 0x502   : > { %v10067_v36 = vpop.eup %10066  ;;  %v7149_v25 = vmul.f32 %v10065_v17, %v7145_v43 }
 0x503   : > { %v10069_v60 = vpop.eup %10068  ;;  %v7148_v61 = vmul.f32 %v10067_v36, %v7144_v58  ;;  %v7155_v6 = vadd.f32 %v7151_v59, %v7147_v29  }
 0x504   : > { %v7150_v62 = vmul.f32 %v10069_v60, %v7146_v38  ;;  %v7157_v10 = vadd.f32 %v7153_v52, %v7149_v25  }
 0x505   : > { %v7156_v7 = vadd.f32 %v7152_v46, %v7148_v61   ;;  %v7159_v13 = vpack.c.bf16 %v7155_v6, %v7155_v6 }
 0x506   : > { %v7158_v11 = vadd.f32 %v7154_v63, %v7150_v62   ;;  %v7161_v14 = vpack.c.bf16 %v7157_v10, %v7157_v10 }
 0x507   : > { %v7160_v3 = vpack.c.bf16 %v7156_v7, %v7156_v7 }
 0x508   : > { %v7162_v30 = vpack.c.bf16 %v7158_v11, %v7158_v11 }
 0x509   : > { %7451 = vmatprep.mubr.bf16.mxu0 %v7160_v3 }
 0x50a   : > { %7491 = vmatprep.mubr.bf16.mxu1 %v7162_v30  ;;  %7452 = vmatmul.mubr.bf16.vlgmr.msra.gmra.mrb[64].mxu0 %v7159_v13 }
 0x50b   : > { %7492 = vmatmul.mubr.bf16.vlgmr.msra.gmra.mrb[64].mxu1 %v7161_v14 }
 0x5dd   : > { %v8576_v16 = vpop.f32.mrb[64].mxu0 }
 0x5de   : > { %v8598_v19 = vpop.f32.mrb[64].mxu1  ;;  %v8577_v56 = vpop.f32.mrb[65].mxu0 }
 0x5df   : > { %v8578_v35 = vadd.f32 %v8577_v56, %v8576_v16  ;;  %v8599_v44 = vpop.f32.mrb[65].mxu1  ;;  %v8579_v20 = vpop.f32.mrb[66].mxu0 }
 0x5e0   : > { %v8600_v34 = vadd.f32 %v8599_v44, %v8598_v19  ;;  %v8601_v21 = vpop.f32.mrb[66].mxu1  ;;  %v8580_v31 = vpop.f32.mrb[67].mxu0 }
 0x5e1   : > { %v7454_v18 = vadd.f32 %v8578_v35, %v10739_v47  ;;  %v8602_v24 = vpop.f32.mrb[67].mxu1 }
 0x5e3   : > { %v7494_v53 = vadd.f32 %v8600_v34, %v7454_v18 }
 0x5e5   : > { %v7505_v57 = vadd.f32 %v10487_v5, %v7494_v53 }
 0x5e7   : > { %v7511_v22 = vsel %vm7510_vm11, %v7505_v57, -1e+30  ;;  %8515 = vst [vmem:[%s7541_s3 + $0x8] sm:$0xff] %v7505_v57 }
 0x5e8   : > { %7512 = vmax.xlane.f32.xlu0 %v7511_v22 }
 0x675   : > { %v7513_v48 = vpop.xlane.xlu0 %7512 }
 0x676   : > { %vm7514_vm12 = vcmp.ge.f32.partialorder %v7511_v22, %v7513_v48 }
 0x677   : > { %v7515_v26 = vsel %vm7514_vm12, %v10495_v8, 128 }
 0x678   : > { %v7517_v50 = vshra.s32 %v7515_v26, 16  ;;  %v7516_v28 = vand.u32 65535, %v7515_v26 }
 0x67a   : > { %v7519_v47 = vcvt.s32.f32 %v7517_v50  ;;  %v7518_v4 = vcvt.s32.f32 %v7516_v28 }
 0x67c   : > { %7520 = vmin.xlane.f32.xlu0 %v7519_v47 }
 0x709   : > { %v7521_v37 = vpop.xlane.xlu0 %7520 }
 0x70a   : > { %vm7522_vm13 = vcmp.eq.f32.partialorder %v7519_v47, %v7521_v37  ;;  %v7527_v40 = vcvt.f32.s32 %v7521_v37 }
 0x70b   : > { %v7523_v51 = vsel %vm7522_vm13, %v7518_v4, inf }
 0x70c   : > { %7524 = vmin.xlane.f32.xlu1 %v7523_v51  ;;  %v7528_v54 = vshll.u32 %v7527_v40, 16 }
 0x796   :  { %163 = sbr.rel (!%p161_p11) target bundleno = 154 (0x9a), region = 104 }
 0x799   : > { %v7525_v49 = vpop.xlane.xlu1 %7524 }
 0x79a   : > { %v7526_v12 = vcvt.f32.s32 %v7525_v49 }
 0x79c   : > { %v7529_v12 = vadd.s32 %v7528_v54, %v7526_v12  }
 0x79d   :  { %7534 = vsyncpa [#allocation3], 1 }
 0x79e   :  { %7535 = vsyncpa [#allocation9], 1 }
 0x79f   :  { %7536 = vsyncpa [#allocation12], 1 }
 0x7a0   :  { %7537 = vsyncpa [#allocation15], 1 }
 0x7a1   :  { %7538 = vsyncpa [#allocation4], 1 }
 0x7a2   :  { %7539 = vsyncpa [#allocation5], 1 }

</bundles_post_ra>
